<compile_context>
chip_gen: v5e
topology: v5e:2x2
jax: 0.10.0
libtpu: 0.0.40
codegen_flags: <defaults>
</compile_context>

<pallas_src>
import functools
import math

import jax
import jax.numpy as jnp
from jax.experimental import pallas as pl
from jax.experimental.pallas import tpu as pltpu

LN_EPS = 1e-5  # PyTorch layer_norm_eps default


def _round_up(x, m):
    return ((x + m - 1) // m) * m


# ----------------------------- fused Pallas kernel ---------------------------

def _fused_forward_kernel(*refs, names, num_layers, num_heads, d_model,
                          bs, s_src, s_tgt):
    n_in = len(names)
    r = dict(zip(names, refs[:n_in]))
    out_ref = refs[n_in]

    dh = d_model // num_heads
    scale = 1.0 / math.sqrt(dh)

    def bf16(x):
        return x.astype(jnp.bfloat16)

    def layer_norm(x, g, b):
        mean = jnp.mean(x, axis=-1, keepdims=True)
        var = jnp.mean((x - mean) ** 2, axis=-1, keepdims=True)  # biased, as torch
        return (x - mean) * jax.lax.rsqrt(var + LN_EPS) * g + b

    def dense(x, w, b=None):
        # bf16 operands, f32 accumulation.
        y = jnp.dot(bf16(x), w, preferred_element_type=jnp.float32)
        return y if b is None else y + b

    def ffn(x, w1, b1, w2, b2):
        h = jnp.maximum(dense(x, w1, b1), 0.0)
        return dense(h, w2, b2)

    def attention(x_q, x_kv, sq, skv, wq, bq, wk, bk, wv, bv, wo, bo):
        # x_q: (bs*sq, D), x_kv: (bs*skv, D); separate projections (no sub-128
        # lane extraction of a fused QKV result).
        q = dense(x_q, wq, bq) * scale
        k = dense(x_kv, wk, bk)
        v = dense(x_kv, wv, bv)
        q3 = bf16(q).reshape(bs, sq, d_model)
        k3 = bf16(k).reshape(bs, skv, d_model)
        v3 = bf16(v).reshape(bs, skv, d_model)
        heads = []
        for h in range(num_heads):
            sl = slice(h * dh, (h + 1) * dh)
            s = jnp.einsum("bqd,bkd->bqk", q3[:, :, sl], k3[:, :, sl],
                           preferred_element_type=jnp.float32)
            s = s - jnp.max(s, axis=-1, keepdims=True)
            p = jnp.exp(s)
            # reciprocal on the EUP slot instead of a per-element divide.
            p = p * pl.reciprocal(jnp.sum(p, axis=-1, keepdims=True), approx=True)
            heads.append(jnp.einsum("bqk,bkd->bqd", bf16(p), v3[:, :, sl],
                                    preferred_element_type=jnp.float32))
        # Concatenate heads once, then a SINGLE output projection matmul.
        ctx = jnp.concatenate(heads, axis=-1).reshape(bs * sq, d_model)
        return dense(ctx, wo, bo)

    # ---- embeddings + positional encoding (PE quirk: one row per batch elem) -
    pe_b = r["pe"][...]                                    # (bs, 1, D) f32
    src = r["src"][...].reshape(bs * s_src, -1)            # (bs*Ss, F)
    tgt = r["tgt"][...].reshape(bs * s_tgt, -1)            # (bs*St, O)

    x_src = dense(src, r["src_emb_w"][...], r["src_emb_b"][...])
    x_src = (x_src.reshape(bs, s_src, d_model) + pe_b).reshape(bs * s_src, d_model)
    x_tgt = dense(tgt, r["tgt_emb_w"][...], r["tgt_emb_b"][...])
    x_tgt = (x_tgt.reshape(bs, s_tgt, d_model) + pe_b).reshape(bs * s_tgt, d_model)

    # ---- encoder (post-norm, no mask; dropout = identity at inference) ------
    mem = x_src
    for l in range(num_layers):
        a = attention(mem, mem, s_src, s_src,
                      r["e_wq"][l], r["e_bq"][l], r["e_wk"][l], r["e_bk"][l],
                      r["e_wv"][l], r["e_bv"][l], r["e_wo"][l], r["e_bo"][l])
        mem = layer_norm(mem + a, r["e_ln1_g"][l], r["e_ln1_b"][l])
        f = ffn(mem, r["e_w1"][l], r["e_b1"][l], r["e_w2"][l], r["e_b2"][l])
        mem = layer_norm(mem + f, r["e_ln2_g"][l], r["e_ln2_b"][l])
    mem = layer_norm(mem, r["enc_norm_g"][...], r["enc_norm_b"][...])

    # ---- decoder (post-norm; faithful to reference: no causal mask passed) --
    y = x_tgt
    for l in range(num_layers):
        a = attention(y, y, s_tgt, s_tgt,
                      r["d_sa_wq"][l], r["d_sa_bq"][l], r["d_sa_wk"][l],
                      r["d_sa_bk"][l], r["d_sa_wv"][l], r["d_sa_bv"][l],
                      r["d_sa_wo"][l], r["d_sa_bo"][l])
        y = layer_norm(y + a, r["d_ln1_g"][l], r["d_ln1_b"][l])
        a = attention(y, mem, s_tgt, s_src,
                      r["d_ca_wq"][l], r["d_ca_bq"][l], r["d_ca_wk"][l],
                      r["d_ca_bk"][l], r["d_ca_wv"][l], r["d_ca_bv"][l],
                      r["d_ca_wo"][l], r["d_ca_bo"][l])
        y = layer_norm(y + a, r["d_ln2_g"][l], r["d_ln2_b"][l])
        f = ffn(y, r["d_w1"][l], r["d_b1"][l], r["d_w2"][l], r["d_b2"][l])
        y = layer_norm(y + f, r["d_ln3_g"][l], r["d_ln3_b"][l])
    y = layer_norm(y, r["dec_norm_g"][...], r["dec_norm_b"][...])

    # ---- output projection (lane-padded to a multiple of 128) ---------------
    out = dense(y, r["fc_out_w"][...], r["fc_out_b"][...])
    out_ref[...] = out.reshape(bs, s_tgt, -1).astype(out_ref.dtype)


# ----------------------------- packing & wrapper ------------------------------

def _pack_inputs(params, src, tgt, p_out):
    """Pack params into stacked / bf16 arrays for the single fused kernel."""
    b = src.shape[0]
    output_dim = tgt.shape[2]
    wdt = jnp.bfloat16  # matmul-weight dtype (f32 accumulation in-kernel)

    def row(v):
        return v.reshape(1, -1).astype(jnp.float32)

    def stack_rows(vs):
        return jnp.stack([v.reshape(1, -1) for v in vs]).astype(jnp.float32)

    def stack_w(vs):
        return jnp.stack(list(vs)).astype(wdt)

    enc = params["encoder_layers"]
    dec = params["decoder_layers"]

    fc_w = params["fc_out_w"]
    fc_b = params["fc_out_b"]
    if p_out != output_dim:
        fc_w = jnp.pad(fc_w, ((0, 0), (0, p_out - output_dim)))
        fc_b = jnp.pad(fc_b, ((0, p_out - output_dim),))

    named = [
        # (name, array, kind): "batch" -> sliced per grid shard, "const" -> resident
        ("src", src, "batch"),
        ("tgt", tgt, "batch"),
        ("pe", params["pe"][:b].astype(jnp.float32), "batch"),   # PE quirk
        ("src_emb_w", params["src_emb_w"].astype(wdt), "const"),
        ("src_emb_b", row(params["src_emb_b"]), "const"),
        ("tgt_emb_w", params["tgt_emb_w"].astype(wdt), "const"),
        ("tgt_emb_b", row(params["tgt_emb_b"]), "const"),
        ("enc_norm_g", row(params["enc_norm_g"]), "const"),
        ("enc_norm_b", row(params["enc_norm_b"]), "const"),
        ("dec_norm_g", row(params["dec_norm_g"]), "const"),
        ("dec_norm_b", row(params["dec_norm_b"]), "const"),
        ("fc_out_w", fc_w.astype(wdt), "const"),
        ("fc_out_b", row(fc_b), "const"),
    ]

    def add_attn(prefix, attns):
        named.extend([
            (prefix + "_wq", stack_w(a["wq"] for a in attns), "const"),
            (prefix + "_bq", stack_rows([a["bq"] for a in attns]), "const"),
            (prefix + "_wk", stack_w(a["wk"] for a in attns), "const"),
            (prefix + "_bk", stack_rows([a["bk"] for a in attns]), "const"),
            (prefix + "_wv", stack_w(a["wv"] for a in attns), "const"),
            (prefix + "_bv", stack_rows([a["bv"] for a in attns]), "const"),
            (prefix + "_wo", stack_w(a["wo"] for a in attns), "const"),
            (prefix + "_bo", stack_rows([a["bo"] for a in attns]), "const"),
        ])

    add_attn("e", [l["self_attn"] for l in enc])
    named.extend([
        ("e_ln1_g", stack_rows([l["ln1_g"] for l in enc]), "const"),
        ("e_ln1_b", stack_rows([l["ln1_b"] for l in enc]), "const"),
        ("e_w1", stack_w(l["ff_w1"] for l in enc), "const"),
        ("e_b1", stack_rows([l["ff_b1"] for l in enc]), "const"),
        ("e_w2", stack_w(l["ff_w2"] for l in enc), "const"),
        ("e_b2", stack_rows([l["ff_b2"] for l in enc]), "const"),
        ("e_ln2_g", stack_rows([l["ln2_g"] for l in enc]), "const"),
        ("e_ln2_b", stack_rows([l["ln2_b"] for l in enc]), "const"),
    ])
    add_attn("d_sa", [l["self_attn"] for l in dec])
    add_attn("d_ca", [l["cross_attn"] for l in dec])
    named.extend([
        ("d_ln1_g", stack_rows([l["ln1_g"] for l in dec]), "const"),
        ("d_ln1_b", stack_rows([l["ln1_b"] for l in dec]), "const"),
        ("d_ln2_g", stack_rows([l["ln2_g"] for l in dec]), "const"),
        ("d_ln2_b", stack_rows([l["ln2_b"] for l in dec]), "const"),
        ("d_ln3_g", stack_rows([l["ln3_g"] for l in dec]), "const"),
        ("d_ln3_b", stack_rows([l["ln3_b"] for l in dec]), "const"),
        ("d_w1", stack_w(l["ff_w1"] for l in dec), "const"),
        ("d_b1", stack_rows([l["ff_b1"] for l in dec]), "const"),
        ("d_w2", stack_w(l["ff_w2"] for l in dec), "const"),
        ("d_b2", stack_rows([l["ff_b2"] for l in dec]), "const"),
    ])
    return named


def _estimate_cost(b, s_src, s_tgt, num_features, output_dim, d_model, dff,
                   num_layers, num_heads, in_bytes, out_bytes):
    def mm(m, k, n):
        return 2 * m * k * n

    f = b * (mm(s_src, num_features, d_model) + mm(s_tgt, output_dim, d_model))
    # encoder layers: q/k/v/out projections + scores + context + FFN
    f += num_layers * b * (4 * mm(s_src, d_model, d_model)
                           + 2 * mm(s_src, d_model, s_src)
                           + mm(s_src, d_model, dff) + mm(s_src, dff, d_model))
    # decoder self-attention
    f += num_layers * b * (4 * mm(s_tgt, d_model, d_model)
                           + 2 * mm(s_tgt, d_model, s_tgt))
    # decoder cross-attention
    f += num_layers * b * (2 * mm(s_tgt, d_model, d_model)
                           + 2 * mm(s_src, d_model, d_model)
                           + 2 * mm(s_tgt, d_model, s_src))
    # decoder FFN + output head
    f += num_layers * b * (mm(s_tgt, d_model, dff) + mm(s_tgt, dff, d_model))
    f += b * mm(s_tgt, d_model, output_dim)
    trans = b * num_layers * num_heads * (s_src * s_src + s_tgt * s_tgt
                                          + s_tgt * s_src)
    return pl.CostEstimate(flops=int(f), transcendentals=int(trans),
                           bytes_accessed=int(in_bytes + out_bytes))


def time_series_transformer_forward(params, src, tgt, *, num_heads,
                                    num_shards=None):
    b, s_src, num_features = src.shape
    _, s_tgt, output_dim = tgt.shape
    d_model = params["src_emb_w"].shape[1]
    dff = params["encoder_layers"][0]["ff_w1"].shape[1]
    num_layers = len(params["encoder_layers"])
    p_out = _round_up(output_dim, 128)   # lane-dense output, sliced back below

    if num_shards is None:
        # One shard per v7x TensorCore (2-way "parallel" grid); remaining batch
        # is folded into the row axis so v5e/v6e pay at most 2 grid steps.
        num_shards = 2 if (b % 2 == 0 and b >= 2) else 1
    assert b % num_shards == 0, "batch must be divisible by num_shards"
    bs = b // num_shards

    named = _pack_inputs(params, src, tgt, p_out)
    names = tuple(n for n, _, _ in named)
    arrays = [a for _, a, _ in named]

    in_specs = []
    for _, a, kind in named:
        nd = a.ndim
        if kind == "batch":
            blk = (bs,) + a.shape[1:]
            in_specs.append(
                pl.BlockSpec(blk, lambda i, nd=nd: (i,) + (0,) * (nd - 1)))
        else:
            # constant block index -> weights stay VMEM-resident across grid steps
            in_specs.append(
                pl.BlockSpec(a.shape, lambda i, nd=nd: (0,) * nd))

    kernel = functools.partial(
        _fused_forward_kernel, names=names, num_layers=num_layers,
        num_heads=num_heads, d_model=d_model, bs=bs, s_src=s_src, s_tgt=s_tgt)

    # VMEM budget from actual packed sizes (double-buffered inputs + output
    # block) plus headroom for in-kernel intermediates.
    in_bytes = sum(int(a.size) * a.dtype.itemsize for a in arrays)
    out_bytes = b * s_tgt * p_out * 4
    out_block_bytes = bs * s_tgt * p_out * 4
    vmem_limit = int(min(100 * 1024 * 1024,
                         2 * (in_bytes + out_block_bytes) + 16 * 1024 * 1024))

    cost = _estimate_cost(b, s_src, s_tgt, num_features, output_dim, d_model,
                          dff, num_layers, num_heads, in_bytes, out_bytes)

    out = pl.pallas_call(
        kernel,
        out_shape=jax.ShapeDtypeStruct((b, s_tgt, p_out), jnp.float32),
        grid=(num_shards,),
        in_specs=in_specs,
        out_specs=pl.BlockSpec((bs, s_tgt, p_out), lambda i: (i, 0, 0)),
        compiler_params=pltpu.CompilerParams(
            dimension_semantics=("parallel",),
            vmem_limit_bytes=vmem_limit),
        cost_estimate=cost,
    )(*arrays)
    return out[..., :output_dim]


# ----------------------------- parameter init ---------------------------------

def make_positional_encoding(d_model, max_len=5000):
    position = jnp.arange(max_len, dtype=jnp.float32)[:, None]
    div_term = jnp.exp(jnp.arange(0, d_model, 2, dtype=jnp.float32)
                       * (-math.log(10000.0) / d_model))
    pe = jnp.zeros((max_len, d_model), jnp.float32)
    pe = pe.at[:, 0::2].set(jnp.sin(position * div_term))
    pe = pe.at[:, 1::2].set(jnp.cos(position * div_term))
    return pe[:, None, :]  # (max_len, 1, d_model), same as the torch buffer


def init_params(key, *, num_features, d_model, num_heads, num_layers,
                output_dim, dim_feedforward=2048):
    keys = iter(jax.random.split(key, 256))

    def w(shape, scale=0.02):
        return scale * jax.random.normal(next(keys), shape, jnp.float32)

    def zeros(shape):
        return jnp.zeros(shape, jnp.float32)

    def ones(shape):
        return jnp.ones(shape, jnp.float32)

    def mha():
        return dict(wq=w((d_model, d_model)), bq=zeros((d_model,)),
                    wk=w((d_model, d_model)), bk=zeros((d_model,)),
                    wv=w((d_model, d_model)), bv=zeros((d_model,)),
                    wo=w((d_model, d_model)), bo=zeros((d_model,)))

    def enc_layer():
        return dict(self_attn=mha(),
                    ln1_g=ones((d_model,)), ln1_b=zeros((d_model,)),
                    ff_w1=w((d_model, dim_feedforward)),
                    ff_b1=zeros((dim_feedforward,)),
                    ff_w2=w((dim_feedforward, d_model)),
                    ff_b2=zeros((d_model,)),
                    ln2_g=ones((d_model,)), ln2_b=zeros((d_model,)))

    def dec_layer():
        return dict(self_attn=mha(), cross_attn=mha(),
                    ln1_g=ones((d_model,)), ln1_b=zeros((d_model,)),
                    ln2_g=ones((d_model,)), ln2_b=zeros((d_model,)),
                    ff_w1=w((d_model, dim_feedforward)),
                    ff_b1=zeros((dim_feedforward,)),
                    ff_w2=w((dim_feedforward, d_model)),
                    ff_b2=zeros((d_model,)),
                    ln3_g=ones((d_model,)), ln3_b=zeros((d_model,)))

    return dict(
        src_emb_w=w((num_features, d_model)), src_emb_b=zeros((d_model,)),
        tgt_emb_w=w((output_dim, d_model)), tgt_emb_b=zeros((d_model,)),
        pe=make_positional_encoding(d_model),
        encoder_layers=[enc_layer() for _ in range(num_layers)],
        enc_norm_g=ones((d_model,)), enc_norm_b=zeros((d_model,)),
        decoder_layers=[dec_layer() for _ in range(num_layers)],
        dec_norm_g=ones((d_model,)), dec_norm_b=zeros((d_model,)),
        fc_out_w=w((d_model, output_dim)), fc_out_b=zeros((output_dim,)),
    )


# ----------------------------------- main --------------------------------------

if __name__ == "__main__":
    num_features, d_model, num_heads, num_layers = 4, 32, 4, 2
    pred_len, output_dim = 8, 4  # pred_len is unused in forward, as in the reference
    batch, src_len, tgt_len = 2, 16, 8

    key = jax.random.PRNGKey(0)
    k_src, k_tgt, k_params = jax.random.split(key, 3)
    src = jax.random.normal(k_src, (batch, src_len, num_features), jnp.float32)
    tgt = jax.random.normal(k_tgt, (batch, tgt_len, output_dim), jnp.float32)

    params = init_params(k_params, num_features=num_features, d_model=d_model,
                         num_heads=num_heads, num_layers=num_layers,
                         output_dim=output_dim)

    fwd = jax.jit(functools.partial(time_series_transformer_forward,
                                    num_heads=num_heads))
    out = fwd(params, src, tgt)
    jax.block_until_ready(out)
    assert out.shape == (batch, tgt_len, output_dim)
    assert bool(jnp.all(jnp.isfinite(out)))
    print("KERNEL_OK")
</pallas_src>

<mosaic_0001>
module attributes {stable_mosaic.version = 11 : i64} {
  func.func @_fused_forward_kernel(%arg0: i32, %arg1: memref<1x16x4xf32, #tpu.memory_space<vmem>>, %arg2: memref<1x8x4xf32, #tpu.memory_space<vmem>>, %arg3: memref<1x1x32xf32, #tpu.memory_space<vmem>>, %arg4: memref<4x32xbf16, #tpu.memory_space<vmem>>, %arg5: memref<1x32xf32, #tpu.memory_space<vmem>>, %arg6: memref<4x32xbf16, #tpu.memory_space<vmem>>, %arg7: memref<1x32xf32, #tpu.memory_space<vmem>>, %arg8: memref<1x32xf32, #tpu.memory_space<vmem>>, %arg9: memref<1x32xf32, #tpu.memory_space<vmem>>, %arg10: memref<1x32xf32, #tpu.memory_space<vmem>>, %arg11: memref<1x32xf32, #tpu.memory_space<vmem>>, %arg12: memref<32x128xbf16, #tpu.memory_space<vmem>>, %arg13: memref<1x128xf32, #tpu.memory_space<vmem>>, %arg14: memref<2x32x32xbf16, #tpu.memory_space<vmem>>, %arg15: memref<2x1x32xf32, #tpu.memory_space<vmem>>, %arg16: memref<2x32x32xbf16, #tpu.memory_space<vmem>>, %arg17: memref<2x1x32xf32, #tpu.memory_space<vmem>>, %arg18: memref<2x32x32xbf16, #tpu.memory_space<vmem>>, %arg19: memref<2x1x32xf32, #tpu.memory_space<vmem>>, %arg20: memref<2x32x32xbf16, #tpu.memory_space<vmem>>, %arg21: memref<2x1x32xf32, #tpu.memory_space<vmem>>, %arg22: memref<2x1x32xf32, #tpu.memory_space<vmem>>, %arg23: memref<2x1x32xf32, #tpu.memory_space<vmem>>, %arg24: memref<2x32x2048xbf16, #tpu.memory_space<vmem>>, %arg25: memref<2x1x2048xf32, #tpu.memory_space<vmem>>, %arg26: memref<2x2048x32xbf16, #tpu.memory_space<vmem>>, %arg27: memref<2x1x32xf32, #tpu.memory_space<vmem>>, %arg28: memref<2x1x32xf32, #tpu.memory_space<vmem>>, %arg29: memref<2x1x32xf32, #tpu.memory_space<vmem>>, %arg30: memref<2x32x32xbf16, #tpu.memory_space<vmem>>, %arg31: memref<2x1x32xf32, #tpu.memory_space<vmem>>, %arg32: memref<2x32x32xbf16, #tpu.memory_space<vmem>>, %arg33: memref<2x1x32xf32, #tpu.memory_space<vmem>>, %arg34: memref<2x32x32xbf16, #tpu.memory_space<vmem>>, %arg35: memref<2x1x32xf32, #tpu.memory_space<vmem>>, %arg36: memref<2x32x32xbf16, #tpu.memory_space<vmem>>, %arg37: memref<2x1x32xf32, #tpu.memory_space<vmem>>, %arg38: memref<2x32x32xbf16, #tpu.memory_space<vmem>>, %arg39: memref<2x1x32xf32, #tpu.memory_space<vmem>>, %arg40: memref<2x32x32xbf16, #tpu.memory_space<vmem>>, %arg41: memref<2x1x32xf32, #tpu.memory_space<vmem>>, %arg42: memref<2x32x32xbf16, #tpu.memory_space<vmem>>, %arg43: memref<2x1x32xf32, #tpu.memory_space<vmem>>, %arg44: memref<2x32x32xbf16, #tpu.memory_space<vmem>>, %arg45: memref<2x1x32xf32, #tpu.memory_space<vmem>>, %arg46: memref<2x1x32xf32, #tpu.memory_space<vmem>>, %arg47: memref<2x1x32xf32, #tpu.memory_space<vmem>>, %arg48: memref<2x1x32xf32, #tpu.memory_space<vmem>>, %arg49: memref<2x1x32xf32, #tpu.memory_space<vmem>>, %arg50: memref<2x1x32xf32, #tpu.memory_space<vmem>>, %arg51: memref<2x1x32xf32, #tpu.memory_space<vmem>>, %arg52: memref<2x32x2048xbf16, #tpu.memory_space<vmem>>, %arg53: memref<2x1x2048xf32, #tpu.memory_space<vmem>>, %arg54: memref<2x2048x32xbf16, #tpu.memory_space<vmem>>, %arg55: memref<2x1x32xf32, #tpu.memory_space<vmem>>, %arg56: memref<1x8x128xf32, #tpu.memory_space<vmem>>) attributes {dimension_semantics = [#tpu.dimension_semantics<parallel>], iteration_bounds = array<i64: 2>, scalar_prefetch = 0 : i64, scratch_operands = 0 : i64, tpu.core_type = #tpu.core_type<tc>, window_params = [{transform_indices = @transform_0, window_bounds = array<i64: 1, 16, 4>}, {transform_indices = @transform_1, window_bounds = array<i64: 1, 8, 4>}, {transform_indices = @transform_2, window_bounds = array<i64: 1, 1, 32>}, {pipeline_mode = #tpu.pipeline_mode<synchronous>, transform_indices = @transform_3, window_bounds = array<i64: 4, 32>}, {pipeline_mode = #tpu.pipeline_mode<synchronous>, transform_indices = @transform_4, window_bounds = array<i64: 1, 32>}, {pipeline_mode = #tpu.pipeline_mode<synchronous>, transform_indices = @transform_5, window_bounds = array<i64: 4, 32>}, {pipeline_mode = #tpu.pipeline_mode<synchronous>, transform_indices = @transform_6, window_bounds = array<i64: 1, 32>}, {pipeline_mode = #tpu.pipeline_mode<synchronous>, transform_indices = @transform_7, window_bounds = array<i64: 1, 32>}, {pipeline_mode = #tpu.pipeline_mode<synchronous>, transform_indices = @transform_8, window_bounds = array<i64: 1, 32>}, {pipeline_mode = #tpu.pipeline_mode<synchronous>, transform_indices = @transform_9, window_bounds = array<i64: 1, 32>}, {pipeline_mode = #tpu.pipeline_mode<synchronous>, transform_indices = @transform_10, window_bounds = array<i64: 1, 32>}, {pipeline_mode = #tpu.pipeline_mode<synchronous>, transform_indices = @transform_11, window_bounds = array<i64: 32, 128>}, {pipeline_mode = #tpu.pipeline_mode<synchronous>, transform_indices = @transform_12, window_bounds = array<i64: 1, 128>}, {pipeline_mode = #tpu.pipeline_mode<synchronous>, transform_indices = @transform_13, window_bounds = array<i64: 2, 32, 32>}, {pipeline_mode = #tpu.pipeline_mode<synchronous>, transform_indices = @transform_14, window_bounds = array<i64: 2, 1, 32>}, {pipeline_mode = #tpu.pipeline_mode<synchronous>, transform_indices = @transform_15, window_bounds = array<i64: 2, 32, 32>}, {pipeline_mode = #tpu.pipeline_mode<synchronous>, transform_indices = @transform_16, window_bounds = array<i64: 2, 1, 32>}, {pipeline_mode = #tpu.pipeline_mode<synchronous>, transform_indices = @transform_17, window_bounds = array<i64: 2, 32, 32>}, {pipeline_mode = #tpu.pipeline_mode<synchronous>, transform_indices = @transform_18, window_bounds = array<i64: 2, 1, 32>}, {pipeline_mode = #tpu.pipeline_mode<synchronous>, transform_indices = @transform_19, window_bounds = array<i64: 2, 32, 32>}, {pipeline_mode = #tpu.pipeline_mode<synchronous>, transform_indices = @transform_20, window_bounds = array<i64: 2, 1, 32>}, {pipeline_mode = #tpu.pipeline_mode<synchronous>, transform_indices = @transform_21, window_bounds = array<i64: 2, 1, 32>}, {pipeline_mode = #tpu.pipeline_mode<synchronous>, transform_indices = @transform_22, window_bounds = array<i64: 2, 1, 32>}, {pipeline_mode = #tpu.pipeline_mode<synchronous>, transform_indices = @transform_23, window_bounds = array<i64: 2, 32, 2048>}, {pipeline_mode = #tpu.pipeline_mode<synchronous>, transform_indices = @transform_24, window_bounds = array<i64: 2, 1, 2048>}, {pipeline_mode = #tpu.pipeline_mode<synchronous>, transform_indices = @transform_25, window_bounds = array<i64: 2, 2048, 32>}, {pipeline_mode = #tpu.pipeline_mode<synchronous>, transform_indices = @transform_26, window_bounds = array<i64: 2, 1, 32>}, {pipeline_mode = #tpu.pipeline_mode<synchronous>, transform_indices = @transform_27, window_bounds = array<i64: 2, 1, 32>}, {pipeline_mode = #tpu.pipeline_mode<synchronous>, transform_indices = @transform_28, window_bounds = array<i64: 2, 1, 32>}, {pipeline_mode = #tpu.pipeline_mode<synchronous>, transform_indices = @transform_29, window_bounds = array<i64: 2, 32, 32>}, {pipeline_mode = #tpu.pipeline_mode<synchronous>, transform_indices = @transform_30, window_bounds = array<i64: 2, 1, 32>}, {pipeline_mode = #tpu.pipeline_mode<synchronous>, transform_indices = @transform_31, window_bounds = array<i64: 2, 32, 32>}, {pipeline_mode = #tpu.pipeline_mode<synchronous>, transform_indices = @transform_32, window_bounds = array<i64: 2, 1, 32>}, {pipeline_mode = #tpu.pipeline_mode<synchronous>, transform_indices = @transform_33, window_bounds = array<i64: 2, 32, 32>}, {pipeline_mode = #tpu.pipeline_mode<synchronous>, transform_indices = @transform_34, window_bounds = array<i64: 2, 1, 32>}, {pipeline_mode = #tpu.pipeline_mode<synchronous>, transform_indices = @transform_35, window_bounds = array<i64: 2, 32, 32>}, {pipeline_mode = #tpu.pipeline_mode<synchronous>, transform_indices = @transform_36, window_bounds = array<i64: 2, 1, 32>}, {pipeline_mode = #tpu.pipeline_mode<synchronous>, transform_indices = @transform_37, window_bounds = array<i64: 2, 32, 32>}, {pipeline_mode = #tpu.pipeline_mode<synchronous>, transform_indices = @transform_38, window_bounds = array<i64: 2, 1, 32>}, {pipeline_mode = #tpu.pipeline_mode<synchronous>, transform_indices = @transform_39, window_bounds = array<i64: 2, 32, 32>}, {pipeline_mode = #tpu.pipeline_mode<synchronous>, transform_indices = @transform_40, window_bounds = array<i64: 2, 1, 32>}, {pipeline_mode = #tpu.pipeline_mode<synchronous>, transform_indices = @transform_41, window_bounds = array<i64: 2, 32, 32>}, {pipeline_mode = #tpu.pipeline_mode<synchronous>, transform_indices = @transform_42, window_bounds = array<i64: 2, 1, 32>}, {pipeline_mode = #tpu.pipeline_mode<synchronous>, transform_indices = @transform_43, window_bounds = array<i64: 2, 32, 32>}, {pipeline_mode = #tpu.pipeline_mode<synchronous>, transform_indices = @transform_44, window_bounds = array<i64: 2, 1, 32>}, {pipeline_mode = #tpu.pipeline_mode<synchronous>, transform_indices = @transform_45, window_bounds = array<i64: 2, 1, 32>}, {pipeline_mode = #tpu.pipeline_mode<synchronous>, transform_indices = @transform_46, window_bounds = array<i64: 2, 1, 32>}, {pipeline_mode = #tpu.pipeline_mode<synchronous>, transform_indices = @transform_47, window_bounds = array<i64: 2, 1, 32>}, {pipeline_mode = #tpu.pipeline_mode<synchronous>, transform_indices = @transform_48, window_bounds = array<i64: 2, 1, 32>}, {pipeline_mode = #tpu.pipeline_mode<synchronous>, transform_indices = @transform_49, window_bounds = array<i64: 2, 1, 32>}, {pipeline_mode = #tpu.pipeline_mode<synchronous>, transform_indices = @transform_50, window_bounds = array<i64: 2, 1, 32>}, {pipeline_mode = #tpu.pipeline_mode<synchronous>, transform_indices = @transform_51, window_bounds = array<i64: 2, 32, 2048>}, {pipeline_mode = #tpu.pipeline_mode<synchronous>, transform_indices = @transform_52, window_bounds = array<i64: 2, 1, 2048>}, {pipeline_mode = #tpu.pipeline_mode<synchronous>, transform_indices = @transform_53, window_bounds = array<i64: 2, 2048, 32>}, {pipeline_mode = #tpu.pipeline_mode<synchronous>, transform_indices = @transform_54, window_bounds = array<i64: 2, 1, 32>}, {transform_indices = @transform_55, window_bounds = array<i64: 1, 8, 128>}]} {
    %c0 = arith.constant 0 : index
    %c0_0 = arith.constant 0 : index
    %c0_1 = arith.constant 0 : index
    %0 = vector.load %arg3[%c0, %c0_0, %c0_1] : memref<1x1x32xf32, #tpu.memory_space<vmem>>, vector<1x1x32xf32>
    %c0_2 = arith.constant 0 : index
    %c0_3 = arith.constant 0 : index
    %c0_4 = arith.constant 0 : index
    %1 = vector.load %arg1[%c0_2, %c0_3, %c0_4] : memref<1x16x4xf32, #tpu.memory_space<vmem>>, vector<1x16x4xf32>
    %2 = vector.shape_cast %1 : vector<1x16x4xf32> to vector<16x4xf32>
    %c0_5 = arith.constant 0 : index
    %c0_6 = arith.constant 0 : index
    %c0_7 = arith.constant 0 : index
    %3 = vector.load %arg2[%c0_5, %c0_6, %c0_7] : memref<1x8x4xf32, #tpu.memory_space<vmem>>, vector<1x8x4xf32>
    %4 = vector.shape_cast %3 : vector<1x8x4xf32> to vector<8x4xf32>
    %c0_8 = arith.constant 0 : index
    %c0_9 = arith.constant 0 : index
    %5 = vector.load %arg4[%c0_8, %c0_9] : memref<4x32xbf16, #tpu.memory_space<vmem>>, vector<4x32xbf16>
    %c0_10 = arith.constant 0 : index
    %c0_11 = arith.constant 0 : index
    %6 = vector.load %arg5[%c0_10, %c0_11] : memref<1x32xf32, #tpu.memory_space<vmem>>, vector<1x32xf32>
    %7 = arith.truncf %2 : vector<16x4xf32> to vector<16x4xbf16>
    %cst = arith.constant dense<0.000000e+00> : vector<16x32xf32>
    %8 = tpu.matmul %7, %5, %cst {dimension_numbers = #tpu.dot_dimension_numbers<[1], [0], [0], [1], [0, 0, 1, 1], [], []>} : vector<16x4xbf16>, vector<4x32xbf16>, vector<16x32xf32> -> vector<16x32xf32>
    %9 = vector.broadcast %6 : vector<1x32xf32> to vector<16x32xf32>
    %10 = arith.addf %8, %9 : vector<16x32xf32>
    %11 = vector.shape_cast %10 : vector<16x32xf32> to vector<1x16x32xf32>
    %12 = vector.broadcast %0 : vector<1x1x32xf32> to vector<1x16x32xf32>
    %13 = arith.addf %11, %12 : vector<1x16x32xf32>
    %14 = vector.shape_cast %13 : vector<1x16x32xf32> to vector<16x32xf32>
    %c0_12 = arith.constant 0 : index
    %c0_13 = arith.constant 0 : index
    %15 = vector.load %arg6[%c0_12, %c0_13] : memref<4x32xbf16, #tpu.memory_space<vmem>>, vector<4x32xbf16>
    %c0_14 = arith.constant 0 : index
    %c0_15 = arith.constant 0 : index
    %16 = vector.load %arg7[%c0_14, %c0_15] : memref<1x32xf32, #tpu.memory_space<vmem>>, vector<1x32xf32>
    %17 = arith.truncf %4 : vector<8x4xf32> to vector<8x4xbf16>
    %cst_16 = arith.constant dense<0.000000e+00> : vector<8x32xf32>
    %18 = tpu.matmul %17, %15, %cst_16 {dimension_numbers = #tpu.dot_dimension_numbers<[1], [0], [0], [1], [0, 0, 1, 1], [], []>} : vector<8x4xbf16>, vector<4x32xbf16>, vector<8x32xf32> -> vector<8x32xf32>
    %19 = vector.broadcast %16 : vector<1x32xf32> to vector<8x32xf32>
    %20 = arith.addf %18, %19 : vector<8x32xf32>
    %21 = vector.shape_cast %20 : vector<8x32xf32> to vector<1x8x32xf32>
    %22 = vector.broadcast %0 : vector<1x1x32xf32> to vector<1x8x32xf32>
    %23 = arith.addf %21, %22 : vector<1x8x32xf32>
    %24 = vector.shape_cast %23 : vector<1x8x32xf32> to vector<8x32xf32>
    %c0_17 = arith.constant 0 : index
    %c0_18 = arith.constant 0 : index
    %c0_19 = arith.constant 0 : index
    %25 = vector.load %arg14[%c0_17, %c0_18, %c0_19] : memref<2x32x32xbf16, #tpu.memory_space<vmem>>, vector<1x32x32xbf16>
    %26 = vector.shape_cast %25 : vector<1x32x32xbf16> to vector<32x32xbf16>
    %c0_20 = arith.constant 0 : index
    %c0_21 = arith.constant 0 : index
    %c0_22 = arith.constant 0 : index
    %27 = vector.load %arg15[%c0_20, %c0_21, %c0_22] : memref<2x1x32xf32, #tpu.memory_space<vmem>>, vector<1x1x32xf32>
    %28 = vector.shape_cast %27 : vector<1x1x32xf32> to vector<1x32xf32>
    %c0_23 = arith.constant 0 : index
    %c0_24 = arith.constant 0 : index
    %c0_25 = arith.constant 0 : index
    %29 = vector.load %arg16[%c0_23, %c0_24, %c0_25] : memref<2x32x32xbf16, #tpu.memory_space<vmem>>, vector<1x32x32xbf16>
    %30 = vector.shape_cast %29 : vector<1x32x32xbf16> to vector<32x32xbf16>
    %c0_26 = arith.constant 0 : index
    %c0_27 = arith.constant 0 : index
    %c0_28 = arith.constant 0 : index
    %31 = vector.load %arg17[%c0_26, %c0_27, %c0_28] : memref<2x1x32xf32, #tpu.memory_space<vmem>>, vector<1x1x32xf32>
    %32 = vector.shape_cast %31 : vector<1x1x32xf32> to vector<1x32xf32>
    %c0_29 = arith.constant 0 : index
    %c0_30 = arith.constant 0 : index
    %c0_31 = arith.constant 0 : index
    %33 = vector.load %arg18[%c0_29, %c0_30, %c0_31] : memref<2x32x32xbf16, #tpu.memory_space<vmem>>, vector<1x32x32xbf16>
    %34 = vector.shape_cast %33 : vector<1x32x32xbf16> to vector<32x32xbf16>
    %c0_32 = arith.constant 0 : index
    %c0_33 = arith.constant 0 : index
    %c0_34 = arith.constant 0 : index
    %35 = vector.load %arg19[%c0_32, %c0_33, %c0_34] : memref<2x1x32xf32, #tpu.memory_space<vmem>>, vector<1x1x32xf32>
    %36 = vector.shape_cast %35 : vector<1x1x32xf32> to vector<1x32xf32>
    %c0_35 = arith.constant 0 : index
    %c0_36 = arith.constant 0 : index
    %c0_37 = arith.constant 0 : index
    %37 = vector.load %arg20[%c0_35, %c0_36, %c0_37] : memref<2x32x32xbf16, #tpu.memory_space<vmem>>, vector<1x32x32xbf16>
    %38 = vector.shape_cast %37 : vector<1x32x32xbf16> to vector<32x32xbf16>
    %c0_38 = arith.constant 0 : index
    %c0_39 = arith.constant 0 : index
    %c0_40 = arith.constant 0 : index
    %39 = vector.load %arg21[%c0_38, %c0_39, %c0_40] : memref<2x1x32xf32, #tpu.memory_space<vmem>>, vector<1x1x32xf32>
    %40 = vector.shape_cast %39 : vector<1x1x32xf32> to vector<1x32xf32>
    %41 = arith.truncf %14 : vector<16x32xf32> to vector<16x32xbf16>
    %cst_41 = arith.constant dense<0.000000e+00> : vector<16x32xf32>
    %42 = tpu.matmul %41, %26, %cst_41 {dimension_numbers = #tpu.dot_dimension_numbers<[1], [0], [0], [1], [0, 0, 1, 1], [], []>} : vector<16x32xbf16>, vector<32x32xbf16>, vector<16x32xf32> -> vector<16x32xf32>
    %43 = vector.broadcast %28 : vector<1x32xf32> to vector<16x32xf32>
    %44 = arith.addf %42, %43 : vector<16x32xf32>
    %cst_42 = arith.constant 0.353553385 : f32
    %45 = vector.broadcast %cst_42 : f32 to vector<16x32xf32>
    %46 = arith.mulf %44, %45 : vector<16x32xf32>
    %47 = arith.truncf %14 : vector<16x32xf32> to vector<16x32xbf16>
    %cst_43 = arith.constant dense<0.000000e+00> : vector<16x32xf32>
    %48 = tpu.matmul %47, %30, %cst_43 {dimension_numbers = #tpu.dot_dimension_numbers<[1], [0], [0], [1], [0, 0, 1, 1], [], []>} : vector<16x32xbf16>, vector<32x32xbf16>, vector<16x32xf32> -> vector<16x32xf32>
    %49 = vector.broadcast %32 : vector<1x32xf32> to vector<16x32xf32>
    %50 = arith.addf %48, %49 : vector<16x32xf32>
    %51 = arith.truncf %14 : vector<16x32xf32> to vector<16x32xbf16>
    %cst_44 = arith.constant dense<0.000000e+00> : vector<16x32xf32>
    %52 = tpu.matmul %51, %34, %cst_44 {dimension_numbers = #tpu.dot_dimension_numbers<[1], [0], [0], [1], [0, 0, 1, 1], [], []>} : vector<16x32xbf16>, vector<32x32xbf16>, vector<16x32xf32> -> vector<16x32xf32>
    %53 = vector.broadcast %36 : vector<1x32xf32> to vector<16x32xf32>
    %54 = arith.addf %52, %53 : vector<16x32xf32>
    %55 = arith.truncf %46 : vector<16x32xf32> to vector<16x32xbf16>
    %56 = vector.shape_cast %55 : vector<16x32xbf16> to vector<1x16x32xbf16>
    %57 = arith.truncf %50 : vector<16x32xf32> to vector<16x32xbf16>
    %58 = vector.shape_cast %57 : vector<16x32xbf16> to vector<1x16x32xbf16>
    %59 = arith.truncf %54 : vector<16x32xf32> to vector<16x32xbf16>
    %60 = vector.shape_cast %59 : vector<16x32xbf16> to vector<1x16x32xbf16>
    %61 = vector.extract_strided_slice %56 {offsets = [0, 0, 0], sizes = [1, 16, 8], strides = [1, 1, 1]} : vector<1x16x32xbf16> to vector<1x16x8xbf16>
    %62 = vector.extract_strided_slice %58 {offsets = [0, 0, 0], sizes = [1, 16, 8], strides = [1, 1, 1]} : vector<1x16x32xbf16> to vector<1x16x8xbf16>
    "tpu.trace_start"() <{level = 10 : i32, message = "bqd,bkd->bqk"}> : () -> ()
    %cst_45 = arith.constant dense<0.000000e+00> : vector<1x16x16xf32>
    %63 = tpu.matmul %61, %62, %cst_45 {dimension_numbers = #tpu.dot_dimension_numbers<[2], [2], [1], [1], [0, 0, 0, 1, 1, 1], [0], [0]>} : vector<1x16x8xbf16>, vector<1x16x8xbf16>, vector<1x16x16xf32> -> vector<1x16x16xf32>
    "tpu.trace_stop"() : () -> ()
    %cst_46 = arith.constant dense<0xFF800000> : vector<1x16xf32>
    %64 = vector.multi_reduction <maximumf>, %63, %cst_46 [2] : vector<1x16x16xf32> to vector<1x16xf32>
    %65 = vector.shape_cast %64 : vector<1x16xf32> to vector<1x16x1xf32>
    %66 = vector.broadcast %65 : vector<1x16x1xf32> to vector<1x16x16xf32>
    %67 = arith.subf %63, %66 : vector<1x16x16xf32>
    %68 = math.exp %67 : vector<1x16x16xf32>
    %cst_47 = arith.constant dense<0.000000e+00> : vector<1x16xf32>
    %69 = vector.multi_reduction <add>, %68, %cst_47 [2] : vector<1x16x16xf32> to vector<1x16xf32>
    %70 = vector.shape_cast %69 : vector<1x16xf32> to vector<1x16x1xf32>
    %71 = tpu.reciprocal %70 {approx = true} : vector<1x16x1xf32> -> vector<1x16x1xf32>
    %72 = vector.broadcast %71 : vector<1x16x1xf32> to vector<1x16x16xf32>
    %73 = arith.mulf %68, %72 : vector<1x16x16xf32>
    %74 = arith.truncf %73 : vector<1x16x16xf32> to vector<1x16x16xbf16>
    %75 = vector.extract_strided_slice %60 {offsets = [0, 0, 0], sizes = [1, 16, 8], strides = [1, 1, 1]} : vector<1x16x32xbf16> to vector<1x16x8xbf16>
    "tpu.trace_start"() <{level = 10 : i32, message = "bqk,bkd->bqd"}> : () -> ()
    %cst_48 = arith.constant dense<0.000000e+00> : vector<1x16x8xf32>
    %76 = tpu.matmul %74, %75, %cst_48 {dimension_numbers = #tpu.dot_dimension_numbers<[2], [1], [1], [2], [0, 0, 0, 1, 1, 2], [0], [0]>} : vector<1x16x16xbf16>, vector<1x16x8xbf16>, vector<1x16x8xf32> -> vector<1x16x8xf32>
    "tpu.trace_stop"() : () -> ()
    %77 = vector.extract_strided_slice %56 {offsets = [0, 0, 8], sizes = [1, 16, 8], strides = [1, 1, 1]} : vector<1x16x32xbf16> to vector<1x16x8xbf16>
    %78 = vector.extract_strided_slice %58 {offsets = [0, 0, 8], sizes = [1, 16, 8], strides = [1, 1, 1]} : vector<1x16x32xbf16> to vector<1x16x8xbf16>
    "tpu.trace_start"() <{level = 10 : i32, message = "bqd,bkd->bqk"}> : () -> ()
    %cst_49 = arith.constant dense<0.000000e+00> : vector<1x16x16xf32>
    %79 = tpu.matmul %77, %78, %cst_49 {dimension_numbers = #tpu.dot_dimension_numbers<[2], [2], [1], [1], [0, 0, 0, 1, 1, 1], [0], [0]>} : vector<1x16x8xbf16>, vector<1x16x8xbf16>, vector<1x16x16xf32> -> vector<1x16x16xf32>
    "tpu.trace_stop"() : () -> ()
    %cst_50 = arith.constant dense<0xFF800000> : vector<1x16xf32>
    %80 = vector.multi_reduction <maximumf>, %79, %cst_50 [2] : vector<1x16x16xf32> to vector<1x16xf32>
    %81 = vector.shape_cast %80 : vector<1x16xf32> to vector<1x16x1xf32>
    %82 = vector.broadcast %81 : vector<1x16x1xf32> to vector<1x16x16xf32>
    %83 = arith.subf %79, %82 : vector<1x16x16xf32>
    %84 = math.exp %83 : vector<1x16x16xf32>
    %cst_51 = arith.constant dense<0.000000e+00> : vector<1x16xf32>
    %85 = vector.multi_reduction <add>, %84, %cst_51 [2] : vector<1x16x16xf32> to vector<1x16xf32>
    %86 = vector.shape_cast %85 : vector<1x16xf32> to vector<1x16x1xf32>
    %87 = tpu.reciprocal %86 {approx = true} : vector<1x16x1xf32> -> vector<1x16x1xf32>
    %88 = vector.broadcast %87 : vector<1x16x1xf32> to vector<1x16x16xf32>
    %89 = arith.mulf %84, %88 : vector<1x16x16xf32>
    %90 = arith.truncf %89 : vector<1x16x16xf32> to vector<1x16x16xbf16>
    %91 = vector.extract_strided_slice %60 {offsets = [0, 0, 8], sizes = [1, 16, 8], strides = [1, 1, 1]} : vector<1x16x32xbf16> to vector<1x16x8xbf16>
    "tpu.trace_start"() <{level = 10 : i32, message = "bqk,bkd->bqd"}> : () -> ()
    %cst_52 = arith.constant dense<0.000000e+00> : vector<1x16x8xf32>
    %92 = tpu.matmul %90, %91, %cst_52 {dimension_numbers = #tpu.dot_dimension_numbers<[2], [1], [1], [2], [0, 0, 0, 1, 1, 2], [0], [0]>} : vector<1x16x16xbf16>, vector<1x16x8xbf16>, vector<1x16x8xf32> -> vector<1x16x8xf32>
    "tpu.trace_stop"() : () -> ()
    %93 = vector.extract_strided_slice %56 {offsets = [0, 0, 16], sizes = [1, 16, 8], strides = [1, 1, 1]} : vector<1x16x32xbf16> to vector<1x16x8xbf16>
    %94 = vector.extract_strided_slice %58 {offsets = [0, 0, 16], sizes = [1, 16, 8], strides = [1, 1, 1]} : vector<1x16x32xbf16> to vector<1x16x8xbf16>
    "tpu.trace_start"() <{level = 10 : i32, message = "bqd,bkd->bqk"}> : () -> ()
    %cst_53 = arith.constant dense<0.000000e+00> : vector<1x16x16xf32>
    %95 = tpu.matmul %93, %94, %cst_53 {dimension_numbers = #tpu.dot_dimension_numbers<[2], [2], [1], [1], [0, 0, 0, 1, 1, 1], [0], [0]>} : vector<1x16x8xbf16>, vector<1x16x8xbf16>, vector<1x16x16xf32> -> vector<1x16x16xf32>
    "tpu.trace_stop"() : () -> ()
    %cst_54 = arith.constant dense<0xFF800000> : vector<1x16xf32>
    %96 = vector.multi_reduction <maximumf>, %95, %cst_54 [2] : vector<1x16x16xf32> to vector<1x16xf32>
    %97 = vector.shape_cast %96 : vector<1x16xf32> to vector<1x16x1xf32>
    %98 = vector.broadcast %97 : vector<1x16x1xf32> to vector<1x16x16xf32>
    %99 = arith.subf %95, %98 : vector<1x16x16xf32>
    %100 = math.exp %99 : vector<1x16x16xf32>
    %cst_55 = arith.constant dense<0.000000e+00> : vector<1x16xf32>
    %101 = vector.multi_reduction <add>, %100, %cst_55 [2] : vector<1x16x16xf32> to vector<1x16xf32>
    %102 = vector.shape_cast %101 : vector<1x16xf32> to vector<1x16x1xf32>
    %103 = tpu.reciprocal %102 {approx = true} : vector<1x16x1xf32> -> vector<1x16x1xf32>
    %104 = vector.broadcast %103 : vector<1x16x1xf32> to vector<1x16x16xf32>
    %105 = arith.mulf %100, %104 : vector<1x16x16xf32>
    %106 = arith.truncf %105 : vector<1x16x16xf32> to vector<1x16x16xbf16>
    %107 = vector.extract_strided_slice %60 {offsets = [0, 0, 16], sizes = [1, 16, 8], strides = [1, 1, 1]} : vector<1x16x32xbf16> to vector<1x16x8xbf16>
    "tpu.trace_start"() <{level = 10 : i32, message = "bqk,bkd->bqd"}> : () -> ()
    %cst_56 = arith.constant dense<0.000000e+00> : vector<1x16x8xf32>
    %108 = tpu.matmul %106, %107, %cst_56 {dimension_numbers = #tpu.dot_dimension_numbers<[2], [1], [1], [2], [0, 0, 0, 1, 1, 2], [0], [0]>} : vector<1x16x16xbf16>, vector<1x16x8xbf16>, vector<1x16x8xf32> -> vector<1x16x8xf32>
    "tpu.trace_stop"() : () -> ()
    %109 = vector.extract_strided_slice %56 {offsets = [0, 0, 24], sizes = [1, 16, 8], strides = [1, 1, 1]} : vector<1x16x32xbf16> to vector<1x16x8xbf16>
    %110 = vector.extract_strided_slice %58 {offsets = [0, 0, 24], sizes = [1, 16, 8], strides = [1, 1, 1]} : vector<1x16x32xbf16> to vector<1x16x8xbf16>
    "tpu.trace_start"() <{level = 10 : i32, message = "bqd,bkd->bqk"}> : () -> ()
    %cst_57 = arith.constant dense<0.000000e+00> : vector<1x16x16xf32>
    %111 = tpu.matmul %109, %110, %cst_57 {dimension_numbers = #tpu.dot_dimension_numbers<[2], [2], [1], [1], [0, 0, 0, 1, 1, 1], [0], [0]>} : vector<1x16x8xbf16>, vector<1x16x8xbf16>, vector<1x16x16xf32> -> vector<1x16x16xf32>
    "tpu.trace_stop"() : () -> ()
    %cst_58 = arith.constant dense<0xFF800000> : vector<1x16xf32>
    %112 = vector.multi_reduction <maximumf>, %111, %cst_58 [2] : vector<1x16x16xf32> to vector<1x16xf32>
    %113 = vector.shape_cast %112 : vector<1x16xf32> to vector<1x16x1xf32>
    %114 = vector.broadcast %113 : vector<1x16x1xf32> to vector<1x16x16xf32>
    %115 = arith.subf %111, %114 : vector<1x16x16xf32>
    %116 = math.exp %115 : vector<1x16x16xf32>
    %cst_59 = arith.constant dense<0.000000e+00> : vector<1x16xf32>
    %117 = vector.multi_reduction <add>, %116, %cst_59 [2] : vector<1x16x16xf32> to vector<1x16xf32>
    %118 = vector.shape_cast %117 : vector<1x16xf32> to vector<1x16x1xf32>
    %119 = tpu.reciprocal %118 {approx = true} : vector<1x16x1xf32> -> vector<1x16x1xf32>
    %120 = vector.broadcast %119 : vector<1x16x1xf32> to vector<1x16x16xf32>
    %121 = arith.mulf %116, %120 : vector<1x16x16xf32>
    %122 = arith.truncf %121 : vector<1x16x16xf32> to vector<1x16x16xbf16>
    %123 = vector.extract_strided_slice %60 {offsets = [0, 0, 24], sizes = [1, 16, 8], strides = [1, 1, 1]} : vector<1x16x32xbf16> to vector<1x16x8xbf16>
    "tpu.trace_start"() <{level = 10 : i32, message = "bqk,bkd->bqd"}> : () -> ()
    %cst_60 = arith.constant dense<0.000000e+00> : vector<1x16x8xf32>
    %124 = tpu.matmul %122, %123, %cst_60 {dimension_numbers = #tpu.dot_dimension_numbers<[2], [1], [1], [2], [0, 0, 0, 1, 1, 2], [0], [0]>} : vector<1x16x16xbf16>, vector<1x16x8xbf16>, vector<1x16x8xf32> -> vector<1x16x8xf32>
    "tpu.trace_stop"() : () -> ()
    %125 = tpu.concatenate %76, %92, %108, %124 in 2 : vector<1x16x8xf32>, vector<1x16x8xf32>, vector<1x16x8xf32>, vector<1x16x8xf32> -> vector<1x16x32xf32>
    %126 = vector.shape_cast %125 : vector<1x16x32xf32> to vector<16x32xf32>
    %127 = arith.truncf %126 : vector<16x32xf32> to vector<16x32xbf16>
    %cst_61 = arith.constant dense<0.000000e+00> : vector<16x32xf32>
    %128 = tpu.matmul %127, %38, %cst_61 {dimension_numbers = #tpu.dot_dimension_numbers<[1], [0], [0], [1], [0, 0, 1, 1], [], []>} : vector<16x32xbf16>, vector<32x32xbf16>, vector<16x32xf32> -> vector<16x32xf32>
    %129 = vector.broadcast %40 : vector<1x32xf32> to vector<16x32xf32>
    %130 = arith.addf %128, %129 : vector<16x32xf32>
    %131 = arith.addf %14, %130 : vector<16x32xf32>
    %c0_62 = arith.constant 0 : index
    %c0_63 = arith.constant 0 : index
    %c0_64 = arith.constant 0 : index
    %132 = vector.load %arg22[%c0_62, %c0_63, %c0_64] : memref<2x1x32xf32, #tpu.memory_space<vmem>>, vector<1x1x32xf32>
    %133 = vector.shape_cast %132 : vector<1x1x32xf32> to vector<1x32xf32>
    %c0_65 = arith.constant 0 : index
    %c0_66 = arith.constant 0 : index
    %c0_67 = arith.constant 0 : index
    %134 = vector.load %arg23[%c0_65, %c0_66, %c0_67] : memref<2x1x32xf32, #tpu.memory_space<vmem>>, vector<1x1x32xf32>
    %135 = vector.shape_cast %134 : vector<1x1x32xf32> to vector<1x32xf32>
    %cst_68 = arith.constant dense<0.000000e+00> : vector<16xf32>
    %136 = vector.multi_reduction <add>, %131, %cst_68 [1] : vector<16x32xf32> to vector<16xf32>
    %137 = vector.shape_cast %136 : vector<16xf32> to vector<16x1xf32>
    %cst_69 = arith.constant 3.200000e+01 : f32
    %138 = vector.broadcast %cst_69 : f32 to vector<16x1xf32>
    %139 = arith.divf %137, %138 : vector<16x1xf32>
    %140 = vector.broadcast %139 : vector<16x1xf32> to vector<16x32xf32>
    %141 = arith.subf %131, %140 : vector<16x32xf32>
    %142 = arith.mulf %141, %141 : vector<16x32xf32>
    %cst_70 = arith.constant dense<0.000000e+00> : vector<16xf32>
    %143 = vector.multi_reduction <add>, %142, %cst_70 [1] : vector<16x32xf32> to vector<16xf32>
    %144 = vector.shape_cast %143 : vector<16xf32> to vector<16x1xf32>
    %cst_71 = arith.constant 3.200000e+01 : f32
    %145 = vector.broadcast %cst_71 : f32 to vector<16x1xf32>
    %146 = arith.divf %144, %145 : vector<16x1xf32>
    %147 = vector.broadcast %139 : vector<16x1xf32> to vector<16x32xf32>
    %148 = arith.subf %131, %147 : vector<16x32xf32>
    %cst_72 = arith.constant 9.99999974E-6 : f32
    %149 = vector.broadcast %cst_72 : f32 to vector<16x1xf32>
    %150 = arith.addf %146, %149 : vector<16x1xf32>
    %151 = math.rsqrt %150 : vector<16x1xf32>
    %152 = vector.broadcast %151 : vector<16x1xf32> to vector<16x32xf32>
    %153 = arith.mulf %148, %152 : vector<16x32xf32>
    %154 = vector.broadcast %133 : vector<1x32xf32> to vector<16x32xf32>
    %155 = arith.mulf %153, %154 : vector<16x32xf32>
    %156 = vector.broadcast %135 : vector<1x32xf32> to vector<16x32xf32>
    %157 = arith.addf %155, %156 : vector<16x32xf32>
    %c0_73 = arith.constant 0 : index
    %c0_74 = arith.constant 0 : index
    %c0_75 = arith.constant 0 : index
    %158 = vector.load %arg24[%c0_73, %c0_74, %c0_75] : memref<2x32x2048xbf16, #tpu.memory_space<vmem>>, vector<1x32x2048xbf16>
    %159 = vector.shape_cast %158 : vector<1x32x2048xbf16> to vector<32x2048xbf16>
    %c0_76 = arith.constant 0 : index
    %c0_77 = arith.constant 0 : index
    %c0_78 = arith.constant 0 : index
    %160 = vector.load %arg25[%c0_76, %c0_77, %c0_78] : memref<2x1x2048xf32, #tpu.memory_space<vmem>>, vector<1x1x2048xf32>
    %161 = vector.shape_cast %160 : vector<1x1x2048xf32> to vector<1x2048xf32>
    %c0_79 = arith.constant 0 : index
    %c0_80 = arith.constant 0 : index
    %c0_81 = arith.constant 0 : index
    %162 = vector.load %arg26[%c0_79, %c0_80, %c0_81] : memref<2x2048x32xbf16, #tpu.memory_space<vmem>>, vector<1x2048x32xbf16>
    %163 = vector.shape_cast %162 : vector<1x2048x32xbf16> to vector<2048x32xbf16>
    %c0_82 = arith.constant 0 : index
    %c0_83 = arith.constant 0 : index
    %c0_84 = arith.constant 0 : index
    %164 = vector.load %arg27[%c0_82, %c0_83, %c0_84] : memref<2x1x32xf32, #tpu.memory_space<vmem>>, vector<1x1x32xf32>
    %165 = vector.shape_cast %164 : vector<1x1x32xf32> to vector<1x32xf32>
    %166 = arith.truncf %157 : vector<16x32xf32> to vector<16x32xbf16>
    %cst_85 = arith.constant dense<0.000000e+00> : vector<16x2048xf32>
    %167 = tpu.matmul %166, %159, %cst_85 {dimension_numbers = #tpu.dot_dimension_numbers<[1], [0], [0], [1], [0, 0, 1, 1], [], []>} : vector<16x32xbf16>, vector<32x2048xbf16>, vector<16x2048xf32> -> vector<16x2048xf32>
    %168 = vector.broadcast %161 : vector<1x2048xf32> to vector<16x2048xf32>
    %169 = arith.addf %167, %168 : vector<16x2048xf32>
    %cst_86 = arith.constant 0.000000e+00 : f32
    %170 = vector.broadcast %cst_86 : f32 to vector<16x2048xf32>
    %171 = arith.maximumf %169, %170 : vector<16x2048xf32>
    %172 = arith.truncf %171 : vector<16x2048xf32> to vector<16x2048xbf16>
    %cst_87 = arith.constant dense<0.000000e+00> : vector<16x32xf32>
    %173 = tpu.matmul %172, %163, %cst_87 {dimension_numbers = #tpu.dot_dimension_numbers<[1], [0], [0], [1], [0, 0, 1, 1], [], []>} : vector<16x2048xbf16>, vector<2048x32xbf16>, vector<16x32xf32> -> vector<16x32xf32>
    %174 = vector.broadcast %165 : vector<1x32xf32> to vector<16x32xf32>
    %175 = arith.addf %173, %174 : vector<16x32xf32>
    %176 = arith.addf %157, %175 : vector<16x32xf32>
    %c0_88 = arith.constant 0 : index
    %c0_89 = arith.constant 0 : index
    %c0_90 = arith.constant 0 : index
    %177 = vector.load %arg28[%c0_88, %c0_89, %c0_90] : memref<2x1x32xf32, #tpu.memory_space<vmem>>, vector<1x1x32xf32>
    %178 = vector.shape_cast %177 : vector<1x1x32xf32> to vector<1x32xf32>
    %c0_91 = arith.constant 0 : index
    %c0_92 = arith.constant 0 : index
    %c0_93 = arith.constant 0 : index
    %179 = vector.load %arg29[%c0_91, %c0_92, %c0_93] : memref<2x1x32xf32, #tpu.memory_space<vmem>>, vector<1x1x32xf32>
    %180 = vector.shape_cast %179 : vector<1x1x32xf32> to vector<1x32xf32>
    %cst_94 = arith.constant dense<0.000000e+00> : vector<16xf32>
    %181 = vector.multi_reduction <add>, %176, %cst_94 [1] : vector<16x32xf32> to vector<16xf32>
    %182 = vector.shape_cast %181 : vector<16xf32> to vector<16x1xf32>
    %cst_95 = arith.constant 3.200000e+01 : f32
    %183 = vector.broadcast %cst_95 : f32 to vector<16x1xf32>
    %184 = arith.divf %182, %183 : vector<16x1xf32>
    %185 = vector.broadcast %184 : vector<16x1xf32> to vector<16x32xf32>
    %186 = arith.subf %176, %185 : vector<16x32xf32>
    %187 = arith.mulf %186, %186 : vector<16x32xf32>
    %cst_96 = arith.constant dense<0.000000e+00> : vector<16xf32>
    %188 = vector.multi_reduction <add>, %187, %cst_96 [1] : vector<16x32xf32> to vector<16xf32>
    %189 = vector.shape_cast %188 : vector<16xf32> to vector<16x1xf32>
    %cst_97 = arith.constant 3.200000e+01 : f32
    %190 = vector.broadcast %cst_97 : f32 to vector<16x1xf32>
    %191 = arith.divf %189, %190 : vector<16x1xf32>
    %192 = vector.broadcast %184 : vector<16x1xf32> to vector<16x32xf32>
    %193 = arith.subf %176, %192 : vector<16x32xf32>
    %cst_98 = arith.constant 9.99999974E-6 : f32
    %194 = vector.broadcast %cst_98 : f32 to vector<16x1xf32>
    %195 = arith.addf %191, %194 : vector<16x1xf32>
    %196 = math.rsqrt %195 : vector<16x1xf32>
    %197 = vector.broadcast %196 : vector<16x1xf32> to vector<16x32xf32>
    %198 = arith.mulf %193, %197 : vector<16x32xf32>
    %199 = vector.broadcast %178 : vector<1x32xf32> to vector<16x32xf32>
    %200 = arith.mulf %198, %199 : vector<16x32xf32>
    %201 = vector.broadcast %180 : vector<1x32xf32> to vector<16x32xf32>
    %202 = arith.addf %200, %201 : vector<16x32xf32>
    %c1 = arith.constant 1 : index
    %c0_99 = arith.constant 0 : index
    %c0_100 = arith.constant 0 : index
    %203 = vector.load %arg14[%c1, %c0_99, %c0_100] : memref<2x32x32xbf16, #tpu.memory_space<vmem>>, vector<1x32x32xbf16>
    %204 = vector.shape_cast %203 : vector<1x32x32xbf16> to vector<32x32xbf16>
    %c1_101 = arith.constant 1 : index
    %c0_102 = arith.constant 0 : index
    %c0_103 = arith.constant 0 : index
    %205 = vector.load %arg15[%c1_101, %c0_102, %c0_103] : memref<2x1x32xf32, #tpu.memory_space<vmem>>, vector<1x1x32xf32>
    %206 = vector.shape_cast %205 : vector<1x1x32xf32> to vector<1x32xf32>
    %c1_104 = arith.constant 1 : index
    %c0_105 = arith.constant 0 : index
    %c0_106 = arith.constant 0 : index
    %207 = vector.load %arg16[%c1_104, %c0_105, %c0_106] : memref<2x32x32xbf16, #tpu.memory_space<vmem>>, vector<1x32x32xbf16>
    %208 = vector.shape_cast %207 : vector<1x32x32xbf16> to vector<32x32xbf16>
    %c1_107 = arith.constant 1 : index
    %c0_108 = arith.constant 0 : index
    %c0_109 = arith.constant 0 : index
    %209 = vector.load %arg17[%c1_107, %c0_108, %c0_109] : memref<2x1x32xf32, #tpu.memory_space<vmem>>, vector<1x1x32xf32>
    %210 = vector.shape_cast %209 : vector<1x1x32xf32> to vector<1x32xf32>
    %c1_110 = arith.constant 1 : index
    %c0_111 = arith.constant 0 : index
    %c0_112 = arith.constant 0 : index
    %211 = vector.load %arg18[%c1_110, %c0_111, %c0_112] : memref<2x32x32xbf16, #tpu.memory_space<vmem>>, vector<1x32x32xbf16>
    %212 = vector.shape_cast %211 : vector<1x32x32xbf16> to vector<32x32xbf16>
    %c1_113 = arith.constant 1 : index
    %c0_114 = arith.constant 0 : index
    %c0_115 = arith.constant 0 : index
    %213 = vector.load %arg19[%c1_113, %c0_114, %c0_115] : memref<2x1x32xf32, #tpu.memory_space<vmem>>, vector<1x1x32xf32>
    %214 = vector.shape_cast %213 : vector<1x1x32xf32> to vector<1x32xf32>
    %c1_116 = arith.constant 1 : index
    %c0_117 = arith.constant 0 : index
    %c0_118 = arith.constant 0 : index
    %215 = vector.load %arg20[%c1_116, %c0_117, %c0_118] : memref<2x32x32xbf16, #tpu.memory_space<vmem>>, vector<1x32x32xbf16>
    %216 = vector.shape_cast %215 : vector<1x32x32xbf16> to vector<32x32xbf16>
    %c1_119 = arith.constant 1 : index
    %c0_120 = arith.constant 0 : index
    %c0_121 = arith.constant 0 : index
    %217 = vector.load %arg21[%c1_119, %c0_120, %c0_121] : memref<2x1x32xf32, #tpu.memory_space<vmem>>, vector<1x1x32xf32>
    %218 = vector.shape_cast %217 : vector<1x1x32xf32> to vector<1x32xf32>
    %219 = arith.truncf %202 : vector<16x32xf32> to vector<16x32xbf16>
    %cst_122 = arith.constant dense<0.000000e+00> : vector<16x32xf32>
    %220 = tpu.matmul %219, %204, %cst_122 {dimension_numbers = #tpu.dot_dimension_numbers<[1], [0], [0], [1], [0, 0, 1, 1], [], []>} : vector<16x32xbf16>, vector<32x32xbf16>, vector<16x32xf32> -> vector<16x32xf32>
    %221 = vector.broadcast %206 : vector<1x32xf32> to vector<16x32xf32>
    %222 = arith.addf %220, %221 : vector<16x32xf32>
    %cst_123 = arith.constant 0.353553385 : f32
    %223 = vector.broadcast %cst_123 : f32 to vector<16x32xf32>
    %224 = arith.mulf %222, %223 : vector<16x32xf32>
    %225 = arith.truncf %202 : vector<16x32xf32> to vector<16x32xbf16>
    %cst_124 = arith.constant dense<0.000000e+00> : vector<16x32xf32>
    %226 = tpu.matmul %225, %208, %cst_124 {dimension_numbers = #tpu.dot_dimension_numbers<[1], [0], [0], [1], [0, 0, 1, 1], [], []>} : vector<16x32xbf16>, vector<32x32xbf16>, vector<16x32xf32> -> vector<16x32xf32>
    %227 = vector.broadcast %210 : vector<1x32xf32> to vector<16x32xf32>
    %228 = arith.addf %226, %227 : vector<16x32xf32>
    %229 = arith.truncf %202 : vector<16x32xf32> to vector<16x32xbf16>
    %cst_125 = arith.constant dense<0.000000e+00> : vector<16x32xf32>
    %230 = tpu.matmul %229, %212, %cst_125 {dimension_numbers = #tpu.dot_dimension_numbers<[1], [0], [0], [1], [0, 0, 1, 1], [], []>} : vector<16x32xbf16>, vector<32x32xbf16>, vector<16x32xf32> -> vector<16x32xf32>
    %231 = vector.broadcast %214 : vector<1x32xf32> to vector<16x32xf32>
    %232 = arith.addf %230, %231 : vector<16x32xf32>
    %233 = arith.truncf %224 : vector<16x32xf32> to vector<16x32xbf16>
    %234 = vector.shape_cast %233 : vector<16x32xbf16> to vector<1x16x32xbf16>
    %235 = arith.truncf %228 : vector<16x32xf32> to vector<16x32xbf16>
    %236 = vector.shape_cast %235 : vector<16x32xbf16> to vector<1x16x32xbf16>
    %237 = arith.truncf %232 : vector<16x32xf32> to vector<16x32xbf16>
    %238 = vector.shape_cast %237 : vector<16x32xbf16> to vector<1x16x32xbf16>
    %239 = vector.extract_strided_slice %234 {offsets = [0, 0, 0], sizes = [1, 16, 8], strides = [1, 1, 1]} : vector<1x16x32xbf16> to vector<1x16x8xbf16>
    %240 = vector.extract_strided_slice %236 {offsets = [0, 0, 0], sizes = [1, 16, 8], strides = [1, 1, 1]} : vector<1x16x32xbf16> to vector<1x16x8xbf16>
    "tpu.trace_start"() <{level = 10 : i32, message = "bqd,bkd->bqk"}> : () -> ()
    %cst_126 = arith.constant dense<0.000000e+00> : vector<1x16x16xf32>
    %241 = tpu.matmul %239, %240, %cst_126 {dimension_numbers = #tpu.dot_dimension_numbers<[2], [2], [1], [1], [0, 0, 0, 1, 1, 1], [0], [0]>} : vector<1x16x8xbf16>, vector<1x16x8xbf16>, vector<1x16x16xf32> -> vector<1x16x16xf32>
    "tpu.trace_stop"() : () -> ()
    %cst_127 = arith.constant dense<0xFF800000> : vector<1x16xf32>
    %242 = vector.multi_reduction <maximumf>, %241, %cst_127 [2] : vector<1x16x16xf32> to vector<1x16xf32>
    %243 = vector.shape_cast %242 : vector<1x16xf32> to vector<1x16x1xf32>
    %244 = vector.broadcast %243 : vector<1x16x1xf32> to vector<1x16x16xf32>
    %245 = arith.subf %241, %244 : vector<1x16x16xf32>
    %246 = math.exp %245 : vector<1x16x16xf32>
    %cst_128 = arith.constant dense<0.000000e+00> : vector<1x16xf32>
    %247 = vector.multi_reduction <add>, %246, %cst_128 [2] : vector<1x16x16xf32> to vector<1x16xf32>
    %248 = vector.shape_cast %247 : vector<1x16xf32> to vector<1x16x1xf32>
    %249 = tpu.reciprocal %248 {approx = true} : vector<1x16x1xf32> -> vector<1x16x1xf32>
    %250 = vector.broadcast %249 : vector<1x16x1xf32> to vector<1x16x16xf32>
    %251 = arith.mulf %246, %250 : vector<1x16x16xf32>
    %252 = arith.truncf %251 : vector<1x16x16xf32> to vector<1x16x16xbf16>
    %253 = vector.extract_strided_slice %238 {offsets = [0, 0, 0], sizes = [1, 16, 8], strides = [1, 1, 1]} : vector<1x16x32xbf16> to vector<1x16x8xbf16>
    "tpu.trace_start"() <{level = 10 : i32, message = "bqk,bkd->bqd"}> : () -> ()
    %cst_129 = arith.constant dense<0.000000e+00> : vector<1x16x8xf32>
    %254 = tpu.matmul %252, %253, %cst_129 {dimension_numbers = #tpu.dot_dimension_numbers<[2], [1], [1], [2], [0, 0, 0, 1, 1, 2], [0], [0]>} : vector<1x16x16xbf16>, vector<1x16x8xbf16>, vector<1x16x8xf32> -> vector<1x16x8xf32>
    "tpu.trace_stop"() : () -> ()
    %255 = vector.extract_strided_slice %234 {offsets = [0, 0, 8], sizes = [1, 16, 8], strides = [1, 1, 1]} : vector<1x16x32xbf16> to vector<1x16x8xbf16>
    %256 = vector.extract_strided_slice %236 {offsets = [0, 0, 8], sizes = [1, 16, 8], strides = [1, 1, 1]} : vector<1x16x32xbf16> to vector<1x16x8xbf16>
    "tpu.trace_start"() <{level = 10 : i32, message = "bqd,bkd->bqk"}> : () -> ()
    %cst_130 = arith.constant dense<0.000000e+00> : vector<1x16x16xf32>
    %257 = tpu.matmul %255, %256, %cst_130 {dimension_numbers = #tpu.dot_dimension_numbers<[2], [2], [1], [1], [0, 0, 0, 1, 1, 1], [0], [0]>} : vector<1x16x8xbf16>, vector<1x16x8xbf16>, vector<1x16x16xf32> -> vector<1x16x16xf32>
    "tpu.trace_stop"() : () -> ()
    %cst_131 = arith.constant dense<0xFF800000> : vector<1x16xf32>
    %258 = vector.multi_reduction <maximumf>, %257, %cst_131 [2] : vector<1x16x16xf32> to vector<1x16xf32>
    %259 = vector.shape_cast %258 : vector<1x16xf32> to vector<1x16x1xf32>
    %260 = vector.broadcast %259 : vector<1x16x1xf32> to vector<1x16x16xf32>
    %261 = arith.subf %257, %260 : vector<1x16x16xf32>
    %262 = math.exp %261 : vector<1x16x16xf32>
    %cst_132 = arith.constant dense<0.000000e+00> : vector<1x16xf32>
    %263 = vector.multi_reduction <add>, %262, %cst_132 [2] : vector<1x16x16xf32> to vector<1x16xf32>
    %264 = vector.shape_cast %263 : vector<1x16xf32> to vector<1x16x1xf32>
    %265 = tpu.reciprocal %264 {approx = true} : vector<1x16x1xf32> -> vector<1x16x1xf32>
    %266 = vector.broadcast %265 : vector<1x16x1xf32> to vector<1x16x16xf32>
    %267 = arith.mulf %262, %266 : vector<1x16x16xf32>
    %268 = arith.truncf %267 : vector<1x16x16xf32> to vector<1x16x16xbf16>
    %269 = vector.extract_strided_slice %238 {offsets = [0, 0, 8], sizes = [1, 16, 8], strides = [1, 1, 1]} : vector<1x16x32xbf16> to vector<1x16x8xbf16>
    "tpu.trace_start"() <{level = 10 : i32, message = "bqk,bkd->bqd"}> : () -> ()
    %cst_133 = arith.constant dense<0.000000e+00> : vector<1x16x8xf32>
    %270 = tpu.matmul %268, %269, %cst_133 {dimension_numbers = #tpu.dot_dimension_numbers<[2], [1], [1], [2], [0, 0, 0, 1, 1, 2], [0], [0]>} : vector<1x16x16xbf16>, vector<1x16x8xbf16>, vector<1x16x8xf32> -> vector<1x16x8xf32>
    "tpu.trace_stop"() : () -> ()
    %271 = vector.extract_strided_slice %234 {offsets = [0, 0, 16], sizes = [1, 16, 8], strides = [1, 1, 1]} : vector<1x16x32xbf16> to vector<1x16x8xbf16>
    %272 = vector.extract_strided_slice %236 {offsets = [0, 0, 16], sizes = [1, 16, 8], strides = [1, 1, 1]} : vector<1x16x32xbf16> to vector<1x16x8xbf16>
    "tpu.trace_start"() <{level = 10 : i32, message = "bqd,bkd->bqk"}> : () -> ()
    %cst_134 = arith.constant dense<0.000000e+00> : vector<1x16x16xf32>
    %273 = tpu.matmul %271, %272, %cst_134 {dimension_numbers = #tpu.dot_dimension_numbers<[2], [2], [1], [1], [0, 0, 0, 1, 1, 1], [0], [0]>} : vector<1x16x8xbf16>, vector<1x16x8xbf16>, vector<1x16x16xf32> -> vector<1x16x16xf32>
    "tpu.trace_stop"() : () -> ()
    %cst_135 = arith.constant dense<0xFF800000> : vector<1x16xf32>
    %274 = vector.multi_reduction <maximumf>, %273, %cst_135 [2] : vector<1x16x16xf32> to vector<1x16xf32>
    %275 = vector.shape_cast %274 : vector<1x16xf32> to vector<1x16x1xf32>
    %276 = vector.broadcast %275 : vector<1x16x1xf32> to vector<1x16x16xf32>
    %277 = arith.subf %273, %276 : vector<1x16x16xf32>
    %278 = math.exp %277 : vector<1x16x16xf32>
    %cst_136 = arith.constant dense<0.000000e+00> : vector<1x16xf32>
    %279 = vector.multi_reduction <add>, %278, %cst_136 [2] : vector<1x16x16xf32> to vector<1x16xf32>
    %280 = vector.shape_cast %279 : vector<1x16xf32> to vector<1x16x1xf32>
    %281 = tpu.reciprocal %280 {approx = true} : vector<1x16x1xf32> -> vector<1x16x1xf32>
    %282 = vector.broadcast %281 : vector<1x16x1xf32> to vector<1x16x16xf32>
    %283 = arith.mulf %278, %282 : vector<1x16x16xf32>
    %284 = arith.truncf %283 : vector<1x16x16xf32> to vector<1x16x16xbf16>
    %285 = vector.extract_strided_slice %238 {offsets = [0, 0, 16], sizes = [1, 16, 8], strides = [1, 1, 1]} : vector<1x16x32xbf16> to vector<1x16x8xbf16>
    "tpu.trace_start"() <{level = 10 : i32, message = "bqk,bkd->bqd"}> : () -> ()
    %cst_137 = arith.constant dense<0.000000e+00> : vector<1x16x8xf32>
    %286 = tpu.matmul %284, %285, %cst_137 {dimension_numbers = #tpu.dot_dimension_numbers<[2], [1], [1], [2], [0, 0, 0, 1, 1, 2], [0], [0]>} : vector<1x16x16xbf16>, vector<1x16x8xbf16>, vector<1x16x8xf32> -> vector<1x16x8xf32>
    "tpu.trace_stop"() : () -> ()
    %287 = vector.extract_strided_slice %234 {offsets = [0, 0, 24], sizes = [1, 16, 8], strides = [1, 1, 1]} : vector<1x16x32xbf16> to vector<1x16x8xbf16>
    %288 = vector.extract_strided_slice %236 {offsets = [0, 0, 24], sizes = [1, 16, 8], strides = [1, 1, 1]} : vector<1x16x32xbf16> to vector<1x16x8xbf16>
    "tpu.trace_start"() <{level = 10 : i32, message = "bqd,bkd->bqk"}> : () -> ()
    %cst_138 = arith.constant dense<0.000000e+00> : vector<1x16x16xf32>
    %289 = tpu.matmul %287, %288, %cst_138 {dimension_numbers = #tpu.dot_dimension_numbers<[2], [2], [1], [1], [0, 0, 0, 1, 1, 1], [0], [0]>} : vector<1x16x8xbf16>, vector<1x16x8xbf16>, vector<1x16x16xf32> -> vector<1x16x16xf32>
    "tpu.trace_stop"() : () -> ()
    %cst_139 = arith.constant dense<0xFF800000> : vector<1x16xf32>
    %290 = vector.multi_reduction <maximumf>, %289, %cst_139 [2] : vector<1x16x16xf32> to vector<1x16xf32>
    %291 = vector.shape_cast %290 : vector<1x16xf32> to vector<1x16x1xf32>
    %292 = vector.broadcast %291 : vector<1x16x1xf32> to vector<1x16x16xf32>
    %293 = arith.subf %289, %292 : vector<1x16x16xf32>
    %294 = math.exp %293 : vector<1x16x16xf32>
    %cst_140 = arith.constant dense<0.000000e+00> : vector<1x16xf32>
    %295 = vector.multi_reduction <add>, %294, %cst_140 [2] : vector<1x16x16xf32> to vector<1x16xf32>
    %296 = vector.shape_cast %295 : vector<1x16xf32> to vector<1x16x1xf32>
    %297 = tpu.reciprocal %296 {approx = true} : vector<1x16x1xf32> -> vector<1x16x1xf32>
    %298 = vector.broadcast %297 : vector<1x16x1xf32> to vector<1x16x16xf32>
    %299 = arith.mulf %294, %298 : vector<1x16x16xf32>
    %300 = arith.truncf %299 : vector<1x16x16xf32> to vector<1x16x16xbf16>
    %301 = vector.extract_strided_slice %238 {offsets = [0, 0, 24], sizes = [1, 16, 8], strides = [1, 1, 1]} : vector<1x16x32xbf16> to vector<1x16x8xbf16>
    "tpu.trace_start"() <{level = 10 : i32, message = "bqk,bkd->bqd"}> : () -> ()
    %cst_141 = arith.constant dense<0.000000e+00> : vector<1x16x8xf32>
    %302 = tpu.matmul %300, %301, %cst_141 {dimension_numbers = #tpu.dot_dimension_numbers<[2], [1], [1], [2], [0, 0, 0, 1, 1, 2], [0], [0]>} : vector<1x16x16xbf16>, vector<1x16x8xbf16>, vector<1x16x8xf32> -> vector<1x16x8xf32>
    "tpu.trace_stop"() : () -> ()
    %303 = tpu.concatenate %254, %270, %286, %302 in 2 : vector<1x16x8xf32>, vector<1x16x8xf32>, vector<1x16x8xf32>, vector<1x16x8xf32> -> vector<1x16x32xf32>
    %304 = vector.shape_cast %303 : vector<1x16x32xf32> to vector<16x32xf32>
    %305 = arith.truncf %304 : vector<16x32xf32> to vector<16x32xbf16>
    %cst_142 = arith.constant dense<0.000000e+00> : vector<16x32xf32>
    %306 = tpu.matmul %305, %216, %cst_142 {dimension_numbers = #tpu.dot_dimension_numbers<[1], [0], [0], [1], [0, 0, 1, 1], [], []>} : vector<16x32xbf16>, vector<32x32xbf16>, vector<16x32xf32> -> vector<16x32xf32>
    %307 = vector.broadcast %218 : vector<1x32xf32> to vector<16x32xf32>
    %308 = arith.addf %306, %307 : vector<16x32xf32>
    %309 = arith.addf %202, %308 : vector<16x32xf32>
    %c1_143 = arith.constant 1 : index
    %c0_144 = arith.constant 0 : index
    %c0_145 = arith.constant 0 : index
    %310 = vector.load %arg22[%c1_143, %c0_144, %c0_145] : memref<2x1x32xf32, #tpu.memory_space<vmem>>, vector<1x1x32xf32>
    %311 = vector.shape_cast %310 : vector<1x1x32xf32> to vector<1x32xf32>
    %c1_146 = arith.constant 1 : index
    %c0_147 = arith.constant 0 : index
    %c0_148 = arith.constant 0 : index
    %312 = vector.load %arg23[%c1_146, %c0_147, %c0_148] : memref<2x1x32xf32, #tpu.memory_space<vmem>>, vector<1x1x32xf32>
    %313 = vector.shape_cast %312 : vector<1x1x32xf32> to vector<1x32xf32>
    %cst_149 = arith.constant dense<0.000000e+00> : vector<16xf32>
    %314 = vector.multi_reduction <add>, %309, %cst_149 [1] : vector<16x32xf32> to vector<16xf32>
    %315 = vector.shape_cast %314 : vector<16xf32> to vector<16x1xf32>
    %cst_150 = arith.constant 3.200000e+01 : f32
    %316 = vector.broadcast %cst_150 : f32 to vector<16x1xf32>
    %317 = arith.divf %315, %316 : vector<16x1xf32>
    %318 = vector.broadcast %317 : vector<16x1xf32> to vector<16x32xf32>
    %319 = arith.subf %309, %318 : vector<16x32xf32>
    %320 = arith.mulf %319, %319 : vector<16x32xf32>
    %cst_151 = arith.constant dense<0.000000e+00> : vector<16xf32>
    %321 = vector.multi_reduction <add>, %320, %cst_151 [1] : vector<16x32xf32> to vector<16xf32>
    %322 = vector.shape_cast %321 : vector<16xf32> to vector<16x1xf32>
    %cst_152 = arith.constant 3.200000e+01 : f32
    %323 = vector.broadcast %cst_152 : f32 to vector<16x1xf32>
    %324 = arith.divf %322, %323 : vector<16x1xf32>
    %325 = vector.broadcast %317 : vector<16x1xf32> to vector<16x32xf32>
    %326 = arith.subf %309, %325 : vector<16x32xf32>
    %cst_153 = arith.constant 9.99999974E-6 : f32
    %327 = vector.broadcast %cst_153 : f32 to vector<16x1xf32>
    %328 = arith.addf %324, %327 : vector<16x1xf32>
    %329 = math.rsqrt %328 : vector<16x1xf32>
    %330 = vector.broadcast %329 : vector<16x1xf32> to vector<16x32xf32>
    %331 = arith.mulf %326, %330 : vector<16x32xf32>
    %332 = vector.broadcast %311 : vector<1x32xf32> to vector<16x32xf32>
    %333 = arith.mulf %331, %332 : vector<16x32xf32>
    %334 = vector.broadcast %313 : vector<1x32xf32> to vector<16x32xf32>
    %335 = arith.addf %333, %334 : vector<16x32xf32>
    %c1_154 = arith.constant 1 : index
    %c0_155 = arith.constant 0 : index
    %c0_156 = arith.constant 0 : index
    %336 = vector.load %arg24[%c1_154, %c0_155, %c0_156] : memref<2x32x2048xbf16, #tpu.memory_space<vmem>>, vector<1x32x2048xbf16>
    %337 = vector.shape_cast %336 : vector<1x32x2048xbf16> to vector<32x2048xbf16>
    %c1_157 = arith.constant 1 : index
    %c0_158 = arith.constant 0 : index
    %c0_159 = arith.constant 0 : index
    %338 = vector.load %arg25[%c1_157, %c0_158, %c0_159] : memref<2x1x2048xf32, #tpu.memory_space<vmem>>, vector<1x1x2048xf32>
    %339 = vector.shape_cast %338 : vector<1x1x2048xf32> to vector<1x2048xf32>
    %c1_160 = arith.constant 1 : index
    %c0_161 = arith.constant 0 : index
    %c0_162 = arith.constant 0 : index
    %340 = vector.load %arg26[%c1_160, %c0_161, %c0_162] : memref<2x2048x32xbf16, #tpu.memory_space<vmem>>, vector<1x2048x32xbf16>
    %341 = vector.shape_cast %340 : vector<1x2048x32xbf16> to vector<2048x32xbf16>
    %c1_163 = arith.constant 1 : index
    %c0_164 = arith.constant 0 : index
    %c0_165 = arith.constant 0 : index
    %342 = vector.load %arg27[%c1_163, %c0_164, %c0_165] : memref<2x1x32xf32, #tpu.memory_space<vmem>>, vector<1x1x32xf32>
    %343 = vector.shape_cast %342 : vector<1x1x32xf32> to vector<1x32xf32>
    %344 = arith.truncf %335 : vector<16x32xf32> to vector<16x32xbf16>
    %cst_166 = arith.constant dense<0.000000e+00> : vector<16x2048xf32>
    %345 = tpu.matmul %344, %337, %cst_166 {dimension_numbers = #tpu.dot_dimension_numbers<[1], [0], [0], [1], [0, 0, 1, 1], [], []>} : vector<16x32xbf16>, vector<32x2048xbf16>, vector<16x2048xf32> -> vector<16x2048xf32>
    %346 = vector.broadcast %339 : vector<1x2048xf32> to vector<16x2048xf32>
    %347 = arith.addf %345, %346 : vector<16x2048xf32>
    %cst_167 = arith.constant 0.000000e+00 : f32
    %348 = vector.broadcast %cst_167 : f32 to vector<16x2048xf32>
    %349 = arith.maximumf %347, %348 : vector<16x2048xf32>
    %350 = arith.truncf %349 : vector<16x2048xf32> to vector<16x2048xbf16>
    %cst_168 = arith.constant dense<0.000000e+00> : vector<16x32xf32>
    %351 = tpu.matmul %350, %341, %cst_168 {dimension_numbers = #tpu.dot_dimension_numbers<[1], [0], [0], [1], [0, 0, 1, 1], [], []>} : vector<16x2048xbf16>, vector<2048x32xbf16>, vector<16x32xf32> -> vector<16x32xf32>
    %352 = vector.broadcast %343 : vector<1x32xf32> to vector<16x32xf32>
    %353 = arith.addf %351, %352 : vector<16x32xf32>
    %354 = arith.addf %335, %353 : vector<16x32xf32>
    %c1_169 = arith.constant 1 : index
    %c0_170 = arith.constant 0 : index
    %c0_171 = arith.constant 0 : index
    %355 = vector.load %arg28[%c1_169, %c0_170, %c0_171] : memref<2x1x32xf32, #tpu.memory_space<vmem>>, vector<1x1x32xf32>
    %356 = vector.shape_cast %355 : vector<1x1x32xf32> to vector<1x32xf32>
    %c1_172 = arith.constant 1 : index
    %c0_173 = arith.constant 0 : index
    %c0_174 = arith.constant 0 : index
    %357 = vector.load %arg29[%c1_172, %c0_173, %c0_174] : memref<2x1x32xf32, #tpu.memory_space<vmem>>, vector<1x1x32xf32>
    %358 = vector.shape_cast %357 : vector<1x1x32xf32> to vector<1x32xf32>
    %cst_175 = arith.constant dense<0.000000e+00> : vector<16xf32>
    %359 = vector.multi_reduction <add>, %354, %cst_175 [1] : vector<16x32xf32> to vector<16xf32>
    %360 = vector.shape_cast %359 : vector<16xf32> to vector<16x1xf32>
    %cst_176 = arith.constant 3.200000e+01 : f32
    %361 = vector.broadcast %cst_176 : f32 to vector<16x1xf32>
    %362 = arith.divf %360, %361 : vector<16x1xf32>
    %363 = vector.broadcast %362 : vector<16x1xf32> to vector<16x32xf32>
    %364 = arith.subf %354, %363 : vector<16x32xf32>
    %365 = arith.mulf %364, %364 : vector<16x32xf32>
    %cst_177 = arith.constant dense<0.000000e+00> : vector<16xf32>
    %366 = vector.multi_reduction <add>, %365, %cst_177 [1] : vector<16x32xf32> to vector<16xf32>
    %367 = vector.shape_cast %366 : vector<16xf32> to vector<16x1xf32>
    %cst_178 = arith.constant 3.200000e+01 : f32
    %368 = vector.broadcast %cst_178 : f32 to vector<16x1xf32>
    %369 = arith.divf %367, %368 : vector<16x1xf32>
    %370 = vector.broadcast %362 : vector<16x1xf32> to vector<16x32xf32>
    %371 = arith.subf %354, %370 : vector<16x32xf32>
    %cst_179 = arith.constant 9.99999974E-6 : f32
    %372 = vector.broadcast %cst_179 : f32 to vector<16x1xf32>
    %373 = arith.addf %369, %372 : vector<16x1xf32>
    %374 = math.rsqrt %373 : vector<16x1xf32>
    %375 = vector.broadcast %374 : vector<16x1xf32> to vector<16x32xf32>
    %376 = arith.mulf %371, %375 : vector<16x32xf32>
    %377 = vector.broadcast %356 : vector<1x32xf32> to vector<16x32xf32>
    %378 = arith.mulf %376, %377 : vector<16x32xf32>
    %379 = vector.broadcast %358 : vector<1x32xf32> to vector<16x32xf32>
    %380 = arith.addf %378, %379 : vector<16x32xf32>
    %c0_180 = arith.constant 0 : index
    %c0_181 = arith.constant 0 : index
    %381 = vector.load %arg8[%c0_180, %c0_181] : memref<1x32xf32, #tpu.memory_space<vmem>>, vector<1x32xf32>
    %c0_182 = arith.constant 0 : index
    %c0_183 = arith.constant 0 : index
    %382 = vector.load %arg9[%c0_182, %c0_183] : memref<1x32xf32, #tpu.memory_space<vmem>>, vector<1x32xf32>
    %cst_184 = arith.constant dense<0.000000e+00> : vector<16xf32>
    %383 = vector.multi_reduction <add>, %380, %cst_184 [1] : vector<16x32xf32> to vector<16xf32>
    %384 = vector.shape_cast %383 : vector<16xf32> to vector<16x1xf32>
    %cst_185 = arith.constant 3.200000e+01 : f32
    %385 = vector.broadcast %cst_185 : f32 to vector<16x1xf32>
    %386 = arith.divf %384, %385 : vector<16x1xf32>
    %387 = vector.broadcast %386 : vector<16x1xf32> to vector<16x32xf32>
    %388 = arith.subf %380, %387 : vector<16x32xf32>
    %389 = arith.mulf %388, %388 : vector<16x32xf32>
    %cst_186 = arith.constant dense<0.000000e+00> : vector<16xf32>
    %390 = vector.multi_reduction <add>, %389, %cst_186 [1] : vector<16x32xf32> to vector<16xf32>
    %391 = vector.shape_cast %390 : vector<16xf32> to vector<16x1xf32>
    %cst_187 = arith.constant 3.200000e+01 : f32
    %392 = vector.broadcast %cst_187 : f32 to vector<16x1xf32>
    %393 = arith.divf %391, %392 : vector<16x1xf32>
    %394 = vector.broadcast %386 : vector<16x1xf32> to vector<16x32xf32>
    %395 = arith.subf %380, %394 : vector<16x32xf32>
    %cst_188 = arith.constant 9.99999974E-6 : f32
    %396 = vector.broadcast %cst_188 : f32 to vector<16x1xf32>
    %397 = arith.addf %393, %396 : vector<16x1xf32>
    %398 = math.rsqrt %397 : vector<16x1xf32>
    %399 = vector.broadcast %398 : vector<16x1xf32> to vector<16x32xf32>
    %400 = arith.mulf %395, %399 : vector<16x32xf32>
    %401 = vector.broadcast %381 : vector<1x32xf32> to vector<16x32xf32>
    %402 = arith.mulf %400, %401 : vector<16x32xf32>
    %403 = vector.broadcast %382 : vector<1x32xf32> to vector<16x32xf32>
    %404 = arith.addf %402, %403 : vector<16x32xf32>
    %c0_189 = arith.constant 0 : index
    %c0_190 = arith.constant 0 : index
    %c0_191 = arith.constant 0 : index
    %405 = vector.load %arg30[%c0_189, %c0_190, %c0_191] : memref<2x32x32xbf16, #tpu.memory_space<vmem>>, vector<1x32x32xbf16>
    %406 = vector.shape_cast %405 : vector<1x32x32xbf16> to vector<32x32xbf16>
    %c0_192 = arith.constant 0 : index
    %c0_193 = arith.constant 0 : index
    %c0_194 = arith.constant 0 : index
    %407 = vector.load %arg31[%c0_192, %c0_193, %c0_194] : memref<2x1x32xf32, #tpu.memory_space<vmem>>, vector<1x1x32xf32>
    %408 = vector.shape_cast %407 : vector<1x1x32xf32> to vector<1x32xf32>
    %c0_195 = arith.constant 0 : index
    %c0_196 = arith.constant 0 : index
    %c0_197 = arith.constant 0 : index
    %409 = vector.load %arg32[%c0_195, %c0_196, %c0_197] : memref<2x32x32xbf16, #tpu.memory_space<vmem>>, vector<1x32x32xbf16>
    %410 = vector.shape_cast %409 : vector<1x32x32xbf16> to vector<32x32xbf16>
    %c0_198 = arith.constant 0 : index
    %c0_199 = arith.constant 0 : index
    %c0_200 = arith.constant 0 : index
    %411 = vector.load %arg33[%c0_198, %c0_199, %c0_200] : memref<2x1x32xf32, #tpu.memory_space<vmem>>, vector<1x1x32xf32>
    %412 = vector.shape_cast %411 : vector<1x1x32xf32> to vector<1x32xf32>
    %c0_201 = arith.constant 0 : index
    %c0_202 = arith.constant 0 : index
    %c0_203 = arith.constant 0 : index
    %413 = vector.load %arg34[%c0_201, %c0_202, %c0_203] : memref<2x32x32xbf16, #tpu.memory_space<vmem>>, vector<1x32x32xbf16>
    %414 = vector.shape_cast %413 : vector<1x32x32xbf16> to vector<32x32xbf16>
    %c0_204 = arith.constant 0 : index
    %c0_205 = arith.constant 0 : index
    %c0_206 = arith.constant 0 : index
    %415 = vector.load %arg35[%c0_204, %c0_205, %c0_206] : memref<2x1x32xf32, #tpu.memory_space<vmem>>, vector<1x1x32xf32>
    %416 = vector.shape_cast %415 : vector<1x1x32xf32> to vector<1x32xf32>
    %c0_207 = arith.constant 0 : index
    %c0_208 = arith.constant 0 : index
    %c0_209 = arith.constant 0 : index
    %417 = vector.load %arg36[%c0_207, %c0_208, %c0_209] : memref<2x32x32xbf16, #tpu.memory_space<vmem>>, vector<1x32x32xbf16>
    %418 = vector.shape_cast %417 : vector<1x32x32xbf16> to vector<32x32xbf16>
    %c0_210 = arith.constant 0 : index
    %c0_211 = arith.constant 0 : index
    %c0_212 = arith.constant 0 : index
    %419 = vector.load %arg37[%c0_210, %c0_211, %c0_212] : memref<2x1x32xf32, #tpu.memory_space<vmem>>, vector<1x1x32xf32>
    %420 = vector.shape_cast %419 : vector<1x1x32xf32> to vector<1x32xf32>
    %421 = arith.truncf %24 : vector<8x32xf32> to vector<8x32xbf16>
    %cst_213 = arith.constant dense<0.000000e+00> : vector<8x32xf32>
    %422 = tpu.matmul %421, %406, %cst_213 {dimension_numbers = #tpu.dot_dimension_numbers<[1], [0], [0], [1], [0, 0, 1, 1], [], []>} : vector<8x32xbf16>, vector<32x32xbf16>, vector<8x32xf32> -> vector<8x32xf32>
    %423 = vector.broadcast %408 : vector<1x32xf32> to vector<8x32xf32>
    %424 = arith.addf %422, %423 : vector<8x32xf32>
    %cst_214 = arith.constant 0.353553385 : f32
    %425 = vector.broadcast %cst_214 : f32 to vector<8x32xf32>
    %426 = arith.mulf %424, %425 : vector<8x32xf32>
    %427 = arith.truncf %24 : vector<8x32xf32> to vector<8x32xbf16>
    %cst_215 = arith.constant dense<0.000000e+00> : vector<8x32xf32>
    %428 = tpu.matmul %427, %410, %cst_215 {dimension_numbers = #tpu.dot_dimension_numbers<[1], [0], [0], [1], [0, 0, 1, 1], [], []>} : vector<8x32xbf16>, vector<32x32xbf16>, vector<8x32xf32> -> vector<8x32xf32>
    %429 = vector.broadcast %412 : vector<1x32xf32> to vector<8x32xf32>
    %430 = arith.addf %428, %429 : vector<8x32xf32>
    %431 = arith.truncf %24 : vector<8x32xf32> to vector<8x32xbf16>
    %cst_216 = arith.constant dense<0.000000e+00> : vector<8x32xf32>
    %432 = tpu.matmul %431, %414, %cst_216 {dimension_numbers = #tpu.dot_dimension_numbers<[1], [0], [0], [1], [0, 0, 1, 1], [], []>} : vector<8x32xbf16>, vector<32x32xbf16>, vector<8x32xf32> -> vector<8x32xf32>
    %433 = vector.broadcast %416 : vector<1x32xf32> to vector<8x32xf32>
    %434 = arith.addf %432, %433 : vector<8x32xf32>
    %435 = arith.truncf %426 : vector<8x32xf32> to vector<8x32xbf16>
    %436 = vector.shape_cast %435 : vector<8x32xbf16> to vector<1x8x32xbf16>
    %437 = arith.truncf %430 : vector<8x32xf32> to vector<8x32xbf16>
    %438 = vector.shape_cast %437 : vector<8x32xbf16> to vector<1x8x32xbf16>
    %439 = arith.truncf %434 : vector<8x32xf32> to vector<8x32xbf16>
    %440 = vector.shape_cast %439 : vector<8x32xbf16> to vector<1x8x32xbf16>
    %441 = vector.extract_strided_slice %436 {offsets = [0, 0, 0], sizes = [1, 8, 8], strides = [1, 1, 1]} : vector<1x8x32xbf16> to vector<1x8x8xbf16>
    %442 = vector.extract_strided_slice %438 {offsets = [0, 0, 0], sizes = [1, 8, 8], strides = [1, 1, 1]} : vector<1x8x32xbf16> to vector<1x8x8xbf16>
    "tpu.trace_start"() <{level = 10 : i32, message = "bqd,bkd->bqk"}> : () -> ()
    %cst_217 = arith.constant dense<0.000000e+00> : vector<1x8x8xf32>
    %443 = tpu.matmul %441, %442, %cst_217 {dimension_numbers = #tpu.dot_dimension_numbers<[2], [2], [1], [1], [0, 0, 0, 1, 1, 1], [0], [0]>} : vector<1x8x8xbf16>, vector<1x8x8xbf16>, vector<1x8x8xf32> -> vector<1x8x8xf32>
    "tpu.trace_stop"() : () -> ()
    %cst_218 = arith.constant dense<0xFF800000> : vector<1x8xf32>
    %444 = vector.multi_reduction <maximumf>, %443, %cst_218 [2] : vector<1x8x8xf32> to vector<1x8xf32>
    %445 = vector.shape_cast %444 : vector<1x8xf32> to vector<1x8x1xf32>
    %446 = vector.broadcast %445 : vector<1x8x1xf32> to vector<1x8x8xf32>
    %447 = arith.subf %443, %446 : vector<1x8x8xf32>
    %448 = math.exp %447 : vector<1x8x8xf32>
    %cst_219 = arith.constant dense<0.000000e+00> : vector<1x8xf32>
    %449 = vector.multi_reduction <add>, %448, %cst_219 [2] : vector<1x8x8xf32> to vector<1x8xf32>
    %450 = vector.shape_cast %449 : vector<1x8xf32> to vector<1x8x1xf32>
    %451 = tpu.reciprocal %450 {approx = true} : vector<1x8x1xf32> -> vector<1x8x1xf32>
    %452 = vector.broadcast %451 : vector<1x8x1xf32> to vector<1x8x8xf32>
    %453 = arith.mulf %448, %452 : vector<1x8x8xf32>
    %454 = arith.truncf %453 : vector<1x8x8xf32> to vector<1x8x8xbf16>
    %455 = vector.extract_strided_slice %440 {offsets = [0, 0, 0], sizes = [1, 8, 8], strides = [1, 1, 1]} : vector<1x8x32xbf16> to vector<1x8x8xbf16>
    "tpu.trace_start"() <{level = 10 : i32, message = "bqk,bkd->bqd"}> : () -> ()
    %cst_220 = arith.constant dense<0.000000e+00> : vector<1x8x8xf32>
    %456 = tpu.matmul %454, %455, %cst_220 {dimension_numbers = #tpu.dot_dimension_numbers<[2], [1], [1], [2], [0, 0, 0, 1, 1, 2], [0], [0]>} : vector<1x8x8xbf16>, vector<1x8x8xbf16>, vector<1x8x8xf32> -> vector<1x8x8xf32>
    "tpu.trace_stop"() : () -> ()
    %457 = vector.extract_strided_slice %436 {offsets = [0, 0, 8], sizes = [1, 8, 8], strides = [1, 1, 1]} : vector<1x8x32xbf16> to vector<1x8x8xbf16>
    %458 = vector.extract_strided_slice %438 {offsets = [0, 0, 8], sizes = [1, 8, 8], strides = [1, 1, 1]} : vector<1x8x32xbf16> to vector<1x8x8xbf16>
    "tpu.trace_start"() <{level = 10 : i32, message = "bqd,bkd->bqk"}> : () -> ()
    %cst_221 = arith.constant dense<0.000000e+00> : vector<1x8x8xf32>
    %459 = tpu.matmul %457, %458, %cst_221 {dimension_numbers = #tpu.dot_dimension_numbers<[2], [2], [1], [1], [0, 0, 0, 1, 1, 1], [0], [0]>} : vector<1x8x8xbf16>, vector<1x8x8xbf16>, vector<1x8x8xf32> -> vector<1x8x8xf32>
    "tpu.trace_stop"() : () -> ()
    %cst_222 = arith.constant dense<0xFF800000> : vector<1x8xf32>
    %460 = vector.multi_reduction <maximumf>, %459, %cst_222 [2] : vector<1x8x8xf32> to vector<1x8xf32>
    %461 = vector.shape_cast %460 : vector<1x8xf32> to vector<1x8x1xf32>
    %462 = vector.broadcast %461 : vector<1x8x1xf32> to vector<1x8x8xf32>
    %463 = arith.subf %459, %462 : vector<1x8x8xf32>
    %464 = math.exp %463 : vector<1x8x8xf32>
    %cst_223 = arith.constant dense<0.000000e+00> : vector<1x8xf32>
    %465 = vector.multi_reduction <add>, %464, %cst_223 [2] : vector<1x8x8xf32> to vector<1x8xf32>
    %466 = vector.shape_cast %465 : vector<1x8xf32> to vector<1x8x1xf32>
    %467 = tpu.reciprocal %466 {approx = true} : vector<1x8x1xf32> -> vector<1x8x1xf32>
    %468 = vector.broadcast %467 : vector<1x8x1xf32> to vector<1x8x8xf32>
    %469 = arith.mulf %464, %468 : vector<1x8x8xf32>
    %470 = arith.truncf %469 : vector<1x8x8xf32> to vector<1x8x8xbf16>
    %471 = vector.extract_strided_slice %440 {offsets = [0, 0, 8], sizes = [1, 8, 8], strides = [1, 1, 1]} : vector<1x8x32xbf16> to vector<1x8x8xbf16>
    "tpu.trace_start"() <{level = 10 : i32, message = "bqk,bkd->bqd"}> : () -> ()
    %cst_224 = arith.constant dense<0.000000e+00> : vector<1x8x8xf32>
    %472 = tpu.matmul %470, %471, %cst_224 {dimension_numbers = #tpu.dot_dimension_numbers<[2], [1], [1], [2], [0, 0, 0, 1, 1, 2], [0], [0]>} : vector<1x8x8xbf16>, vector<1x8x8xbf16>, vector<1x8x8xf32> -> vector<1x8x8xf32>
    "tpu.trace_stop"() : () -> ()
    %473 = vector.extract_strided_slice %436 {offsets = [0, 0, 16], sizes = [1, 8, 8], strides = [1, 1, 1]} : vector<1x8x32xbf16> to vector<1x8x8xbf16>
    %474 = vector.extract_strided_slice %438 {offsets = [0, 0, 16], sizes = [1, 8, 8], strides = [1, 1, 1]} : vector<1x8x32xbf16> to vector<1x8x8xbf16>
    "tpu.trace_start"() <{level = 10 : i32, message = "bqd,bkd->bqk"}> : () -> ()
    %cst_225 = arith.constant dense<0.000000e+00> : vector<1x8x8xf32>
    %475 = tpu.matmul %473, %474, %cst_225 {dimension_numbers = #tpu.dot_dimension_numbers<[2], [2], [1], [1], [0, 0, 0, 1, 1, 1], [0], [0]>} : vector<1x8x8xbf16>, vector<1x8x8xbf16>, vector<1x8x8xf32> -> vector<1x8x8xf32>
    "tpu.trace_stop"() : () -> ()
    %cst_226 = arith.constant dense<0xFF800000> : vector<1x8xf32>
    %476 = vector.multi_reduction <maximumf>, %475, %cst_226 [2] : vector<1x8x8xf32> to vector<1x8xf32>
    %477 = vector.shape_cast %476 : vector<1x8xf32> to vector<1x8x1xf32>
    %478 = vector.broadcast %477 : vector<1x8x1xf32> to vector<1x8x8xf32>
    %479 = arith.subf %475, %478 : vector<1x8x8xf32>
    %480 = math.exp %479 : vector<1x8x8xf32>
    %cst_227 = arith.constant dense<0.000000e+00> : vector<1x8xf32>
    %481 = vector.multi_reduction <add>, %480, %cst_227 [2] : vector<1x8x8xf32> to vector<1x8xf32>
    %482 = vector.shape_cast %481 : vector<1x8xf32> to vector<1x8x1xf32>
    %483 = tpu.reciprocal %482 {approx = true} : vector<1x8x1xf32> -> vector<1x8x1xf32>
    %484 = vector.broadcast %483 : vector<1x8x1xf32> to vector<1x8x8xf32>
    %485 = arith.mulf %480, %484 : vector<1x8x8xf32>
    %486 = arith.truncf %485 : vector<1x8x8xf32> to vector<1x8x8xbf16>
    %487 = vector.extract_strided_slice %440 {offsets = [0, 0, 16], sizes = [1, 8, 8], strides = [1, 1, 1]} : vector<1x8x32xbf16> to vector<1x8x8xbf16>
    "tpu.trace_start"() <{level = 10 : i32, message = "bqk,bkd->bqd"}> : () -> ()
    %cst_228 = arith.constant dense<0.000000e+00> : vector<1x8x8xf32>
    %488 = tpu.matmul %486, %487, %cst_228 {dimension_numbers = #tpu.dot_dimension_numbers<[2], [1], [1], [2], [0, 0, 0, 1, 1, 2], [0], [0]>} : vector<1x8x8xbf16>, vector<1x8x8xbf16>, vector<1x8x8xf32> -> vector<1x8x8xf32>
    "tpu.trace_stop"() : () -> ()
    %489 = vector.extract_strided_slice %436 {offsets = [0, 0, 24], sizes = [1, 8, 8], strides = [1, 1, 1]} : vector<1x8x32xbf16> to vector<1x8x8xbf16>
    %490 = vector.extract_strided_slice %438 {offsets = [0, 0, 24], sizes = [1, 8, 8], strides = [1, 1, 1]} : vector<1x8x32xbf16> to vector<1x8x8xbf16>
    "tpu.trace_start"() <{level = 10 : i32, message = "bqd,bkd->bqk"}> : () -> ()
    %cst_229 = arith.constant dense<0.000000e+00> : vector<1x8x8xf32>
    %491 = tpu.matmul %489, %490, %cst_229 {dimension_numbers = #tpu.dot_dimension_numbers<[2], [2], [1], [1], [0, 0, 0, 1, 1, 1], [0], [0]>} : vector<1x8x8xbf16>, vector<1x8x8xbf16>, vector<1x8x8xf32> -> vector<1x8x8xf32>
    "tpu.trace_stop"() : () -> ()
    %cst_230 = arith.constant dense<0xFF800000> : vector<1x8xf32>
    %492 = vector.multi_reduction <maximumf>, %491, %cst_230 [2] : vector<1x8x8xf32> to vector<1x8xf32>
    %493 = vector.shape_cast %492 : vector<1x8xf32> to vector<1x8x1xf32>
    %494 = vector.broadcast %493 : vector<1x8x1xf32> to vector<1x8x8xf32>
    %495 = arith.subf %491, %494 : vector<1x8x8xf32>
    %496 = math.exp %495 : vector<1x8x8xf32>
    %cst_231 = arith.constant dense<0.000000e+00> : vector<1x8xf32>
    %497 = vector.multi_reduction <add>, %496, %cst_231 [2] : vector<1x8x8xf32> to vector<1x8xf32>
    %498 = vector.shape_cast %497 : vector<1x8xf32> to vector<1x8x1xf32>
    %499 = tpu.reciprocal %498 {approx = true} : vector<1x8x1xf32> -> vector<1x8x1xf32>
    %500 = vector.broadcast %499 : vector<1x8x1xf32> to vector<1x8x8xf32>
    %501 = arith.mulf %496, %500 : vector<1x8x8xf32>
    %502 = arith.truncf %501 : vector<1x8x8xf32> to vector<1x8x8xbf16>
    %503 = vector.extract_strided_slice %440 {offsets = [0, 0, 24], sizes = [1, 8, 8], strides = [1, 1, 1]} : vector<1x8x32xbf16> to vector<1x8x8xbf16>
    "tpu.trace_start"() <{level = 10 : i32, message = "bqk,bkd->bqd"}> : () -> ()
    %cst_232 = arith.constant dense<0.000000e+00> : vector<1x8x8xf32>
    %504 = tpu.matmul %502, %503, %cst_232 {dimension_numbers = #tpu.dot_dimension_numbers<[2], [1], [1], [2], [0, 0, 0, 1, 1, 2], [0], [0]>} : vector<1x8x8xbf16>, vector<1x8x8xbf16>, vector<1x8x8xf32> -> vector<1x8x8xf32>
    "tpu.trace_stop"() : () -> ()
    %505 = tpu.concatenate %456, %472, %488, %504 in 2 : vector<1x8x8xf32>, vector<1x8x8xf32>, vector<1x8x8xf32>, vector<1x8x8xf32> -> vector<1x8x32xf32>
    %506 = vector.shape_cast %505 : vector<1x8x32xf32> to vector<8x32xf32>
    %507 = arith.truncf %506 : vector<8x32xf32> to vector<8x32xbf16>
    %cst_233 = arith.constant dense<0.000000e+00> : vector<8x32xf32>
    %508 = tpu.matmul %507, %418, %cst_233 {dimension_numbers = #tpu.dot_dimension_numbers<[1], [0], [0], [1], [0, 0, 1, 1], [], []>} : vector<8x32xbf16>, vector<32x32xbf16>, vector<8x32xf32> -> vector<8x32xf32>
    %509 = vector.broadcast %420 : vector<1x32xf32> to vector<8x32xf32>
    %510 = arith.addf %508, %509 : vector<8x32xf32>
    %511 = arith.addf %24, %510 : vector<8x32xf32>
    %c0_234 = arith.constant 0 : index
    %c0_235 = arith.constant 0 : index
    %c0_236 = arith.constant 0 : index
    %512 = vector.load %arg46[%c0_234, %c0_235, %c0_236] : memref<2x1x32xf32, #tpu.memory_space<vmem>>, vector<1x1x32xf32>
    %513 = vector.shape_cast %512 : vector<1x1x32xf32> to vector<1x32xf32>
    %c0_237 = arith.constant 0 : index
    %c0_238 = arith.constant 0 : index
    %c0_239 = arith.constant 0 : index
    %514 = vector.load %arg47[%c0_237, %c0_238, %c0_239] : memref<2x1x32xf32, #tpu.memory_space<vmem>>, vector<1x1x32xf32>
    %515 = vector.shape_cast %514 : vector<1x1x32xf32> to vector<1x32xf32>
    %cst_240 = arith.constant dense<0.000000e+00> : vector<8xf32>
    %516 = vector.multi_reduction <add>, %511, %cst_240 [1] : vector<8x32xf32> to vector<8xf32>
    %517 = vector.shape_cast %516 : vector<8xf32> to vector<8x1xf32>
    %cst_241 = arith.constant 3.200000e+01 : f32
    %518 = vector.broadcast %cst_241 : f32 to vector<8x1xf32>
    %519 = arith.divf %517, %518 : vector<8x1xf32>
    %520 = vector.broadcast %519 : vector<8x1xf32> to vector<8x32xf32>
    %521 = arith.subf %511, %520 : vector<8x32xf32>
    %522 = arith.mulf %521, %521 : vector<8x32xf32>
    %cst_242 = arith.constant dense<0.000000e+00> : vector<8xf32>
    %523 = vector.multi_reduction <add>, %522, %cst_242 [1] : vector<8x32xf32> to vector<8xf32>
    %524 = vector.shape_cast %523 : vector<8xf32> to vector<8x1xf32>
    %cst_243 = arith.constant 3.200000e+01 : f32
    %525 = vector.broadcast %cst_243 : f32 to vector<8x1xf32>
    %526 = arith.divf %524, %525 : vector<8x1xf32>
    %527 = vector.broadcast %519 : vector<8x1xf32> to vector<8x32xf32>
    %528 = arith.subf %511, %527 : vector<8x32xf32>
    %cst_244 = arith.constant 9.99999974E-6 : f32
    %529 = vector.broadcast %cst_244 : f32 to vector<8x1xf32>
    %530 = arith.addf %526, %529 : vector<8x1xf32>
    %531 = math.rsqrt %530 : vector<8x1xf32>
    %532 = vector.broadcast %531 : vector<8x1xf32> to vector<8x32xf32>
    %533 = arith.mulf %528, %532 : vector<8x32xf32>
    %534 = vector.broadcast %513 : vector<1x32xf32> to vector<8x32xf32>
    %535 = arith.mulf %533, %534 : vector<8x32xf32>
    %536 = vector.broadcast %515 : vector<1x32xf32> to vector<8x32xf32>
    %537 = arith.addf %535, %536 : vector<8x32xf32>
    %c0_245 = arith.constant 0 : index
    %c0_246 = arith.constant 0 : index
    %c0_247 = arith.constant 0 : index
    %538 = vector.load %arg38[%c0_245, %c0_246, %c0_247] : memref<2x32x32xbf16, #tpu.memory_space<vmem>>, vector<1x32x32xbf16>
    %539 = vector.shape_cast %538 : vector<1x32x32xbf16> to vector<32x32xbf16>
    %c0_248 = arith.constant 0 : index
    %c0_249 = arith.constant 0 : index
    %c0_250 = arith.constant 0 : index
    %540 = vector.load %arg39[%c0_248, %c0_249, %c0_250] : memref<2x1x32xf32, #tpu.memory_space<vmem>>, vector<1x1x32xf32>
    %541 = vector.shape_cast %540 : vector<1x1x32xf32> to vector<1x32xf32>
    %c0_251 = arith.constant 0 : index
    %c0_252 = arith.constant 0 : index
    %c0_253 = arith.constant 0 : index
    %542 = vector.load %arg40[%c0_251, %c0_252, %c0_253] : memref<2x32x32xbf16, #tpu.memory_space<vmem>>, vector<1x32x32xbf16>
    %543 = vector.shape_cast %542 : vector<1x32x32xbf16> to vector<32x32xbf16>
    %c0_254 = arith.constant 0 : index
    %c0_255 = arith.constant 0 : index
    %c0_256 = arith.constant 0 : index
    %544 = vector.load %arg41[%c0_254, %c0_255, %c0_256] : memref<2x1x32xf32, #tpu.memory_space<vmem>>, vector<1x1x32xf32>
    %545 = vector.shape_cast %544 : vector<1x1x32xf32> to vector<1x32xf32>
    %c0_257 = arith.constant 0 : index
    %c0_258 = arith.constant 0 : index
    %c0_259 = arith.constant 0 : index
    %546 = vector.load %arg42[%c0_257, %c0_258, %c0_259] : memref<2x32x32xbf16, #tpu.memory_space<vmem>>, vector<1x32x32xbf16>
    %547 = vector.shape_cast %546 : vector<1x32x32xbf16> to vector<32x32xbf16>
    %c0_260 = arith.constant 0 : index
    %c0_261 = arith.constant 0 : index
    %c0_262 = arith.constant 0 : index
    %548 = vector.load %arg43[%c0_260, %c0_261, %c0_262] : memref<2x1x32xf32, #tpu.memory_space<vmem>>, vector<1x1x32xf32>
    %549 = vector.shape_cast %548 : vector<1x1x32xf32> to vector<1x32xf32>
    %c0_263 = arith.constant 0 : index
    %c0_264 = arith.constant 0 : index
    %c0_265 = arith.constant 0 : index
    %550 = vector.load %arg44[%c0_263, %c0_264, %c0_265] : memref<2x32x32xbf16, #tpu.memory_space<vmem>>, vector<1x32x32xbf16>
    %551 = vector.shape_cast %550 : vector<1x32x32xbf16> to vector<32x32xbf16>
    %c0_266 = arith.constant 0 : index
    %c0_267 = arith.constant 0 : index
    %c0_268 = arith.constant 0 : index
    %552 = vector.load %arg45[%c0_266, %c0_267, %c0_268] : memref<2x1x32xf32, #tpu.memory_space<vmem>>, vector<1x1x32xf32>
    %553 = vector.shape_cast %552 : vector<1x1x32xf32> to vector<1x32xf32>
    %554 = arith.truncf %537 : vector<8x32xf32> to vector<8x32xbf16>
    %cst_269 = arith.constant dense<0.000000e+00> : vector<8x32xf32>
    %555 = tpu.matmul %554, %539, %cst_269 {dimension_numbers = #tpu.dot_dimension_numbers<[1], [0], [0], [1], [0, 0, 1, 1], [], []>} : vector<8x32xbf16>, vector<32x32xbf16>, vector<8x32xf32> -> vector<8x32xf32>
    %556 = vector.broadcast %541 : vector<1x32xf32> to vector<8x32xf32>
    %557 = arith.addf %555, %556 : vector<8x32xf32>
    %cst_270 = arith.constant 0.353553385 : f32
    %558 = vector.broadcast %cst_270 : f32 to vector<8x32xf32>
    %559 = arith.mulf %557, %558 : vector<8x32xf32>
    %560 = arith.truncf %404 : vector<16x32xf32> to vector<16x32xbf16>
    %cst_271 = arith.constant dense<0.000000e+00> : vector<16x32xf32>
    %561 = tpu.matmul %560, %543, %cst_271 {dimension_numbers = #tpu.dot_dimension_numbers<[1], [0], [0], [1], [0, 0, 1, 1], [], []>} : vector<16x32xbf16>, vector<32x32xbf16>, vector<16x32xf32> -> vector<16x32xf32>
    %562 = vector.broadcast %545 : vector<1x32xf32> to vector<16x32xf32>
    %563 = arith.addf %561, %562 : vector<16x32xf32>
    %564 = arith.truncf %404 : vector<16x32xf32> to vector<16x32xbf16>
    %cst_272 = arith.constant dense<0.000000e+00> : vector<16x32xf32>
    %565 = tpu.matmul %564, %547, %cst_272 {dimension_numbers = #tpu.dot_dimension_numbers<[1], [0], [0], [1], [0, 0, 1, 1], [], []>} : vector<16x32xbf16>, vector<32x32xbf16>, vector<16x32xf32> -> vector<16x32xf32>
    %566 = vector.broadcast %549 : vector<1x32xf32> to vector<16x32xf32>
    %567 = arith.addf %565, %566 : vector<16x32xf32>
    %568 = arith.truncf %559 : vector<8x32xf32> to vector<8x32xbf16>
    %569 = vector.shape_cast %568 : vector<8x32xbf16> to vector<1x8x32xbf16>
    %570 = arith.truncf %563 : vector<16x32xf32> to vector<16x32xbf16>
    %571 = vector.shape_cast %570 : vector<16x32xbf16> to vector<1x16x32xbf16>
    %572 = arith.truncf %567 : vector<16x32xf32> to vector<16x32xbf16>
    %573 = vector.shape_cast %572 : vector<16x32xbf16> to vector<1x16x32xbf16>
    %574 = vector.extract_strided_slice %569 {offsets = [0, 0, 0], sizes = [1, 8, 8], strides = [1, 1, 1]} : vector<1x8x32xbf16> to vector<1x8x8xbf16>
    %575 = vector.extract_strided_slice %571 {offsets = [0, 0, 0], sizes = [1, 16, 8], strides = [1, 1, 1]} : vector<1x16x32xbf16> to vector<1x16x8xbf16>
    "tpu.trace_start"() <{level = 10 : i32, message = "bqd,bkd->bqk"}> : () -> ()
    %cst_273 = arith.constant dense<0.000000e+00> : vector<1x8x16xf32>
    %576 = tpu.matmul %574, %575, %cst_273 {dimension_numbers = #tpu.dot_dimension_numbers<[2], [2], [1], [1], [0, 0, 0, 1, 1, 1], [0], [0]>} : vector<1x8x8xbf16>, vector<1x16x8xbf16>, vector<1x8x16xf32> -> vector<1x8x16xf32>
    "tpu.trace_stop"() : () -> ()
    %cst_274 = arith.constant dense<0xFF800000> : vector<1x8xf32>
    %577 = vector.multi_reduction <maximumf>, %576, %cst_274 [2] : vector<1x8x16xf32> to vector<1x8xf32>
    %578 = vector.shape_cast %577 : vector<1x8xf32> to vector<1x8x1xf32>
    %579 = vector.broadcast %578 : vector<1x8x1xf32> to vector<1x8x16xf32>
    %580 = arith.subf %576, %579 : vector<1x8x16xf32>
    %581 = math.exp %580 : vector<1x8x16xf32>
    %cst_275 = arith.constant dense<0.000000e+00> : vector<1x8xf32>
    %582 = vector.multi_reduction <add>, %581, %cst_275 [2] : vector<1x8x16xf32> to vector<1x8xf32>
    %583 = vector.shape_cast %582 : vector<1x8xf32> to vector<1x8x1xf32>
    %584 = tpu.reciprocal %583 {approx = true} : vector<1x8x1xf32> -> vector<1x8x1xf32>
    %585 = vector.broadcast %584 : vector<1x8x1xf32> to vector<1x8x16xf32>
    %586 = arith.mulf %581, %585 : vector<1x8x16xf32>
    %587 = arith.truncf %586 : vector<1x8x16xf32> to vector<1x8x16xbf16>
    %588 = vector.extract_strided_slice %573 {offsets = [0, 0, 0], sizes = [1, 16, 8], strides = [1, 1, 1]} : vector<1x16x32xbf16> to vector<1x16x8xbf16>
    "tpu.trace_start"() <{level = 10 : i32, message = "bqk,bkd->bqd"}> : () -> ()
    %cst_276 = arith.constant dense<0.000000e+00> : vector<1x8x8xf32>
    %589 = tpu.matmul %587, %588, %cst_276 {dimension_numbers = #tpu.dot_dimension_numbers<[2], [1], [1], [2], [0, 0, 0, 1, 1, 2], [0], [0]>} : vector<1x8x16xbf16>, vector<1x16x8xbf16>, vector<1x8x8xf32> -> vector<1x8x8xf32>
    "tpu.trace_stop"() : () -> ()
    %590 = vector.extract_strided_slice %569 {offsets = [0, 0, 8], sizes = [1, 8, 8], strides = [1, 1, 1]} : vector<1x8x32xbf16> to vector<1x8x8xbf16>
    %591 = vector.extract_strided_slice %571 {offsets = [0, 0, 8], sizes = [1, 16, 8], strides = [1, 1, 1]} : vector<1x16x32xbf16> to vector<1x16x8xbf16>
    "tpu.trace_start"() <{level = 10 : i32, message = "bqd,bkd->bqk"}> : () -> ()
    %cst_277 = arith.constant dense<0.000000e+00> : vector<1x8x16xf32>
    %592 = tpu.matmul %590, %591, %cst_277 {dimension_numbers = #tpu.dot_dimension_numbers<[2], [2], [1], [1], [0, 0, 0, 1, 1, 1], [0], [0]>} : vector<1x8x8xbf16>, vector<1x16x8xbf16>, vector<1x8x16xf32> -> vector<1x8x16xf32>
    "tpu.trace_stop"() : () -> ()
    %cst_278 = arith.constant dense<0xFF800000> : vector<1x8xf32>
    %593 = vector.multi_reduction <maximumf>, %592, %cst_278 [2] : vector<1x8x16xf32> to vector<1x8xf32>
    %594 = vector.shape_cast %593 : vector<1x8xf32> to vector<1x8x1xf32>
    %595 = vector.broadcast %594 : vector<1x8x1xf32> to vector<1x8x16xf32>
    %596 = arith.subf %592, %595 : vector<1x8x16xf32>
    %597 = math.exp %596 : vector<1x8x16xf32>
    %cst_279 = arith.constant dense<0.000000e+00> : vector<1x8xf32>
    %598 = vector.multi_reduction <add>, %597, %cst_279 [2] : vector<1x8x16xf32> to vector<1x8xf32>
    %599 = vector.shape_cast %598 : vector<1x8xf32> to vector<1x8x1xf32>
    %600 = tpu.reciprocal %599 {approx = true} : vector<1x8x1xf32> -> vector<1x8x1xf32>
    %601 = vector.broadcast %600 : vector<1x8x1xf32> to vector<1x8x16xf32>
    %602 = arith.mulf %597, %601 : vector<1x8x16xf32>
    %603 = arith.truncf %602 : vector<1x8x16xf32> to vector<1x8x16xbf16>
    %604 = vector.extract_strided_slice %573 {offsets = [0, 0, 8], sizes = [1, 16, 8], strides = [1, 1, 1]} : vector<1x16x32xbf16> to vector<1x16x8xbf16>
    "tpu.trace_start"() <{level = 10 : i32, message = "bqk,bkd->bqd"}> : () -> ()
    %cst_280 = arith.constant dense<0.000000e+00> : vector<1x8x8xf32>
    %605 = tpu.matmul %603, %604, %cst_280 {dimension_numbers = #tpu.dot_dimension_numbers<[2], [1], [1], [2], [0, 0, 0, 1, 1, 2], [0], [0]>} : vector<1x8x16xbf16>, vector<1x16x8xbf16>, vector<1x8x8xf32> -> vector<1x8x8xf32>
    "tpu.trace_stop"() : () -> ()
    %606 = vector.extract_strided_slice %569 {offsets = [0, 0, 16], sizes = [1, 8, 8], strides = [1, 1, 1]} : vector<1x8x32xbf16> to vector<1x8x8xbf16>
    %607 = vector.extract_strided_slice %571 {offsets = [0, 0, 16], sizes = [1, 16, 8], strides = [1, 1, 1]} : vector<1x16x32xbf16> to vector<1x16x8xbf16>
    "tpu.trace_start"() <{level = 10 : i32, message = "bqd,bkd->bqk"}> : () -> ()
    %cst_281 = arith.constant dense<0.000000e+00> : vector<1x8x16xf32>
    %608 = tpu.matmul %606, %607, %cst_281 {dimension_numbers = #tpu.dot_dimension_numbers<[2], [2], [1], [1], [0, 0, 0, 1, 1, 1], [0], [0]>} : vector<1x8x8xbf16>, vector<1x16x8xbf16>, vector<1x8x16xf32> -> vector<1x8x16xf32>
    "tpu.trace_stop"() : () -> ()
    %cst_282 = arith.constant dense<0xFF800000> : vector<1x8xf32>
    %609 = vector.multi_reduction <maximumf>, %608, %cst_282 [2] : vector<1x8x16xf32> to vector<1x8xf32>
    %610 = vector.shape_cast %609 : vector<1x8xf32> to vector<1x8x1xf32>
    %611 = vector.broadcast %610 : vector<1x8x1xf32> to vector<1x8x16xf32>
    %612 = arith.subf %608, %611 : vector<1x8x16xf32>
    %613 = math.exp %612 : vector<1x8x16xf32>
    %cst_283 = arith.constant dense<0.000000e+00> : vector<1x8xf32>
    %614 = vector.multi_reduction <add>, %613, %cst_283 [2] : vector<1x8x16xf32> to vector<1x8xf32>
    %615 = vector.shape_cast %614 : vector<1x8xf32> to vector<1x8x1xf32>
    %616 = tpu.reciprocal %615 {approx = true} : vector<1x8x1xf32> -> vector<1x8x1xf32>
    %617 = vector.broadcast %616 : vector<1x8x1xf32> to vector<1x8x16xf32>
    %618 = arith.mulf %613, %617 : vector<1x8x16xf32>
    %619 = arith.truncf %618 : vector<1x8x16xf32> to vector<1x8x16xbf16>
    %620 = vector.extract_strided_slice %573 {offsets = [0, 0, 16], sizes = [1, 16, 8], strides = [1, 1, 1]} : vector<1x16x32xbf16> to vector<1x16x8xbf16>
    "tpu.trace_start"() <{level = 10 : i32, message = "bqk,bkd->bqd"}> : () -> ()
    %cst_284 = arith.constant dense<0.000000e+00> : vector<1x8x8xf32>
    %621 = tpu.matmul %619, %620, %cst_284 {dimension_numbers = #tpu.dot_dimension_numbers<[2], [1], [1], [2], [0, 0, 0, 1, 1, 2], [0], [0]>} : vector<1x8x16xbf16>, vector<1x16x8xbf16>, vector<1x8x8xf32> -> vector<1x8x8xf32>
    "tpu.trace_stop"() : () -> ()
    %622 = vector.extract_strided_slice %569 {offsets = [0, 0, 24], sizes = [1, 8, 8], strides = [1, 1, 1]} : vector<1x8x32xbf16> to vector<1x8x8xbf16>
    %623 = vector.extract_strided_slice %571 {offsets = [0, 0, 24], sizes = [1, 16, 8], strides = [1, 1, 1]} : vector<1x16x32xbf16> to vector<1x16x8xbf16>
    "tpu.trace_start"() <{level = 10 : i32, message = "bqd,bkd->bqk"}> : () -> ()
    %cst_285 = arith.constant dense<0.000000e+00> : vector<1x8x16xf32>
    %624 = tpu.matmul %622, %623, %cst_285 {dimension_numbers = #tpu.dot_dimension_numbers<[2], [2], [1], [1], [0, 0, 0, 1, 1, 1], [0], [0]>} : vector<1x8x8xbf16>, vector<1x16x8xbf16>, vector<1x8x16xf32> -> vector<1x8x16xf32>
    "tpu.trace_stop"() : () -> ()
    %cst_286 = arith.constant dense<0xFF800000> : vector<1x8xf32>
    %625 = vector.multi_reduction <maximumf>, %624, %cst_286 [2] : vector<1x8x16xf32> to vector<1x8xf32>
    %626 = vector.shape_cast %625 : vector<1x8xf32> to vector<1x8x1xf32>
    %627 = vector.broadcast %626 : vector<1x8x1xf32> to vector<1x8x16xf32>
    %628 = arith.subf %624, %627 : vector<1x8x16xf32>
    %629 = math.exp %628 : vector<1x8x16xf32>
    %cst_287 = arith.constant dense<0.000000e+00> : vector<1x8xf32>
    %630 = vector.multi_reduction <add>, %629, %cst_287 [2] : vector<1x8x16xf32> to vector<1x8xf32>
    %631 = vector.shape_cast %630 : vector<1x8xf32> to vector<1x8x1xf32>
    %632 = tpu.reciprocal %631 {approx = true} : vector<1x8x1xf32> -> vector<1x8x1xf32>
    %633 = vector.broadcast %632 : vector<1x8x1xf32> to vector<1x8x16xf32>
    %634 = arith.mulf %629, %633 : vector<1x8x16xf32>
    %635 = arith.truncf %634 : vector<1x8x16xf32> to vector<1x8x16xbf16>
    %636 = vector.extract_strided_slice %573 {offsets = [0, 0, 24], sizes = [1, 16, 8], strides = [1, 1, 1]} : vector<1x16x32xbf16> to vector<1x16x8xbf16>
    "tpu.trace_start"() <{level = 10 : i32, message = "bqk,bkd->bqd"}> : () -> ()
    %cst_288 = arith.constant dense<0.000000e+00> : vector<1x8x8xf32>
    %637 = tpu.matmul %635, %636, %cst_288 {dimension_numbers = #tpu.dot_dimension_numbers<[2], [1], [1], [2], [0, 0, 0, 1, 1, 2], [0], [0]>} : vector<1x8x16xbf16>, vector<1x16x8xbf16>, vector<1x8x8xf32> -> vector<1x8x8xf32>
    "tpu.trace_stop"() : () -> ()
    %638 = tpu.concatenate %589, %605, %621, %637 in 2 : vector<1x8x8xf32>, vector<1x8x8xf32>, vector<1x8x8xf32>, vector<1x8x8xf32> -> vector<1x8x32xf32>
    %639 = vector.shape_cast %638 : vector<1x8x32xf32> to vector<8x32xf32>
    %640 = arith.truncf %639 : vector<8x32xf32> to vector<8x32xbf16>
    %cst_289 = arith.constant dense<0.000000e+00> : vector<8x32xf32>
    %641 = tpu.matmul %640, %551, %cst_289 {dimension_numbers = #tpu.dot_dimension_numbers<[1], [0], [0], [1], [0, 0, 1, 1], [], []>} : vector<8x32xbf16>, vector<32x32xbf16>, vector<8x32xf32> -> vector<8x32xf32>
    %642 = vector.broadcast %553 : vector<1x32xf32> to vector<8x32xf32>
    %643 = arith.addf %641, %642 : vector<8x32xf32>
    %644 = arith.addf %537, %643 : vector<8x32xf32>
    %c0_290 = arith.constant 0 : index
    %c0_291 = arith.constant 0 : index
    %c0_292 = arith.constant 0 : index
    %645 = vector.load %arg48[%c0_290, %c0_291, %c0_292] : memref<2x1x32xf32, #tpu.memory_space<vmem>>, vector<1x1x32xf32>
    %646 = vector.shape_cast %645 : vector<1x1x32xf32> to vector<1x32xf32>
    %c0_293 = arith.constant 0 : index
    %c0_294 = arith.constant 0 : index
    %c0_295 = arith.constant 0 : index
    %647 = vector.load %arg49[%c0_293, %c0_294, %c0_295] : memref<2x1x32xf32, #tpu.memory_space<vmem>>, vector<1x1x32xf32>
    %648 = vector.shape_cast %647 : vector<1x1x32xf32> to vector<1x32xf32>
    %cst_296 = arith.constant dense<0.000000e+00> : vector<8xf32>
    %649 = vector.multi_reduction <add>, %644, %cst_296 [1] : vector<8x32xf32> to vector<8xf32>
    %650 = vector.shape_cast %649 : vector<8xf32> to vector<8x1xf32>
    %cst_297 = arith.constant 3.200000e+01 : f32
    %651 = vector.broadcast %cst_297 : f32 to vector<8x1xf32>
    %652 = arith.divf %650, %651 : vector<8x1xf32>
    %653 = vector.broadcast %652 : vector<8x1xf32> to vector<8x32xf32>
    %654 = arith.subf %644, %653 : vector<8x32xf32>
    %655 = arith.mulf %654, %654 : vector<8x32xf32>
    %cst_298 = arith.constant dense<0.000000e+00> : vector<8xf32>
    %656 = vector.multi_reduction <add>, %655, %cst_298 [1] : vector<8x32xf32> to vector<8xf32>
    %657 = vector.shape_cast %656 : vector<8xf32> to vector<8x1xf32>
    %cst_299 = arith.constant 3.200000e+01 : f32
    %658 = vector.broadcast %cst_299 : f32 to vector<8x1xf32>
    %659 = arith.divf %657, %658 : vector<8x1xf32>
    %660 = vector.broadcast %652 : vector<8x1xf32> to vector<8x32xf32>
    %661 = arith.subf %644, %660 : vector<8x32xf32>
    %cst_300 = arith.constant 9.99999974E-6 : f32
    %662 = vector.broadcast %cst_300 : f32 to vector<8x1xf32>
    %663 = arith.addf %659, %662 : vector<8x1xf32>
    %664 = math.rsqrt %663 : vector<8x1xf32>
    %665 = vector.broadcast %664 : vector<8x1xf32> to vector<8x32xf32>
    %666 = arith.mulf %661, %665 : vector<8x32xf32>
    %667 = vector.broadcast %646 : vector<1x32xf32> to vector<8x32xf32>
    %668 = arith.mulf %666, %667 : vector<8x32xf32>
    %669 = vector.broadcast %648 : vector<1x32xf32> to vector<8x32xf32>
    %670 = arith.addf %668, %669 : vector<8x32xf32>
    %c0_301 = arith.constant 0 : index
    %c0_302 = arith.constant 0 : index
    %c0_303 = arith.constant 0 : index
    %671 = vector.load %arg52[%c0_301, %c0_302, %c0_303] : memref<2x32x2048xbf16, #tpu.memory_space<vmem>>, vector<1x32x2048xbf16>
    %672 = vector.shape_cast %671 : vector<1x32x2048xbf16> to vector<32x2048xbf16>
    %c0_304 = arith.constant 0 : index
    %c0_305 = arith.constant 0 : index
    %c0_306 = arith.constant 0 : index
    %673 = vector.load %arg53[%c0_304, %c0_305, %c0_306] : memref<2x1x2048xf32, #tpu.memory_space<vmem>>, vector<1x1x2048xf32>
    %674 = vector.shape_cast %673 : vector<1x1x2048xf32> to vector<1x2048xf32>
    %c0_307 = arith.constant 0 : index
    %c0_308 = arith.constant 0 : index
    %c0_309 = arith.constant 0 : index
    %675 = vector.load %arg54[%c0_307, %c0_308, %c0_309] : memref<2x2048x32xbf16, #tpu.memory_space<vmem>>, vector<1x2048x32xbf16>
    %676 = vector.shape_cast %675 : vector<1x2048x32xbf16> to vector<2048x32xbf16>
    %c0_310 = arith.constant 0 : index
    %c0_311 = arith.constant 0 : index
    %c0_312 = arith.constant 0 : index
    %677 = vector.load %arg55[%c0_310, %c0_311, %c0_312] : memref<2x1x32xf32, #tpu.memory_space<vmem>>, vector<1x1x32xf32>
    %678 = vector.shape_cast %677 : vector<1x1x32xf32> to vector<1x32xf32>
    %679 = arith.truncf %670 : vector<8x32xf32> to vector<8x32xbf16>
    %cst_313 = arith.constant dense<0.000000e+00> : vector<8x2048xf32>
    %680 = tpu.matmul %679, %672, %cst_313 {dimension_numbers = #tpu.dot_dimension_numbers<[1], [0], [0], [1], [0, 0, 1, 1], [], []>} : vector<8x32xbf16>, vector<32x2048xbf16>, vector<8x2048xf32> -> vector<8x2048xf32>
    %681 = vector.broadcast %674 : vector<1x2048xf32> to vector<8x2048xf32>
    %682 = arith.addf %680, %681 : vector<8x2048xf32>
    %cst_314 = arith.constant 0.000000e+00 : f32
    %683 = vector.broadcast %cst_314 : f32 to vector<8x2048xf32>
    %684 = arith.maximumf %682, %683 : vector<8x2048xf32>
    %685 = arith.truncf %684 : vector<8x2048xf32> to vector<8x2048xbf16>
    %cst_315 = arith.constant dense<0.000000e+00> : vector<8x32xf32>
    %686 = tpu.matmul %685, %676, %cst_315 {dimension_numbers = #tpu.dot_dimension_numbers<[1], [0], [0], [1], [0, 0, 1, 1], [], []>} : vector<8x2048xbf16>, vector<2048x32xbf16>, vector<8x32xf32> -> vector<8x32xf32>
    %687 = vector.broadcast %678 : vector<1x32xf32> to vector<8x32xf32>
    %688 = arith.addf %686, %687 : vector<8x32xf32>
    %689 = arith.addf %670, %688 : vector<8x32xf32>
    %c0_316 = arith.constant 0 : index
    %c0_317 = arith.constant 0 : index
    %c0_318 = arith.constant 0 : index
    %690 = vector.load %arg50[%c0_316, %c0_317, %c0_318] : memref<2x1x32xf32, #tpu.memory_space<vmem>>, vector<1x1x32xf32>
    %691 = vector.shape_cast %690 : vector<1x1x32xf32> to vector<1x32xf32>
    %c0_319 = arith.constant 0 : index
    %c0_320 = arith.constant 0 : index
    %c0_321 = arith.constant 0 : index
    %692 = vector.load %arg51[%c0_319, %c0_320, %c0_321] : memref<2x1x32xf32, #tpu.memory_space<vmem>>, vector<1x1x32xf32>
    %693 = vector.shape_cast %692 : vector<1x1x32xf32> to vector<1x32xf32>
    %cst_322 = arith.constant dense<0.000000e+00> : vector<8xf32>
    %694 = vector.multi_reduction <add>, %689, %cst_322 [1] : vector<8x32xf32> to vector<8xf32>
    %695 = vector.shape_cast %694 : vector<8xf32> to vector<8x1xf32>
    %cst_323 = arith.constant 3.200000e+01 : f32
    %696 = vector.broadcast %cst_323 : f32 to vector<8x1xf32>
    %697 = arith.divf %695, %696 : vector<8x1xf32>
    %698 = vector.broadcast %697 : vector<8x1xf32> to vector<8x32xf32>
    %699 = arith.subf %689, %698 : vector<8x32xf32>
    %700 = arith.mulf %699, %699 : vector<8x32xf32>
    %cst_324 = arith.constant dense<0.000000e+00> : vector<8xf32>
    %701 = vector.multi_reduction <add>, %700, %cst_324 [1] : vector<8x32xf32> to vector<8xf32>
    %702 = vector.shape_cast %701 : vector<8xf32> to vector<8x1xf32>
    %cst_325 = arith.constant 3.200000e+01 : f32
    %703 = vector.broadcast %cst_325 : f32 to vector<8x1xf32>
    %704 = arith.divf %702, %703 : vector<8x1xf32>
    %705 = vector.broadcast %697 : vector<8x1xf32> to vector<8x32xf32>
    %706 = arith.subf %689, %705 : vector<8x32xf32>
    %cst_326 = arith.constant 9.99999974E-6 : f32
    %707 = vector.broadcast %cst_326 : f32 to vector<8x1xf32>
    %708 = arith.addf %704, %707 : vector<8x1xf32>
    %709 = math.rsqrt %708 : vector<8x1xf32>
    %710 = vector.broadcast %709 : vector<8x1xf32> to vector<8x32xf32>
    %711 = arith.mulf %706, %710 : vector<8x32xf32>
    %712 = vector.broadcast %691 : vector<1x32xf32> to vector<8x32xf32>
    %713 = arith.mulf %711, %712 : vector<8x32xf32>
    %714 = vector.broadcast %693 : vector<1x32xf32> to vector<8x32xf32>
    %715 = arith.addf %713, %714 : vector<8x32xf32>
    %c1_327 = arith.constant 1 : index
    %c0_328 = arith.constant 0 : index
    %c0_329 = arith.constant 0 : index
    %716 = vector.load %arg30[%c1_327, %c0_328, %c0_329] : memref<2x32x32xbf16, #tpu.memory_space<vmem>>, vector<1x32x32xbf16>
    %717 = vector.shape_cast %716 : vector<1x32x32xbf16> to vector<32x32xbf16>
    %c1_330 = arith.constant 1 : index
    %c0_331 = arith.constant 0 : index
    %c0_332 = arith.constant 0 : index
    %718 = vector.load %arg31[%c1_330, %c0_331, %c0_332] : memref<2x1x32xf32, #tpu.memory_space<vmem>>, vector<1x1x32xf32>
    %719 = vector.shape_cast %718 : vector<1x1x32xf32> to vector<1x32xf32>
    %c1_333 = arith.constant 1 : index
    %c0_334 = arith.constant 0 : index
    %c0_335 = arith.constant 0 : index
    %720 = vector.load %arg32[%c1_333, %c0_334, %c0_335] : memref<2x32x32xbf16, #tpu.memory_space<vmem>>, vector<1x32x32xbf16>
    %721 = vector.shape_cast %720 : vector<1x32x32xbf16> to vector<32x32xbf16>
    %c1_336 = arith.constant 1 : index
    %c0_337 = arith.constant 0 : index
    %c0_338 = arith.constant 0 : index
    %722 = vector.load %arg33[%c1_336, %c0_337, %c0_338] : memref<2x1x32xf32, #tpu.memory_space<vmem>>, vector<1x1x32xf32>
    %723 = vector.shape_cast %722 : vector<1x1x32xf32> to vector<1x32xf32>
    %c1_339 = arith.constant 1 : index
    %c0_340 = arith.constant 0 : index
    %c0_341 = arith.constant 0 : index
    %724 = vector.load %arg34[%c1_339, %c0_340, %c0_341] : memref<2x32x32xbf16, #tpu.memory_space<vmem>>, vector<1x32x32xbf16>
    %725 = vector.shape_cast %724 : vector<1x32x32xbf16> to vector<32x32xbf16>
    %c1_342 = arith.constant 1 : index
    %c0_343 = arith.constant 0 : index
    %c0_344 = arith.constant 0 : index
    %726 = vector.load %arg35[%c1_342, %c0_343, %c0_344] : memref<2x1x32xf32, #tpu.memory_space<vmem>>, vector<1x1x32xf32>
    %727 = vector.shape_cast %726 : vector<1x1x32xf32> to vector<1x32xf32>
    %c1_345 = arith.constant 1 : index
    %c0_346 = arith.constant 0 : index
    %c0_347 = arith.constant 0 : index
    %728 = vector.load %arg36[%c1_345, %c0_346, %c0_347] : memref<2x32x32xbf16, #tpu.memory_space<vmem>>, vector<1x32x32xbf16>
    %729 = vector.shape_cast %728 : vector<1x32x32xbf16> to vector<32x32xbf16>
    %c1_348 = arith.constant 1 : index
    %c0_349 = arith.constant 0 : index
    %c0_350 = arith.constant 0 : index
    %730 = vector.load %arg37[%c1_348, %c0_349, %c0_350] : memref<2x1x32xf32, #tpu.memory_space<vmem>>, vector<1x1x32xf32>
    %731 = vector.shape_cast %730 : vector<1x1x32xf32> to vector<1x32xf32>
    %732 = arith.truncf %715 : vector<8x32xf32> to vector<8x32xbf16>
    %cst_351 = arith.constant dense<0.000000e+00> : vector<8x32xf32>
    %733 = tpu.matmul %732, %717, %cst_351 {dimension_numbers = #tpu.dot_dimension_numbers<[1], [0], [0], [1], [0, 0, 1, 1], [], []>} : vector<8x32xbf16>, vector<32x32xbf16>, vector<8x32xf32> -> vector<8x32xf32>
    %734 = vector.broadcast %719 : vector<1x32xf32> to vector<8x32xf32>
    %735 = arith.addf %733, %734 : vector<8x32xf32>
    %cst_352 = arith.constant 0.353553385 : f32
    %736 = vector.broadcast %cst_352 : f32 to vector<8x32xf32>
    %737 = arith.mulf %735, %736 : vector<8x32xf32>
    %738 = arith.truncf %715 : vector<8x32xf32> to vector<8x32xbf16>
    %cst_353 = arith.constant dense<0.000000e+00> : vector<8x32xf32>
    %739 = tpu.matmul %738, %721, %cst_353 {dimension_numbers = #tpu.dot_dimension_numbers<[1], [0], [0], [1], [0, 0, 1, 1], [], []>} : vector<8x32xbf16>, vector<32x32xbf16>, vector<8x32xf32> -> vector<8x32xf32>
    %740 = vector.broadcast %723 : vector<1x32xf32> to vector<8x32xf32>
    %741 = arith.addf %739, %740 : vector<8x32xf32>
    %742 = arith.truncf %715 : vector<8x32xf32> to vector<8x32xbf16>
    %cst_354 = arith.constant dense<0.000000e+00> : vector<8x32xf32>
    %743 = tpu.matmul %742, %725, %cst_354 {dimension_numbers = #tpu.dot_dimension_numbers<[1], [0], [0], [1], [0, 0, 1, 1], [], []>} : vector<8x32xbf16>, vector<32x32xbf16>, vector<8x32xf32> -> vector<8x32xf32>
    %744 = vector.broadcast %727 : vector<1x32xf32> to vector<8x32xf32>
    %745 = arith.addf %743, %744 : vector<8x32xf32>
    %746 = arith.truncf %737 : vector<8x32xf32> to vector<8x32xbf16>
    %747 = vector.shape_cast %746 : vector<8x32xbf16> to vector<1x8x32xbf16>
    %748 = arith.truncf %741 : vector<8x32xf32> to vector<8x32xbf16>
    %749 = vector.shape_cast %748 : vector<8x32xbf16> to vector<1x8x32xbf16>
    %750 = arith.truncf %745 : vector<8x32xf32> to vector<8x32xbf16>
    %751 = vector.shape_cast %750 : vector<8x32xbf16> to vector<1x8x32xbf16>
    %752 = vector.extract_strided_slice %747 {offsets = [0, 0, 0], sizes = [1, 8, 8], strides = [1, 1, 1]} : vector<1x8x32xbf16> to vector<1x8x8xbf16>
    %753 = vector.extract_strided_slice %749 {offsets = [0, 0, 0], sizes = [1, 8, 8], strides = [1, 1, 1]} : vector<1x8x32xbf16> to vector<1x8x8xbf16>
    "tpu.trace_start"() <{level = 10 : i32, message = "bqd,bkd->bqk"}> : () -> ()
    %cst_355 = arith.constant dense<0.000000e+00> : vector<1x8x8xf32>
    %754 = tpu.matmul %752, %753, %cst_355 {dimension_numbers = #tpu.dot_dimension_numbers<[2], [2], [1], [1], [0, 0, 0, 1, 1, 1], [0], [0]>} : vector<1x8x8xbf16>, vector<1x8x8xbf16>, vector<1x8x8xf32> -> vector<1x8x8xf32>
    "tpu.trace_stop"() : () -> ()
    %cst_356 = arith.constant dense<0xFF800000> : vector<1x8xf32>
    %755 = vector.multi_reduction <maximumf>, %754, %cst_356 [2] : vector<1x8x8xf32> to vector<1x8xf32>
    %756 = vector.shape_cast %755 : vector<1x8xf32> to vector<1x8x1xf32>
    %757 = vector.broadcast %756 : vector<1x8x1xf32> to vector<1x8x8xf32>
    %758 = arith.subf %754, %757 : vector<1x8x8xf32>
    %759 = math.exp %758 : vector<1x8x8xf32>
    %cst_357 = arith.constant dense<0.000000e+00> : vector<1x8xf32>
    %760 = vector.multi_reduction <add>, %759, %cst_357 [2] : vector<1x8x8xf32> to vector<1x8xf32>
    %761 = vector.shape_cast %760 : vector<1x8xf32> to vector<1x8x1xf32>
    %762 = tpu.reciprocal %761 {approx = true} : vector<1x8x1xf32> -> vector<1x8x1xf32>
    %763 = vector.broadcast %762 : vector<1x8x1xf32> to vector<1x8x8xf32>
    %764 = arith.mulf %759, %763 : vector<1x8x8xf32>
    %765 = arith.truncf %764 : vector<1x8x8xf32> to vector<1x8x8xbf16>
    %766 = vector.extract_strided_slice %751 {offsets = [0, 0, 0], sizes = [1, 8, 8], strides = [1, 1, 1]} : vector<1x8x32xbf16> to vector<1x8x8xbf16>
    "tpu.trace_start"() <{level = 10 : i32, message = "bqk,bkd->bqd"}> : () -> ()
    %cst_358 = arith.constant dense<0.000000e+00> : vector<1x8x8xf32>
    %767 = tpu.matmul %765, %766, %cst_358 {dimension_numbers = #tpu.dot_dimension_numbers<[2], [1], [1], [2], [0, 0, 0, 1, 1, 2], [0], [0]>} : vector<1x8x8xbf16>, vector<1x8x8xbf16>, vector<1x8x8xf32> -> vector<1x8x8xf32>
    "tpu.trace_stop"() : () -> ()
    %768 = vector.extract_strided_slice %747 {offsets = [0, 0, 8], sizes = [1, 8, 8], strides = [1, 1, 1]} : vector<1x8x32xbf16> to vector<1x8x8xbf16>
    %769 = vector.extract_strided_slice %749 {offsets = [0, 0, 8], sizes = [1, 8, 8], strides = [1, 1, 1]} : vector<1x8x32xbf16> to vector<1x8x8xbf16>
    "tpu.trace_start"() <{level = 10 : i32, message = "bqd,bkd->bqk"}> : () -> ()
    %cst_359 = arith.constant dense<0.000000e+00> : vector<1x8x8xf32>
    %770 = tpu.matmul %768, %769, %cst_359 {dimension_numbers = #tpu.dot_dimension_numbers<[2], [2], [1], [1], [0, 0, 0, 1, 1, 1], [0], [0]>} : vector<1x8x8xbf16>, vector<1x8x8xbf16>, vector<1x8x8xf32> -> vector<1x8x8xf32>
    "tpu.trace_stop"() : () -> ()
    %cst_360 = arith.constant dense<0xFF800000> : vector<1x8xf32>
    %771 = vector.multi_reduction <maximumf>, %770, %cst_360 [2] : vector<1x8x8xf32> to vector<1x8xf32>
    %772 = vector.shape_cast %771 : vector<1x8xf32> to vector<1x8x1xf32>
    %773 = vector.broadcast %772 : vector<1x8x1xf32> to vector<1x8x8xf32>
    %774 = arith.subf %770, %773 : vector<1x8x8xf32>
    %775 = math.exp %774 : vector<1x8x8xf32>
    %cst_361 = arith.constant dense<0.000000e+00> : vector<1x8xf32>
    %776 = vector.multi_reduction <add>, %775, %cst_361 [2] : vector<1x8x8xf32> to vector<1x8xf32>
    %777 = vector.shape_cast %776 : vector<1x8xf32> to vector<1x8x1xf32>
    %778 = tpu.reciprocal %777 {approx = true} : vector<1x8x1xf32> -> vector<1x8x1xf32>
    %779 = vector.broadcast %778 : vector<1x8x1xf32> to vector<1x8x8xf32>
    %780 = arith.mulf %775, %779 : vector<1x8x8xf32>
    %781 = arith.truncf %780 : vector<1x8x8xf32> to vector<1x8x8xbf16>
    %782 = vector.extract_strided_slice %751 {offsets = [0, 0, 8], sizes = [1, 8, 8], strides = [1, 1, 1]} : vector<1x8x32xbf16> to vector<1x8x8xbf16>
    "tpu.trace_start"() <{level = 10 : i32, message = "bqk,bkd->bqd"}> : () -> ()
    %cst_362 = arith.constant dense<0.000000e+00> : vector<1x8x8xf32>
    %783 = tpu.matmul %781, %782, %cst_362 {dimension_numbers = #tpu.dot_dimension_numbers<[2], [1], [1], [2], [0, 0, 0, 1, 1, 2], [0], [0]>} : vector<1x8x8xbf16>, vector<1x8x8xbf16>, vector<1x8x8xf32> -> vector<1x8x8xf32>
    "tpu.trace_stop"() : () -> ()
    %784 = vector.extract_strided_slice %747 {offsets = [0, 0, 16], sizes = [1, 8, 8], strides = [1, 1, 1]} : vector<1x8x32xbf16> to vector<1x8x8xbf16>
    %785 = vector.extract_strided_slice %749 {offsets = [0, 0, 16], sizes = [1, 8, 8], strides = [1, 1, 1]} : vector<1x8x32xbf16> to vector<1x8x8xbf16>
    "tpu.trace_start"() <{level = 10 : i32, message = "bqd,bkd->bqk"}> : () -> ()
    %cst_363 = arith.constant dense<0.000000e+00> : vector<1x8x8xf32>
    %786 = tpu.matmul %784, %785, %cst_363 {dimension_numbers = #tpu.dot_dimension_numbers<[2], [2], [1], [1], [0, 0, 0, 1, 1, 1], [0], [0]>} : vector<1x8x8xbf16>, vector<1x8x8xbf16>, vector<1x8x8xf32> -> vector<1x8x8xf32>
    "tpu.trace_stop"() : () -> ()
    %cst_364 = arith.constant dense<0xFF800000> : vector<1x8xf32>
    %787 = vector.multi_reduction <maximumf>, %786, %cst_364 [2] : vector<1x8x8xf32> to vector<1x8xf32>
    %788 = vector.shape_cast %787 : vector<1x8xf32> to vector<1x8x1xf32>
    %789 = vector.broadcast %788 : vector<1x8x1xf32> to vector<1x8x8xf32>
    %790 = arith.subf %786, %789 : vector<1x8x8xf32>
    %791 = math.exp %790 : vector<1x8x8xf32>
    %cst_365 = arith.constant dense<0.000000e+00> : vector<1x8xf32>
    %792 = vector.multi_reduction <add>, %791, %cst_365 [2] : vector<1x8x8xf32> to vector<1x8xf32>
    %793 = vector.shape_cast %792 : vector<1x8xf32> to vector<1x8x1xf32>
    %794 = tpu.reciprocal %793 {approx = true} : vector<1x8x1xf32> -> vector<1x8x1xf32>
    %795 = vector.broadcast %794 : vector<1x8x1xf32> to vector<1x8x8xf32>
    %796 = arith.mulf %791, %795 : vector<1x8x8xf32>
    %797 = arith.truncf %796 : vector<1x8x8xf32> to vector<1x8x8xbf16>
    %798 = vector.extract_strided_slice %751 {offsets = [0, 0, 16], sizes = [1, 8, 8], strides = [1, 1, 1]} : vector<1x8x32xbf16> to vector<1x8x8xbf16>
    "tpu.trace_start"() <{level = 10 : i32, message = "bqk,bkd->bqd"}> : () -> ()
    %cst_366 = arith.constant dense<0.000000e+00> : vector<1x8x8xf32>
    %799 = tpu.matmul %797, %798, %cst_366 {dimension_numbers = #tpu.dot_dimension_numbers<[2], [1], [1], [2], [0, 0, 0, 1, 1, 2], [0], [0]>} : vector<1x8x8xbf16>, vector<1x8x8xbf16>, vector<1x8x8xf32> -> vector<1x8x8xf32>
    "tpu.trace_stop"() : () -> ()
    %800 = vector.extract_strided_slice %747 {offsets = [0, 0, 24], sizes = [1, 8, 8], strides = [1, 1, 1]} : vector<1x8x32xbf16> to vector<1x8x8xbf16>
    %801 = vector.extract_strided_slice %749 {offsets = [0, 0, 24], sizes = [1, 8, 8], strides = [1, 1, 1]} : vector<1x8x32xbf16> to vector<1x8x8xbf16>
    "tpu.trace_start"() <{level = 10 : i32, message = "bqd,bkd->bqk"}> : () -> ()
    %cst_367 = arith.constant dense<0.000000e+00> : vector<1x8x8xf32>
    %802 = tpu.matmul %800, %801, %cst_367 {dimension_numbers = #tpu.dot_dimension_numbers<[2], [2], [1], [1], [0, 0, 0, 1, 1, 1], [0], [0]>} : vector<1x8x8xbf16>, vector<1x8x8xbf16>, vector<1x8x8xf32> -> vector<1x8x8xf32>
    "tpu.trace_stop"() : () -> ()
    %cst_368 = arith.constant dense<0xFF800000> : vector<1x8xf32>
    %803 = vector.multi_reduction <maximumf>, %802, %cst_368 [2] : vector<1x8x8xf32> to vector<1x8xf32>
    %804 = vector.shape_cast %803 : vector<1x8xf32> to vector<1x8x1xf32>
    %805 = vector.broadcast %804 : vector<1x8x1xf32> to vector<1x8x8xf32>
    %806 = arith.subf %802, %805 : vector<1x8x8xf32>
    %807 = math.exp %806 : vector<1x8x8xf32>
    %cst_369 = arith.constant dense<0.000000e+00> : vector<1x8xf32>
    %808 = vector.multi_reduction <add>, %807, %cst_369 [2] : vector<1x8x8xf32> to vector<1x8xf32>
    %809 = vector.shape_cast %808 : vector<1x8xf32> to vector<1x8x1xf32>
    %810 = tpu.reciprocal %809 {approx = true} : vector<1x8x1xf32> -> vector<1x8x1xf32>
    %811 = vector.broadcast %810 : vector<1x8x1xf32> to vector<1x8x8xf32>
    %812 = arith.mulf %807, %811 : vector<1x8x8xf32>
    %813 = arith.truncf %812 : vector<1x8x8xf32> to vector<1x8x8xbf16>
    %814 = vector.extract_strided_slice %751 {offsets = [0, 0, 24], sizes = [1, 8, 8], strides = [1, 1, 1]} : vector<1x8x32xbf16> to vector<1x8x8xbf16>
    "tpu.trace_start"() <{level = 10 : i32, message = "bqk,bkd->bqd"}> : () -> ()
    %cst_370 = arith.constant dense<0.000000e+00> : vector<1x8x8xf32>
    %815 = tpu.matmul %813, %814, %cst_370 {dimension_numbers = #tpu.dot_dimension_numbers<[2], [1], [1], [2], [0, 0, 0, 1, 1, 2], [0], [0]>} : vector<1x8x8xbf16>, vector<1x8x8xbf16>, vector<1x8x8xf32> -> vector<1x8x8xf32>
    "tpu.trace_stop"() : () -> ()
    %816 = tpu.concatenate %767, %783, %799, %815 in 2 : vector<1x8x8xf32>, vector<1x8x8xf32>, vector<1x8x8xf32>, vector<1x8x8xf32> -> vector<1x8x32xf32>
    %817 = vector.shape_cast %816 : vector<1x8x32xf32> to vector<8x32xf32>
    %818 = arith.truncf %817 : vector<8x32xf32> to vector<8x32xbf16>
    %cst_371 = arith.constant dense<0.000000e+00> : vector<8x32xf32>
    %819 = tpu.matmul %818, %729, %cst_371 {dimension_numbers = #tpu.dot_dimension_numbers<[1], [0], [0], [1], [0, 0, 1, 1], [], []>} : vector<8x32xbf16>, vector<32x32xbf16>, vector<8x32xf32> -> vector<8x32xf32>
    %820 = vector.broadcast %731 : vector<1x32xf32> to vector<8x32xf32>
    %821 = arith.addf %819, %820 : vector<8x32xf32>
    %822 = arith.addf %715, %821 : vector<8x32xf32>
    %c1_372 = arith.constant 1 : index
    %c0_373 = arith.constant 0 : index
    %c0_374 = arith.constant 0 : index
    %823 = vector.load %arg46[%c1_372, %c0_373, %c0_374] : memref<2x1x32xf32, #tpu.memory_space<vmem>>, vector<1x1x32xf32>
    %824 = vector.shape_cast %823 : vector<1x1x32xf32> to vector<1x32xf32>
    %c1_375 = arith.constant 1 : index
    %c0_376 = arith.constant 0 : index
    %c0_377 = arith.constant 0 : index
    %825 = vector.load %arg47[%c1_375, %c0_376, %c0_377] : memref<2x1x32xf32, #tpu.memory_space<vmem>>, vector<1x1x32xf32>
    %826 = vector.shape_cast %825 : vector<1x1x32xf32> to vector<1x32xf32>
    %cst_378 = arith.constant dense<0.000000e+00> : vector<8xf32>
    %827 = vector.multi_reduction <add>, %822, %cst_378 [1] : vector<8x32xf32> to vector<8xf32>
    %828 = vector.shape_cast %827 : vector<8xf32> to vector<8x1xf32>
    %cst_379 = arith.constant 3.200000e+01 : f32
    %829 = vector.broadcast %cst_379 : f32 to vector<8x1xf32>
    %830 = arith.divf %828, %829 : vector<8x1xf32>
    %831 = vector.broadcast %830 : vector<8x1xf32> to vector<8x32xf32>
    %832 = arith.subf %822, %831 : vector<8x32xf32>
    %833 = arith.mulf %832, %832 : vector<8x32xf32>
    %cst_380 = arith.constant dense<0.000000e+00> : vector<8xf32>
    %834 = vector.multi_reduction <add>, %833, %cst_380 [1] : vector<8x32xf32> to vector<8xf32>
    %835 = vector.shape_cast %834 : vector<8xf32> to vector<8x1xf32>
    %cst_381 = arith.constant 3.200000e+01 : f32
    %836 = vector.broadcast %cst_381 : f32 to vector<8x1xf32>
    %837 = arith.divf %835, %836 : vector<8x1xf32>
    %838 = vector.broadcast %830 : vector<8x1xf32> to vector<8x32xf32>
    %839 = arith.subf %822, %838 : vector<8x32xf32>
    %cst_382 = arith.constant 9.99999974E-6 : f32
    %840 = vector.broadcast %cst_382 : f32 to vector<8x1xf32>
    %841 = arith.addf %837, %840 : vector<8x1xf32>
    %842 = math.rsqrt %841 : vector<8x1xf32>
    %843 = vector.broadcast %842 : vector<8x1xf32> to vector<8x32xf32>
    %844 = arith.mulf %839, %843 : vector<8x32xf32>
    %845 = vector.broadcast %824 : vector<1x32xf32> to vector<8x32xf32>
    %846 = arith.mulf %844, %845 : vector<8x32xf32>
    %847 = vector.broadcast %826 : vector<1x32xf32> to vector<8x32xf32>
    %848 = arith.addf %846, %847 : vector<8x32xf32>
    %c1_383 = arith.constant 1 : index
    %c0_384 = arith.constant 0 : index
    %c0_385 = arith.constant 0 : index
    %849 = vector.load %arg38[%c1_383, %c0_384, %c0_385] : memref<2x32x32xbf16, #tpu.memory_space<vmem>>, vector<1x32x32xbf16>
    %850 = vector.shape_cast %849 : vector<1x32x32xbf16> to vector<32x32xbf16>
    %c1_386 = arith.constant 1 : index
    %c0_387 = arith.constant 0 : index
    %c0_388 = arith.constant 0 : index
    %851 = vector.load %arg39[%c1_386, %c0_387, %c0_388] : memref<2x1x32xf32, #tpu.memory_space<vmem>>, vector<1x1x32xf32>
    %852 = vector.shape_cast %851 : vector<1x1x32xf32> to vector<1x32xf32>
    %c1_389 = arith.constant 1 : index
    %c0_390 = arith.constant 0 : index
    %c0_391 = arith.constant 0 : index
    %853 = vector.load %arg40[%c1_389, %c0_390, %c0_391] : memref<2x32x32xbf16, #tpu.memory_space<vmem>>, vector<1x32x32xbf16>
    %854 = vector.shape_cast %853 : vector<1x32x32xbf16> to vector<32x32xbf16>
    %c1_392 = arith.constant 1 : index
    %c0_393 = arith.constant 0 : index
    %c0_394 = arith.constant 0 : index
    %855 = vector.load %arg41[%c1_392, %c0_393, %c0_394] : memref<2x1x32xf32, #tpu.memory_space<vmem>>, vector<1x1x32xf32>
    %856 = vector.shape_cast %855 : vector<1x1x32xf32> to vector<1x32xf32>
    %c1_395 = arith.constant 1 : index
    %c0_396 = arith.constant 0 : index
    %c0_397 = arith.constant 0 : index
    %857 = vector.load %arg42[%c1_395, %c0_396, %c0_397] : memref<2x32x32xbf16, #tpu.memory_space<vmem>>, vector<1x32x32xbf16>
    %858 = vector.shape_cast %857 : vector<1x32x32xbf16> to vector<32x32xbf16>
    %c1_398 = arith.constant 1 : index
    %c0_399 = arith.constant 0 : index
    %c0_400 = arith.constant 0 : index
    %859 = vector.load %arg43[%c1_398, %c0_399, %c0_400] : memref<2x1x32xf32, #tpu.memory_space<vmem>>, vector<1x1x32xf32>
    %860 = vector.shape_cast %859 : vector<1x1x32xf32> to vector<1x32xf32>
    %c1_401 = arith.constant 1 : index
    %c0_402 = arith.constant 0 : index
    %c0_403 = arith.constant 0 : index
    %861 = vector.load %arg44[%c1_401, %c0_402, %c0_403] : memref<2x32x32xbf16, #tpu.memory_space<vmem>>, vector<1x32x32xbf16>
    %862 = vector.shape_cast %861 : vector<1x32x32xbf16> to vector<32x32xbf16>
    %c1_404 = arith.constant 1 : index
    %c0_405 = arith.constant 0 : index
    %c0_406 = arith.constant 0 : index
    %863 = vector.load %arg45[%c1_404, %c0_405, %c0_406] : memref<2x1x32xf32, #tpu.memory_space<vmem>>, vector<1x1x32xf32>
    %864 = vector.shape_cast %863 : vector<1x1x32xf32> to vector<1x32xf32>
    %865 = arith.truncf %848 : vector<8x32xf32> to vector<8x32xbf16>
    %cst_407 = arith.constant dense<0.000000e+00> : vector<8x32xf32>
    %866 = tpu.matmul %865, %850, %cst_407 {dimension_numbers = #tpu.dot_dimension_numbers<[1], [0], [0], [1], [0, 0, 1, 1], [], []>} : vector<8x32xbf16>, vector<32x32xbf16>, vector<8x32xf32> -> vector<8x32xf32>
    %867 = vector.broadcast %852 : vector<1x32xf32> to vector<8x32xf32>
    %868 = arith.addf %866, %867 : vector<8x32xf32>
    %cst_408 = arith.constant 0.353553385 : f32
    %869 = vector.broadcast %cst_408 : f32 to vector<8x32xf32>
    %870 = arith.mulf %868, %869 : vector<8x32xf32>
    %871 = arith.truncf %404 : vector<16x32xf32> to vector<16x32xbf16>
    %cst_409 = arith.constant dense<0.000000e+00> : vector<16x32xf32>
    %872 = tpu.matmul %871, %854, %cst_409 {dimension_numbers = #tpu.dot_dimension_numbers<[1], [0], [0], [1], [0, 0, 1, 1], [], []>} : vector<16x32xbf16>, vector<32x32xbf16>, vector<16x32xf32> -> vector<16x32xf32>
    %873 = vector.broadcast %856 : vector<1x32xf32> to vector<16x32xf32>
    %874 = arith.addf %872, %873 : vector<16x32xf32>
    %875 = arith.truncf %404 : vector<16x32xf32> to vector<16x32xbf16>
    %cst_410 = arith.constant dense<0.000000e+00> : vector<16x32xf32>
    %876 = tpu.matmul %875, %858, %cst_410 {dimension_numbers = #tpu.dot_dimension_numbers<[1], [0], [0], [1], [0, 0, 1, 1], [], []>} : vector<16x32xbf16>, vector<32x32xbf16>, vector<16x32xf32> -> vector<16x32xf32>
    %877 = vector.broadcast %860 : vector<1x32xf32> to vector<16x32xf32>
    %878 = arith.addf %876, %877 : vector<16x32xf32>
    %879 = arith.truncf %870 : vector<8x32xf32> to vector<8x32xbf16>
    %880 = vector.shape_cast %879 : vector<8x32xbf16> to vector<1x8x32xbf16>
    %881 = arith.truncf %874 : vector<16x32xf32> to vector<16x32xbf16>
    %882 = vector.shape_cast %881 : vector<16x32xbf16> to vector<1x16x32xbf16>
    %883 = arith.truncf %878 : vector<16x32xf32> to vector<16x32xbf16>
    %884 = vector.shape_cast %883 : vector<16x32xbf16> to vector<1x16x32xbf16>
    %885 = vector.extract_strided_slice %880 {offsets = [0, 0, 0], sizes = [1, 8, 8], strides = [1, 1, 1]} : vector<1x8x32xbf16> to vector<1x8x8xbf16>
    %886 = vector.extract_strided_slice %882 {offsets = [0, 0, 0], sizes = [1, 16, 8], strides = [1, 1, 1]} : vector<1x16x32xbf16> to vector<1x16x8xbf16>
    "tpu.trace_start"() <{level = 10 : i32, message = "bqd,bkd->bqk"}> : () -> ()
    %cst_411 = arith.constant dense<0.000000e+00> : vector<1x8x16xf32>
    %887 = tpu.matmul %885, %886, %cst_411 {dimension_numbers = #tpu.dot_dimension_numbers<[2], [2], [1], [1], [0, 0, 0, 1, 1, 1], [0], [0]>} : vector<1x8x8xbf16>, vector<1x16x8xbf16>, vector<1x8x16xf32> -> vector<1x8x16xf32>
    "tpu.trace_stop"() : () -> ()
    %cst_412 = arith.constant dense<0xFF800000> : vector<1x8xf32>
    %888 = vector.multi_reduction <maximumf>, %887, %cst_412 [2] : vector<1x8x16xf32> to vector<1x8xf32>
    %889 = vector.shape_cast %888 : vector<1x8xf32> to vector<1x8x1xf32>
    %890 = vector.broadcast %889 : vector<1x8x1xf32> to vector<1x8x16xf32>
    %891 = arith.subf %887, %890 : vector<1x8x16xf32>
    %892 = math.exp %891 : vector<1x8x16xf32>
    %cst_413 = arith.constant dense<0.000000e+00> : vector<1x8xf32>
    %893 = vector.multi_reduction <add>, %892, %cst_413 [2] : vector<1x8x16xf32> to vector<1x8xf32>
    %894 = vector.shape_cast %893 : vector<1x8xf32> to vector<1x8x1xf32>
    %895 = tpu.reciprocal %894 {approx = true} : vector<1x8x1xf32> -> vector<1x8x1xf32>
    %896 = vector.broadcast %895 : vector<1x8x1xf32> to vector<1x8x16xf32>
    %897 = arith.mulf %892, %896 : vector<1x8x16xf32>
    %898 = arith.truncf %897 : vector<1x8x16xf32> to vector<1x8x16xbf16>
    %899 = vector.extract_strided_slice %884 {offsets = [0, 0, 0], sizes = [1, 16, 8], strides = [1, 1, 1]} : vector<1x16x32xbf16> to vector<1x16x8xbf16>
    "tpu.trace_start"() <{level = 10 : i32, message = "bqk,bkd->bqd"}> : () -> ()
    %cst_414 = arith.constant dense<0.000000e+00> : vector<1x8x8xf32>
    %900 = tpu.matmul %898, %899, %cst_414 {dimension_numbers = #tpu.dot_dimension_numbers<[2], [1], [1], [2], [0, 0, 0, 1, 1, 2], [0], [0]>} : vector<1x8x16xbf16>, vector<1x16x8xbf16>, vector<1x8x8xf32> -> vector<1x8x8xf32>
    "tpu.trace_stop"() : () -> ()
    %901 = vector.extract_strided_slice %880 {offsets = [0, 0, 8], sizes = [1, 8, 8], strides = [1, 1, 1]} : vector<1x8x32xbf16> to vector<1x8x8xbf16>
    %902 = vector.extract_strided_slice %882 {offsets = [0, 0, 8], sizes = [1, 16, 8], strides = [1, 1, 1]} : vector<1x16x32xbf16> to vector<1x16x8xbf16>
    "tpu.trace_start"() <{level = 10 : i32, message = "bqd,bkd->bqk"}> : () -> ()
    %cst_415 = arith.constant dense<0.000000e+00> : vector<1x8x16xf32>
    %903 = tpu.matmul %901, %902, %cst_415 {dimension_numbers = #tpu.dot_dimension_numbers<[2], [2], [1], [1], [0, 0, 0, 1, 1, 1], [0], [0]>} : vector<1x8x8xbf16>, vector<1x16x8xbf16>, vector<1x8x16xf32> -> vector<1x8x16xf32>
    "tpu.trace_stop"() : () -> ()
    %cst_416 = arith.constant dense<0xFF800000> : vector<1x8xf32>
    %904 = vector.multi_reduction <maximumf>, %903, %cst_416 [2] : vector<1x8x16xf32> to vector<1x8xf32>
    %905 = vector.shape_cast %904 : vector<1x8xf32> to vector<1x8x1xf32>
    %906 = vector.broadcast %905 : vector<1x8x1xf32> to vector<1x8x16xf32>
    %907 = arith.subf %903, %906 : vector<1x8x16xf32>
    %908 = math.exp %907 : vector<1x8x16xf32>
    %cst_417 = arith.constant dense<0.000000e+00> : vector<1x8xf32>
    %909 = vector.multi_reduction <add>, %908, %cst_417 [2] : vector<1x8x16xf32> to vector<1x8xf32>
    %910 = vector.shape_cast %909 : vector<1x8xf32> to vector<1x8x1xf32>
    %911 = tpu.reciprocal %910 {approx = true} : vector<1x8x1xf32> -> vector<1x8x1xf32>
    %912 = vector.broadcast %911 : vector<1x8x1xf32> to vector<1x8x16xf32>
    %913 = arith.mulf %908, %912 : vector<1x8x16xf32>
    %914 = arith.truncf %913 : vector<1x8x16xf32> to vector<1x8x16xbf16>
    %915 = vector.extract_strided_slice %884 {offsets = [0, 0, 8], sizes = [1, 16, 8], strides = [1, 1, 1]} : vector<1x16x32xbf16> to vector<1x16x8xbf16>
    "tpu.trace_start"() <{level = 10 : i32, message = "bqk,bkd->bqd"}> : () -> ()
    %cst_418 = arith.constant dense<0.000000e+00> : vector<1x8x8xf32>
    %916 = tpu.matmul %914, %915, %cst_418 {dimension_numbers = #tpu.dot_dimension_numbers<[2], [1], [1], [2], [0, 0, 0, 1, 1, 2], [0], [0]>} : vector<1x8x16xbf16>, vector<1x16x8xbf16>, vector<1x8x8xf32> -> vector<1x8x8xf32>
    "tpu.trace_stop"() : () -> ()
    %917 = vector.extract_strided_slice %880 {offsets = [0, 0, 16], sizes = [1, 8, 8], strides = [1, 1, 1]} : vector<1x8x32xbf16> to vector<1x8x8xbf16>
    %918 = vector.extract_strided_slice %882 {offsets = [0, 0, 16], sizes = [1, 16, 8], strides = [1, 1, 1]} : vector<1x16x32xbf16> to vector<1x16x8xbf16>
    "tpu.trace_start"() <{level = 10 : i32, message = "bqd,bkd->bqk"}> : () -> ()
    %cst_419 = arith.constant dense<0.000000e+00> : vector<1x8x16xf32>
    %919 = tpu.matmul %917, %918, %cst_419 {dimension_numbers = #tpu.dot_dimension_numbers<[2], [2], [1], [1], [0, 0, 0, 1, 1, 1], [0], [0]>} : vector<1x8x8xbf16>, vector<1x16x8xbf16>, vector<1x8x16xf32> -> vector<1x8x16xf32>
    "tpu.trace_stop"() : () -> ()
    %cst_420 = arith.constant dense<0xFF800000> : vector<1x8xf32>
    %920 = vector.multi_reduction <maximumf>, %919, %cst_420 [2] : vector<1x8x16xf32> to vector<1x8xf32>
    %921 = vector.shape_cast %920 : vector<1x8xf32> to vector<1x8x1xf32>
    %922 = vector.broadcast %921 : vector<1x8x1xf32> to vector<1x8x16xf32>
    %923 = arith.subf %919, %922 : vector<1x8x16xf32>
    %924 = math.exp %923 : vector<1x8x16xf32>
    %cst_421 = arith.constant dense<0.000000e+00> : vector<1x8xf32>
    %925 = vector.multi_reduction <add>, %924, %cst_421 [2] : vector<1x8x16xf32> to vector<1x8xf32>
    %926 = vector.shape_cast %925 : vector<1x8xf32> to vector<1x8x1xf32>
    %927 = tpu.reciprocal %926 {approx = true} : vector<1x8x1xf32> -> vector<1x8x1xf32>
    %928 = vector.broadcast %927 : vector<1x8x1xf32> to vector<1x8x16xf32>
    %929 = arith.mulf %924, %928 : vector<1x8x16xf32>
    %930 = arith.truncf %929 : vector<1x8x16xf32> to vector<1x8x16xbf16>
    %931 = vector.extract_strided_slice %884 {offsets = [0, 0, 16], sizes = [1, 16, 8], strides = [1, 1, 1]} : vector<1x16x32xbf16> to vector<1x16x8xbf16>
    "tpu.trace_start"() <{level = 10 : i32, message = "bqk,bkd->bqd"}> : () -> ()
    %cst_422 = arith.constant dense<0.000000e+00> : vector<1x8x8xf32>
    %932 = tpu.matmul %930, %931, %cst_422 {dimension_numbers = #tpu.dot_dimension_numbers<[2], [1], [1], [2], [0, 0, 0, 1, 1, 2], [0], [0]>} : vector<1x8x16xbf16>, vector<1x16x8xbf16>, vector<1x8x8xf32> -> vector<1x8x8xf32>
    "tpu.trace_stop"() : () -> ()
    %933 = vector.extract_strided_slice %880 {offsets = [0, 0, 24], sizes = [1, 8, 8], strides = [1, 1, 1]} : vector<1x8x32xbf16> to vector<1x8x8xbf16>
    %934 = vector.extract_strided_slice %882 {offsets = [0, 0, 24], sizes = [1, 16, 8], strides = [1, 1, 1]} : vector<1x16x32xbf16> to vector<1x16x8xbf16>
    "tpu.trace_start"() <{level = 10 : i32, message = "bqd,bkd->bqk"}> : () -> ()
    %cst_423 = arith.constant dense<0.000000e+00> : vector<1x8x16xf32>
    %935 = tpu.matmul %933, %934, %cst_423 {dimension_numbers = #tpu.dot_dimension_numbers<[2], [2], [1], [1], [0, 0, 0, 1, 1, 1], [0], [0]>} : vector<1x8x8xbf16>, vector<1x16x8xbf16>, vector<1x8x16xf32> -> vector<1x8x16xf32>
    "tpu.trace_stop"() : () -> ()
    %cst_424 = arith.constant dense<0xFF800000> : vector<1x8xf32>
    %936 = vector.multi_reduction <maximumf>, %935, %cst_424 [2] : vector<1x8x16xf32> to vector<1x8xf32>
    %937 = vector.shape_cast %936 : vector<1x8xf32> to vector<1x8x1xf32>
    %938 = vector.broadcast %937 : vector<1x8x1xf32> to vector<1x8x16xf32>
    %939 = arith.subf %935, %938 : vector<1x8x16xf32>
    %940 = math.exp %939 : vector<1x8x16xf32>
    %cst_425 = arith.constant dense<0.000000e+00> : vector<1x8xf32>
    %941 = vector.multi_reduction <add>, %940, %cst_425 [2] : vector<1x8x16xf32> to vector<1x8xf32>
    %942 = vector.shape_cast %941 : vector<1x8xf32> to vector<1x8x1xf32>
    %943 = tpu.reciprocal %942 {approx = true} : vector<1x8x1xf32> -> vector<1x8x1xf32>
    %944 = vector.broadcast %943 : vector<1x8x1xf32> to vector<1x8x16xf32>
    %945 = arith.mulf %940, %944 : vector<1x8x16xf32>
    %946 = arith.truncf %945 : vector<1x8x16xf32> to vector<1x8x16xbf16>
    %947 = vector.extract_strided_slice %884 {offsets = [0, 0, 24], sizes = [1, 16, 8], strides = [1, 1, 1]} : vector<1x16x32xbf16> to vector<1x16x8xbf16>
    "tpu.trace_start"() <{level = 10 : i32, message = "bqk,bkd->bqd"}> : () -> ()
    %cst_426 = arith.constant dense<0.000000e+00> : vector<1x8x8xf32>
    %948 = tpu.matmul %946, %947, %cst_426 {dimension_numbers = #tpu.dot_dimension_numbers<[2], [1], [1], [2], [0, 0, 0, 1, 1, 2], [0], [0]>} : vector<1x8x16xbf16>, vector<1x16x8xbf16>, vector<1x8x8xf32> -> vector<1x8x8xf32>
    "tpu.trace_stop"() : () -> ()
    %949 = tpu.concatenate %900, %916, %932, %948 in 2 : vector<1x8x8xf32>, vector<1x8x8xf32>, vector<1x8x8xf32>, vector<1x8x8xf32> -> vector<1x8x32xf32>
    %950 = vector.shape_cast %949 : vector<1x8x32xf32> to vector<8x32xf32>
    %951 = arith.truncf %950 : vector<8x32xf32> to vector<8x32xbf16>
    %cst_427 = arith.constant dense<0.000000e+00> : vector<8x32xf32>
    %952 = tpu.matmul %951, %862, %cst_427 {dimension_numbers = #tpu.dot_dimension_numbers<[1], [0], [0], [1], [0, 0, 1, 1], [], []>} : vector<8x32xbf16>, vector<32x32xbf16>, vector<8x32xf32> -> vector<8x32xf32>
    %953 = vector.broadcast %864 : vector<1x32xf32> to vector<8x32xf32>
    %954 = arith.addf %952, %953 : vector<8x32xf32>
    %955 = arith.addf %848, %954 : vector<8x32xf32>
    %c1_428 = arith.constant 1 : index
    %c0_429 = arith.constant 0 : index
    %c0_430 = arith.constant 0 : index
    %956 = vector.load %arg48[%c1_428, %c0_429, %c0_430] : memref<2x1x32xf32, #tpu.memory_space<vmem>>, vector<1x1x32xf32>
    %957 = vector.shape_cast %956 : vector<1x1x32xf32> to vector<1x32xf32>
    %c1_431 = arith.constant 1 : index
    %c0_432 = arith.constant 0 : index
    %c0_433 = arith.constant 0 : index
    %958 = vector.load %arg49[%c1_431, %c0_432, %c0_433] : memref<2x1x32xf32, #tpu.memory_space<vmem>>, vector<1x1x32xf32>
    %959 = vector.shape_cast %958 : vector<1x1x32xf32> to vector<1x32xf32>
    %cst_434 = arith.constant dense<0.000000e+00> : vector<8xf32>
    %960 = vector.multi_reduction <add>, %955, %cst_434 [1] : vector<8x32xf32> to vector<8xf32>
    %961 = vector.shape_cast %960 : vector<8xf32> to vector<8x1xf32>
    %cst_435 = arith.constant 3.200000e+01 : f32
    %962 = vector.broadcast %cst_435 : f32 to vector<8x1xf32>
    %963 = arith.divf %961, %962 : vector<8x1xf32>
    %964 = vector.broadcast %963 : vector<8x1xf32> to vector<8x32xf32>
    %965 = arith.subf %955, %964 : vector<8x32xf32>
    %966 = arith.mulf %965, %965 : vector<8x32xf32>
    %cst_436 = arith.constant dense<0.000000e+00> : vector<8xf32>
    %967 = vector.multi_reduction <add>, %966, %cst_436 [1] : vector<8x32xf32> to vector<8xf32>
    %968 = vector.shape_cast %967 : vector<8xf32> to vector<8x1xf32>
    %cst_437 = arith.constant 3.200000e+01 : f32
    %969 = vector.broadcast %cst_437 : f32 to vector<8x1xf32>
    %970 = arith.divf %968, %969 : vector<8x1xf32>
    %971 = vector.broadcast %963 : vector<8x1xf32> to vector<8x32xf32>
    %972 = arith.subf %955, %971 : vector<8x32xf32>
    %cst_438 = arith.constant 9.99999974E-6 : f32
    %973 = vector.broadcast %cst_438 : f32 to vector<8x1xf32>
    %974 = arith.addf %970, %973 : vector<8x1xf32>
    %975 = math.rsqrt %974 : vector<8x1xf32>
    %976 = vector.broadcast %975 : vector<8x1xf32> to vector<8x32xf32>
    %977 = arith.mulf %972, %976 : vector<8x32xf32>
    %978 = vector.broadcast %957 : vector<1x32xf32> to vector<8x32xf32>
    %979 = arith.mulf %977, %978 : vector<8x32xf32>
    %980 = vector.broadcast %959 : vector<1x32xf32> to vector<8x32xf32>
    %981 = arith.addf %979, %980 : vector<8x32xf32>
    %c1_439 = arith.constant 1 : index
    %c0_440 = arith.constant 0 : index
    %c0_441 = arith.constant 0 : index
    %982 = vector.load %arg52[%c1_439, %c0_440, %c0_441] : memref<2x32x2048xbf16, #tpu.memory_space<vmem>>, vector<1x32x2048xbf16>
    %983 = vector.shape_cast %982 : vector<1x32x2048xbf16> to vector<32x2048xbf16>
    %c1_442 = arith.constant 1 : index
    %c0_443 = arith.constant 0 : index
    %c0_444 = arith.constant 0 : index
    %984 = vector.load %arg53[%c1_442, %c0_443, %c0_444] : memref<2x1x2048xf32, #tpu.memory_space<vmem>>, vector<1x1x2048xf32>
    %985 = vector.shape_cast %984 : vector<1x1x2048xf32> to vector<1x2048xf32>
    %c1_445 = arith.constant 1 : index
    %c0_446 = arith.constant 0 : index
    %c0_447 = arith.constant 0 : index
    %986 = vector.load %arg54[%c1_445, %c0_446, %c0_447] : memref<2x2048x32xbf16, #tpu.memory_space<vmem>>, vector<1x2048x32xbf16>
    %987 = vector.shape_cast %986 : vector<1x2048x32xbf16> to vector<2048x32xbf16>
    %c1_448 = arith.constant 1 : index
    %c0_449 = arith.constant 0 : index
    %c0_450 = arith.constant 0 : index
    %988 = vector.load %arg55[%c1_448, %c0_449, %c0_450] : memref<2x1x32xf32, #tpu.memory_space<vmem>>, vector<1x1x32xf32>
    %989 = vector.shape_cast %988 : vector<1x1x32xf32> to vector<1x32xf32>
    %990 = arith.truncf %981 : vector<8x32xf32> to vector<8x32xbf16>
    %cst_451 = arith.constant dense<0.000000e+00> : vector<8x2048xf32>
    %991 = tpu.matmul %990, %983, %cst_451 {dimension_numbers = #tpu.dot_dimension_numbers<[1], [0], [0], [1], [0, 0, 1, 1], [], []>} : vector<8x32xbf16>, vector<32x2048xbf16>, vector<8x2048xf32> -> vector<8x2048xf32>
    %992 = vector.broadcast %985 : vector<1x2048xf32> to vector<8x2048xf32>
    %993 = arith.addf %991, %992 : vector<8x2048xf32>
    %cst_452 = arith.constant 0.000000e+00 : f32
    %994 = vector.broadcast %cst_452 : f32 to vector<8x2048xf32>
    %995 = arith.maximumf %993, %994 : vector<8x2048xf32>
    %996 = arith.truncf %995 : vector<8x2048xf32> to vector<8x2048xbf16>
    %cst_453 = arith.constant dense<0.000000e+00> : vector<8x32xf32>
    %997 = tpu.matmul %996, %987, %cst_453 {dimension_numbers = #tpu.dot_dimension_numbers<[1], [0], [0], [1], [0, 0, 1, 1], [], []>} : vector<8x2048xbf16>, vector<2048x32xbf16>, vector<8x32xf32> -> vector<8x32xf32>
    %998 = vector.broadcast %989 : vector<1x32xf32> to vector<8x32xf32>
    %999 = arith.addf %997, %998 : vector<8x32xf32>
    %1000 = arith.addf %981, %999 : vector<8x32xf32>
    %c1_454 = arith.constant 1 : index
    %c0_455 = arith.constant 0 : index
    %c0_456 = arith.constant 0 : index
    %1001 = vector.load %arg50[%c1_454, %c0_455, %c0_456] : memref<2x1x32xf32, #tpu.memory_space<vmem>>, vector<1x1x32xf32>
    %1002 = vector.shape_cast %1001 : vector<1x1x32xf32> to vector<1x32xf32>
    %c1_457 = arith.constant 1 : index
    %c0_458 = arith.constant 0 : index
    %c0_459 = arith.constant 0 : index
    %1003 = vector.load %arg51[%c1_457, %c0_458, %c0_459] : memref<2x1x32xf32, #tpu.memory_space<vmem>>, vector<1x1x32xf32>
    %1004 = vector.shape_cast %1003 : vector<1x1x32xf32> to vector<1x32xf32>
    %cst_460 = arith.constant dense<0.000000e+00> : vector<8xf32>
    %1005 = vector.multi_reduction <add>, %1000, %cst_460 [1] : vector<8x32xf32> to vector<8xf32>
    %1006 = vector.shape_cast %1005 : vector<8xf32> to vector<8x1xf32>
    %cst_461 = arith.constant 3.200000e+01 : f32
    %1007 = vector.broadcast %cst_461 : f32 to vector<8x1xf32>
    %1008 = arith.divf %1006, %1007 : vector<8x1xf32>
    %1009 = vector.broadcast %1008 : vector<8x1xf32> to vector<8x32xf32>
    %1010 = arith.subf %1000, %1009 : vector<8x32xf32>
    %1011 = arith.mulf %1010, %1010 : vector<8x32xf32>
    %cst_462 = arith.constant dense<0.000000e+00> : vector<8xf32>
    %1012 = vector.multi_reduction <add>, %1011, %cst_462 [1] : vector<8x32xf32> to vector<8xf32>
    %1013 = vector.shape_cast %1012 : vector<8xf32> to vector<8x1xf32>
    %cst_463 = arith.constant 3.200000e+01 : f32
    %1014 = vector.broadcast %cst_463 : f32 to vector<8x1xf32>
    %1015 = arith.divf %1013, %1014 : vector<8x1xf32>
    %1016 = vector.broadcast %1008 : vector<8x1xf32> to vector<8x32xf32>
    %1017 = arith.subf %1000, %1016 : vector<8x32xf32>
    %cst_464 = arith.constant 9.99999974E-6 : f32
    %1018 = vector.broadcast %cst_464 : f32 to vector<8x1xf32>
    %1019 = arith.addf %1015, %1018 : vector<8x1xf32>
    %1020 = math.rsqrt %1019 : vector<8x1xf32>
    %1021 = vector.broadcast %1020 : vector<8x1xf32> to vector<8x32xf32>
    %1022 = arith.mulf %1017, %1021 : vector<8x32xf32>
    %1023 = vector.broadcast %1002 : vector<1x32xf32> to vector<8x32xf32>
    %1024 = arith.mulf %1022, %1023 : vector<8x32xf32>
    %1025 = vector.broadcast %1004 : vector<1x32xf32> to vector<8x32xf32>
    %1026 = arith.addf %1024, %1025 : vector<8x32xf32>
    %c0_465 = arith.constant 0 : index
    %c0_466 = arith.constant 0 : index
    %1027 = vector.load %arg10[%c0_465, %c0_466] : memref<1x32xf32, #tpu.memory_space<vmem>>, vector<1x32xf32>
    %c0_467 = arith.constant 0 : index
    %c0_468 = arith.constant 0 : index
    %1028 = vector.load %arg11[%c0_467, %c0_468] : memref<1x32xf32, #tpu.memory_space<vmem>>, vector<1x32xf32>
    %cst_469 = arith.constant dense<0.000000e+00> : vector<8xf32>
    %1029 = vector.multi_reduction <add>, %1026, %cst_469 [1] : vector<8x32xf32> to vector<8xf32>
    %1030 = vector.shape_cast %1029 : vector<8xf32> to vector<8x1xf32>
    %cst_470 = arith.constant 3.200000e+01 : f32
    %1031 = vector.broadcast %cst_470 : f32 to vector<8x1xf32>
    %1032 = arith.divf %1030, %1031 : vector<8x1xf32>
    %1033 = vector.broadcast %1032 : vector<8x1xf32> to vector<8x32xf32>
    %1034 = arith.subf %1026, %1033 : vector<8x32xf32>
    %1035 = arith.mulf %1034, %1034 : vector<8x32xf32>
    %cst_471 = arith.constant dense<0.000000e+00> : vector<8xf32>
    %1036 = vector.multi_reduction <add>, %1035, %cst_471 [1] : vector<8x32xf32> to vector<8xf32>
    %1037 = vector.shape_cast %1036 : vector<8xf32> to vector<8x1xf32>
    %cst_472 = arith.constant 3.200000e+01 : f32
    %1038 = vector.broadcast %cst_472 : f32 to vector<8x1xf32>
    %1039 = arith.divf %1037, %1038 : vector<8x1xf32>
    %1040 = vector.broadcast %1032 : vector<8x1xf32> to vector<8x32xf32>
    %1041 = arith.subf %1026, %1040 : vector<8x32xf32>
    %cst_473 = arith.constant 9.99999974E-6 : f32
    %1042 = vector.broadcast %cst_473 : f32 to vector<8x1xf32>
    %1043 = arith.addf %1039, %1042 : vector<8x1xf32>
    %1044 = math.rsqrt %1043 : vector<8x1xf32>
    %1045 = vector.broadcast %1044 : vector<8x1xf32> to vector<8x32xf32>
    %1046 = arith.mulf %1041, %1045 : vector<8x32xf32>
    %1047 = vector.broadcast %1027 : vector<1x32xf32> to vector<8x32xf32>
    %1048 = arith.mulf %1046, %1047 : vector<8x32xf32>
    %1049 = vector.broadcast %1028 : vector<1x32xf32> to vector<8x32xf32>
    %1050 = arith.addf %1048, %1049 : vector<8x32xf32>
    %c0_474 = arith.constant 0 : index
    %c0_475 = arith.constant 0 : index
    %1051 = vector.load %arg12[%c0_474, %c0_475] : memref<32x128xbf16, #tpu.memory_space<vmem>>, vector<32x128xbf16>
    %c0_476 = arith.constant 0 : index
    %c0_477 = arith.constant 0 : index
    %1052 = vector.load %arg13[%c0_476, %c0_477] : memref<1x128xf32, #tpu.memory_space<vmem>>, vector<1x128xf32>
    %1053 = arith.truncf %1050 : vector<8x32xf32> to vector<8x32xbf16>
    %cst_478 = arith.constant dense<0.000000e+00> : vector<8x128xf32>
    %1054 = tpu.matmul %1053, %1051, %cst_478 {dimension_numbers = #tpu.dot_dimension_numbers<[1], [0], [0], [1], [0, 0, 1, 1], [], []>} : vector<8x32xbf16>, vector<32x128xbf16>, vector<8x128xf32> -> vector<8x128xf32>
    %1055 = vector.broadcast %1052 : vector<1x128xf32> to vector<8x128xf32>
    %1056 = arith.addf %1054, %1055 : vector<8x128xf32>
    %1057 = vector.shape_cast %1056 : vector<8x128xf32> to vector<1x8x128xf32>
    %c0_479 = arith.constant 0 : index
    %c0_480 = arith.constant 0 : index
    %c0_481 = arith.constant 0 : index
    %1058 = vector.load %arg56[%c0_479, %c0_480, %c0_481] : memref<1x8x128xf32, #tpu.memory_space<vmem>>, vector<1x8x128xf32>
    tpu.vector_store %arg56[%c0_479, %c0_480, %c0_481], %1057 {strides = array<i32>} : memref<1x8x128xf32, #tpu.memory_space<vmem>>, vector<1x8x128xf32>,
    return
  }
  func.func @transform_0(%arg0: i32) -> (i32, i32, i32) {
    %c0_i32 = arith.constant 0 : i32
    %c0_i32_0 = arith.constant 0 : i32
    %c0_i32_1 = arith.constant 0 : i32
    return %arg0, %c0_i32, %c0_i32_0 : i32, i32, i32
  }
  func.func @transform_1(%arg0: i32) -> (i32, i32, i32) {
    %c0_i32 = arith.constant 0 : i32
    %c0_i32_0 = arith.constant 0 : i32
    %c0_i32_1 = arith.constant 0 : i32
    return %arg0, %c0_i32, %c0_i32_0 : i32, i32, i32
  }
  func.func @transform_2(%arg0: i32) -> (i32, i32, i32) {
    %c0_i32 = arith.constant 0 : i32
    %c0_i32_0 = arith.constant 0 : i32
    %c0_i32_1 = arith.constant 0 : i32
    return %arg0, %c0_i32, %c0_i32_0 : i32, i32, i32
  }
  func.func @transform_3(%arg0: i32) -> (i32, i32) {
    %c0_i32 = arith.constant 0 : i32
    %c0_i32_0 = arith.constant 0 : i32
    %c0_i32_1 = arith.constant 0 : i32
    return %c0_i32, %c0_i32_0 : i32, i32
  }
  func.func @transform_4(%arg0: i32) -> (i32, i32) {
    %c0_i32 = arith.constant 0 : i32
    %c0_i32_0 = arith.constant 0 : i32
    %c0_i32_1 = arith.constant 0 : i32
    return %c0_i32, %c0_i32_0 : i32, i32
  }
  func.func @transform_5(%arg0: i32) -> (i32, i32) {
    %c0_i32 = arith.constant 0 : i32
    %c0_i32_0 = arith.constant 0 : i32
    %c0_i32_1 = arith.constant 0 : i32
    return %c0_i32, %c0_i32_0 : i32, i32
  }
  func.func @transform_6(%arg0: i32) -> (i32, i32) {
    %c0_i32 = arith.constant 0 : i32
    %c0_i32_0 = arith.constant 0 : i32
    %c0_i32_1 = arith.constant 0 : i32
    return %c0_i32, %c0_i32_0 : i32, i32
  }
  func.func @transform_7(%arg0: i32) -> (i32, i32) {
    %c0_i32 = arith.constant 0 : i32
    %c0_i32_0 = arith.constant 0 : i32
    %c0_i32_1 = arith.constant 0 : i32
    return %c0_i32, %c0_i32_0 : i32, i32
  }
  func.func @transform_8(%arg0: i32) -> (i32, i32) {
    %c0_i32 = arith.constant 0 : i32
    %c0_i32_0 = arith.constant 0 : i32
    %c0_i32_1 = arith.constant 0 : i32
    return %c0_i32, %c0_i32_0 : i32, i32
  }
  func.func @transform_9(%arg0: i32) -> (i32, i32) {
    %c0_i32 = arith.constant 0 : i32
    %c0_i32_0 = arith.constant 0 : i32
    %c0_i32_1 = arith.constant 0 : i32
    return %c0_i32, %c0_i32_0 : i32, i32
  }
  func.func @transform_10(%arg0: i32) -> (i32, i32) {
    %c0_i32 = arith.constant 0 : i32
    %c0_i32_0 = arith.constant 0 : i32
    %c0_i32_1 = arith.constant 0 : i32
    return %c0_i32, %c0_i32_0 : i32, i32
  }
  func.func @transform_11(%arg0: i32) -> (i32, i32) {
    %c0_i32 = arith.constant 0 : i32
    %c0_i32_0 = arith.constant 0 : i32
    %c0_i32_1 = arith.constant 0 : i32
    return %c0_i32, %c0_i32_0 : i32, i32
  }
  func.func @transform_12(%arg0: i32) -> (i32, i32) {
    %c0_i32 = arith.constant 0 : i32
    %c0_i32_0 = arith.constant 0 : i32
    %c0_i32_1 = arith.constant 0 : i32
    return %c0_i32, %c0_i32_0 : i32, i32
  }
  func.func @transform_13(%arg0: i32) -> (i32, i32, i32) {
    %c0_i32 = arith.constant 0 : i32
    %c0_i32_0 = arith.constant 0 : i32
    %c0_i32_1 = arith.constant 0 : i32
    %c0_i32_2 = arith.constant 0 : i32
    return %c0_i32, %c0_i32_0, %c0_i32_1 : i32, i32, i32
  }
  func.func @transform_14(%arg0: i32) -> (i32, i32, i32) {
    %c0_i32 = arith.constant 0 : i32
    %c0_i32_0 = arith.constant 0 : i32
    %c0_i32_1 = arith.constant 0 : i32
    %c0_i32_2 = arith.constant 0 : i32
    return %c0_i32, %c0_i32_0, %c0_i32_1 : i32, i32, i32
  }
  func.func @transform_15(%arg0: i32) -> (i32, i32, i32) {
    %c0_i32 = arith.constant 0 : i32
    %c0_i32_0 = arith.constant 0 : i32
    %c0_i32_1 = arith.constant 0 : i32
    %c0_i32_2 = arith.constant 0 : i32
    return %c0_i32, %c0_i32_0, %c0_i32_1 : i32, i32, i32
  }
  func.func @transform_16(%arg0: i32) -> (i32, i32, i32) {
    %c0_i32 = arith.constant 0 : i32
    %c0_i32_0 = arith.constant 0 : i32
    %c0_i32_1 = arith.constant 0 : i32
    %c0_i32_2 = arith.constant 0 : i32
    return %c0_i32, %c0_i32_0, %c0_i32_1 : i32, i32, i32
  }
  func.func @transform_17(%arg0: i32) -> (i32, i32, i32) {
    %c0_i32 = arith.constant 0 : i32
    %c0_i32_0 = arith.constant 0 : i32
    %c0_i32_1 = arith.constant 0 : i32
    %c0_i32_2 = arith.constant 0 : i32
    return %c0_i32, %c0_i32_0, %c0_i32_1 : i32, i32, i32
  }
  func.func @transform_18(%arg0: i32) -> (i32, i32, i32) {
    %c0_i32 = arith.constant 0 : i32
    %c0_i32_0 = arith.constant 0 : i32
    %c0_i32_1 = arith.constant 0 : i32
    %c0_i32_2 = arith.constant 0 : i32
    return %c0_i32, %c0_i32_0, %c0_i32_1 : i32, i32, i32
  }
  func.func @transform_19(%arg0: i32) -> (i32, i32, i32) {
    %c0_i32 = arith.constant 0 : i32
    %c0_i32_0 = arith.constant 0 : i32
    %c0_i32_1 = arith.constant 0 : i32
    %c0_i32_2 = arith.constant 0 : i32
    return %c0_i32, %c0_i32_0, %c0_i32_1 : i32, i32, i32
  }
  func.func @transform_20(%arg0: i32) -> (i32, i32, i32) {
    %c0_i32 = arith.constant 0 : i32
    %c0_i32_0 = arith.constant 0 : i32
    %c0_i32_1 = arith.constant 0 : i32
    %c0_i32_2 = arith.constant 0 : i32
    return %c0_i32, %c0_i32_0, %c0_i32_1 : i32, i32, i32
  }
  func.func @transform_21(%arg0: i32) -> (i32, i32, i32) {
    %c0_i32 = arith.constant 0 : i32
    %c0_i32_0 = arith.constant 0 : i32
    %c0_i32_1 = arith.constant 0 : i32
    %c0_i32_2 = arith.constant 0 : i32
    return %c0_i32, %c0_i32_0, %c0_i32_1 : i32, i32, i32
  }
  func.func @transform_22(%arg0: i32) -> (i32, i32, i32) {
    %c0_i32 = arith.constant 0 : i32
    %c0_i32_0 = arith.constant 0 : i32
    %c0_i32_1 = arith.constant 0 : i32
    %c0_i32_2 = arith.constant 0 : i32
    return %c0_i32, %c0_i32_0, %c0_i32_1 : i32, i32, i32
  }
  func.func @transform_23(%arg0: i32) -> (i32, i32, i32) {
    %c0_i32 = arith.constant 0 : i32
    %c0_i32_0 = arith.constant 0 : i32
    %c0_i32_1 = arith.constant 0 : i32
    %c0_i32_2 = arith.constant 0 : i32
    return %c0_i32, %c0_i32_0, %c0_i32_1 : i32, i32, i32
  }
  func.func @transform_24(%arg0: i32) -> (i32, i32, i32) {
    %c0_i32 = arith.constant 0 : i32
    %c0_i32_0 = arith.constant 0 : i32
    %c0_i32_1 = arith.constant 0 : i32
    %c0_i32_2 = arith.constant 0 : i32
    return %c0_i32, %c0_i32_0, %c0_i32_1 : i32, i32, i32
  }
  func.func @transform_25(%arg0: i32) -> (i32, i32, i32) {
    %c0_i32 = arith.constant 0 : i32
    %c0_i32_0 = arith.constant 0 : i32
    %c0_i32_1 = arith.constant 0 : i32
    %c0_i32_2 = arith.constant 0 : i32
    return %c0_i32, %c0_i32_0, %c0_i32_1 : i32, i32, i32
  }
  func.func @transform_26(%arg0: i32) -> (i32, i32, i32) {
    %c0_i32 = arith.constant 0 : i32
    %c0_i32_0 = arith.constant 0 : i32
    %c0_i32_1 = arith.constant 0 : i32
    %c0_i32_2 = arith.constant 0 : i32
    return %c0_i32, %c0_i32_0, %c0_i32_1 : i32, i32, i32
  }
  func.func @transform_27(%arg0: i32) -> (i32, i32, i32) {
    %c0_i32 = arith.constant 0 : i32
    %c0_i32_0 = arith.constant 0 : i32
    %c0_i32_1 = arith.constant 0 : i32
    %c0_i32_2 = arith.constant 0 : i32
    return %c0_i32, %c0_i32_0, %c0_i32_1 : i32, i32, i32
  }
  func.func @transform_28(%arg0: i32) -> (i32, i32, i32) {
    %c0_i32 = arith.constant 0 : i32
    %c0_i32_0 = arith.constant 0 : i32
    %c0_i32_1 = arith.constant 0 : i32
    %c0_i32_2 = arith.constant 0 : i32
    return %c0_i32, %c0_i32_0, %c0_i32_1 : i32, i32, i32
  }
  func.func @transform_29(%arg0: i32) -> (i32, i32, i32) {
    %c0_i32 = arith.constant 0 : i32
    %c0_i32_0 = arith.constant 0 : i32
    %c0_i32_1 = arith.constant 0 : i32
    %c0_i32_2 = arith.constant 0 : i32
    return %c0_i32, %c0_i32_0, %c0_i32_1 : i32, i32, i32
  }
  func.func @transform_30(%arg0: i32) -> (i32, i32, i32) {
    %c0_i32 = arith.constant 0 : i32
    %c0_i32_0 = arith.constant 0 : i32
    %c0_i32_1 = arith.constant 0 : i32
    %c0_i32_2 = arith.constant 0 : i32
    return %c0_i32, %c0_i32_0, %c0_i32_1 : i32, i32, i32
  }
  func.func @transform_31(%arg0: i32) -> (i32, i32, i32) {
    %c0_i32 = arith.constant 0 : i32
    %c0_i32_0 = arith.constant 0 : i32
    %c0_i32_1 = arith.constant 0 : i32
    %c0_i32_2 = arith.constant 0 : i32
    return %c0_i32, %c0_i32_0, %c0_i32_1 : i32, i32, i32
  }
  func.func @transform_32(%arg0: i32) -> (i32, i32, i32) {
    %c0_i32 = arith.constant 0 : i32
    %c0_i32_0 = arith.constant 0 : i32
    %c0_i32_1 = arith.constant 0 : i32
    %c0_i32_2 = arith.constant 0 : i32
    return %c0_i32, %c0_i32_0, %c0_i32_1 : i32, i32, i32
  }
  func.func @transform_33(%arg0: i32) -> (i32, i32, i32) {
    %c0_i32 = arith.constant 0 : i32
    %c0_i32_0 = arith.constant 0 : i32
    %c0_i32_1 = arith.constant 0 : i32
    %c0_i32_2 = arith.constant 0 : i32
    return %c0_i32, %c0_i32_0, %c0_i32_1 : i32, i32, i32
  }
  func.func @transform_34(%arg0: i32) -> (i32, i32, i32) {
    %c0_i32 = arith.constant 0 : i32
    %c0_i32_0 = arith.constant 0 : i32
    %c0_i32_1 = arith.constant 0 : i32
    %c0_i32_2 = arith.constant 0 : i32
    return %c0_i32, %c0_i32_0, %c0_i32_1 : i32, i32, i32
  }
  func.func @transform_35(%arg0: i32) -> (i32, i32, i32) {
    %c0_i32 = arith.constant 0 : i32
    %c0_i32_0 = arith.constant 0 : i32
    %c0_i32_1 = arith.constant 0 : i32
    %c0_i32_2 = arith.constant 0 : i32
    return %c0_i32, %c0_i32_0, %c0_i32_1 : i32, i32, i32
  }
  func.func @transform_36(%arg0: i32) -> (i32, i32, i32) {
    %c0_i32 = arith.constant 0 : i32
    %c0_i32_0 = arith.constant 0 : i32
    %c0_i32_1 = arith.constant 0 : i32
    %c0_i32_2 = arith.constant 0 : i32
    return %c0_i32, %c0_i32_0, %c0_i32_1 : i32, i32, i32
  }
  func.func @transform_37(%arg0: i32) -> (i32, i32, i32) {
    %c0_i32 = arith.constant 0 : i32
    %c0_i32_0 = arith.constant 0 : i32
    %c0_i32_1 = arith.constant 0 : i32
    %c0_i32_2 = arith.constant 0 : i32
    return %c0_i32, %c0_i32_0, %c0_i32_1 : i32, i32, i32
  }
  func.func @transform_38(%arg0: i32) -> (i32, i32, i32) {
    %c0_i32 = arith.constant 0 : i32
    %c0_i32_0 = arith.constant 0 : i32
    %c0_i32_1 = arith.constant 0 : i32
    %c0_i32_2 = arith.constant 0 : i32
    return %c0_i32, %c0_i32_0, %c0_i32_1 : i32, i32, i32
  }
  func.func @transform_39(%arg0: i32) -> (i32, i32, i32) {
    %c0_i32 = arith.constant 0 : i32
    %c0_i32_0 = arith.constant 0 : i32
    %c0_i32_1 = arith.constant 0 : i32
    %c0_i32_2 = arith.constant 0 : i32
    return %c0_i32, %c0_i32_0, %c0_i32_1 : i32, i32, i32
  }
  func.func @transform_40(%arg0: i32) -> (i32, i32, i32) {
    %c0_i32 = arith.constant 0 : i32
    %c0_i32_0 = arith.constant 0 : i32
    %c0_i32_1 = arith.constant 0 : i32
    %c0_i32_2 = arith.constant 0 : i32
    return %c0_i32, %c0_i32_0, %c0_i32_1 : i32, i32, i32
  }
  func.func @transform_41(%arg0: i32) -> (i32, i32, i32) {
    %c0_i32 = arith.constant 0 : i32
    %c0_i32_0 = arith.constant 0 : i32
    %c0_i32_1 = arith.constant 0 : i32
    %c0_i32_2 = arith.constant 0 : i32
    return %c0_i32, %c0_i32_0, %c0_i32_1 : i32, i32, i32
  }
  func.func @transform_42(%arg0: i32) -> (i32, i32, i32) {
    %c0_i32 = arith.constant 0 : i32
    %c0_i32_0 = arith.constant 0 : i32
    %c0_i32_1 = arith.constant 0 : i32
    %c0_i32_2 = arith.constant 0 : i32
    return %c0_i32, %c0_i32_0, %c0_i32_1 : i32, i32, i32
  }
  func.func @transform_43(%arg0: i32) -> (i32, i32, i32) {
    %c0_i32 = arith.constant 0 : i32
    %c0_i32_0 = arith.constant 0 : i32
    %c0_i32_1 = arith.constant 0 : i32
    %c0_i32_2 = arith.constant 0 : i32
    return %c0_i32, %c0_i32_0, %c0_i32_1 : i32, i32, i32
  }
  func.func @transform_44(%arg0: i32) -> (i32, i32, i32) {
    %c0_i32 = arith.constant 0 : i32
    %c0_i32_0 = arith.constant 0 : i32
    %c0_i32_1 = arith.constant 0 : i32
    %c0_i32_2 = arith.constant 0 : i32
    return %c0_i32, %c0_i32_0, %c0_i32_1 : i32, i32, i32
  }
  func.func @transform_45(%arg0: i32) -> (i32, i32, i32) {
    %c0_i32 = arith.constant 0 : i32
    %c0_i32_0 = arith.constant 0 : i32
    %c0_i32_1 = arith.constant 0 : i32
    %c0_i32_2 = arith.constant 0 : i32
    return %c0_i32, %c0_i32_0, %c0_i32_1 : i32, i32, i32
  }
  func.func @transform_46(%arg0: i32) -> (i32, i32, i32) {
    %c0_i32 = arith.constant 0 : i32
    %c0_i32_0 = arith.constant 0 : i32
    %c0_i32_1 = arith.constant 0 : i32
    %c0_i32_2 = arith.constant 0 : i32
    return %c0_i32, %c0_i32_0, %c0_i32_1 : i32, i32, i32
  }
  func.func @transform_47(%arg0: i32) -> (i32, i32, i32) {
    %c0_i32 = arith.constant 0 : i32
    %c0_i32_0 = arith.constant 0 : i32
    %c0_i32_1 = arith.constant 0 : i32
    %c0_i32_2 = arith.constant 0 : i32
    return %c0_i32, %c0_i32_0, %c0_i32_1 : i32, i32, i32
  }
  func.func @transform_48(%arg0: i32) -> (i32, i32, i32) {
    %c0_i32 = arith.constant 0 : i32
    %c0_i32_0 = arith.constant 0 : i32
    %c0_i32_1 = arith.constant 0 : i32
    %c0_i32_2 = arith.constant 0 : i32
    return %c0_i32, %c0_i32_0, %c0_i32_1 : i32, i32, i32
  }
  func.func @transform_49(%arg0: i32) -> (i32, i32, i32) {
    %c0_i32 = arith.constant 0 : i32
    %c0_i32_0 = arith.constant 0 : i32
    %c0_i32_1 = arith.constant 0 : i32
    %c0_i32_2 = arith.constant 0 : i32
    return %c0_i32, %c0_i32_0, %c0_i32_1 : i32, i32, i32
  }
  func.func @transform_50(%arg0: i32) -> (i32, i32, i32) {
    %c0_i32 = arith.constant 0 : i32
    %c0_i32_0 = arith.constant 0 : i32
    %c0_i32_1 = arith.constant 0 : i32
    %c0_i32_2 = arith.constant 0 : i32
    return %c0_i32, %c0_i32_0, %c0_i32_1 : i32, i32, i32
  }
  func.func @transform_51(%arg0: i32) -> (i32, i32, i32) {
    %c0_i32 = arith.constant 0 : i32
    %c0_i32_0 = arith.constant 0 : i32
    %c0_i32_1 = arith.constant 0 : i32
    %c0_i32_2 = arith.constant 0 : i32
    return %c0_i32, %c0_i32_0, %c0_i32_1 : i32, i32, i32
  }
  func.func @transform_52(%arg0: i32) -> (i32, i32, i32) {
    %c0_i32 = arith.constant 0 : i32
    %c0_i32_0 = arith.constant 0 : i32
    %c0_i32_1 = arith.constant 0 : i32
    %c0_i32_2 = arith.constant 0 : i32
    return %c0_i32, %c0_i32_0, %c0_i32_1 : i32, i32, i32
  }
  func.func @transform_53(%arg0: i32) -> (i32, i32, i32) {
    %c0_i32 = arith.constant 0 : i32
    %c0_i32_0 = arith.constant 0 : i32
    %c0_i32_1 = arith.constant 0 : i32
    %c0_i32_2 = arith.constant 0 : i32
    return %c0_i32, %c0_i32_0, %c0_i32_1 : i32, i32, i32
  }
  func.func @transform_54(%arg0: i32) -> (i32, i32, i32) {
    %c0_i32 = arith.constant 0 : i32
    %c0_i32_0 = arith.constant 0 : i32
    %c0_i32_1 = arith.constant 0 : i32
    %c0_i32_2 = arith.constant 0 : i32
    return %c0_i32, %c0_i32_0, %c0_i32_1 : i32, i32, i32
  }
  func.func @transform_55(%arg0: i32) -> (i32, i32, i32) {
    %c0_i32 = arith.constant 0 : i32
    %c0_i32_0 = arith.constant 0 : i32
    %c0_i32_1 = arith.constant 0 : i32
    return %arg0, %c0_i32, %c0_i32_0 : i32, i32, i32
  }
}

</mosaic_0001>

<bundles_post_ra>
// kernel: time_series_transformer_forward.1
= control target key start
LH: loop header
LB: loop body
LE: loop exit
PB: predicated region body
PF: predicated region fallthrough
CT: control target
= control target key end

     0   :  { %s16487_s6 = smov 1   ;;  %s16488_s10 = smov 2   ;;  %s18526_s0 = inlined_call_operand.smem [shape: u32[56], index: -1, kind: input, shape index: {}] }
   0x1   :  { %s16557_s5 = sld [smem:[%s18526_s0]]   ;;  %s16489_s14 = smov 3  }
   0x2   :  { %s16562_s9 = sld [smem:[%s18526_s0 + %s16487_s6]]   ;;  %s16490_s18 = smov 4  }
   0x3   :  { %s16567_s13 = sld [smem:[%s18526_s0 + %s16488_s10]]   ;;  %s16491_s22 = smov 5  }
   0x4   :  { %s16572_s17 = sld [smem:[%s18526_s0 + %s16489_s14]]   ;;  %s16492_s26 = smov 6  }
   0x5   :  { %s16577_s21 = sld [smem:[%s18526_s0 + %s16490_s18]]   ;;  %s16493_s30 = smov 7  }
   0x6   :  { %s16582_s25 = sld [smem:[%s18526_s0 + %s16491_s22]]   ;;  %s16494_s4 = smov 8  }
   0x7   :  { %18594 = sst [smem:[#allocation2_spill]] %s16557_s5  ;;  %s16495_s10 = smov 9  }
   0x8   :  { %18595 = sst [smem:[#allocation3_spill]] %s16562_s9  ;;  %s16496_s15 = smov 10  }
   0x9   :  { %18596 = sst [smem:[#allocation4_spill]] %s16567_s13  ;;  %s16497_s20 = smov 11  }
   0xa   :  { %18597 = sst [smem:[#allocation5_spill]] %s16572_s17  ;;  %s16499_s1 = smov 13  }
   0xb   :  { %18598 = sst [smem:[#allocation6_spill]] %s16577_s21  ;;  %s16500_s7 = smov 14  }
   0xc   :  { %18599 = sst [smem:[#allocation7_spill]] %s16582_s25  ;;  %s16502_s22 = smov 16  }
   0xd   :  { %s16587_s29 = sld [smem:[%s18526_s0 + %s16492_s26]]   ;;  %s16498_s26 = smov 12  }
   0xe   :  { %s16592_s3 = sld [smem:[%s18526_s0 + %s16493_s30]]   ;;  %s16503_s28 = smov 17  }
   0xf   :  { %s16597_s8 = sld [smem:[%s18526_s0 + %s16494_s4]]  }
  0x10   :  { %s16602_s14 = sld [smem:[%s18526_s0 + %s16495_s10]]  }
  0x11   :  { %s16607_s19 = sld [smem:[%s18526_s0 + %s16496_s15]]   ;;  %s16501_s15 = smov 15  }
  0x12   :  { %s16612_s24 = sld [smem:[%s18526_s0 + %s16497_s20]]  }
  0x13   :  { %18600 = sst [smem:[#allocation8_spill]] %s16587_s29 }
  0x14   :  { %18601 = sst [smem:[#allocation9_spill]] %s16592_s3 }
  0x15   :  { %18602 = sst [smem:[#allocation10_spill]] %s16597_s8 }
  0x16   :  { %18603 = sst [smem:[#allocation11_spill]] %s16602_s14 }
  0x17   :  { %18604 = sst [smem:[#allocation12_spill]] %s16607_s19 }
  0x18   :  { %18605 = sst [smem:[#allocation13_spill]] %s16612_s24 }
  0x19   :  { %s16617_s30 = sld [smem:[%s18526_s0 + %s16498_s26]]  }
  0x1a   :  { %s16622_s6 = sld [smem:[%s18526_s0 + %s16499_s1]]  }
  0x1b   :  { %s16627_s12 = sld [smem:[%s18526_s0 + %s16500_s7]]   ;;  %s16504_s7 = smov 18  }
  0x1c   :  { %s16632_s20 = sld [smem:[%s18526_s0 + %s16501_s15]]   ;;  %s16505_s15 = smov 19  }
  0x1d   :  { %s16637_s27 = sld [smem:[%s18526_s0 + %s16502_s22]]   ;;  %s16506_s22 = smov 20  }
  0x1e   :  { %s16642_s4 = sld [smem:[%s18526_s0 + %s16503_s28]]   ;;  %s16507_s28 = smov 21  }
  0x1f   :  { %18606 = sst [smem:[#allocation14_spill]] %s16617_s30 }
  0x20   :  { %18607 = sst [smem:[#allocation15_spill]] %s16622_s6 }
  0x21   :  { %18608 = sst [smem:[#allocation16_spill]] %s16627_s12 }
  0x22   :  { %18609 = sst [smem:[#allocation17_spill]] %s16632_s20 }
  0x23   :  { %18610 = sst [smem:[#allocation18_spill]] %s16637_s27 }
  0x24   :  { %18611 = sst [smem:[#allocation19_spill]] %s16642_s4 }
  0x25   :  { %s16647_s30 = sld [smem:[%s18526_s0 + %s16504_s7]]   ;;  %s16508_s7 = smov 22  }
  0x26   :  { %s16652_s19 = sld [smem:[%s18526_s0 + %s16505_s15]]   ;;  %s16509_s15 = smov 23  }
  0x27   :  { %s16657_s14 = sld [smem:[%s18526_s0 + %s16506_s22]]   ;;  %s16510_s22 = smov 24  }
  0x28   :  { %s16662_s24 = sld [smem:[%s18526_s0 + %s16507_s28]]   ;;  %s16511_s28 = smov 25  }
  0x29   :  { %s16667_s8 = sld [smem:[%s18526_s0 + %s16508_s7]]   ;;  %s16512_s7 = smov 26  }
  0x2a   :  { %s16672_s3 = sld [smem:[%s18526_s0 + %s16509_s15]]   ;;  %s16513_s15 = smov 27  }
  0x2b   :  { %18612 = sst [smem:[#allocation20_spill]] %s16647_s30 }
  0x2c   :  { %18613 = sst [smem:[#allocation21_spill]] %s16652_s19 }
  0x2d   :  { %18614 = sst [smem:[#allocation22_spill]] %s16657_s14 }
  0x2e   :  { %18615 = sst [smem:[#allocation23_spill]] %s16662_s24 }
  0x2f   :  { %18616 = sst [smem:[#allocation24_spill]] %s16667_s8 }
  0x30   :  { %18617 = sst [smem:[#allocation25_spill]] %s16672_s3 }
  0x31   :  { %s16677_s29 = sld [smem:[%s18526_s0 + %s16510_s22]]   ;;  %s16514_s22 = smov 28  }
  0x32   :  { %s16682_s24 = sld [smem:[%s18526_s0 + %s16511_s28]]   ;;  %s16515_s28 = smov 29  }
  0x33   :  { %s16687_s8 = sld [smem:[%s18526_s0 + %s16512_s7]]   ;;  %s16516_s7 = smov 30  }
  0x34   :  { %s16692_s3 = sld [smem:[%s18526_s0 + %s16513_s15]]   ;;  %s16517_s15 = smov 31  }
  0x37   :  { %18618 = sst [smem:[#allocation26_spill]] %s16677_s29 }
  0x38   :  { %18619 = sst [smem:[#allocation27_spill]] %s16682_s24 }
  0x39   :  { %18620 = sst [smem:[#allocation28_spill]] %s16687_s8 }
  0x3a   :  { %18621 = sst [smem:[#allocation29_spill]] %s16692_s3 }
  0x3b   :  { %s16697_s29 = sld [smem:[%s18526_s0 + %s16514_s22]]   ;;  %s16518_s22 = smov 32  }
  0x3c   :  { %s16702_s24 = sld [smem:[%s18526_s0 + %s16515_s28]]   ;;  %s16519_s28 = smov 33  }
  0x3d   :  { %s16707_s8 = sld [smem:[%s18526_s0 + %s16516_s7]]   ;;  %s16520_s7 = smov 34  }
  0x3e   :  { %s16712_s3 = sld [smem:[%s18526_s0 + %s16517_s15]]   ;;  %s16521_s15 = smov 35  }
  0x41   :  { %18622 = sst [smem:[#allocation30_spill]] %s16697_s29 }
  0x42   :  { %18623 = sst [smem:[#allocation31_spill]] %s16702_s24 }
  0x43   :  { %18624 = sst [smem:[#allocation32_spill]] %s16707_s8 }
  0x44   :  { %18625 = sst [smem:[#allocation33_spill]] %s16712_s3 }
  0x45   :  { %s16717_s29 = sld [smem:[%s18526_s0 + %s16518_s22]]   ;;  %s16522_s22 = smov 36  }
  0x46   :  { %s16722_s24 = sld [smem:[%s18526_s0 + %s16519_s28]]   ;;  %s16523_s28 = smov 37  }
  0x47   :  { %s16727_s8 = sld [smem:[%s18526_s0 + %s16520_s7]]   ;;  %s16524_s7 = smov 38  }
  0x48   :  { %s16732_s3 = sld [smem:[%s18526_s0 + %s16521_s15]]   ;;  %s16525_s15 = smov 39  }
  0x4b   :  { %18626 = sst [smem:[#allocation34_spill]] %s16717_s29 }
  0x4c   :  { %18627 = sst [smem:[#allocation35_spill]] %s16722_s24 }
  0x4d   :  { %18628 = sst [smem:[#allocation36_spill]] %s16727_s8 }
  0x4e   :  { %18629 = sst [smem:[#allocation37_spill]] %s16732_s3 }
  0x4f   :  { %s16737_s29 = sld [smem:[%s18526_s0 + %s16522_s22]]   ;;  %s16526_s22 = smov 40  }
  0x50   :  { %s16742_s24 = sld [smem:[%s18526_s0 + %s16523_s28]]   ;;  %s16527_s28 = smov 41  }
  0x51   :  { %s16747_s8 = sld [smem:[%s18526_s0 + %s16524_s7]]   ;;  %s16528_s7 = smov 42  }
  0x52   :  { %s16752_s3 = sld [smem:[%s18526_s0 + %s16525_s15]]   ;;  %s16529_s15 = smov 43  }
  0x55   :  { %18630 = sst [smem:[#allocation38_spill]] %s16737_s29 }
  0x56   :  { %18631 = sst [smem:[#allocation39_spill]] %s16742_s24 }
  0x57   :  { %18632 = sst [smem:[#allocation40_spill]] %s16747_s8 }
  0x58   :  { %18633 = sst [smem:[#allocation41_spill]] %s16752_s3 }
  0x59   :  { %s16757_s29 = sld [smem:[%s18526_s0 + %s16526_s22]]   ;;  %s16530_s22 = smov 44  }
  0x5a   :  { %s16762_s24 = sld [smem:[%s18526_s0 + %s16527_s28]]   ;;  %s16531_s28 = smov 45  }
  0x5b   :  { %s16767_s8 = sld [smem:[%s18526_s0 + %s16528_s7]]   ;;  %s16532_s7 = smov 46  }
  0x5c   :  { %s16772_s3 = sld [smem:[%s18526_s0 + %s16529_s15]]   ;;  %s16533_s15 = smov 47  }
  0x5f   :  { %18634 = sst [smem:[#allocation42_spill]] %s16757_s29 }
  0x60   :  { %18635 = sst [smem:[#allocation43_spill]] %s16762_s24 }
  0x61   :  { %18636 = sst [smem:[#allocation44_spill]] %s16767_s8 }
  0x62   :  { %18637 = sst [smem:[#allocation45_spill]] %s16772_s3 }
  0x63   :  { %s16777_s29 = sld [smem:[%s18526_s0 + %s16530_s22]]   ;;  %s16534_s22 = smov 48  }
  0x64   :  { %s16782_s24 = sld [smem:[%s18526_s0 + %s16531_s28]]   ;;  %s16535_s28 = smov 49  }
  0x65   :  { %s16787_s8 = sld [smem:[%s18526_s0 + %s16532_s7]]   ;;  %s16536_s7 = smov 50  }
  0x66   :  { %s16792_s3 = sld [smem:[%s18526_s0 + %s16533_s15]]   ;;  %s16537_s15 = smov 51  }
  0x69   :  { %18638 = sst [smem:[#allocation46_spill]] %s16777_s29 }
  0x6a   :  { %18639 = sst [smem:[#allocation47_spill]] %s16782_s24 }
  0x6b   :  { %18640 = sst [smem:[#allocation48_spill]] %s16787_s8 }
  0x6c   :  { %18641 = sst [smem:[#allocation49_spill]] %s16792_s3 }
  0x6d   :  { %s16797_s29 = sld [smem:[%s18526_s0 + %s16534_s22]]   ;;  %s16538_s22 = smov 52  }
  0x6e   :  { %s16802_s24 = sld [smem:[%s18526_s0 + %s16535_s28]]   ;;  %s16539_s28 = smov 53  }
  0x6f   :  { %s16807_s8 = sld [smem:[%s18526_s0 + %s16536_s7]]   ;;  %s16540_s7 = smov 54  }
  0x70   :  { %s16812_s3 = sld [smem:[%s18526_s0 + %s16537_s15]]   ;;  %s16541_s15 = smov 55  }
  0x73   :  { %18642 = sst [smem:[#allocation50_spill]] %s16797_s29 }
  0x74   :  { %18643 = sst [smem:[#allocation51_spill]] %s16802_s24 }
  0x75   :  { %18644 = sst [smem:[#allocation52_spill]] %s16807_s8 }
  0x76   :  { %18645 = sst [smem:[#allocation53_spill]] %s16812_s3 }
  0x77   :  { %s16817_s29 = sld [smem:[%s18526_s0 + %s16538_s22]]   ;;  %s16834_s22 = smov 0  }
  0x78   :  { %s16822_s24 = sld [smem:[%s18526_s0 + %s16539_s28]]  }
  0x79   :  { %s16827_s8 = sld [smem:[%s18526_s0 + %s16540_s7]]  }
  0x7a   :  { %s16832_s3 = sld [smem:[%s18526_s0 + %s16541_s15]]  }
  0x7d   :  { %18646 = sst [smem:[#allocation54_spill]] %s16817_s29 }
  0x7f   :  { %18647 = sst [smem:[#allocation55_spill]] %s16827_s8 }
  0x80   :  { %18648 = sst [smem:[#allocation56_spill]] %s16832_s3 }
  0x81 LB: > { %s18649_s29 = sld [smem:[#allocation54_spill]]  ;;  %s11905_s23 = sadd.s32 4294967295, %s16485_s22   ;;  %s16485_s22 = sphi %s16834_s22, %s121_s22  }
  0x82   : > { %s18650_s30 = sld [smem:[#allocation20_spill]]  ;;  %p11909_p0 = scmp.ge.s32.totalorder %s16485_s22, 1 }
  0x83   : > { %s18651_s27 = sld [smem:[#allocation18_spill]]  ;;  %p1510_p1 = scmp.lt.s32.totalorder %s16485_s22, 3 }
  0x84   : > { %s18652_s20 = sld [smem:[#allocation17_spill]] }
  0x85   : > { %s18653_s19 = sld [smem:[#allocation21_spill]]  ;;  %p1511_p2 = pnand %p11909_p0, %p1510_p1 }
  0x86   : > { %s18654_s14 = sld [smem:[#allocation22_spill]] }
  0x87   : > { %s18655_s12 = sld [smem:[#allocation16_spill]]  ;;  %1514 = sbr.rel (%p1511_p2) target bundleno = 10833 (0x2a51), region = 240 }
  0x88   : > { %s18656_s6 = sld [smem:[#allocation15_spill]] }
  0x89   : > { %s18657_s4 = sld [smem:[#allocation19_spill]] }
  0x8a   : > { %18658 = sst [smem:[#allocation57_spill]] %s16485_s22 }
  0x8c   : > { %s18659_s17 = sld [smem:[#allocation5_spill]]  ;;  %vm1675_vm0 = vcmask 1041408   ;;  %p1644_p3 = scmp.lt.s32.totalorder %s11905_s23, 1  ;;  %vm1671_vm1 = vcmask 31744   ;;  %v15471_v6 = vld [vmem:[%s18652_s20 + $0x8] sm:$0xff]  ;;  %v15470_v9 = vld [vmem:[%s18652_s20] sm:$0xff] }
  0x8d   : > { %s18660_s13 = sld [smem:[#allocation4_spill]]  ;;  %1801 = vmatpush.bf16.msra.mxu3 %v15471_v6  ;;  %vm1760_vm2 = vcmask 261120   ;;  %v16260_v25 = vld [vmem:[%s18650_s30] ss:$0 sm:$0xff]  ;;  %vm1854_vm3 = vcmask 64512   ;;  %s18571_s7 = smov 112  }
  0x8e   : > { %s18661_s5 = sld [smem:[#allocation2_spill]]  ;;  %s18720_s23 = smov (!%p1644_p3, %s11905_s23), 1  ;;  %v15469_v5 = vld [vmem:[%s18656_s6 + $0x8] sm:$0xff]  ;;  %v15468_v8 = vld [vmem:[%s18656_s6] sm:$0xff]  ;;  %vm1875_vm4 = vcmask 130048   ;;  %vm2175_vm5 = vcmask 195584  }
  0x8f   : > { %18662 = sst [smem:[#allocation58_spill]] %s18720_s23  ;;  %s15467_s0 = sshll.u32 %s18720_s23, 4  ;;  %v15473_v7 = vld [vmem:[%s18657_s4 + $0x8] sm:$0xff]  ;;  %1770 = vmatpush.bf16.msra.mxu2 %v15469_v5  ;;  %v15472_v10 = vld [vmem:[%s18657_s4] sm:$0xff] }
  0x90   : > { %s18663_s21 = sld [smem:[#allocation6_spill]]  ;;  %s18559_s1 = sshll.u32 %s18720_s23, 3  ;;  %v16261_v26 = vld [vmem:[%s18655_s12] ss:$0 sm:$0xff] }
  0x91   : > { %1802 = vmatpush.bf16.msra.mxu3 %v15470_v9  ;;  %s18664_s9 = sld [smem:[#allocation3_spill]]  ;;  %v16262_v30 = vld [vmem:[%s18651_s27] ss:$0 sm:$0xff]  ;;  %s18569_s10 = smov 120  }
  0x92   : > { %v1665_v0 = vld [vmem:[%s18659_s17] sm:$0x3]  ;;  %s18665_s25 = sld [smem:[#allocation7_spill]]  ;;  %s18566_s11 = smov 104  }
  0x93   : > { %v1677_v1 = vsel %vm1675_vm0, %v1665_v0, 0  ;;  %s16849_s26 = scalar_lea.vmem %s18660_s13, %s18720_s23  ;;  %1771 = vmatpush.bf16.msra.mxu2 %v15468_v8  ;;  %s18564_s15 = smov 8  }
  0x94   : > { %1686 = vmatpush.bf16.msra.mxu0 %v1677_v1  ;;  %s1648_s28 = scalar_lea.vmem %s18661_s5, %s15467_s0  ;;  %v16259_v14 = vld [vmem:[%s16849_s26] ss:$0 sm:$0xff]  ;;  %s18560_s16 = smov 16  }
  0x95   : > { %v1662_v2 = vld [vmem:[%s1648_s28] sm:$0xff]  ;;  %v1663_v3 = vld [vmem:[%s1648_s28 + $0x8] sm:$0xff]  ;;  %s18562_s18 = smov 24   ;;  %s18666_s0 = sld [smem:[#allocation25_spill]] }
  0x96   : > { %v1667_v4 = vpack.c.bf16 %v1663_v3, %v1662_v2  ;;  %v16258_v12 = vld [vmem:[%s18663_s21] ss:$0 sm:$0xff]  ;;  %s18667_s28 = sld [smem:[#allocation23_spill]]  ;;  %s18677_s5 = smov 16  }
  0x97   : > { %s1652_s2 = scalar_lea.vmem %s18664_s9, %s18559_s1  ;;  %s18669_s1 = sld [smem:[#allocation27_spill]] }
  0x98   : > { %11914 = vmatmul.msk.bf16.vlgmr.msra.gmra.mxu0 %vm1671_vm1, %v1667_v4  ;;  %v1698_v20 = vld [vmem:[%s18665_s25] sm:$0x3]  ;;  %s18681_s9 = sld [smem:[#allocation8_spill]]  ;;  %s18686_s13 = smov 120  }
  0x99   : > { %1830 = vmatpush.bf16.msrb.mxu0 %v15473_v7  ;;  %v1708_v21 = vsel %vm1675_vm0, %v1698_v20, 0  ;;  %v1664_v22 = vld [vmem:[%s1652_s2] sm:$0xff]  ;;  %s18668_s2 = sld [smem:[#allocation24_spill]] }
  0x9a   : > { %1717 = vmatpush.bf16.msra.mxu1 %v1708_v21  ;;  %v1700_v23 = vpack.c.bf16 %v1664_v22, %v1664_v22  ;;  %s18691_s17 = sld [smem:[#allocation48_spill]] }
  0x9b   : > { %s18695_s21 = sld [smem:[#allocation10_spill]] }
  0x9c   : > { %s18696_s25 = sld [smem:[#allocation40_spill]] }
  0x9d   : > { %1831 = vmatpush.bf16.msrb.mxu0 %v15472_v10  ;;  %11915 = vmatmul.msk.bf16.vlgmr.msra.gmra.mxu1 %vm1671_vm1, %v1700_v23  ;;  %s18702_s22 = sld [smem:[#allocation49_spill]] }
  0x9e   : > { %s18704_s23 = sld [smem:[#allocation50_spill]] }
  0x9f   : > { %s18705_s8 = sld [smem:[#allocation55_spill]] }
  0xa3   : > { %s18703_s3 = smov %s18702_s22 }
 0x115   : > { %v1688_v11 = vpop.f32.mrf.mxu0 }
 0x116   : > { %v1689_v13 = vadd.f32 %v16258_v12, %v1688_v11 }
 0x118   : > { %v16861_v17 = vadd.f32 %v16259_v14, %v1689_v13 }
 0x11a   : > { %v16891_v57 = vpop.f32.mrf.mxu1 }
 0x11d   : > { %v1690_v15 = vpop.f32.mrf.mxu0 }
 0x11e   : > { %v1691_v16 = vadd.f32 %v16258_v12, %v1690_v15 }
 0x120   : > { %v16863_v18 = vadd.f32 %v16259_v14, %v1691_v16 }
 0x122   : > { %v1744_v19 = vpack.c.bf16 %v16863_v18, %v16861_v17  ;;  %v1721_v58 = vpop.f32.mrf.mxu1 }
 0x124   : > { %11924 = vmatmul.msk.bf16.vlgmr.msra.gmra.mxu2 %vm1760_vm2, %v1744_v19  ;;  %11933 = vmatmul.msk.bf16.vlgmr.msra.gmra.mxu3 %vm1760_vm2, %v1744_v19 }
 0x125   : > { %11942 = vmatmul.msk.bf16.vlgmr.msrb.gmra.mxu0 %vm1760_vm2, %v1744_v19 }
 0x1a2   : > { %v1833_v24 = vpop.f32.mrf.mxu0 }
 0x1a3   : > { %v1834_v27 = vadd.f32 %v16260_v25, %v1833_v24 }
 0x1a5   : > { %v1842_v33 = vpack.c.bf16 %v1834_v27, %v1834_v27 }
 0x1a7   : > { %v1773_v28 = vpop.f32.mrf.mxu2  ;;  %v1804_v29 = vpop.f32.mrf.mxu3  ;;  %v1907_v38 = vunpack.c.l.b16 %v1842_v33 }
 0x1a8   : > { %v1774_v31 = vadd.f32 %v16261_v26, %v1773_v28  ;;  %v1805_v35 = vadd.f32 %v16262_v30, %v1804_v29 }
 0x1aa   : > { %v1835_v32 = vpop.f32.mrf.mxu0  ;;  %v1778_v37 = vmul.f32 0.35355338, %v1774_v31  ;;  %v1840_v42 = vpack.c.bf16 %v1805_v35, %v1805_v35 }
 0x1ab   : > { %v1836_v34 = vadd.f32 %v16260_v25, %v1835_v32 }
 0x1ac   : > { %v1838_v46 = vpack.c.bf16 %v1778_v37, %v1778_v37  ;;  %v1851_v49 = vunpack.c.l.b16 %v1840_v42 }
 0x1ad   : > { %v1843_v36 = vpack.c.bf16 %v1836_v34, %v1836_v34 }
 0x1ae   : > { %v1846_v52 = vunpack.c.l.b16 %v1838_v46 }
 0x1af   : > { %v1908_v39 = vunpack.c.l.b16 %v1843_v36  ;;  %v1775_v40 = vpop.f32.mrf.mxu2  ;;  %v1806_v41 = vpop.f32.mrf.mxu3 }
 0x1b0   : > { %v1776_v43 = vadd.f32 %v16261_v26, %v1775_v40  ;;  %v1807_v44 = vadd.f32 %v16262_v30, %v1806_v41 }
 0x1b1   : > { %v16880_v45 = vpack.c.b16 %v1908_v39, %v1907_v38 }
 0x1b2   : > { %v1779_v47 = vmul.f32 0.35355338, %v1776_v43  ;;  %v1841_v48 = vpack.c.bf16 %v1807_v44, %v1807_v44 }
 0x1b3   : > { %1921 = vmatpush.bf16.msrb.mxu2 %v16880_v45 }
 0x1b4   : > { %v1839_v50 = vpack.c.bf16 %v1779_v47, %v1779_v47  ;;  %v1852_v51 = vunpack.c.l.b16 %v1841_v48 }
 0x1b6   : > { %v1847_v53 = vunpack.c.l.b16 %v1839_v50  ;;  %v1853_v54 = vpack.c.b16 %v1852_v51, %v1851_v49 }
 0x1b8   : > { %v1848_v55 = vpack.c.b16 %v1847_v53, %v1846_v52  ;;  %2003 = vrot.lane.b32.xlu1 %v1853_v54, %s18571_s7  ;;  %1930 = vrot.lane.b32.xlu0 %v1853_v54, %s18569_s10  ;;  %v1859_v56 = vsel %vm1854_vm3, %v1853_v54, 0 }
 0x1b9   : > { %1868 = vmatpush.bf16.xpose.msrb.mxu1 %v1859_v56 }
 0x1ba   : > { %2001 = vrot.lane.b32.xlu2 %v1848_v55, %s18571_s7 }
 0x1c0   : > { %2076 = vrot.lane.b32.xlu1 %v1853_v54, %s18566_s11  ;;  %1928 = vrot.lane.b32.xlu0 %v1848_v55, %s18569_s10 }
 0x1c1   : > { %11943 = vmatmul.msk.bf16.vlgmr.msrb.gmra.mxu1 %vm1854_vm3, %v1848_v55 }
 0x1c2   : > { %2074 = vrot.lane.b32.xlu2 %v1848_v55, %s18566_s11 }
 0x214   : > { %v2002_v63 = vpop.permute.xlu2 %2001 }
 0x21c   : > { %v2075_v5 = vpop.permute.xlu2 %2074 }
 0x22a   : > { %v2004_v59 = vpop.permute.xlu1 %2003  ;;  %v1931_v60 = vpop.permute.xlu0 %1930 }
 0x22b   : > { %v2009_v61 = vsel %vm1854_vm3, %v2004_v59, 0  ;;  %v1936_v62 = vsel %vm1854_vm3, %v1931_v60, 0 }
 0x22c   : > { %1945 = vmatpush.bf16.xpose.msrb.mxu3 %v1936_v62  ;;  %2018 = vmatpush.bf16.xpose.msra.mxu1 %v2009_v61 }
 0x232   : > { %v2077_v0 = vpop.permute.xlu1 %2076  ;;  %v1929_v1 = vpop.permute.xlu0 %1928 }
 0x233   : > { %v2082_v2 = vsel %vm1854_vm3, %v2077_v0, 0  ;;  %11945 = vmatmul.msk.bf16.vlgmr.msrb.gmra.mxu3 %vm1854_vm3, %v1929_v1  ;;  %11947 = vmatmul.msk.bf16.vlgmr.msra.gmra.mxu1 %vm1854_vm3, %v2002_v63 }
 0x234   : > { %2091 = vmatpush.bf16.xpose.msra.mxu3 %v2082_v2 }
 0x23e   : > { %v1870_v3 = vpop.f32.mrf.mxu1 }
 0x23f   : > { %v1876_v4 = vsel %vm1875_vm4, %v1870_v3, -inf }
 0x240   : > { %1877 = vmax.xlane.f32.xlu0 %v1876_v4 }
 0x243   : > { %11949 = vmatmul.msk.bf16.vlgmr.msra.gmra.mxu3 %vm1854_vm3, %v2075_v5 }
 0x246   : > { %v1872_v6 = vpop.f32.mrf.mxu1 }
 0x247   : > { %v1879_v7 = vsel %vm1875_vm4, %v1872_v6, -inf }
 0x248   : > { %1880 = vmax.xlane.f32.xlu1 %v1879_v7 }
 0x2b0   : > { %v2020_v8 = vpop.f32.mrf.mxu1 }
 0x2b1   : > { %v2025_v9 = vsel %vm1875_vm4, %v2020_v8, -inf }
 0x2b2   : > { %2026 = vmax.xlane.f32.xlu0 %v2025_v9 }
 0x2b3   : > { %v1878_v10 = vpop.xlane.xlu0 %1877 }
 0x2b4   : > { %v1882_v11 = vsub.f32 %v1870_v3, %v1878_v10 }
 0x2b6   : > { %v1884_v12 = vmul.f32 1.442695, %v1882_v11  ;;  %v1947_v13 = vpop.f32.mrf.mxu3 }
 0x2b7   : > { %v1952_v14 = vsel %vm1875_vm4, %v1947_v13, -inf }
 0x2b8   : > { %16314 = vpow2.f32 %v1884_v12  ;;  %1953 = vmax.xlane.f32.xlu2 %v1952_v14  ;;  %v2022_v15 = vpop.f32.mrf.mxu1 }
 0x2b9   : > { %v2028_v16 = vsel %vm1875_vm4, %v2022_v15, -inf }
 0x2ba   : > { %2029 = vmax.xlane.f32.xlu1 %v2028_v16 }
 0x2bb   : > { %v1881_v19 = vpop.xlane.xlu1 %1880 }
 0x2bc   : > { %v1883_v21 = vsub.f32 %v1872_v6, %v1881_v19 }
 0x2be   : > { %v16315_v20 = vpop.eup %16314  ;;  %v1949_v22 = vpop.f32.mrf.mxu3  ;;  %v1886_v25 = vmul.f32 1.442695, %v1883_v21 }
 0x2bf   : > { %v1955_v23 = vsel %vm1875_vm4, %v1949_v22, -inf  ;;  %v1888_v24 = vsel %vm1875_vm4, %v16315_v20, 0.0 }
 0x2c0   : > { %1956 = vmax.xlane.f32.xlu2 %v1955_v23  ;;  %16316 = vpow2.f32 %v1886_v25 }
 0x2c2   : > { %1889 = vadd.xlane.f32.xlu1 %v1888_v24 }
 0x2c6   : > { %v2093_v26 = vpop.f32.mrf.mxu3  ;;  %v16317_v28 = vpop.eup %16316 }
 0x2c7   : > { %v2098_v27 = vsel %vm1875_vm4, %v2093_v26, -inf  ;;  %v1891_v31 = vsel %vm1875_vm4, %v16317_v28, 0.0 }
 0x2c8   : > { %2099 = vmax.xlane.f32.xlu2 %v2098_v27 }
 0x2ce   : > { %v2095_v29 = vpop.f32.mrf.mxu3 }
 0x2cf   : > { %v2101_v30 = vsel %vm1875_vm4, %v2095_v29, -inf }
 0x2d0   : > { %2102 = vmax.xlane.f32.xlu0 %v2101_v30  ;;  %1892 = vadd.xlane.f32.xlu2 %v1891_v31 }
 0x325   : > { %v2027_v32 = vpop.xlane.xlu0 %2026 }
 0x326   : > { %v2031_v33 = vsub.f32 %v2020_v8, %v2027_v32 }
 0x328   : > { %v2033_v34 = vmul.f32 1.442695, %v2031_v33 }
 0x32a   : > { %16318 = vpow2.f32 %v2033_v34 }
 0x32b   : > { %v1954_v35 = vpop.xlane.xlu2 %1953 }
 0x32c   : > { %v1958_v36 = vsub.f32 %v1947_v13, %v1954_v35 }
 0x32d   : > { %v2030_v37 = vpop.xlane.xlu1 %2029 }
 0x32e   : > { %v1960_v38 = vmul.f32 1.442695, %v1958_v36  ;;  %v2032_v39 = vsub.f32 %v2022_v15, %v2030_v37 }
 0x330   : > { %v16319_v40 = vpop.eup %16318  ;;  %16320 = vpow2.f32 %v1960_v38  ;;  %v2035_v42 = vmul.f32 1.442695, %v2032_v39 }
 0x331   : > { %v2037_v41 = vsel %vm1875_vm4, %v16319_v40, 0.0 }
 0x332   : > { %2038 = vadd.xlane.f32.xlu2 %v2037_v41  ;;  %16322 = vpow2.f32 %v2035_v42 }
 0x333   : > { %v1957_v43 = vpop.xlane.xlu2 %1956 }
 0x334   : > { %v1959_v44 = vsub.f32 %v1949_v22, %v1957_v43 }
 0x335   : > { %v1890_v49 = vpop.xlane.xlu1 %1889 }
 0x336   : > { %v16910_v46 = vpop.eup %16320  ;;  %v1962_v47 = vmul.f32 1.442695, %v1959_v44 }
 0x337   : > { %v1964_v48 = vsel %vm1875_vm4, %v16910_v46, 0.0 }
 0x338   : > { %16324 = vpow2.f32 %v1962_v47  ;;  %1965 = vadd.xlane.f32.xlu0 %v1964_v48  ;;  %v16323_v51 = vpop.eup %16322 }
 0x339   : > { %16326 = vrcp.f32 %v1890_v49  ;;  %v2040_v56 = vsel %vm1875_vm4, %v16323_v51, 0.0 }
 0x33b   : > { %v2100_v50 = vpop.xlane.xlu2 %2099 }
 0x33c   : > { %v2104_v52 = vsub.f32 %v2093_v26, %v2100_v50 }
 0x33e   : > { %v16325_v53 = vpop.eup %16324  ;;  %v2106_v54 = vmul.f32 1.442695, %v2104_v52 }
 0x33f   : > { %v1967_v55 = vsel %vm1875_vm4, %v16325_v53, 0.0  ;;  %v16327_v60 = vpop.eup %16326 }
 0x340   : > { %16328 = vpow2.f32 %v2106_v54  ;;  %1968 = vadd.xlane.f32.xlu1 %v1967_v55  ;;  %2041 = vadd.xlane.f32.xlu0 %v2040_v56  ;;  %v1896_v0 = vmul.f32 %v16327_v60, %v16315_v20 }
 0x342   : > { %v1898_v3 = vpack.c.bf16 %v1896_v0, %v1896_v0 }
 0x343   : > { %v2103_v58 = vpop.xlane.xlu0 %2102  ;;  %v1893_v59 = vpop.xlane.xlu2 %1892 }
 0x344   : > { %v2105_v61 = vsub.f32 %v2095_v29, %v2103_v58  ;;  %16330 = vrcp.f32 %v1893_v59  ;;  %v1902_v8 = vunpack.c.l.b16 %v1898_v3 }
 0x346   : > { %v16329_v62 = vpop.eup %16328  ;;  %v2108_v63 = vmul.f32 1.442695, %v2105_v61  ;;  %v15475_v61 = vld [vmem:[%s18653_s19 + $0x8] sm:$0xff] }
 0x347   : > { %v2110_v1 = vsel %vm1875_vm4, %v16329_v62, 0.0  ;;  %2203 = vmatpush.bf16.msrb.mxu1 %v15475_v61  ;;  %v11964_v61 = vld [vmem:[%s18666_s0 + $0x40] sm:$0xf0] }
 0x348   : > { %16332 = vpow2.f32 %v2108_v63  ;;  %2111 = vadd.xlane.f32.xlu2 %v2110_v1 }
 0x34a   : > { %v16331_v2 = vpop.eup %16330 }
 0x34b   : > { %v1897_v4 = vmul.f32 %v16331_v2, %v16317_v28 }
 0x34d   : > { %v1899_v5 = vpack.c.bf16 %v1897_v4, %v1897_v4 }
 0x34e   : > { %v16333_v6 = vpop.eup %16332 }
 0x34f   : > { %v2113_v7 = vsel %vm1875_vm4, %v16333_v6, 0.0  ;;  %v1903_v9 = vunpack.c.l.b16 %v1899_v5 }
 0x350   : > { %2114 = vadd.xlane.f32.xlu0 %v2113_v7 }
 0x351   : > { %v1904_v10 = vpack.c.b16 %v1903_v9, %v1902_v8 }
 0x353   : > { %11944 = vmatmul.msk.bf16.vlgmr.msrb.gmra.mxu2 %vm1875_vm4, %v1904_v10 }
 0x359   : > { %1981 = vrot.lane.b32.xlu1 %v16880_v45, %s18569_s10 }
 0x360   : > { %2054 = vrot.lane.b32.xlu2 %v16880_v45, %s18571_s7 }
 0x364   : > { %2127 = vrot.lane.b32.xlu0 %v16880_v45, %s18566_s11  ;;  %s18673_s11 = sld [smem:[#allocation30_spill]] }
 0x3a5   : > { %v2039_v12 = vpop.xlane.xlu2 %2038 }
 0x3a6   : > { %16334 = vrcp.f32 %v2039_v12 }
 0x3ab   : > { %v1966_v11 = vpop.xlane.xlu0 %1965 }
 0x3ac   : > { %v16335_v15 = vpop.eup %16334 }
 0x3ad   : > { %v2045_v19 = vmul.f32 %v16335_v15, %v16319_v40  ;;  %v16264_v15 = vld [vmem:[%s18654_s14] ss:$0 sm:$0xff] }
 0x3af   : > { %v2047_v24 = vpack.c.bf16 %v2045_v19, %v2045_v19 }
 0x3b1   : > { %v2051_v45 = vunpack.c.l.b16 %v2047_v24 }
 0x3b3   : > { %v2042_v13 = vpop.xlane.xlu0 %2041  ;;  %v1969_v14 = vpop.xlane.xlu1 %1968 }
 0x3b4   : > { %16336 = vrcp.f32 %v2042_v13 }
 0x3b5   : > { %16338 = vrcp.f32 %v1969_v14 }
 0x3b6   : > { %16340 = vrcp.f32 %v1966_v11 }
 0x3ba   : > { %v16337_v16 = vpop.eup %16336 }
 0x3bb   : > { %v2046_v20 = vmul.f32 %v16337_v16, %v16323_v51  ;;  %v2112_v21 = vpop.xlane.xlu2 %2111  ;;  %v16339_v23 = vpop.eup %16338 }
 0x3bc   : > { %v16341_v25 = vpop.eup %16340  ;;  %v1973_v27 = vmul.f32 %v16339_v23, %v16325_v53 }
 0x3bd   : > { %v2048_v22 = vpack.c.bf16 %v2046_v20, %v2046_v20  ;;  %v1972_v28 = vmul.f32 %v16341_v25, %v16910_v46 }
 0x3be   : > { %v1975_v31 = vpack.c.bf16 %v1973_v27, %v1973_v27 }
 0x3bf   : > { %v2052_v26 = vunpack.c.l.b16 %v2048_v22  ;;  %v1974_v33 = vpack.c.bf16 %v1972_v28, %v1972_v28 }
 0x3c0   : > { %v1979_v34 = vunpack.c.l.b16 %v1975_v31 }
 0x3c1   : > { %v2053_v30 = vpack.c.b16 %v2052_v26, %v2051_v45  ;;  %v1978_v35 = vunpack.c.l.b16 %v1974_v33  ;;  %v16548_v26 = vmov 32.0  }
 0x3c3   : > { %v2055_v29 = vpop.permute.xlu2 %2054  ;;  %v2115_v32 = vpop.xlane.xlu0 %2114  ;;  %v1980_v37 = vpack.c.b16 %v1979_v34, %v1978_v35 }
 0x3c4   : > { %2067 = vmatpush.bf16.msra.mxu2 %v2055_v29  ;;  %16342 = vrcp.f32 %v2115_v32 }
 0x3c5   : > { %16344 = vrcp.f32 %v2112_v21 }
 0x3c6   : > { %16346 = vrcp.f32 %v16548_v26 }
 0x3c7   : > { %11948 = vmatmul.msk.bf16.vlgmr.msra.gmra.mxu2 %vm1875_vm4, %v2053_v30 }
 0x3ca   : > { %v16343_v38 = vpop.eup %16342 }
 0x3cb   : > { %v1982_v36 = vpop.permute.xlu1 %1981  ;;  %v16345_v39 = vpop.eup %16344  ;;  %v2119_v40 = vmul.f32 %v16343_v38, %v16333_v6 }
 0x3cc   : > { %1994 = vmatpush.bf16.msra.mxu0 %v1982_v36  ;;  %v2118_v41 = vmul.f32 %v16345_v39, %v16329_v62  ;;  %v15474_v62 = vld [vmem:[%s18653_s19] sm:$0xff]  ;;  %v16347_v27 = vpop.eup %16346 }
 0x3cd   : > { %v2121_v42 = vpack.c.bf16 %v2119_v40, %v2119_v40  ;;  %2204 = vmatpush.bf16.msrb.mxu1 %v15474_v62  ;;  %v2222_v45 = vmul.f32 32.0, %v16347_v27  ;;  %vm2226_vm6 = vweird.f32 %v16347_v27  ;;  %v12026_v40 = vld [vmem:[%s18666_s0 + $0x80] sm:$0xf]  ;;  %v11970_v62 = vld [vmem:[%s18666_s0 + $0x8] sm:$0xf] }
 0x3ce   : > { %v2120_v44 = vpack.c.bf16 %v2118_v41, %v2118_v41  ;;  %v15500_v41 = vld [vmem:[%s18666_s0 + $0xbc] sm:$0xf0] }
 0x3cf   : > { %11946 = vmatmul.msk.bf16.vlgmr.msra.gmra.mxu0 %vm1875_vm4, %v1980_v37  ;;  %v2125_v46 = vunpack.c.l.b16 %v2121_v42  ;;  %v2223_v28 = vsub.f32 1.0, %v2222_v45  ;;  %v15492_v42 = vld [vmem:[%s18666_s0 + $0x84] sm:$0xf]  ;;  %v11980_v45 = vld [vmem:[%s18666_s0 + $0x50] sm:$0xf0] }
 0x3d0   : > { %v2124_v47 = vunpack.c.l.b16 %v2120_v44  ;;  %v12028_v44 = vld [vmem:[%s18666_s0 + $0xc0] sm:$0xf0] }
 0x3d1   : > { %v2224_v29 = vmul.f32 %v16347_v27, %v2223_v28  ;;  %v11986_v28 = vld [vmem:[%s18666_s0 + $0x18] sm:$0xf] }
 0x3d2   : > { %v2126_v48 = vpack.c.b16 %v2125_v46, %v2124_v47  ;;  %v12034_v46 = vld [vmem:[%s18666_s0 + $0x88] sm:$0xf] }
 0x3d3   : > { %v2225_v30 = vadd.f32 %v16347_v27, %v2224_v29  ;;  %v15501_v47 = vld [vmem:[%s18666_s0 + $0xc4] sm:$0xf0]  ;;  %v15487_v29 = vld [vmem:[%s18666_s0 + $0x54] sm:$0xf0] }
 0x3d6   : > { %v2128_v43 = vpop.permute.xlu0 %2127  ;;  %v1923_v49 = vpop.f32.mrf.mxu2 }
 0x3d7   : > { %2140 = vmatpush.bf16.msrb.mxu0 %v2128_v43  ;;  %v12027_v43 = vor.u32 %v15500_v41, %v12026_v40 }
 0x3d9   : > { %2771 = vmatpush.bf16.msrb.mxu2 %v12027_v43 }
 0x3de   : > { %v1925_v50 = vpop.f32.mrf.mxu2 }
 0x3df   : > { %11950 = vmatmul.msk.bf16.vlgmr.msrb.gmra.mxu0 %vm1875_vm4, %v2126_v48 }
 0x44a   : > { %v2069_v52 = vpop.f32.mrf.mxu2 }
 0x44c   : > { %v1996_v51 = vpop.f32.mrf.mxu0 }
 0x452   : > { %v2071_v55 = vpop.f32.mrf.mxu2 }
 0x453   : > { %v16233_v58 = vpack.i.bf16 %v2071_v55, %v2069_v52  ;;  %v12036_v52 = vld [vmem:[%s18666_s0 + $0xc8] sm:$0xf0]  ;;  %v11962_v55 = vld [vmem:[%s18666_s0] sm:$0xf] }
 0x454   : > { %v1998_v53 = vpop.f32.mrf.mxu0 }
 0x455   : > { %v16228_v54 = vpack.i.bf16 %v1998_v53, %v1996_v51  ;;  %v15493_v51 = vld [vmem:[%s18666_s0 + $0x8c] sm:$0xf] }
 0x457   : > { %16229 = vrot.lane.b32.xlu1 %v16228_v54, %s18564_s15  ;;  %v12039_v54 = vor.u32 %v15493_v51, %v12036_v52  ;;  %v16266_v51 = vld [vmem:[%s18668_s2] ss:$0 sm:$0xff]  ;;  %s18672_s15 = sld [smem:[#allocation29_spill]] }
 0x459   : > { %2813 = vmatpush.bf16.msra.mxu1 %v12039_v54 }
 0x45c   : > { %v2142_v56 = vpop.f32.mrf.mxu0 }
 0x45f   : > { %16234 = vrot.lane.b32.xlu1 %v16233_v58, %s18560_s16  ;;  %v15476_v58 = vld [vmem:[%s18666_s0 + $0x4] sm:$0xf]  ;;  %s18670_s16 = sld [smem:[#allocation26_spill]] }
 0x464   : > { %v2144_v59 = vpop.f32.mrf.mxu0 }
 0x465   : > { %v16238_v60 = vpack.i.bf16 %v2144_v59, %v2142_v56  ;;  %v15484_v56 = vld [vmem:[%s18666_s0 + $0x3c] sm:$0xf0] }
 0x467   : > { %16239 = vrot.lane.b32.xlu0 %v16238_v60, %s18562_s18  ;;  %v11963_v60 = vor.u32 %v15484_v56, %v11962_v55  ;;  %v12058_v55 = vld [vmem:[%s18666_s0 + $0xa0] sm:$0xf]  ;;  %s18671_s18 = sld [smem:[#allocation28_spill]] }
 0x468   : > { %v15504_v56 = vld [vmem:[%s18666_s0 + $0xdc] sm:$0xf0] }
 0x469   : > { %2772 = vmatpush.bf16.msrb.mxu2 %v11963_v60 }
 0x4c9   : > { %v16230_v63 = vpop.permute.xlu1 %16229 }
 0x4ca   : > { %v16232_v1 = vunpack.i.h.bf16 %v16230_v63  ;;  %v16231_v2 = vunpack.i.l.bf16 %v16230_v63  ;;  %v11967_v63 = vor.u32 %v15476_v58, %v11964_v61  ;;  %v15496_v58 = vld [vmem:[%s18666_s0 + $0xa4] sm:$0xf] }
 0x4cc   : > { %v2172_v6 = vsel %vm1854_vm3, %v1925_v50, %v16232_v1  ;;  %v2171_v7 = vsel %vm1854_vm3, %v1923_v49, %v16231_v2  ;;  %v12031_v49 = vor.u32 %v15492_v42, %v12028_v44  ;;  %v12035_v50 = vor.u32 %v15501_v47, %v12034_v46  ;;  %v15477_v1 = vld [vmem:[%s18666_s0 + $0xc] sm:$0xf]  ;;  %v16265_v47 = vld [vmem:[%s18667_s28] ss:$0 sm:$0xff] }
 0x4cd   : > { %v11972_v2 = vld [vmem:[%s18666_s0 + $0x48] sm:$0xf0] }
 0x4ce   : > { %2785 = vmatpush.bf16.msrb.mxu3 %v12031_v49  ;;  %2799 = vmatpush.bf16.msra.mxu0 %v12035_v50 }
 0x4d1   : > { %v16235_v0 = vpop.permute.xlu1 %16234 }
 0x4d2   : > { %v16237_v3 = vunpack.i.h.bf16 %v16235_v0  ;;  %v16236_v4 = vunpack.i.l.bf16 %v16235_v0  ;;  %v15485_v0 = vld [vmem:[%s18666_s0 + $0x44] sm:$0xf0]  ;;  %2786 = vmatpush.bf16.msrb.mxu3 %v11967_v63  ;;  %v15497_v63 = vld [vmem:[%s18666_s0 + $0xac] sm:$0xf] }
 0x4d4   : > { %v2173_v10 = vsel %vm1875_vm4, %v2171_v7, %v16236_v4  ;;  %v2174_v11 = vsel %vm1875_vm4, %v2172_v6, %v16237_v3  ;;  %v11971_v3 = vor.u32 %v15485_v0, %v11970_v62  ;;  %v11975_v4 = vor.u32 %v15477_v1, %v11972_v2  ;;  %v12042_v6 = vld [vmem:[%s18666_s0 + $0x90] sm:$0xf]  ;;  %v15505_v62 = vld [vmem:[%s18666_s0 + $0xe4] sm:$0xf0] }
 0x4d5   : > { %v15502_v7 = vld [vmem:[%s18666_s0 + $0xcc] sm:$0xf0]  ;;  %v12059_v1 = vor.u32 %v15504_v56, %v12058_v55  ;;  %v15521_v55 = vld [vmem:[%s18669_s1 + $0x68] sm:$0xff]  ;;  %v15528_v56 = vld [vmem:[%s18669_s1 + $0xa0] sm:$0xff] }
 0x4d6   : > { %2800 = vmatpush.bf16.msra.mxu0 %v11971_v3  ;;  %2814 = vmatpush.bf16.msra.mxu1 %v11975_v4  ;;  %v11994_v3 = vld [vmem:[%s18666_s0 + $0x20] sm:$0xf] }
 0x4d7   : > { %v15488_v4 = vld [vmem:[%s18666_s0 + $0x5c] sm:$0xf0] }
 0x4d9   : > { %v16240_v5 = vpop.permute.xlu0 %16239 }
 0x4da   : > { %v16242_v8 = vunpack.i.h.bf16 %v16240_v5  ;;  %v16241_v9 = vunpack.i.l.bf16 %v16240_v5 }
 0x4dc   : > { %v2177_v12 = vsel %vm2175_vm5, %v2174_v11, %v16242_v8  ;;  %v2176_v13 = vsel %vm2175_vm5, %v2173_v10, %v16241_v9  ;;  %v15494_v8 = vld [vmem:[%s18666_s0 + $0x94] sm:$0xf]  ;;  %v12043_v10 = vor.u32 %v15502_v7, %v12042_v6  ;;  %v15480_v7 = vld [vmem:[%s18666_s0 + $0x24] sm:$0xf] }
 0x4dd   : > { %v2178_v14 = vpack.c.bf16 %v2177_v12, %v2176_v13  ;;  %v12044_v11 = vld [vmem:[%s18666_s0 + $0xd0] sm:$0xf0]  ;;  %v12050_v12 = vld [vmem:[%s18666_s0 + $0x98] sm:$0xf] }
 0x4de   : > { %v15503_v13 = vld [vmem:[%s18666_s0 + $0xd4] sm:$0xf0]  ;;  %2827 = vmatpush.bf16.msra.mxu2 %v12043_v10  ;;  %v15489_v10 = vld [vmem:[%s18666_s0 + $0x64] sm:$0xf0] }
 0x4df   : > { %11959 = vmatmul.msk.bf16.vlgmr.msrb.gmra.mxu1 %vm1760_vm2, %v2178_v14  ;;  %v12047_v14 = vor.u32 %v15494_v8, %v12044_v11  ;;  %v11996_v8 = vld [vmem:[%s18666_s0 + $0x60] sm:$0xf0]  ;;  %v15481_v11 = vld [vmem:[%s18666_s0 + $0x2c] sm:$0xf] }
 0x4e1   : > { %2841 = vmatpush.bf16.msra.mxu3 %v12047_v14  ;;  %v11999_v14 = vor.u32 %v15480_v7, %v11996_v8  ;;  %v15509_v7 = vld [vmem:[%s18669_s1 + $0x8] sm:$0xff] }
 0x4e2   : > { %v15517_v8 = vld [vmem:[%s18669_s1 + $0x48] sm:$0xff] }
 0x55c   : > { %v2206_v16 = vpop.f32.mrf.mxu1 }
 0x55d   : > { %v2207_v19 = vadd.f32 %v16264_v15, %v2206_v16  ;;  %v15495_v16 = vld [vmem:[%s18666_s0 + $0x9c] sm:$0xf] }
 0x55f   : > { %v2211_v20 = vadd.f32 %v2207_v19, %v16861_v17  ;;  %v16946_v17 = vsel %vm2226_vm6, %v16347_v27, %v2225_v30  ;;  %v12052_v19 = vld [vmem:[%s18666_s0 + $0xd8] sm:$0xf0] }
 0x561   : > { %v2215_v21 = vsel %vm1760_vm2, %v2211_v20, 0.0 }
 0x562   : > { %2216 = vadd.xlane.f32.xlu2 %v2215_v21 }
 0x564   : > { %v2208_v22 = vpop.f32.mrf.mxu1 }
 0x565   : > { %v2209_v23 = vadd.f32 %v16264_v15, %v2208_v22  ;;  %v12051_v15 = vor.u32 %v15503_v13, %v12050_v12  ;;  %v12004_v12 = vld [vmem:[%s18666_s0 + $0x68] sm:$0xf0]  ;;  %v11995_v13 = vor.u32 %v15488_v4, %v11994_v3  ;;  %v15534_v3 = vld [vmem:[%s18669_s1 + $0xd0] sm:$0xff] }
 0x566   : > { %v15510_v4 = vld [vmem:[%s18669_s1 + $0x10] sm:$0xff] }
 0x567   : > { %v2212_v24 = vadd.f32 %v2209_v23, %v16863_v18  ;;  %v12055_v23 = vor.u32 %v15495_v16, %v12052_v19  ;;  %2855 = vmatpush.bf16.msrb.mxu0 %v12051_v15  ;;  %v12007_v16 = vor.u32 %v15481_v11, %v12004_v12  ;;  %v12074_v19 = vld [vmem:[%s18666_s0 + $0xb0] sm:$0xf]  ;;  %v15563_v11 = vld [vmem:[%s18669_s1 + $0x1b8] sm:$0xff] }
 0x568   : > { %v15571_v12 = vld [vmem:[%s18669_s1 + $0x1f8] sm:$0xff] }
 0x569   : > { %v2218_v25 = vsel %vm1760_vm2, %v2212_v24, 0.0  ;;  %2869 = vmatpush.bf16.msrb.mxu1 %v12055_v23  ;;  %v12082_v23 = vld [vmem:[%s18666_s0 + $0xb8] sm:$0xf] }
 0x56a   : > { %2219 = vadd.xlane.f32.xlu1 %v2218_v25  ;;  %v15478_v25 = vld [vmem:[%s18666_s0 + $0x14] sm:$0xf] }
 0x56b   : > { %v11983_v30 = vor.u32 %v15478_v25, %v11980_v45  ;;  %v15499_v25 = vld [vmem:[%s18666_s0 + $0xbc] sm:$0xf] }
 0x56d   : > { %2842 = vmatpush.bf16.msra.mxu3 %v11983_v30 }
 0x5d5   : > { %v2217_v31 = vpop.xlane.xlu2 %2216 }
 0x5d6   : > { %v2228_v18 = vmul.f32 %v16946_v17, %v2217_v31  ;;  %v11987_v31 = vor.u32 %v15487_v29, %v11986_v28  ;;  %v12010_v28 = vld [vmem:[%s18666_s0 + $0x30] sm:$0xf] }
 0x5d7   : > { %v15490_v29 = vld [vmem:[%s18666_s0 + $0x6c] sm:$0xf0] }
 0x5d8   : > { %v16949_v32 = vsub.f32 %v2211_v20, %v2228_v18  ;;  %v11978_v20 = vld [vmem:[%s18666_s0 + $0x10] sm:$0xf]  ;;  %v15479_v18 = vld [vmem:[%s18666_s0 + $0x1c] sm:$0xf]  ;;  %2856 = vmatpush.bf16.msrb.mxu0 %v11987_v31 }
 0x5da   : > { %v2232_v33 = vmul.f32 %v16949_v32, %v16949_v32 }
 0x5dc   : > { %v2234_v34 = vsel %vm1760_vm2, %v2232_v33, 0.0  ;;  %v11988_v33 = vld [vmem:[%s18666_s0 + $0x58] sm:$0xf0] }
 0x5dd   : > { %v2220_v35 = vpop.xlane.xlu1 %2219  ;;  %2235 = vadd.xlane.f32.xlu0 %v2234_v34 }
 0x5de   : > { %v2229_v36 = vmul.f32 %v16946_v17, %v2220_v35  ;;  %v11991_v35 = vor.u32 %v15479_v18, %v11988_v33  ;;  %v15482_v18 = vld [vmem:[%s18666_s0 + $0x34] sm:$0xf] }
 0x5df   : > { %v12012_v33 = vld [vmem:[%s18666_s0 + $0x70] sm:$0xf0] }
 0x5e0   : > { %v16955_v37 = vsub.f32 %v2212_v24, %v2229_v36  ;;  %v15486_v24 = vld [vmem:[%s18666_s0 + $0x4c] sm:$0xf0]  ;;  %2870 = vmatpush.bf16.msrb.mxu1 %v11991_v35  ;;  %v15491_v35 = vld [vmem:[%s18666_s0 + $0x74] sm:$0xf0] }
 0x5e1   : > { %v11979_v27 = vor.u32 %v15486_v24, %v11978_v20  ;;  %v15506_v20 = vld [vmem:[%s18666_s0 + $0xec] sm:$0xf0]  ;;  %v15507_v24 = vld [vmem:[%s18666_s0 + $0xf4] sm:$0xf0] }
 0x5e2   : > { %v2233_v38 = vmul.f32 %v16955_v37, %v16955_v37  ;;  %v12083_v30 = vor.u32 %v15507_v24, %v12082_v23  ;;  %v15561_v23 = vld [vmem:[%s18669_s1 + $0x1a8] sm:$0xff] }
 0x5e3   : > { %2828 = vmatpush.bf16.msra.mxu2 %v11979_v27  ;;  %v12075_v27 = vor.u32 %v15506_v20, %v12074_v19  ;;  %v15562_v19 = vld [vmem:[%s18669_s1 + $0x1b0] sm:$0xff]  ;;  %v15569_v24 = vld [vmem:[%s18669_s1 + $0x1e8] sm:$0xff] }
 0x5e4   : > { %v2237_v39 = vsel %vm1760_vm2, %v2233_v38, 0.0  ;;  %v15570_v20 = vld [vmem:[%s18669_s1 + $0x1f0] sm:$0xff] }
 0x5e5   : > { %2238 = vadd.xlane.f32.xlu2 %v2237_v39 }
 0x650   : > { %v2236_v48 = vpop.xlane.xlu0 %2235 }
 0x651   : > { %v2240_v53 = vmul.f32 %v2236_v48, %v16946_v17 }
 0x653   : > { %v16972_v59 = vadd.f32 1e-05, %v2240_v53 }
 0x655   : > { %16348 = vrsqrt.f32 %v16972_v59  ;;  %vm2250_vm8 = vweird.f32 %v16972_v59 }
 0x658   : > { %v2239_v5 = vpop.xlane.xlu2 %2238 }
 0x659   : > { %v2241_v9 = vmul.f32 %v2239_v5, %v16946_v17 }
 0x65b   : > { %v16349_v21 = vpop.eup %16348  ;;  %v2243_v22 = vadd.f32 1e-05, %v2241_v9  ;;  %v12002_v9 = vld [vmem:[%s18666_s0 + $0x28] sm:$0xf] }
 0x65c   : > { %v2245_v26 = vmul.f32 %v16349_v21, %v16972_v59  ;;  %vm2251_vm7 = vweird.f32 %v16349_v21  ;;  %v12066_v59 = vld [vmem:[%s18666_s0 + $0xa8] sm:$0xf]  ;;  %v12003_v15 = vor.u32 %v15489_v10, %v12002_v9  ;;  %v15524_v9 = vld [vmem:[%s18669_s1 + $0x80] sm:$0xff] }
 0x65d   : > { %16350 = vrsqrt.f32 %v2243_v22  ;;  %vm2252_vm9 = vmor %vm2250_vm8, %vm2251_vm7  ;;  %vm2260_vm11 = vweird.f32 %v2243_v22  ;;  %v12067_v5 = vor.u32 %v15505_v62, %v12066_v59  ;;  %v15520_v59 = vld [vmem:[%s18669_s1 + $0x60] sm:$0xff]  ;;  %v15527_v62 = vld [vmem:[%s18669_s1 + $0x98] sm:$0xff] }
 0x65e   : > { %v2246_v34 = vmul.f32 %v16349_v21, %v2245_v26  ;;  %v12084_v26 = vld [vmem:[%s18666_s0 + $0xf8] sm:$0xf0]  ;;  %v15532_v10 = vld [vmem:[%s18669_s1 + $0xc0] sm:$0xff] }
 0x65f   : > { %v12087_v31 = vor.u32 %v15499_v25, %v12084_v26  ;;  %v15560_v25 = vld [vmem:[%s18669_s1 + $0x1a0] sm:$0xff] }
 0x660   : > { %v2247_v36 = vmul.f32 0.5, %v2246_v34  ;;  %v12018_v34 = vld [vmem:[%s18666_s0 + $0x38] sm:$0xf]  ;;  %v15568_v26 = vld [vmem:[%s18669_s1 + $0x1e0] sm:$0xff] }
 0x662   : > { %v2248_v38 = vsub.f32 1.5, %v2247_v36  ;;  %v15483_v36 = vld [vmem:[%s18666_s0 + $0x3c] sm:$0xf] }
 0x663   : > { %v16351_v39 = vpop.eup %16350 }
 0x664   : > { %v2249_v40 = vmul.f32 %v16349_v21, %v2248_v38  ;;  %v2255_v41 = vmul.f32 %v16351_v39, %v2243_v22  ;;  %vm2261_vm10 = vweird.f32 %v16351_v39  ;;  %v12076_v22 = vld [vmem:[%s18666_s0 + $0xf0] sm:$0xf0]  ;;  %v12020_v38 = vld [vmem:[%s18666_s0 + $0x78] sm:$0xf0] }
 0x665   : > { %vm2262_vm12 = vmor %vm2260_vm11, %vm2261_vm10 }
 0x666   : > { %v2256_v42 = vmul.f32 %v16351_v39, %v2255_v41  ;;  %v2253_v43 = vsel %vm2252_vm9, %v16349_v21, %v2249_v40  ;;  %v15498_v21 = vld [vmem:[%s18666_s0 + $0xb4] sm:$0xf]  ;;  %v12015_v40 = vor.u32 %v15482_v18, %v12012_v33  ;;  %v12019_v41 = vor.u32 %v15491_v35, %v12018_v34  ;;  %v15543_v34 = vld [vmem:[%s18669_s1 + $0x118] sm:$0xff] }
 0x667   : > { %v2264_v48 = vmul.f32 %v2253_v43, %v16949_v32  ;;  %v12060_v32 = vld [vmem:[%s18666_s0 + $0xe0] sm:$0xf0]  ;;  %v12079_v45 = vor.u32 %v15498_v21, %v12076_v22  ;;  %v15531_v43 = vld [vmem:[%s18669_s1 + $0xb8] sm:$0xff]  ;;  %v15546_v21 = vld [vmem:[%s18669_s1 + $0x130] sm:$0xff] }
 0x668   : > { %v2257_v44 = vmul.f32 0.5, %v2256_v42  ;;  %v12063_v2 = vor.u32 %v15496_v58, %v12060_v32  ;;  %v12023_v42 = vor.u32 %v15483_v36, %v12020_v38  ;;  %v15536_v58 = vld [vmem:[%s18669_s1 + $0xe0] sm:$0xff]  ;;  %v15554_v22 = vld [vmem:[%s18669_s1 + $0x170] sm:$0xff]  ;;  %v15551_v35 = vld [vmem:[%s18669_s1 + $0x158] sm:$0xff] }
 0x669   : > { %v2269_v52 = vmul.f32 %v16265_v47, %v2264_v48  ;;  %v15530_v48 = vld [vmem:[%s18669_s1 + $0xb0] sm:$0xff]  ;;  %v15512_v32 = vld [vmem:[%s18669_s1 + $0x20] sm:$0xff]  ;;  %v15557_v36 = vld [vmem:[%s18669_s1 + $0x188] sm:$0xff] }
 0x66a   : > { %v2258_v46 = vsub.f32 1.5, %v2257_v44  ;;  %v15539_v44 = vld [vmem:[%s18669_s1 + $0xf8] sm:$0xff]  ;;  %v15558_v18 = vld [vmem:[%s18669_s1 + $0x190] sm:$0xff]  ;;  %v15565_v38 = vld [vmem:[%s18669_s1 + $0x1c8] sm:$0xff] }
 0x66b   : > { %v17008_v60 = vadd.f32 %v16266_v51, %v2269_v52  ;;  %v15529_v52 = vld [vmem:[%s18669_s1 + $0xa8] sm:$0xff]  ;;  %v15566_v33 = vld [vmem:[%s18669_s1 + $0x1d0] sm:$0xff] }
 0x66c   : > { %v2259_v49 = vmul.f32 %v16351_v39, %v2258_v46  ;;  %v15515_v46 = vld [vmem:[%s18669_s1 + $0x38] sm:$0xff] }
 0x66e   : > { %v2263_v50 = vsel %vm2262_vm12, %v16351_v39, %v2259_v49  ;;  %v12011_v39 = vor.u32 %v15490_v29, %v12010_v28  ;;  %v15538_v49 = vld [vmem:[%s18669_s1 + $0xf0] sm:$0xff]  ;;  %v15559_v28 = vld [vmem:[%s18669_s1 + $0x198] sm:$0xff] }
 0x66f   : > { %v2265_v53 = vmul.f32 %v2263_v50, %v16955_v37  ;;  %v12068_v37 = vld [vmem:[%s18666_s0 + $0xe8] sm:$0xf0]  ;;  %v15514_v50 = vld [vmem:[%s18669_s1 + $0x30] sm:$0xff]  ;;  %v15567_v29 = vld [vmem:[%s18669_s1 + $0x1d8] sm:$0xff] }
 0x670   : > { %v12071_v6 = vor.u32 %v15497_v63, %v12068_v37  ;;  %v15535_v63 = vld [vmem:[%s18669_s1 + $0xd8] sm:$0xff] }
 0x671   : > { %v2270_v54 = vmul.f32 %v16265_v47, %v2265_v53  ;;  %v15523_v47 = vld [vmem:[%s18669_s1 + $0x78] sm:$0xff]  ;;  %v15537_v53 = vld [vmem:[%s18669_s1 + $0xe8] sm:$0xff] }
 0x672   : > { %v15511_v37 = vld [vmem:[%s18669_s1 + $0x18] sm:$0xff] }
 0x673   : > { %v17010_v61 = vadd.f32 %v16266_v51, %v2270_v54  ;;  %v15522_v51 = vld [vmem:[%s18669_s1 + $0x70] sm:$0xff]  ;;  %v15513_v54 = vld [vmem:[%s18669_s1 + $0x28] sm:$0xff] }
 0x675   : > { %v17017_v0 = vpack.c.bf16 %v17010_v61, %v17008_v60 }
 0x677   : > { %12088 = vmatmul.msk.bf16.vlgmr.msrb.gmra.mxu2 %vm1760_vm2, %v17017_v0  ;;  %12089 = vmatmul.msk.bf16.vlgmr.msrb.gmra.mxu3 %vm1760_vm2, %v17017_v0 }
 0x678   : > { %12090 = vmatmul.msk.bf16.vlgmr.msra.gmra.mxu0 %vm1760_vm2, %v17017_v0  ;;  %12091 = vmatmul.msk.bf16.vlgmr.msra.gmra.mxu1 %vm1760_vm2, %v17017_v0 }
 0x679   : > { %2883 = vmatpush.bf16.msrb.mxu2 %v12059_v1  ;;  %2897 = vmatpush.bf16.msrb.mxu3 %v12063_v2  ;;  %v15519_v1 = vld [vmem:[%s18669_s1 + $0x58] sm:$0xff]  ;;  %v15526_v2 = vld [vmem:[%s18669_s1 + $0x90] sm:$0xff] }
 0x67a   : > { %2911 = vmatpush.bf16.msra.mxu0 %v12067_v5  ;;  %2925 = vmatpush.bf16.msra.mxu1 %v12071_v6  ;;  %v15518_v5 = vld [vmem:[%s18669_s1 + $0x50] sm:$0xff]  ;;  %v15525_v6 = vld [vmem:[%s18669_s1 + $0x88] sm:$0xff] }
 0x67d   : > { %2884 = vmatpush.bf16.msrb.mxu2 %v11995_v13  ;;  %2898 = vmatpush.bf16.msrb.mxu3 %v11999_v14  ;;  %v15508_v13 = vld [vmem:[%s18669_s1] sm:$0xff] }
 0x67e   : > { %2912 = vmatpush.bf16.msra.mxu0 %v12003_v15  ;;  %2926 = vmatpush.bf16.msra.mxu1 %v12007_v16  ;;  %v15516_v14 = vld [vmem:[%s18669_s1 + $0x40] sm:$0xff]  ;;  %v15547_v15 = vld [vmem:[%s18669_s1 + $0x138] sm:$0xff] }
 0x67f   : > { %v15555_v16 = vld [vmem:[%s18669_s1 + $0x178] sm:$0xff] }
 0x687   : > { %12092 = vmatmul.msk.bf16.vlgmr.msra.gmra.mxu2 %vm1760_vm2, %v17017_v0  ;;  %12093 = vmatmul.msk.bf16.vlgmr.msra.gmra.mxu3 %vm1760_vm2, %v17017_v0 }
 0x688   : > { %12094 = vmatmul.msk.bf16.vlgmr.msrb.gmra.mxu0 %vm1760_vm2, %v17017_v0  ;;  %12095 = vmatmul.msk.bf16.vlgmr.msrb.gmra.mxu1 %vm1760_vm2, %v17017_v0 }
 0x689   : > { %2939 = vmatpush.bf16.msra.mxu2 %v12075_v27  ;;  %2953 = vmatpush.bf16.msra.mxu3 %v12079_v45  ;;  %v15545_v27 = vld [vmem:[%s18669_s1 + $0x128] sm:$0xff] }
 0x68a   : > { %2967 = vmatpush.bf16.msrb.mxu0 %v12083_v30  ;;  %2981 = vmatpush.bf16.msrb.mxu1 %v12087_v31  ;;  %v15553_v45 = vld [vmem:[%s18669_s1 + $0x168] sm:$0xff]  ;;  %v15544_v30 = vld [vmem:[%s18669_s1 + $0x120] sm:$0xff] }
 0x68b   : > { %v15552_v31 = vld [vmem:[%s18669_s1 + $0x160] sm:$0xff] }
 0x68d   : > { %2940 = vmatpush.bf16.msra.mxu2 %v12011_v39  ;;  %2954 = vmatpush.bf16.msra.mxu3 %v12015_v40  ;;  %v15542_v39 = vld [vmem:[%s18669_s1 + $0x110] sm:$0xff] }
 0x68e   : > { %2968 = vmatpush.bf16.msrb.mxu0 %v12019_v41  ;;  %2982 = vmatpush.bf16.msrb.mxu1 %v12023_v42  ;;  %v15550_v40 = vld [vmem:[%s18669_s1 + $0x150] sm:$0xff]  ;;  %v15556_v41 = vld [vmem:[%s18669_s1 + $0x180] sm:$0xff] }
 0x68f   : > { %v15564_v42 = vld [vmem:[%s18669_s1 + $0x1c0] sm:$0xff] }
 0x697   : > { %12096 = vmatmul.msk.bf16.vlgmr.msrb.gmra.mxu2 %vm1760_vm2, %v17017_v0  ;;  %12097 = vmatmul.msk.bf16.vlgmr.msrb.gmra.mxu3 %vm1760_vm2, %v17017_v0 }
 0x698   : > { %12098 = vmatmul.msk.bf16.vlgmr.msra.gmra.mxu0 %vm1760_vm2, %v17017_v0  ;;  %12099 = vmatmul.msk.bf16.vlgmr.msra.gmra.mxu1 %vm1760_vm2, %v17017_v0 }
 0x699   : > { %3836 = vmatpush.bf16.msra.mxu0 %v15531_v43  ;;  %3850 = vmatpush.bf16.msra.mxu1 %v15539_v44  ;;  %v15541_v43 = vld [vmem:[%s18669_s1 + $0x108] sm:$0xff] }
 0x69a   : > { %3808 = vmatpush.bf16.msrb.mxu2 %v15515_v46  ;;  %3822 = vmatpush.bf16.msrb.mxu3 %v15523_v47  ;;  %v15549_v44 = vld [vmem:[%s18669_s1 + $0x148] sm:$0xff]  ;;  %v15540_v46 = vld [vmem:[%s18669_s1 + $0x100] sm:$0xff] }
 0x69b   : > { %v15548_v47 = vld [vmem:[%s18669_s1 + $0x140] sm:$0xff] }
 0x69d   : > { %3837 = vmatpush.bf16.msra.mxu0 %v15530_v48  ;;  %3851 = vmatpush.bf16.msra.mxu1 %v15538_v49  ;;  %v17140_v48 = vld [vmem:[%s18670_s16] sm:$0xff] }
 0x69e   : > { %3809 = vmatpush.bf16.msrb.mxu2 %v15514_v50  ;;  %3823 = vmatpush.bf16.msrb.mxu3 %v15522_v51  ;;  %v2572_v51 = vperm.slane %v17140_v48, 2 }
 0x6a1   : > { %3838 = vmatpush.bf16.msra.mxu0 %v15529_v52  ;;  %3852 = vmatpush.bf16.msra.mxu1 %v15537_v53  ;;  %v2573_v52 = vperm.slane %v17140_v48, 3 }
 0x6a2   : > { %3810 = vmatpush.bf16.msrb.mxu2 %v15513_v54  ;;  %3824 = vmatpush.bf16.msrb.mxu3 %v15521_v55 }
 0x6a5   : > { %3839 = vmatpush.bf16.msra.mxu0 %v15528_v56  ;;  %3853 = vmatpush.bf16.msra.mxu1 %v15536_v58  ;;  %v2570_v58 = vperm.slane %v17140_v48, 0 }
 0x6a6   : > { %3811 = vmatpush.bf16.msrb.mxu2 %v15512_v32  ;;  %3825 = vmatpush.bf16.msrb.mxu3 %v15520_v59  ;;  %v2571_v32 = vperm.slane %v17140_v48, 1 }
 0x6a7   : > { %12100 = vmatmul.msk.bf16.vlgmr.msra.gmra.mxu2 %vm1760_vm2, %v17017_v0  ;;  %12101 = vmatmul.msk.bf16.vlgmr.msra.gmra.mxu3 %vm1760_vm2, %v17017_v0 }
 0x6a8   : > { %12102 = vmatmul.msk.bf16.vlgmr.msrb.gmra.mxu0 %vm1760_vm2, %v17017_v0  ;;  %12103 = vmatmul.msk.bf16.vlgmr.msrb.gmra.mxu1 %vm1760_vm2, %v17017_v0  ;;  %v15533_v0 = vld [vmem:[%s18669_s1 + $0xc8] sm:$0xff] }
 0x6a9   : > { %3840 = vmatpush.bf16.msra.mxu0 %v15527_v62  ;;  %3854 = vmatpush.bf16.msra.mxu1 %v15535_v63 }
 0x6aa   : > { %3812 = vmatpush.bf16.msrb.mxu2 %v15511_v37  ;;  %3826 = vmatpush.bf16.msrb.mxu3 %v15519_v1 }
 0x6ad   : > { %3841 = vmatpush.bf16.msra.mxu0 %v15526_v2  ;;  %3855 = vmatpush.bf16.msra.mxu1 %v15534_v3 }
 0x6ae   : > { %3813 = vmatpush.bf16.msrb.mxu2 %v15510_v4  ;;  %3827 = vmatpush.bf16.msrb.mxu3 %v15518_v5 }
 0x6b1   : > { %3842 = vmatpush.bf16.msra.mxu0 %v15525_v6  ;;  %3856 = vmatpush.bf16.msra.mxu1 %v15533_v0  ;;  %v15595_v0 = vld [vmem:[%s18669_s1 + $0x2b8] sm:$0xff] }
 0x6b2   : > { %3814 = vmatpush.bf16.msrb.mxu2 %v15509_v7  ;;  %3828 = vmatpush.bf16.msrb.mxu3 %v15517_v8  ;;  %v15603_v7 = vld [vmem:[%s18669_s1 + $0x2f8] sm:$0xff] }
 0x6b5   : > { %3843 = vmatpush.bf16.msra.mxu0 %v15524_v9  ;;  %3857 = vmatpush.bf16.msra.mxu1 %v15532_v10 }
 0x6b6   : > { %3815 = vmatpush.bf16.msrb.mxu2 %v15508_v13  ;;  %3829 = vmatpush.bf16.msrb.mxu3 %v15516_v14 }
 0x6b9   : > { %3892 = vmatpush.bf16.msrb.mxu0 %v15563_v11  ;;  %3906 = vmatpush.bf16.msrb.mxu1 %v15571_v12 }
 0x6ba   : > { %3864 = vmatpush.bf16.msra.mxu2 %v15547_v15  ;;  %3878 = vmatpush.bf16.msra.mxu3 %v15555_v16 }
 0x6bd   : > { %3893 = vmatpush.bf16.msrb.mxu0 %v15562_v19  ;;  %3907 = vmatpush.bf16.msrb.mxu1 %v15570_v20 }
 0x6be   : > { %3865 = vmatpush.bf16.msra.mxu2 %v15546_v21  ;;  %3879 = vmatpush.bf16.msra.mxu3 %v15554_v22  ;;  %v15594_v22 = vld [vmem:[%s18669_s1 + $0x2b0] sm:$0xff] }
 0x6c1   : > { %3894 = vmatpush.bf16.msrb.mxu0 %v15561_v23  ;;  %3908 = vmatpush.bf16.msrb.mxu1 %v15569_v24  ;;  %v15602_v23 = vld [vmem:[%s18669_s1 + $0x2f0] sm:$0xff] }
 0x6c2   : > { %3866 = vmatpush.bf16.msra.mxu2 %v15545_v27  ;;  %3880 = vmatpush.bf16.msra.mxu3 %v15553_v45  ;;  %v15587_v27 = vld [vmem:[%s18669_s1 + $0x278] sm:$0xff]  ;;  %v2576_v45 = vperm.slane %v17140_v48, 6 }
 0x6c5   : > { %3895 = vmatpush.bf16.msrb.mxu0 %v15560_v25  ;;  %3909 = vmatpush.bf16.msrb.mxu1 %v15568_v26  ;;  %v15579_v26 = vld [vmem:[%s18669_s1 + $0x238] sm:$0xff] }
 0x6c6   : > { %3867 = vmatpush.bf16.msra.mxu2 %v15544_v30  ;;  %3881 = vmatpush.bf16.msra.mxu3 %v15552_v31  ;;  %v15601_v30 = vld [vmem:[%s18669_s1 + $0x2e8] sm:$0xff] }
 0x6c9   : > { %3896 = vmatpush.bf16.msrb.mxu0 %v15559_v28  ;;  %3910 = vmatpush.bf16.msrb.mxu1 %v15567_v29  ;;  %v2577_v28 = vperm.slane %v17140_v48, 7  ;;  %v15593_v29 = vld [vmem:[%s18669_s1 + $0x2a8] sm:$0xff] }
 0x6ca   : > { %3868 = vmatpush.bf16.msra.mxu2 %v15543_v34  ;;  %3882 = vmatpush.bf16.msra.mxu3 %v15551_v35  ;;  %v15586_v34 = vld [vmem:[%s18669_s1 + $0x270] sm:$0xff] }
 0x6cd   : > { %3897 = vmatpush.bf16.msrb.mxu0 %v15558_v18  ;;  %3911 = vmatpush.bf16.msrb.mxu1 %v15566_v33  ;;  %v15578_v33 = vld [vmem:[%s18669_s1 + $0x230] sm:$0xff] }
 0x6ce   : > { %3869 = vmatpush.bf16.msra.mxu2 %v15542_v39  ;;  %3883 = vmatpush.bf16.msra.mxu3 %v15550_v40  ;;  %v2575_v39 = vperm.slane %v17140_v48, 5 }
 0x6d1   : > { %3898 = vmatpush.bf16.msrb.mxu0 %v15557_v36  ;;  %3912 = vmatpush.bf16.msrb.mxu1 %v15565_v38  ;;  %v2574_v38 = vperm.slane %v17140_v48, 4 }
 0x6d2   : > { %3870 = vmatpush.bf16.msra.mxu2 %v15541_v43  ;;  %3884 = vmatpush.bf16.msra.mxu3 %v15549_v44  ;;  %v15600_v43 = vld [vmem:[%s18669_s1 + $0x2e0] sm:$0xff] }
 0x6d5   : > { %3899 = vmatpush.bf16.msrb.mxu0 %v15556_v41  ;;  %3913 = vmatpush.bf16.msrb.mxu1 %v15564_v42  ;;  %v15592_v42 = vld [vmem:[%s18669_s1 + $0x2a0] sm:$0xff] }
 0x6d6   : > { %3871 = vmatpush.bf16.msra.mxu2 %v15540_v46  ;;  %3885 = vmatpush.bf16.msra.mxu3 %v15548_v47  ;;  %v15577_v47 = vld [vmem:[%s18669_s1 + $0x228] sm:$0xff] }
 0x6f5   : > { %v2802_v49 = vpop.f32.mrf.mxu0  ;;  %v2816_v50 = vpop.f32.mrf.mxu1 }
 0x6f6   : > { %v2803_v55 = vadd.f32 %v2802_v49, %v2572_v51  ;;  %v2817_v56 = vadd.f32 %v2816_v50, %v2573_v52  ;;  %v15585_v49 = vld [vmem:[%s18669_s1 + $0x268] sm:$0xff] }
 0x6f8   : > { %v2991_v1 = vmax.f32 %v2803_v55, 0.0  ;;  %v2992_v2 = vmax.f32 %v2817_v56, 0.0  ;;  %v15591_v55 = vld [vmem:[%s18669_s1 + $0x298] sm:$0xff] }
 0x6f9   : > { %v15599_v56 = vld [vmem:[%s18669_s1 + $0x2d8] sm:$0xff] }
 0x6fa   : > { %v2774_v53 = vpop.f32.mrf.mxu2  ;;  %v2788_v54 = vpop.f32.mrf.mxu3 }
 0x6fb   : > { %v2775_v5 = vadd.f32 %v2774_v53, %v2570_v58  ;;  %v2789_v6 = vadd.f32 %v2788_v54, %v2571_v32 }
 0x6fd   : > { %v2804_v59 = vpop.f32.mrf.mxu0  ;;  %v2818_v62 = vpop.f32.mrf.mxu1  ;;  %v2989_v14 = vmax.f32 %v2775_v5, 0.0  ;;  %v2990_v15 = vmax.f32 %v2789_v6, 0.0 }
 0x6fe   : > { %v2805_v63 = vadd.f32 %v2804_v59, %v2572_v51  ;;  %v2819_v37 = vadd.f32 %v2818_v62, %v2573_v52 }
 0x700   : > { %v3007_v3 = vmax.f32 %v2805_v63, 0.0  ;;  %v3008_v4 = vmax.f32 %v2819_v37, 0.0 }
 0x702   : > { %v3023_v8 = vpack.c.bf16 %v3007_v3, %v2991_v1  ;;  %v3024_v9 = vpack.c.bf16 %v3008_v4, %v2992_v2  ;;  %v2776_v10 = vpop.f32.mrf.mxu2  ;;  %v2790_v11 = vpop.f32.mrf.mxu3  ;;  %v15576_v1 = vld [vmem:[%s18669_s1 + $0x220] sm:$0xff]  ;;  %v17169_v3 = vld [vmem:[%s18670_s16 + $0x8] sm:$0xff] }
 0x703   : > { %v2777_v12 = vadd.f32 %v2776_v10, %v2570_v58  ;;  %v2791_v13 = vadd.f32 %v2790_v11, %v2571_v32  ;;  %v15584_v2 = vld [vmem:[%s18669_s1 + $0x260] sm:$0xff]  ;;  %v15598_v10 = vld [vmem:[%s18669_s1 + $0x2d0] sm:$0xff] }
 0x704   : > { %3844 = vmatmul.bf16.vlgmr.msra.gmra.mxu0 %v3023_v8  ;;  %3858 = vmatmul.bf16.vlgmr.msra.gmra.mxu1 %v3024_v9  ;;  %v15590_v9 = vld [vmem:[%s18669_s1 + $0x290] sm:$0xff] }
 0x705   : > { %v3005_v16 = vmax.f32 %v2777_v12, 0.0  ;;  %v3006_v19 = vmax.f32 %v2791_v13, 0.0  ;;  %3948 = vmatpush.bf16.msra.mxu0 %v15595_v0  ;;  %3962 = vmatpush.bf16.msra.mxu1 %v15603_v7  ;;  %v2858_v20 = vpop.f32.mrf.mxu0  ;;  %v2872_v21 = vpop.f32.mrf.mxu1  ;;  %v15575_v13 = vld [vmem:[%s18669_s1 + $0x218] sm:$0xff] }
 0x706   : > { %v2859_v35 = vadd.f32 %v2858_v20, %v2576_v45  ;;  %v2873_v36 = vadd.f32 %v2872_v21, %v2577_v28  ;;  %v15597_v20 = vld [vmem:[%s18669_s1 + $0x2c8] sm:$0xff] }
 0x707   : > { %v3021_v24 = vpack.c.bf16 %v3005_v16, %v2989_v14  ;;  %v3022_v25 = vpack.c.bf16 %v3006_v19, %v2990_v15  ;;  %v15583_v14 = vld [vmem:[%s18669_s1 + $0x258] sm:$0xff]  ;;  %v2580_v15 = vperm.slane %v17169_v3, 2  ;;  %v2581_v16 = vperm.slane %v17169_v3, 3  ;;  %v15589_v19 = vld [vmem:[%s18669_s1 + $0x288] sm:$0xff] }
 0x708   : > { %v2995_v50 = vmax.f32 %v2859_v35, 0.0  ;;  %v2996_v51 = vmax.f32 %v2873_v36, 0.0  ;;  %v15635_v35 = vld [vmem:[%s18669_s1 + $0x3f8] sm:$0xff]  ;;  %v15573_v36 = vld [vmem:[%s18669_s1 + $0x208] sm:$0xff] }
 0x709   : > { %3949 = vmatpush.bf16.msra.mxu0 %v15594_v22  ;;  %3963 = vmatpush.bf16.msra.mxu1 %v15602_v23  ;;  %v15574_v23 = vld [vmem:[%s18669_s1 + $0x210] sm:$0xff] }
 0x70a   : > { %3816 = vmatmul.bf16.vlgmr.msrb.gmra.mxu2 %v3021_v24  ;;  %3830 = vmatmul.bf16.vlgmr.msrb.gmra.mxu3 %v3022_v25  ;;  %v2830_v31 = vpop.f32.mrf.mxu2  ;;  %v2844_v18 = vpop.f32.mrf.mxu3  ;;  %v15582_v24 = vld [vmem:[%s18669_s1 + $0x250] sm:$0xff] }
 0x70b   : > { %3920 = vmatpush.bf16.msrb.mxu2 %v15579_v26  ;;  %3934 = vmatpush.bf16.msrb.mxu3 %v15587_v27  ;;  %v2831_v48 = vadd.f32 %v2830_v31, %v2574_v38  ;;  %v2845_v54 = vadd.f32 %v2844_v18, %v2575_v39  ;;  %v2578_v27 = vperm.slane %v17169_v3, 0  ;;  %v15596_v31 = vld [vmem:[%s18669_s1 + $0x2c0] sm:$0xff] }
 0x70d   : > { %3950 = vmatpush.bf16.msra.mxu0 %v15593_v29  ;;  %3964 = vmatpush.bf16.msra.mxu1 %v15601_v30  ;;  %v2860_v40 = vpop.f32.mrf.mxu0  ;;  %v2874_v41 = vpop.f32.mrf.mxu1  ;;  %v2993_v4 = vmax.f32 %v2831_v48, 0.0  ;;  %v2994_v5 = vmax.f32 %v2845_v54, 0.0  ;;  %v15588_v30 = vld [vmem:[%s18669_s1 + $0x280] sm:$0xff] }
 0x70e   : > { %v2861_v44 = vadd.f32 %v2860_v40, %v2576_v45  ;;  %v2875_v46 = vadd.f32 %v2874_v41, %v2577_v28  ;;  %v2579_v45 = vperm.slane %v17169_v3, 1  ;;  %v15572_v54 = vld [vmem:[%s18669_s1 + $0x200] sm:$0xff] }
 0x70f   : > { %3921 = vmatpush.bf16.msrb.mxu2 %v15578_v33  ;;  %3935 = vmatpush.bf16.msrb.mxu3 %v15586_v34  ;;  %v15627_v34 = vld [vmem:[%s18669_s1 + $0x3b8] sm:$0xff] }
 0x710   : > { %v3011_v52 = vmax.f32 %v2861_v44, 0.0  ;;  %v3012_v53 = vmax.f32 %v2875_v46, 0.0 }
 0x711   : > { %3951 = vmatpush.bf16.msra.mxu0 %v15592_v42  ;;  %3965 = vmatpush.bf16.msra.mxu1 %v15600_v43 }
 0x712   : > { %v3027_v58 = vpack.c.bf16 %v3011_v52, %v2995_v50  ;;  %v3028_v32 = vpack.c.bf16 %v3012_v53, %v2996_v51  ;;  %v2832_v59 = vpop.f32.mrf.mxu2  ;;  %v2846_v62 = vpop.f32.mrf.mxu3  ;;  %v15626_v51 = vld [vmem:[%s18669_s1 + $0x3b0] sm:$0xff] }
 0x713   : > { %3922 = vmatpush.bf16.msrb.mxu2 %v15577_v47  ;;  %3936 = vmatpush.bf16.msrb.mxu3 %v15585_v49  ;;  %v2833_v63 = vadd.f32 %v2832_v59, %v2574_v38  ;;  %v2847_v37 = vadd.f32 %v2846_v62, %v2575_v39  ;;  %v15581_v38 = vld [vmem:[%s18669_s1 + $0x248] sm:$0xff]  ;;  %v15634_v52 = vld [vmem:[%s18669_s1 + $0x3f0] sm:$0xff] }
 0x714   : > { %3900 = vmatmul.bf16.vlgmr.msrb.gmra.mxu0 %v3027_v58  ;;  %3914 = vmatmul.bf16.vlgmr.msrb.gmra.mxu1 %v3028_v32  ;;  %v15619_v58 = vld [vmem:[%s18669_s1 + $0x378] sm:$0xff] }
 0x715   : > { %v3009_v6 = vmax.f32 %v2833_v63, 0.0  ;;  %v3010_v0 = vmax.f32 %v2847_v37, 0.0  ;;  %3952 = vmatpush.bf16.msra.mxu0 %v15591_v55  ;;  %3966 = vmatpush.bf16.msra.mxu1 %v15599_v56  ;;  %v2914_v7 = vpop.f32.mrf.mxu0  ;;  %v2928_v8 = vpop.f32.mrf.mxu1  ;;  %v15580_v55 = vld [vmem:[%s18669_s1 + $0x240] sm:$0xff]  ;;  %v15611_v56 = vld [vmem:[%s18669_s1 + $0x338] sm:$0xff]  ;;  %v15625_v37 = vld [vmem:[%s18669_s1 + $0x3a8] sm:$0xff] }
 0x716   : > { %v2915_v25 = vadd.f32 %v2914_v7, %v2580_v15  ;;  %v2929_v26 = vadd.f32 %v2928_v8, %v2581_v16  ;;  %v15624_v8 = vld [vmem:[%s18669_s1 + $0x3a0] sm:$0xff] }
 0x717   : > { %v3025_v11 = vpack.c.bf16 %v3009_v6, %v2993_v4  ;;  %v3026_v12 = vpack.c.bf16 %v3010_v0, %v2994_v5  ;;  %3923 = vmatpush.bf16.msrb.mxu2 %v15576_v1  ;;  %3937 = vmatpush.bf16.msrb.mxu3 %v15584_v2  ;;  %v15633_v1 = vld [vmem:[%s18669_s1 + $0x3e8] sm:$0xff]  ;;  %v15610_v5 = vld [vmem:[%s18669_s1 + $0x330] sm:$0xff] }
 0x718   : > { %v2999_v39 = vmax.f32 %v2915_v25, 0.0  ;;  %v3000_v40 = vmax.f32 %v2929_v26, 0.0  ;;  %v15618_v6 = vld [vmem:[%s18669_s1 + $0x370] sm:$0xff]  ;;  %v15615_v25 = vld [vmem:[%s18669_s1 + $0x358] sm:$0xff]  ;;  %v2584_v26 = vperm.slane %v17169_v3, 6 }
 0x719   : > { %3953 = vmatpush.bf16.msra.mxu0 %v15590_v9  ;;  %3967 = vmatpush.bf16.msra.mxu1 %v15598_v10  ;;  %v15632_v9 = vld [vmem:[%s18669_s1 + $0x3e0] sm:$0xff]  ;;  %v15609_v10 = vld [vmem:[%s18669_s1 + $0x328] sm:$0xff] }
 0x71a   : > { %3872 = vmatmul.bf16.vlgmr.msra.gmra.mxu2 %v3025_v11  ;;  %3886 = vmatmul.bf16.vlgmr.msra.gmra.mxu3 %v3026_v12  ;;  %v2886_v21 = vpop.f32.mrf.mxu2  ;;  %v2900_v22 = vpop.f32.mrf.mxu3  ;;  %v15617_v11 = vld [vmem:[%s18669_s1 + $0x368] sm:$0xff]  ;;  %v15623_v12 = vld [vmem:[%s18669_s1 + $0x398] sm:$0xff] }
 0x71b   : > { %3924 = vmatpush.bf16.msrb.mxu2 %v15575_v13  ;;  %3938 = vmatpush.bf16.msrb.mxu3 %v15583_v14  ;;  %v2887_v43 = vadd.f32 %v2886_v21, %v2578_v27  ;;  %v2901_v44 = vadd.f32 %v2900_v22, %v2579_v45  ;;  %v15631_v13 = vld [vmem:[%s18669_s1 + $0x3d8] sm:$0xff]  ;;  %v15630_v21 = vld [vmem:[%s18669_s1 + $0x3d0] sm:$0xff] }
 0x71d   : > { %3954 = vmatpush.bf16.msra.mxu0 %v15589_v19  ;;  %3968 = vmatpush.bf16.msra.mxu1 %v15597_v20  ;;  %v2916_v28 = vpop.f32.mrf.mxu0  ;;  %v2930_v29 = vpop.f32.mrf.mxu1  ;;  %v2997_v32 = vmax.f32 %v2887_v43, 0.0  ;;  %v2998_v59 = vmax.f32 %v2901_v44, 0.0  ;;  %v15616_v19 = vld [vmem:[%s18669_s1 + $0x360] sm:$0xff]  ;;  %v15622_v20 = vld [vmem:[%s18669_s1 + $0x390] sm:$0xff]  ;;  %v15605_v44 = vld [vmem:[%s18669_s1 + $0x308] sm:$0xff] }
 0x71e   : > { %v2917_v18 = vadd.f32 %v2916_v28, %v2580_v15  ;;  %v2931_v33 = vadd.f32 %v2930_v29, %v2581_v16  ;;  %v15608_v16 = vld [vmem:[%s18669_s1 + $0x320] sm:$0xff]  ;;  %v15629_v28 = vld [vmem:[%s18669_s1 + $0x3c8] sm:$0xff] }
 0x71f   : > { %3925 = vmatpush.bf16.msrb.mxu2 %v15574_v23  ;;  %3939 = vmatpush.bf16.msrb.mxu3 %v15582_v24  ;;  %v15607_v24 = vld [vmem:[%s18669_s1 + $0x318] sm:$0xff] }
 0x720   : > { %v3015_v41 = vmax.f32 %v2917_v18, 0.0  ;;  %v3016_v42 = vmax.f32 %v2931_v33, 0.0  ;;  %v15614_v18 = vld [vmem:[%s18669_s1 + $0x350] sm:$0xff] }
 0x721   : > { %3955 = vmatpush.bf16.msra.mxu0 %v15588_v30  ;;  %3969 = vmatpush.bf16.msra.mxu1 %v15596_v31  ;;  %v15606_v31 = vld [vmem:[%s18669_s1 + $0x310] sm:$0xff] }
 0x722   : > { %v3031_v46 = vpack.c.bf16 %v3015_v41, %v2999_v39  ;;  %v3032_v47 = vpack.c.bf16 %v3016_v42, %v3000_v40  ;;  %v2888_v49 = vpop.f32.mrf.mxu2  ;;  %v2902_v50 = vpop.f32.mrf.mxu3  ;;  %v15628_v39 = vld [vmem:[%s18669_s1 + $0x3c0] sm:$0xff]  ;;  %v2582_v40 = vperm.slane %v17169_v3, 4  ;;  %v2583_v41 = vperm.slane %v17169_v3, 5 }
 0x723   : > { %3926 = vmatpush.bf16.msrb.mxu2 %v15573_v36  ;;  %3940 = vmatpush.bf16.msrb.mxu3 %v15581_v38  ;;  %v2889_v53 = vadd.f32 %v2888_v49, %v2578_v27  ;;  %v2903_v48 = vadd.f32 %v2902_v50, %v2579_v45  ;;  %v2585_v27 = vperm.slane %v17169_v3, 7  ;;  %v15621_v45 = vld [vmem:[%s18669_s1 + $0x388] sm:$0xff]  ;;  %v15620_v38 = vld [vmem:[%s18669_s1 + $0x380] sm:$0xff] }
 0x724   : > { %3956 = vmatmul.bf16.vlgmr.msra.gmra.mxu0 %v3031_v46  ;;  %3970 = vmatmul.bf16.vlgmr.msra.gmra.mxu1 %v3032_v47  ;;  %v15613_v46 = vld [vmem:[%s18669_s1 + $0x348] sm:$0xff]  ;;  %v15604_v3 = vld [vmem:[%s18669_s1 + $0x300] sm:$0xff] }
 0x725   : > { %4004 = vmatpush.bf16.msrb.mxu0 %v15627_v34  ;;  %4018 = vmatpush.bf16.msrb.mxu1 %v15635_v35  ;;  %v3013_v62 = vmax.f32 %v2889_v53, 0.0  ;;  %v3014_v63 = vmax.f32 %v2903_v48, 0.0  ;;  %v2970_v0 = vpop.f32.mrf.mxu0  ;;  %v2984_v7 = vpop.f32.mrf.mxu1 }
 0x726   : > { %v2971_v33 = vadd.f32 %v2970_v0, %v2584_v26  ;;  %v2985_v34 = vadd.f32 %v2984_v7, %v2585_v27  ;;  %v16267_v7 = vld [vmem:[%s18671_s18] ss:$0 sm:$0xff] }
 0x727   : > { %v3029_v2 = vpack.c.bf16 %v3013_v62, %v2997_v32  ;;  %v3030_v4 = vpack.c.bf16 %v3014_v63, %v2998_v59  ;;  %3927 = vmatpush.bf16.msrb.mxu2 %v15572_v54  ;;  %3941 = vmatpush.bf16.msrb.mxu3 %v15580_v55  ;;  %v15612_v55 = vld [vmem:[%s18669_s1 + $0x340] sm:$0xff] }
 0x728   : > { %v3003_v47 = vmax.f32 %v2971_v33, 0.0  ;;  %v3004_v49 = vmax.f32 %v2985_v34, 0.0 }
 0x729   : > { %4005 = vmatpush.bf16.msrb.mxu0 %v15626_v51  ;;  %4019 = vmatpush.bf16.msrb.mxu1 %v15634_v52 }
 0x72a   : > { %3928 = vmatmul.bf16.vlgmr.msrb.gmra.mxu2 %v3029_v2  ;;  %3942 = vmatmul.bf16.vlgmr.msrb.gmra.mxu3 %v3030_v4  ;;  %v2942_v14 = vpop.f32.mrf.mxu2  ;;  %v2956_v15 = vpop.f32.mrf.mxu3 }
 0x72b   : > { %3976 = vmatpush.bf16.msra.mxu2 %v15611_v56  ;;  %3990 = vmatpush.bf16.msra.mxu3 %v15619_v58  ;;  %v2943_v52 = vadd.f32 %v2942_v14, %v2582_v40  ;;  %v2957_v53 = vadd.f32 %v2956_v15, %v2583_v41 }
 0x72d   : > { %4006 = vmatpush.bf16.msrb.mxu0 %v15625_v37  ;;  %4020 = vmatpush.bf16.msrb.mxu1 %v15633_v1  ;;  %v2972_v22 = vpop.f32.mrf.mxu0  ;;  %v2986_v23 = vpop.f32.mrf.mxu1  ;;  %v3001_v32 = vmax.f32 %v2943_v52, 0.0  ;;  %v3002_v59 = vmax.f32 %v2957_v53, 0.0 }
 0x72e   : > { %v2973_v29 = vadd.f32 %v2972_v22, %v2584_v26  ;;  %v2987_v30 = vadd.f32 %v2986_v23, %v2585_v27 }
 0x72f   : > { %3977 = vmatpush.bf16.msra.mxu2 %v15610_v5  ;;  %3991 = vmatpush.bf16.msra.mxu3 %v15618_v6 }
 0x730   : > { %v3019_v42 = vmax.f32 %v2973_v29, 0.0  ;;  %v3020_v43 = vmax.f32 %v2987_v30, 0.0 }
 0x731   : > { %4007 = vmatpush.bf16.msrb.mxu0 %v15624_v8  ;;  %4021 = vmatpush.bf16.msrb.mxu1 %v15632_v9 }
 0x732   : > { %v2944_v35 = vpop.f32.mrf.mxu2  ;;  %v2958_v36 = vpop.f32.mrf.mxu3  ;;  %v3035_v48 = vpack.c.bf16 %v3019_v42, %v3003_v47  ;;  %v3036_v54 = vpack.c.bf16 %v3020_v43, %v3004_v49 }
 0x733   : > { %3978 = vmatpush.bf16.msra.mxu2 %v15609_v10  ;;  %3992 = vmatpush.bf16.msra.mxu3 %v15617_v11  ;;  %v2945_v50 = vadd.f32 %v2944_v35, %v2582_v40  ;;  %v2959_v51 = vadd.f32 %v2958_v36, %v2583_v41 }
 0x735   : > { %4008 = vmatpush.bf16.msrb.mxu0 %v15623_v12  ;;  %4022 = vmatpush.bf16.msrb.mxu1 %v15631_v13  ;;  %v3017_v56 = vmax.f32 %v2945_v50, 0.0  ;;  %v3018_v58 = vmax.f32 %v2959_v51, 0.0 }
 0x737   : > { %3979 = vmatpush.bf16.msra.mxu2 %v15608_v16  ;;  %3993 = vmatpush.bf16.msra.mxu3 %v15616_v19  ;;  %v3033_v62 = vpack.c.bf16 %v3017_v56, %v3001_v32  ;;  %v3034_v63 = vpack.c.bf16 %v3018_v58, %v3002_v59 }
 0x739   : > { %4009 = vmatpush.bf16.msrb.mxu0 %v15622_v20  ;;  %4023 = vmatpush.bf16.msrb.mxu1 %v15630_v21 }
 0x73b   : > { %3980 = vmatpush.bf16.msra.mxu2 %v15607_v24  ;;  %3994 = vmatpush.bf16.msra.mxu3 %v15615_v25 }
 0x73d   : > { %4010 = vmatpush.bf16.msrb.mxu0 %v15621_v45  ;;  %4024 = vmatpush.bf16.msrb.mxu1 %v15629_v28 }
 0x73f   : > { %3981 = vmatpush.bf16.msra.mxu2 %v15606_v31  ;;  %3995 = vmatpush.bf16.msra.mxu3 %v15614_v18 }
 0x741   : > { %4011 = vmatpush.bf16.msrb.mxu0 %v15620_v38  ;;  %4025 = vmatpush.bf16.msrb.mxu1 %v15628_v39 }
 0x743   : > { %3982 = vmatpush.bf16.msra.mxu2 %v15605_v44  ;;  %3996 = vmatpush.bf16.msra.mxu3 %v15613_v46 }
 0x744   : > { %4012 = vmatmul.bf16.vlgmr.msrb.gmra.mxu0 %v3035_v48  ;;  %4026 = vmatmul.bf16.vlgmr.msrb.gmra.mxu1 %v3036_v54 }
 0x747   : > { %3983 = vmatpush.bf16.msra.mxu2 %v15604_v3  ;;  %3997 = vmatpush.bf16.msra.mxu3 %v15612_v55 }
 0x74a   : > { %3984 = vmatmul.bf16.vlgmr.msra.gmra.mxu2 %v3033_v62  ;;  %3998 = vmatmul.bf16.vlgmr.msra.gmra.mxu3 %v3034_v63 }
 0x781   : > { %v3845_v2 = vpop.f32.mrf.mxu0  ;;  %v3859_v4 = vpop.f32.mrf.mxu1 }
 0x789   : > { %v3847_v0 = vpop.f32.mrf.mxu0  ;;  %v3861_v8 = vpop.f32.mrf.mxu1 }
 0x78d   : > { %v3817_v37 = vpop.f32.mrf.mxu2  ;;  %v3831_v1 = vpop.f32.mrf.mxu3 }
 0x78e   : > { %v3818_v9 = vadd.f32 %v16267_v7, %v3817_v37 }
 0x790   : > { %v3832_v12 = vadd.f32 %v3831_v1, %v3818_v9 }
 0x791   : > { %v3901_v13 = vpop.f32.mrf.mxu0  ;;  %v3915_v14 = vpop.f32.mrf.mxu1 }
 0x792   : > { %v3846_v15 = vadd.f32 %v3845_v2, %v3832_v12 }
 0x794   : > { %v3860_v20 = vadd.f32 %v3859_v4, %v3846_v15 }
 0x795   : > { %v3819_v5 = vpop.f32.mrf.mxu2  ;;  %v3833_v6 = vpop.f32.mrf.mxu3 }
 0x796   : > { %v3820_v16 = vadd.f32 %v16267_v7, %v3819_v5 }
 0x798   : > { %v3834_v19 = vadd.f32 %v3833_v6, %v3820_v16 }
 0x799   : > { %v3903_v24 = vpop.f32.mrf.mxu0  ;;  %v3917_v26 = vpop.f32.mrf.mxu1 }
 0x79a   : > { %v3848_v25 = vadd.f32 %v3847_v0, %v3834_v19  ;;  %v15637_v19 = vld [vmem:[%s18656_s6 + $0x18] sm:$0xff] }
 0x79b   : > { %4143 = vmatpush.bf16.msrb.mxu2 %v15637_v19 }
 0x79c   : > { %v3862_v45 = vadd.f32 %v3861_v8, %v3848_v25  ;;  %v15638_v25 = vld [vmem:[%s18652_s20 + $0x10] sm:$0xff] }
 0x79d   : > { %v3873_v10 = vpop.f32.mrf.mxu2  ;;  %v3887_v11 = vpop.f32.mrf.mxu3 }
 0x79e   : > { %v3874_v23 = vadd.f32 %v3873_v10, %v3860_v20  ;;  %v15639_v20 = vld [vmem:[%s18652_s20 + $0x18] sm:$0xff]  ;;  %s18694_s20 = sld [smem:[#allocation9_spill]] }
 0x79f   : > { %4174 = vmatpush.bf16.msrb.mxu3 %v15639_v20 }
 0x7a0   : > { %v3888_v27 = vadd.f32 %v3887_v11, %v3874_v23 }
 0x7a1   : > { %v3957_v18 = vpop.f32.mrf.mxu0  ;;  %v3971_v35 = vpop.f32.mrf.mxu1 }
 0x7a2   : > { %v3902_v28 = vadd.f32 %v3901_v13, %v3888_v27 }
 0x7a3   : > { %4175 = vmatpush.bf16.msrb.mxu3 %v15638_v25 }
 0x7a4   : > { %v3916_v34 = vadd.f32 %v3915_v14, %v3902_v28 }
 0x7a5   : > { %v3875_v21 = vpop.f32.mrf.mxu2  ;;  %v3889_v22 = vpop.f32.mrf.mxu3 }
 0x7a6   : > { %v3876_v29 = vadd.f32 %v3875_v21, %v3862_v45  ;;  %v15641_v21 = vld [vmem:[%s18657_s4 + $0x18] sm:$0xff] }
 0x7a7   : > { %4203 = vmatpush.bf16.msra.mxu0 %v15641_v21 }
 0x7a8   : > { %v3890_v33 = vadd.f32 %v3889_v22, %v3876_v29 }
 0x7a9   : > { %v3959_v43 = vpop.f32.mrf.mxu0  ;;  %v3973_v47 = vpop.f32.mrf.mxu1 }
 0x7aa   : > { %v3904_v38 = vadd.f32 %v3903_v24, %v3890_v33  ;;  %v15636_v24 = vld [vmem:[%s18656_s6 + $0x10] sm:$0xff]  ;;  %s18680_s6 = sld [smem:[#allocation33_spill]] }
 0x7ab   : > { %4144 = vmatpush.bf16.msrb.mxu2 %v15636_v24 }
 0x7ac   : > { %v3918_v42 = vadd.f32 %v3917_v26, %v3904_v38  ;;  %v15640_v26 = vld [vmem:[%s18657_s4 + $0x10] sm:$0xff]  ;;  %s18674_s4 = smov 104  }
 0x7ad   : > { %v3929_v30 = vpop.f32.mrf.mxu2  ;;  %v3943_v31 = vpop.f32.mrf.mxu3  ;;  %4204 = vmatpush.bf16.msra.mxu0 %v15640_v26 }
 0x7ae   : > { %v3930_v36 = vadd.f32 %v3929_v30, %v3916_v34 }
 0x7b0   : > { %v3944_v39 = vadd.f32 %v3943_v31, %v3930_v36 }
 0x7b2   : > { %v3958_v44 = vadd.f32 %v3957_v18, %v3944_v39 }
 0x7b4   : > { %v3972_v50 = vadd.f32 %v3971_v35, %v3958_v44 }
 0x7b5   : > { %v3931_v40 = vpop.f32.mrf.mxu2  ;;  %v3945_v41 = vpop.f32.mrf.mxu3 }
 0x7b6   : > { %v3932_v46 = vadd.f32 %v3931_v40, %v3918_v42 }
 0x7b8   : > { %v3946_v49 = vadd.f32 %v3945_v41, %v3932_v46 }
 0x7ba   : > { %v3960_v54 = vadd.f32 %v3959_v43, %v3946_v49  ;;  %v16268_v43 = vld [vmem:[%s18672_s15] ss:$0 sm:$0xff] }
 0x7bb   : > { %v16269_v49 = vld [vmem:[%s18673_s11] ss:$0 sm:$0xff] }
 0x7bc   : > { %v3974_v58 = vadd.f32 %v3973_v47, %v3960_v54 }
 0x7c1   : > { %v4013_v48 = vpop.f32.mrf.mxu0  ;;  %v4027_v55 = vpop.f32.mrf.mxu1 }
 0x7c9   : > { %v4015_v4 = vpop.f32.mrf.mxu0  ;;  %v4029_v6 = vpop.f32.mrf.mxu1 }
 0x7cd   : > { %v3985_v51 = vpop.f32.mrf.mxu2  ;;  %v3999_v52 = vpop.f32.mrf.mxu3 }
 0x7ce   : > { %v3986_v53 = vadd.f32 %v3985_v51, %v3972_v50 }
 0x7d0   : > { %v4000_v3 = vadd.f32 %v3999_v52, %v3986_v53 }
 0x7d2   : > { %v4014_v56 = vadd.f32 %v4013_v48, %v4000_v3 }
 0x7d4   : > { %v4028_v32 = vadd.f32 %v4027_v55, %v4014_v56  ;;  %v16270_v55 = vld [vmem:[%s18650_s30 + $0x1] ss:$0 sm:$0xff]  ;;  %s18701_s30 = sld [smem:[#allocation53_spill]] }
 0x7d5   : > { %v3987_v59 = vpop.f32.mrf.mxu2  ;;  %v4001_v37 = vpop.f32.mrf.mxu3  ;;  %v16271_v56 = vld [vmem:[%s18655_s12 + $0x1] ss:$0 sm:$0xff]  ;;  %s18685_s12 = smov 112  }
 0x7d6   : > { %v3988_v62 = vadd.f32 %v3987_v59, %v3974_v58  ;;  %v4032_v63 = vadd.f32 %v4028_v32, %v17008_v60 }
 0x7d8   : > { %v4002_v1 = vadd.f32 %v4001_v37, %v3988_v62  ;;  %v4036_v2 = vsel %vm1760_vm2, %v4032_v63, 0.0  ;;  %v16272_v62 = vld [vmem:[%s18651_s27 + $0x1] ss:$0 sm:$0xff]  ;;  %s18697_s27 = sld [smem:[#allocation44_spill]] }
 0x7d9   : > { %4037 = vadd.xlane.f32.xlu1 %v4036_v2 }
 0x7da   : > { %v4016_v5 = vadd.f32 %v4015_v4, %v4002_v1 }
 0x7dc   : > { %v4030_v0 = vadd.f32 %v4029_v6, %v4016_v5 }
 0x7de   : > { %v4033_v7 = vadd.f32 %v4030_v0, %v17010_v61 }
 0x7e0   : > { %v4039_v8 = vsel %vm1760_vm2, %v4033_v7, 0.0 }
 0x7e1   : > { %4040 = vadd.xlane.f32.xlu0 %v4039_v8 }
 0x84c   : > { %v4038_v9 = vpop.xlane.xlu1 %4037 }
 0x84d   : > { %v4042_v60 = vmul.f32 %v4038_v9, %v16946_v17 }
 0x84f   : > { %v4044_v10 = vsub.f32 %v4032_v63, %v4042_v60 }
 0x851   : > { %v4046_v11 = vmul.f32 %v4044_v10, %v4044_v10 }
 0x853   : > { %v4048_v12 = vsel %vm1760_vm2, %v4046_v11, 0.0 }
 0x854   : > { %v4041_v13 = vpop.xlane.xlu0 %4040  ;;  %4049 = vadd.xlane.f32.xlu2 %v4048_v12 }
 0x855   : > { %v4043_v14 = vmul.f32 %v4041_v13, %v16946_v17 }
 0x857   : > { %v4045_v61 = vsub.f32 %v4033_v7, %v4043_v14 }
 0x859   : > { %v4047_v15 = vmul.f32 %v4045_v61, %v4045_v61 }
 0x85b   : > { %v4051_v16 = vsel %vm1760_vm2, %v4047_v15, 0.0 }
 0x85c   : > { %4052 = vadd.xlane.f32.xlu1 %v4051_v16 }
 0x8c7   : > { %v4050_v22 = vpop.xlane.xlu2 %4049 }
 0x8c8   : > { %v4054_v23 = vmul.f32 %v4050_v22, %v16946_v17 }
 0x8ca   : > { %v4056_v27 = vadd.f32 1e-05, %v4054_v23 }
 0x8cc   : > { %16352 = vrsqrt.f32 %v4056_v27  ;;  %vm4064_vm14 = vweird.f32 %v4056_v27 }
 0x8cf   : > { %v4053_v45 = vpop.xlane.xlu1 %4052 }
 0x8d0   : > { %v4055_v28 = vmul.f32 %v4053_v45, %v16946_v17 }
 0x8d2   : > { %v16353_v29 = vpop.eup %16352  ;;  %v4057_v30 = vadd.f32 1e-05, %v4055_v28 }
 0x8d3   : > { %v4059_v31 = vmul.f32 %v16353_v29, %v4056_v27  ;;  %vm4065_vm13 = vweird.f32 %v16353_v29 }
 0x8d4   : > { %16354 = vrsqrt.f32 %v4057_v30  ;;  %vm4066_vm15 = vmor %vm4064_vm14, %vm4065_vm13  ;;  %vm4074_vm1 = vweird.f32 %v4057_v30  ;;  %vm6663_vm13 = vcmask 1043456  }
 0x8d5   : > { %v4060_v18 = vmul.f32 %v16353_v29, %v4059_v31 }
 0x8d7   : > { %v4061_v33 = vmul.f32 0.5, %v4060_v18 }
 0x8d9   : > { %v4062_v34 = vsub.f32 1.5, %v4061_v33 }
 0x8da   : > { %v16355_v35 = vpop.eup %16354 }
 0x8db   : > { %v4063_v36 = vmul.f32 %v16353_v29, %v4062_v34  ;;  %v4069_v38 = vmul.f32 %v16355_v35, %v4057_v30  ;;  %vm4075_vm0 = vweird.f32 %v16355_v35 }
 0x8dc   : > { %vm4076_vm6 = vmor %vm4074_vm1, %vm4075_vm0 }
 0x8dd   : > { %v4070_v39 = vmul.f32 %v16355_v35, %v4069_v38  ;;  %v4067_v40 = vsel %vm4066_vm15, %v16353_v29, %v4063_v36 }
 0x8de   : > { %v4078_v44 = vmul.f32 %v4067_v40, %v4044_v10 }
 0x8df   : > { %v4071_v41 = vmul.f32 0.5, %v4070_v39 }
 0x8e0   : > { %v4083_v50 = vmul.f32 %v16268_v43, %v4078_v44 }
 0x8e1   : > { %v4072_v42 = vsub.f32 1.5, %v4071_v41 }
 0x8e2   : > { %v17244_v53 = vadd.f32 %v16269_v49, %v4083_v50 }
 0x8e3   : > { %v4073_v46 = vmul.f32 %v16355_v35, %v4072_v42 }
 0x8e5   : > { %v4077_v47 = vsel %vm4076_vm6, %v16355_v35, %v4073_v46 }
 0x8e6   : > { %v4079_v51 = vmul.f32 %v4077_v47, %v4045_v61 }
 0x8e8   : > { %v4084_v52 = vmul.f32 %v16268_v43, %v4079_v51 }
 0x8ea   : > { %v17246_v48 = vadd.f32 %v16269_v49, %v4084_v52 }
 0x8ec   : > { %v4118_v54 = vpack.c.bf16 %v17246_v48, %v17244_v53 }
 0x8ee   : > { %12644 = vmatmul.msk.bf16.vlgmr.msrb.gmra.mxu2 %vm1760_vm2, %v4118_v54  ;;  %12653 = vmatmul.msk.bf16.vlgmr.msrb.gmra.mxu3 %vm1760_vm2, %v4118_v54 }
 0x8ef   : > { %12662 = vmatmul.msk.bf16.vlgmr.msra.gmra.mxu0 %vm1760_vm2, %v4118_v54 }
 0x96c   : > { %v4206_v3 = vpop.f32.mrf.mxu0 }
 0x96d   : > { %v4207_v58 = vadd.f32 %v16270_v55, %v4206_v3 }
 0x96f   : > { %v4215_v1 = vpack.c.bf16 %v4207_v58, %v4207_v58 }
 0x971   : > { %v4146_v32 = vpop.f32.mrf.mxu2  ;;  %v4177_v59 = vpop.f32.mrf.mxu3  ;;  %v4278_v0 = vunpack.c.l.b16 %v4215_v1 }
 0x972   : > { %v4147_v63 = vadd.f32 %v16271_v56, %v4146_v32  ;;  %v4178_v4 = vadd.f32 %v16272_v62, %v4177_v59 }
 0x974   : > { %v4208_v37 = vpop.f32.mrf.mxu0  ;;  %v4151_v6 = vmul.f32 0.35355338, %v4147_v63  ;;  %v4213_v60 = vpack.c.bf16 %v4178_v4, %v4178_v4 }
 0x975   : > { %v4209_v2 = vadd.f32 %v16270_v55, %v4208_v37 }
 0x976   : > { %v4211_v13 = vpack.c.bf16 %v4151_v6, %v4151_v6  ;;  %v4224_v15 = vunpack.c.l.b16 %v4213_v60 }
 0x977   : > { %v4216_v5 = vpack.c.bf16 %v4209_v2, %v4209_v2 }
 0x978   : > { %v4219_v20 = vunpack.c.l.b16 %v4211_v13 }
 0x979   : > { %v4279_v7 = vunpack.c.l.b16 %v4216_v5  ;;  %v4148_v8 = vpop.f32.mrf.mxu2  ;;  %v4179_v9 = vpop.f32.mrf.mxu3 }
 0x97a   : > { %v4149_v10 = vadd.f32 %v16271_v56, %v4148_v8  ;;  %v4180_v11 = vadd.f32 %v16272_v62, %v4179_v9 }
 0x97b   : > { %v17256_v12 = vpack.c.b16 %v4279_v7, %v4278_v0 }
 0x97c   : > { %v4152_v14 = vmul.f32 0.35355338, %v4149_v10  ;;  %v4214_v61 = vpack.c.bf16 %v4180_v11, %v4180_v11 }
 0x97d   : > { %4292 = vmatpush.bf16.msra.mxu2 %v17256_v12 }
 0x97e   : > { %v4212_v16 = vpack.c.bf16 %v4152_v14, %v4152_v14  ;;  %v4225_v19 = vunpack.c.l.b16 %v4214_v61 }
 0x980   : > { %v4220_v21 = vunpack.c.l.b16 %v4212_v16  ;;  %v4226_v22 = vpack.c.b16 %v4225_v19, %v4224_v15 }
 0x982   : > { %v4221_v23 = vpack.c.b16 %v4220_v21, %v4219_v20  ;;  %4374 = vrot.lane.b32.xlu1 %v4226_v22, %s18571_s7  ;;  %4301 = vrot.lane.b32.xlu0 %v4226_v22, %s18569_s10  ;;  %v4231_v24 = vsel %vm1854_vm3, %v4226_v22, 0 }
 0x983   : > { %4240 = vmatpush.bf16.xpose.msra.mxu1 %v4231_v24 }
 0x984   : > { %4299 = vrot.lane.b32.xlu2 %v4221_v23, %s18569_s10 }
 0x98a   : > { %4447 = vrot.lane.b32.xlu0 %v4226_v22, %s18674_s4  ;;  %12663 = vmatmul.msk.bf16.vlgmr.msra.gmra.mxu1 %vm1854_vm3, %v4221_v23 }
 0x98c   : > { %4372 = vrot.lane.b32.xlu2 %v4221_v23, %s18571_s7 }
 0x992   : > { %4445 = vrot.lane.b32.xlu0 %v4221_v23, %s18674_s4 }
 0x9de   : > { %v4300_v25 = vpop.permute.xlu2 %4299 }
 0x9e6   : > { %v4373_v29 = vpop.permute.xlu2 %4372 }
 0x9f4   : > { %v4375_v26 = vpop.permute.xlu1 %4374  ;;  %v4302_v27 = vpop.permute.xlu0 %4301 }
 0x9f5   : > { %v4380_v45 = vsel %vm1854_vm3, %v4375_v26, 0  ;;  %v4307_v28 = vsel %vm1854_vm3, %v4302_v27, 0 }
 0x9f6   : > { %4316 = vmatpush.bf16.xpose.msra.mxu3 %v4307_v28  ;;  %4389 = vmatpush.bf16.xpose.msrb.mxu1 %v4380_v45 }
 0x9fc   : > { %v4448_v30 = vpop.permute.xlu0 %4447 }
 0x9fd   : > { %v4453_v31 = vsel %vm1854_vm3, %v4448_v30, 0  ;;  %12665 = vmatmul.msk.bf16.vlgmr.msra.gmra.mxu3 %vm1854_vm3, %v4300_v25  ;;  %12667 = vmatmul.msk.bf16.vlgmr.msrb.gmra.mxu1 %vm1854_vm3, %v4373_v29 }
 0x9fe   : > { %4462 = vmatpush.bf16.xpose.msrb.mxu3 %v4453_v31 }
 0xa04   : > { %v4446_v34 = vpop.permute.xlu0 %4445 }
 0xa07   : > { %v4242_v18 = vpop.f32.mrf.mxu1 }
 0xa08   : > { %v4247_v33 = vsel %vm1875_vm4, %v4242_v18, -inf }
 0xa09   : > { %4248 = vmax.xlane.f32.xlu1 %v4247_v33 }
 0xa0d   : > { %12669 = vmatmul.msk.bf16.vlgmr.msrb.gmra.mxu3 %vm1854_vm3, %v4446_v34 }
 0xa0f   : > { %v4244_v35 = vpop.f32.mrf.mxu1 }
 0xa10   : > { %v4250_v36 = vsel %vm1875_vm4, %v4244_v35, -inf }
 0xa11   : > { %4251 = vmax.xlane.f32.xlu2 %v4250_v36 }
 0xa7a   : > { %v4391_v38 = vpop.f32.mrf.mxu1 }
 0xa7b   : > { %v4396_v39 = vsel %vm1875_vm4, %v4391_v38, -inf }
 0xa7c   : > { %4397 = vmax.xlane.f32.xlu2 %v4396_v39  ;;  %v4249_v40 = vpop.xlane.xlu1 %4248 }
 0xa7d   : > { %v4253_v41 = vsub.f32 %v4242_v18, %v4249_v40 }
 0xa7f   : > { %v4255_v44 = vmul.f32 1.442695, %v4253_v41 }
 0xa80   : > { %v4318_v42 = vpop.f32.mrf.mxu3 }
 0xa81   : > { %v4323_v43 = vsel %vm1875_vm4, %v4318_v42, -inf  ;;  %16356 = vpow2.f32 %v4255_v44 }
 0xa82   : > { %4324 = vmax.xlane.f32.xlu0 %v4323_v43  ;;  %v4393_v49 = vpop.f32.mrf.mxu1 }
 0xa83   : > { %v4399_v54 = vsel %vm1875_vm4, %v4393_v49, -inf }
 0xa84   : > { %v4252_v46 = vpop.xlane.xlu2 %4251 }
 0xa85   : > { %v4254_v47 = vsub.f32 %v4244_v35, %v4252_v46 }
 0xa87   : > { %v4257_v50 = vmul.f32 1.442695, %v4254_v47  ;;  %v16357_v3 = vpop.eup %16356 }
 0xa88   : > { %v4320_v51 = vpop.f32.mrf.mxu3  ;;  %v4259_v32 = vsel %vm1875_vm4, %v16357_v3, 0.0 }
 0xa89   : > { %16358 = vpow2.f32 %v4257_v50  ;;  %v4326_v52 = vsel %vm1875_vm4, %v4320_v51, -inf }
 0xa8a   : > { %4327 = vmax.xlane.f32.xlu1 %v4326_v52  ;;  %4400 = vmax.xlane.f32.xlu0 %v4399_v54 }
 0xa8f   : > { %v16359_v55 = vpop.eup %16358 }
 0xa90   : > { %v4464_v56 = vpop.f32.mrf.mxu3  ;;  %v4262_v58 = vsel %vm1875_vm4, %v16359_v55, 0.0 }
 0xa91   : > { %v4469_v63 = vsel %vm1875_vm4, %v4464_v56, -inf }
 0xa92   : > { %4260 = vadd.xlane.f32.xlu0 %v4259_v32  ;;  %4263 = vadd.xlane.f32.xlu1 %v4262_v58 }
 0xa98   : > { %v4466_v59 = vpop.f32.mrf.mxu3 }
 0xa99   : > { %v4472_v62 = vsel %vm1875_vm4, %v4466_v59, -inf }
 0xa9a   : > { %4473 = vmax.xlane.f32.xlu2 %v4472_v62  ;;  %4470 = vmax.xlane.f32.xlu1 %v4469_v63 }
 0xaef   : > { %v4398_v37 = vpop.xlane.xlu2 %4397 }
 0xaf0   : > { %v4402_v1 = vsub.f32 %v4391_v38, %v4398_v37 }
 0xaf2   : > { %v4404_v2 = vmul.f32 1.442695, %v4402_v1 }
 0xaf4   : > { %16360 = vpow2.f32 %v4404_v2 }
 0xaf5   : > { %v4325_v4 = vpop.xlane.xlu0 %4324 }
 0xaf6   : > { %v4329_v5 = vsub.f32 %v4318_v42, %v4325_v4 }
 0xaf8   : > { %v4331_v6 = vmul.f32 1.442695, %v4329_v5 }
 0xafa   : > { %v17283_v0 = vpop.eup %16360  ;;  %16362 = vpow2.f32 %v4331_v6 }
 0xafb   : > { %v4408_v7 = vsel %vm1875_vm4, %v17283_v0, 0.0 }
 0xafc   : > { %4409 = vadd.xlane.f32.xlu1 %v4408_v7 }
 0xafd   : > { %v4328_v8 = vpop.xlane.xlu1 %4327  ;;  %v4401_v9 = vpop.xlane.xlu0 %4400 }
 0xafe   : > { %v4330_v60 = vsub.f32 %v4320_v51, %v4328_v8  ;;  %v4403_v10 = vsub.f32 %v4393_v49, %v4401_v9 }
 0xb00   : > { %v16363_v11 = vpop.eup %16362  ;;  %v4333_v13 = vmul.f32 1.442695, %v4330_v60  ;;  %v4406_v14 = vmul.f32 1.442695, %v4403_v10 }
 0xb01   : > { %v4335_v61 = vsel %vm1875_vm4, %v16363_v11, 0.0 }
 0xb02   : > { %16364 = vpow2.f32 %v4333_v13  ;;  %4336 = vadd.xlane.f32.xlu2 %v4335_v61 }
 0xb03   : > { %16366 = vpow2.f32 %v4406_v14 }
 0xb05   : > { %v4261_v15 = vpop.xlane.xlu0 %4260  ;;  %v4264_v16 = vpop.xlane.xlu1 %4263 }
 0xb06   : > { %16368 = vrcp.f32 %v4261_v15 }
 0xb07   : > { %16370 = vrcp.f32 %v4264_v16 }
 0xb08   : > { %v16365_v19 = vpop.eup %16364 }
 0xb09   : > { %v17288_v20 = vpop.eup %16366  ;;  %v4338_v21 = vsel %vm1875_vm4, %v16365_v19, 0.0 }
 0xb0a   : > { %4339 = vadd.xlane.f32.xlu0 %v4338_v21  ;;  %v4411_v22 = vsel %vm1875_vm4, %v17288_v20, 0.0 }
 0xb0b   : > { %4412 = vadd.xlane.f32.xlu2 %v4411_v22 }
 0xb0c   : > { %v16369_v23 = vpop.eup %16368 }
 0xb0d   : > { %v16371_v24 = vpop.eup %16370  ;;  %v4267_v25 = vmul.f32 %v16369_v23, %v16357_v3  ;;  %v4471_v26 = vpop.xlane.xlu1 %4470 }
 0xb0e   : > { %v4474_v27 = vpop.xlane.xlu2 %4473  ;;  %v4268_v45 = vmul.f32 %v16371_v24, %v16359_v55  ;;  %v4475_v28 = vsub.f32 %v4464_v56, %v4471_v26 }
 0xb0f   : > { %v4476_v29 = vsub.f32 %v4466_v59, %v4474_v27  ;;  %v4269_v30 = vpack.c.bf16 %v4267_v25, %v4267_v25 }
 0xb10   : > { %v4270_v31 = vpack.c.bf16 %v4268_v45, %v4268_v45  ;;  %v4477_v18 = vmul.f32 1.442695, %v4475_v28  ;;  %v15643_v28 = vld [vmem:[%s18653_s19 + $0x18] sm:$0xff] }
 0xb11   : > { %v4479_v33 = vmul.f32 1.442695, %v4476_v29  ;;  %v4273_v34 = vunpack.c.l.b16 %v4269_v30  ;;  %4573 = vmatpush.bf16.msra.mxu1 %v15643_v28  ;;  %v15642_v29 = vld [vmem:[%s18653_s19 + $0x10] sm:$0xff]  ;;  %s18693_s19 = sld [smem:[#allocation43_spill]] }
 0xb12   : > { %v4274_v35 = vunpack.c.l.b16 %v4270_v31  ;;  %16372 = vpow2.f32 %v4477_v18 }
 0xb13   : > { %16374 = vpow2.f32 %v4479_v33 }
 0xb14   : > { %v4275_v36 = vpack.c.b16 %v4274_v35, %v4273_v34 }
 0xb15   : > { %4574 = vmatpush.bf16.msra.mxu1 %v15642_v29 }
 0xb16   : > { %12664 = vmatmul.msk.bf16.vlgmr.msra.gmra.mxu2 %vm1875_vm4, %v4275_v36 }
 0xb18   : > { %v16373_v38 = vpop.eup %16372 }
 0xb19   : > { %v16375_v39 = vpop.eup %16374  ;;  %v4481_v40 = vsel %vm1875_vm4, %v16373_v38, 0.0 }
 0xb1a   : > { %4482 = vadd.xlane.f32.xlu1 %v4481_v40  ;;  %v4484_v41 = vsel %vm1875_vm4, %v16375_v39, 0.0 }
 0xb1b   : > { %4485 = vadd.xlane.f32.xlu2 %v4484_v41 }
 0xb1e   : > { %4352 = vrot.lane.b32.xlu0 %v17256_v12, %s18569_s10  ;;  %s18675_s10 = smov 8  }
 0xb33   : > { %4498 = vrot.lane.b32.xlu2 %v17256_v12, %s18674_s4  ;;  %4425 = vrot.lane.b32.xlu1 %v17256_v12, %s18571_s7  ;;  %s18676_s7 = smov 24  }
 0xb6f   : > { %v4410_v47 = vpop.xlane.xlu1 %4409 }
 0xb75   : > { %v4337_v42 = vpop.xlane.xlu2 %4336 }
 0xb7d   : > { %v4340_v43 = vpop.xlane.xlu0 %4339 }
 0xb7e   : > { %16376 = vrcp.f32 %v4340_v43  ;;  %v4413_v50 = vpop.xlane.xlu2 %4412 }
 0xb7f   : > { %16378 = vrcp.f32 %v4337_v42 }
 0xb84   : > { %v16377_v44 = vpop.eup %16376 }
 0xb85   : > { %v16379_v46 = vpop.eup %16378  ;;  %v4344_v49 = vmul.f32 %v16377_v44, %v16365_v19 }
 0xb86   : > { %v4343_v51 = vmul.f32 %v16379_v46, %v16363_v11 }
 0xb87   : > { %v4346_v52 = vpack.c.bf16 %v4344_v49, %v4344_v49  ;;  %v16273_v49 = vld [vmem:[%s18654_s14 + $0x1] ss:$0 sm:$0xff]  ;;  %s18687_s14 = sld [smem:[#allocation37_spill]] }
 0xb88   : > { %v4345_v54 = vpack.c.bf16 %v4343_v51, %v4343_v51 }
 0xb89   : > { %v4350_v55 = vunpack.c.l.b16 %v4346_v52 }
 0xb8a   : > { %v4349_v58 = vunpack.c.l.b16 %v4345_v54 }
 0xb8c   : > { %v4351_v12 = vpack.c.b16 %v4350_v55, %v4349_v58 }
 0xb8d   : > { %v4483_v3 = vpop.xlane.xlu1 %4482 }
 0xb8e   : > { %16380 = vrcp.f32 %v4483_v3  ;;  %v4486_v56 = vpop.xlane.xlu2 %4485 }
 0xb8f   : > { %16382 = vrcp.f32 %v4486_v56 }
 0xb90   : > { %v4353_v32 = vpop.permute.xlu0 %4352  ;;  %16384 = vrcp.f32 %v4413_v50 }
 0xb91   : > { %4365 = vmatpush.bf16.msrb.mxu0 %v4353_v32  ;;  %16386 = vrcp.f32 %v4410_v47 }
 0xb94   : > { %v16381_v59 = vpop.eup %16380  ;;  %12666 = vmatmul.msk.bf16.vlgmr.msrb.gmra.mxu0 %vm1875_vm4, %v4351_v12 }
 0xb95   : > { %v16383_v62 = vpop.eup %16382  ;;  %v4489_v63 = vmul.f32 %v16381_v59, %v16373_v38 }
 0xb96   : > { %v4490_v37 = vmul.f32 %v16383_v62, %v16375_v39  ;;  %v4499_v1 = vpop.permute.xlu2 %4498  ;;  %v16385_v2 = vpop.eup %16384 }
 0xb97   : > { %4511 = vmatpush.bf16.msra.mxu0 %v4499_v1  ;;  %v16387_v4 = vpop.eup %16386  ;;  %v4491_v5 = vpack.c.bf16 %v4489_v63, %v4489_v63  ;;  %v4417_v7 = vmul.f32 %v16385_v2, %v17288_v20 }
 0xb98   : > { %v4492_v6 = vpack.c.bf16 %v4490_v37, %v4490_v37  ;;  %v4416_v8 = vmul.f32 %v16387_v4, %v17283_v0  ;;  %v13039_v4 = vld [vmem:[%s18666_s0 + $0x180] sm:$0xf] }
 0xb99   : > { %v4495_v9 = vunpack.c.l.b16 %v4491_v5  ;;  %v4419_v10 = vpack.c.bf16 %v4417_v7, %v4417_v7  ;;  %v4294_v21 = vpop.f32.mrf.mxu2  ;;  %v15668_v5 = vld [vmem:[%s18666_s0 + $0x1bc] sm:$0xf0] }
 0xb9a   : > { %v4496_v60 = vunpack.c.l.b16 %v4492_v6  ;;  %v4418_v11 = vpack.c.bf16 %v4416_v8, %v4416_v8  ;;  %v15660_v6 = vld [vmem:[%s18666_s0 + $0x184] sm:$0xf]  ;;  %v13040_v7 = vor.u32 %v15668_v5, %v13039_v4 }
 0xb9b   : > { %v4423_v14 = vunpack.c.l.b16 %v4419_v10  ;;  %v13041_v8 = vld [vmem:[%s18666_s0 + $0x1c0] sm:$0xf0] }
 0xb9c   : > { %v4497_v13 = vpack.c.b16 %v4496_v60, %v4495_v9  ;;  %v4422_v61 = vunpack.c.l.b16 %v4418_v11  ;;  %v13047_v9 = vld [vmem:[%s18666_s0 + $0x188] sm:$0xf]  ;;  %v13044_v11 = vor.u32 %v15660_v6, %v13041_v8 }
 0xb9d   : > { %v15669_v60 = vld [vmem:[%s18666_s0 + $0x1c4] sm:$0xf0] }
 0xb9e   : > { %v4424_v16 = vpack.c.b16 %v4423_v14, %v4422_v61  ;;  %v15661_v14 = vld [vmem:[%s18666_s0 + $0x18c] sm:$0xf]  ;;  %5154 = vmatpush.bf16.msra.mxu3 %v13044_v11 }
 0xb9f   : > { %v13049_v61 = vld [vmem:[%s18666_s0 + $0x1c8] sm:$0xf0] }
 0xba1   : > { %v4296_v23 = vpop.f32.mrf.mxu2 }
 0xba4   : > { %12670 = vmatmul.msk.bf16.vlgmr.msra.gmra.mxu0 %vm1875_vm4, %v4497_v13  ;;  %v13048_v13 = vor.u32 %v15669_v60, %v13047_v9  ;;  %v16274_v60 = vld [vmem:[%s18667_s28 + $0x1] ss:$0 sm:$0xff]  ;;  %s18700_s28 = sld [smem:[#allocation46_spill]] }
 0xba5   : > { %v4426_v15 = vpop.permute.xlu1 %4425 }
 0xba6   : > { %4438 = vmatpush.bf16.msrb.mxu2 %v4426_v15  ;;  %5168 = vmatpush.bf16.msrb.mxu0 %v13048_v13 }
 0xba9   : > { %12668 = vmatmul.msk.bf16.vlgmr.msrb.gmra.mxu2 %vm1875_vm4, %v4424_v16  ;;  %v13052_v16 = vor.u32 %v15661_v14, %v13049_v61  ;;  %v16275_v14 = vld [vmem:[%s18668_s2 + $0x1] ss:$0 sm:$0xff]  ;;  %s18679_s2 = sld [smem:[#allocation31_spill]] }
 0xbaa   : > { %5140 = vmatpush.bf16.msra.mxu2 %v13040_v7 }
 0xbab   : > { %5182 = vmatpush.bf16.msrb.mxu1 %v13052_v16 }
 0xc11   : > { %v4367_v19 = vpop.f32.mrf.mxu0 }
 0xc19   : > { %v4369_v20 = vpop.f32.mrf.mxu0 }
 0xc1a   : > { %v16243_v0 = vpack.i.bf16 %v4369_v20, %v4367_v19  ;;  %v12975_v19 = vld [vmem:[%s18666_s0 + $0x100] sm:$0xf] }
 0xc1b   : > { %v15652_v20 = vld [vmem:[%s18666_s0 + $0x13c] sm:$0xf0] }
 0xc1c   : > { %16244 = vrot.lane.b32.xlu0 %v16243_v0, %s18675_s10 }
 0xc21   : > { %v4513_v22 = vpop.f32.mrf.mxu0 }
 0xc29   : > { %v4515_v24 = vpop.f32.mrf.mxu0 }
 0xc2a   : > { %v16253_v25 = vpack.i.bf16 %v4515_v24, %v4513_v22  ;;  %v12976_v22 = vor.u32 %v15652_v20, %v12975_v19  ;;  %v12983_v24 = vld [vmem:[%s18666_s0 + $0x108] sm:$0xf]  ;;  %v13071_v19 = vld [vmem:[%s18666_s0 + $0x1a0] sm:$0xf] }
 0xc2b   : > { %v15672_v20 = vld [vmem:[%s18666_s0 + $0x1dc] sm:$0xf0] }
 0xc2c   : > { %v4440_v26 = vpop.f32.mrf.mxu2  ;;  %16254 = vrot.lane.b32.xlu1 %v16253_v25, %s18676_s7  ;;  %5141 = vmatpush.bf16.msra.mxu2 %v12976_v22 }
 0xc34   : > { %v4442_v27 = vpop.f32.mrf.mxu2 }
 0xc35   : > { %v16248_v45 = vpack.i.bf16 %v4442_v27, %v4440_v26  ;;  %v15653_v26 = vld [vmem:[%s18666_s0 + $0x144] sm:$0xf0]  ;;  %v15645_v27 = vld [vmem:[%s18666_s0 + $0x10c] sm:$0xf] }
 0xc36   : > { %v12984_v28 = vor.u32 %v15653_v26, %v12983_v24  ;;  %v15673_v24 = vld [vmem:[%s18666_s0 + $0x1e4] sm:$0xf0] }
 0xc37   : > { %16249 = vrot.lane.b32.xlu0 %v16248_v45, %s18677_s5  ;;  %v12985_v45 = vld [vmem:[%s18666_s0 + $0x148] sm:$0xf0] }
 0xc38   : > { %v12988_v29 = vor.u32 %v15645_v27, %v12985_v45  ;;  %5169 = vmatpush.bf16.msrb.mxu0 %v12984_v28  ;;  %v13072_v27 = vor.u32 %v15672_v20, %v13071_v19  ;;  %v13007_v28 = vld [vmem:[%s18666_s0 + $0x120] sm:$0xf]  ;;  %v15689_v19 = vld [vmem:[%s18669_s1 + $0x468] sm:$0xff] }
 0xc39   : > { %v15696_v20 = vld [vmem:[%s18669_s1 + $0x4a0] sm:$0xff] }
 0xc3a   : > { %5183 = vmatpush.bf16.msrb.mxu1 %v12988_v29  ;;  %v15656_v29 = vld [vmem:[%s18666_s0 + $0x15c] sm:$0xf0] }
 0xc8e   : > { %v16245_v30 = vpop.permute.xlu0 %16244 }
 0xc8f   : > { %v16247_v31 = vunpack.i.h.bf16 %v16245_v30  ;;  %v16246_v18 = vunpack.i.l.bf16 %v16245_v30 }
 0xc91   : > { %v4543_v38 = vsel %vm1854_vm3, %v4296_v23, %v16247_v31  ;;  %v4542_v39 = vsel %vm1854_vm3, %v4294_v21, %v16246_v18  ;;  %v15644_v21 = vld [vmem:[%s18666_s0 + $0x104] sm:$0xf]  ;;  %v13055_v31 = vld [vmem:[%s18666_s0 + $0x190] sm:$0xf] }
 0xc92   : > { %v12977_v23 = vld [vmem:[%s18666_s0 + $0x140] sm:$0xf0]  ;;  %v15670_v18 = vld [vmem:[%s18666_s0 + $0x1cc] sm:$0xf0] }
 0xc93   : > { %v12980_v25 = vor.u32 %v15644_v21, %v12977_v23  ;;  %v15664_v21 = vld [vmem:[%s18666_s0 + $0x1a4] sm:$0xf] }
 0xc95   : > { %5155 = vmatpush.bf16.msra.mxu3 %v12980_v25  ;;  %v15665_v25 = vld [vmem:[%s18666_s0 + $0x1ac] sm:$0xf] }
 0xc9e   : > { %v16255_v33 = vpop.permute.xlu1 %16254 }
 0xc9f   : > { %v16257_v40 = vunpack.i.h.bf16 %v16255_v33  ;;  %v16256_v41 = vunpack.i.l.bf16 %v16255_v33  ;;  %v15662_v33 = vld [vmem:[%s18666_s0 + $0x194] sm:$0xf] }
 0xca9   : > { %v16250_v34 = vpop.permute.xlu0 %16249 }
 0xcaa   : > { %v16252_v35 = vunpack.i.h.bf16 %v16250_v34  ;;  %v16251_v36 = vunpack.i.l.bf16 %v16250_v34 }
 0xcac   : > { %v4545_v42 = vsel %vm1875_vm4, %v4543_v38, %v16252_v35  ;;  %v4544_v43 = vsel %vm1875_vm4, %v4542_v39, %v16251_v36  ;;  %v13056_v35 = vor.u32 %v15670_v18, %v13055_v31  ;;  %v13057_v36 = vld [vmem:[%s18666_s0 + $0x1d0] sm:$0xf0]  ;;  %v13063_v38 = vld [vmem:[%s18666_s0 + $0x198] sm:$0xf]  ;;  %v15648_v18 = vld [vmem:[%s18666_s0 + $0x124] sm:$0xf] }
 0xcad   : > { %v4546_v44 = vsel %vm2175_vm5, %v4544_v43, %v16256_v41  ;;  %v4547_v46 = vsel %vm2175_vm5, %v4545_v42, %v16257_v40  ;;  %v15671_v39 = vld [vmem:[%s18666_s0 + $0x1d4] sm:$0xf0]  ;;  %v13060_v40 = vor.u32 %v15662_v33, %v13057_v36  ;;  %v15663_v42 = vld [vmem:[%s18666_s0 + $0x19c] sm:$0xf]  ;;  %v13009_v33 = vld [vmem:[%s18666_s0 + $0x160] sm:$0xf0] }
 0xcae   : > { %v4548_v47 = vpack.c.bf16 %v4547_v46, %v4546_v44  ;;  %v13064_v41 = vor.u32 %v15671_v39, %v13063_v38  ;;  %v13065_v43 = vld [vmem:[%s18666_s0 + $0x1d8] sm:$0xf0]  ;;  %v12991_v44 = vld [vmem:[%s18666_s0 + $0x110] sm:$0xf]  ;;  %5196 = vmatpush.bf16.msrb.mxu2 %v13056_v35  ;;  %v15657_v35 = vld [vmem:[%s18666_s0 + $0x164] sm:$0xf0]  ;;  %v13008_v39 = vor.u32 %v15656_v29, %v13007_v28 }
 0xcaf   : > { %5210 = vmatpush.bf16.msrb.mxu3 %v13060_v40  ;;  %v15649_v36 = vld [vmem:[%s18666_s0 + $0x12c] sm:$0xf]  ;;  %v13012_v40 = vor.u32 %v15648_v18, %v13009_v33  ;;  %v15702_v28 = vld [vmem:[%s18669_s1 + $0x4d0] sm:$0xff] }
 0xcb0   : > { %12679 = vmatmul.msk.bf16.vlgmr.msra.gmra.mxu1 %vm1760_vm2, %v4548_v47  ;;  %5224 = vmatpush.bf16.msra.mxu0 %v13064_v41  ;;  %v13017_v38 = vld [vmem:[%s18666_s0 + $0x168] sm:$0xf0]  ;;  %v15678_v29 = vld [vmem:[%s18669_s1 + $0x410] sm:$0xff] }
 0xcb1   : > { %v15677_v18 = vld [vmem:[%s18669_s1 + $0x408] sm:$0xff] }
 0xcb2   : > { %v15685_v33 = vld [vmem:[%s18669_s1 + $0x448] sm:$0xff] }
 0xd2d   : > { %v4576_v50 = vpop.f32.mrf.mxu1 }
 0xd2e   : > { %v4577_v51 = vadd.f32 %v16273_v49, %v4576_v50  ;;  %v15654_v50 = vld [vmem:[%s18666_s0 + $0x14c] sm:$0xf0] }
 0xd30   : > { %v4581_v52 = vadd.f32 %v4577_v51, %v17244_v53  ;;  %v15646_v51 = vld [vmem:[%s18666_s0 + $0x114] sm:$0xf] }
 0xd32   : > { %v4587_v54 = vsel %vm1760_vm2, %v4581_v52, 0.0 }
 0xd33   : > { %4588 = vadd.xlane.f32.xlu0 %v4587_v54  ;;  %v12992_v54 = vor.u32 %v15654_v50, %v12991_v44  ;;  %v15674_v44 = vld [vmem:[%s18666_s0 + $0x1ec] sm:$0xf0]  ;;  %v15675_v50 = vld [vmem:[%s18666_s0 + $0x1f4] sm:$0xf0] }
 0xd35   : > { %v4578_v3 = vpop.f32.mrf.mxu1  ;;  %5197 = vmatpush.bf16.msrb.mxu2 %v12992_v54 }
 0xd36   : > { %v4579_v55 = vadd.f32 %v16273_v49, %v4578_v3  ;;  %v13068_v49 = vor.u32 %v15663_v42, %v13065_v43  ;;  %v12993_v3 = vld [vmem:[%s18666_s0 + $0x150] sm:$0xf0]  ;;  %v13020_v42 = vor.u32 %v15649_v36, %v13017_v38  ;;  %v13087_v43 = vld [vmem:[%s18666_s0 + $0x1b0] sm:$0xf]  ;;  %v15731_v36 = vld [vmem:[%s18669_s1 + $0x5b8] sm:$0xff] }
 0xd37   : > { %v13088_v54 = vor.u32 %v15674_v44, %v13087_v43  ;;  %v15739_v38 = vld [vmem:[%s18669_s1 + $0x5f8] sm:$0xff]  ;;  %v15730_v43 = vld [vmem:[%s18669_s1 + $0x5b0] sm:$0xff] }
 0xd38   : > { %v4582_v56 = vadd.f32 %v4579_v55, %v17246_v48  ;;  %v12999_v55 = vld [vmem:[%s18666_s0 + $0x118] sm:$0xf]  ;;  %5238 = vmatpush.bf16.msra.mxu1 %v13068_v49  ;;  %v15738_v44 = vld [vmem:[%s18669_s1 + $0x5f0] sm:$0xff] }
 0xd39   : > { %v13095_v49 = vld [vmem:[%s18666_s0 + $0x1b8] sm:$0xf] }
 0xd3a   : > { %v4590_v58 = vsel %vm1760_vm2, %v4582_v56, 0.0 }
 0xd3b   : > { %4591 = vadd.xlane.f32.xlu2 %v4590_v58  ;;  %v12996_v58 = vor.u32 %v15646_v51, %v12993_v3  ;;  %v15667_v51 = vld [vmem:[%s18666_s0 + $0x1bc] sm:$0xf] }
 0xd3d   : > { %5211 = vmatpush.bf16.msrb.mxu3 %v12996_v58  ;;  %v13096_v58 = vor.u32 %v15675_v50, %v13095_v49  ;;  %v15729_v49 = vld [vmem:[%s18669_s1 + $0x5a8] sm:$0xff] }
 0xd3e   : > { %v15737_v50 = vld [vmem:[%s18669_s1 + $0x5e8] sm:$0xff] }
 0xda6   : > { %v4589_v32 = vpop.xlane.xlu0 %4588 }
 0xda7   : > { %v4593_v12 = vmul.f32 %v4589_v32, %v16946_v17 }
 0xda9   : > { %v17325_v59 = vsub.f32 %v4581_v52, %v4593_v12  ;;  %v15647_v12 = vld [vmem:[%s18666_s0 + $0x11c] sm:$0xf] }
 0xdab   : > { %v4597_v53 = vmul.f32 %v17325_v59, %v17325_v59 }
 0xdad   : > { %v4599_v62 = vsel %vm1760_vm2, %v4597_v53, 0.0  ;;  %v13001_v53 = vld [vmem:[%s18666_s0 + $0x158] sm:$0xf0] }
 0xdae   : > { %v4592_v63 = vpop.xlane.xlu2 %4591  ;;  %4600 = vadd.xlane.f32.xlu1 %v4599_v62 }
 0xdaf   : > { %v4594_v48 = vmul.f32 %v4592_v63, %v16946_v17  ;;  %v13004_v63 = vor.u32 %v15647_v12, %v13001_v53  ;;  %v15650_v12 = vld [vmem:[%s18666_s0 + $0x134] sm:$0xf] }
 0xdb0   : > { %v13025_v53 = vld [vmem:[%s18666_s0 + $0x170] sm:$0xf0] }
 0xdb1   : > { %v17331_v37 = vsub.f32 %v4582_v56, %v4594_v48  ;;  %v15655_v56 = vld [vmem:[%s18666_s0 + $0x154] sm:$0xf0]  ;;  %5239 = vmatpush.bf16.msra.mxu1 %v13004_v63 }
 0xdb2   : > { %v13000_v32 = vor.u32 %v15655_v56, %v12999_v55  ;;  %v13023_v55 = vld [vmem:[%s18666_s0 + $0x130] sm:$0xf]  ;;  %v15659_v63 = vld [vmem:[%s18666_s0 + $0x174] sm:$0xf0] }
 0xdb3   : > { %v4598_v1 = vmul.f32 %v17331_v37, %v17331_v37  ;;  %v15658_v56 = vld [vmem:[%s18666_s0 + $0x16c] sm:$0xf0] }
 0xdb4   : > { %5225 = vmatpush.bf16.msra.mxu0 %v13000_v32 }
 0xdb5   : > { %v4602_v2 = vsel %vm1760_vm2, %v4598_v1, 0.0 }
 0xdb6   : > { %4603 = vadd.xlane.f32.xlu0 %v4602_v2 }
 0xe21   : > { %v4601_v10 = vpop.xlane.xlu1 %4600 }
 0xe22   : > { %v4605_v15 = vmul.f32 %v4601_v10, %v16946_v17 }
 0xe24   : > { %v17348_v0 = vadd.f32 1e-05, %v4605_v15 }
 0xe26   : > { %16388 = vrsqrt.f32 %v17348_v0  ;;  %vm4615_vm8 = vweird.f32 %v17348_v0 }
 0xe29   : > { %v4604_v30 = vpop.xlane.xlu0 %4603 }
 0xe2a   : > { %v4606_v34 = vmul.f32 %v4604_v30, %v16946_v17 }
 0xe2c   : > { %v16389_v46 = vpop.eup %16388  ;;  %v4608_v47 = vadd.f32 1e-05, %v4606_v34  ;;  %v13015_v34 = vld [vmem:[%s18666_s0 + $0x128] sm:$0xf] }
 0xe2d   : > { %v4610_v52 = vmul.f32 %v16389_v46, %v17348_v0  ;;  %vm4616_vm7 = vweird.f32 %v16389_v46  ;;  %v13079_v0 = vld [vmem:[%s18666_s0 + $0x1a8] sm:$0xf]  ;;  %v13016_v41 = vor.u32 %v15657_v35, %v13015_v34  ;;  %v15692_v34 = vld [vmem:[%s18669_s1 + $0x480] sm:$0xff] }
 0xe2e   : > { %16390 = vrsqrt.f32 %v4608_v47  ;;  %vm4617_vm9 = vmor %vm4615_vm8, %vm4616_vm7  ;;  %vm4625_vm11 = vweird.f32 %v4608_v47  ;;  %v13080_v30 = vor.u32 %v15673_v24, %v13079_v0  ;;  %v15688_v0 = vld [vmem:[%s18669_s1 + $0x460] sm:$0xff]  ;;  %v15695_v24 = vld [vmem:[%s18669_s1 + $0x498] sm:$0xff] }
 0xe2f   : > { %v4611_v62 = vmul.f32 %v16389_v46, %v4610_v52  ;;  %v13097_v52 = vld [vmem:[%s18666_s0 + $0x1f8] sm:$0xf0]  ;;  %v15700_v35 = vld [vmem:[%s18669_s1 + $0x4c0] sm:$0xff] }
 0xe30   : > { %v13100_v32 = vor.u32 %v15667_v51, %v13097_v52  ;;  %v15728_v51 = vld [vmem:[%s18669_s1 + $0x5a0] sm:$0xff] }
 0xe31   : > { %v4612_v48 = vmul.f32 0.5, %v4611_v62  ;;  %v13031_v62 = vld [vmem:[%s18666_s0 + $0x138] sm:$0xf]  ;;  %v15736_v52 = vld [vmem:[%s18669_s1 + $0x5e0] sm:$0xff] }
 0xe33   : > { %v4613_v1 = vsub.f32 1.5, %v4612_v48  ;;  %v15651_v48 = vld [vmem:[%s18666_s0 + $0x13c] sm:$0xf] }
 0xe34   : > { %v16391_v2 = vpop.eup %16390 }
 0xe35   : > { %v4614_v4 = vmul.f32 %v16389_v46, %v4613_v1  ;;  %v4620_v5 = vmul.f32 %v16391_v2, %v4608_v47  ;;  %vm4626_vm10 = vweird.f32 %v16391_v2  ;;  %v13089_v47 = vld [vmem:[%s18666_s0 + $0x1f0] sm:$0xf0]  ;;  %v13033_v1 = vld [vmem:[%s18666_s0 + $0x178] sm:$0xf0] }
 0xe36   : > { %vm4627_vm12 = vmor %vm4625_vm11, %vm4626_vm10 }
 0xe37   : > { %v4621_v6 = vmul.f32 %v16391_v2, %v4620_v5  ;;  %v4618_v7 = vsel %vm4617_vm9, %v16389_v46, %v4614_v4  ;;  %v15666_v46 = vld [vmem:[%s18666_s0 + $0x1b4] sm:$0xf]  ;;  %v13028_v4 = vor.u32 %v15650_v12, %v13025_v53  ;;  %v13032_v5 = vor.u32 %v15659_v63, %v13031_v62  ;;  %v15711_v62 = vld [vmem:[%s18669_s1 + $0x518] sm:$0xff] }
 0xe38   : > { %v4629_v10 = vmul.f32 %v4618_v7, %v17325_v59  ;;  %v13073_v59 = vld [vmem:[%s18666_s0 + $0x1e0] sm:$0xf0]  ;;  %v13092_v3 = vor.u32 %v15666_v46, %v13089_v47  ;;  %v15699_v7 = vld [vmem:[%s18669_s1 + $0x4b8] sm:$0xff]  ;;  %v15714_v46 = vld [vmem:[%s18669_s1 + $0x530] sm:$0xff] }
 0xe39   : > { %v4622_v8 = vmul.f32 0.5, %v4621_v6  ;;  %v13076_v45 = vor.u32 %v15664_v21, %v13073_v59  ;;  %v13036_v6 = vor.u32 %v15651_v48, %v13033_v1  ;;  %v15704_v21 = vld [vmem:[%s18669_s1 + $0x4e0] sm:$0xff]  ;;  %v15722_v47 = vld [vmem:[%s18669_s1 + $0x570] sm:$0xff]  ;;  %v15719_v63 = vld [vmem:[%s18669_s1 + $0x558] sm:$0xff] }
 0xe3a   : > { %v4634_v61 = vmul.f32 %v16274_v60, %v4629_v10  ;;  %v15698_v10 = vld [vmem:[%s18669_s1 + $0x4b0] sm:$0xff]  ;;  %v15680_v59 = vld [vmem:[%s18669_s1 + $0x420] sm:$0xff]  ;;  %v15725_v48 = vld [vmem:[%s18669_s1 + $0x588] sm:$0xff] }
 0xe3b   : > { %v4623_v9 = vsub.f32 1.5, %v4622_v8  ;;  %v15707_v8 = vld [vmem:[%s18669_s1 + $0x4f8] sm:$0xff]  ;;  %v15726_v12 = vld [vmem:[%s18669_s1 + $0x590] sm:$0xff]  ;;  %v15733_v1 = vld [vmem:[%s18669_s1 + $0x5c8] sm:$0xff] }
 0xe3c   : > { %v17384_v22 = vadd.f32 %v16275_v14, %v4634_v61  ;;  %v15697_v61 = vld [vmem:[%s18669_s1 + $0x4a8] sm:$0xff]  ;;  %v15734_v53 = vld [vmem:[%s18669_s1 + $0x5d0] sm:$0xff] }
 0xe3d   : > { %v4624_v11 = vmul.f32 %v16391_v2, %v4623_v9  ;;  %v15683_v9 = vld [vmem:[%s18669_s1 + $0x438] sm:$0xff] }
 0xe3f   : > { %v4628_v13 = vsel %vm4627_vm12, %v16391_v2, %v4624_v11  ;;  %v13024_v2 = vor.u32 %v15658_v56, %v13023_v55  ;;  %v15706_v11 = vld [vmem:[%s18669_s1 + $0x4f0] sm:$0xff]  ;;  %v15727_v55 = vld [vmem:[%s18669_s1 + $0x598] sm:$0xff] }
 0xe40   : > { %v4630_v15 = vmul.f32 %v4628_v13, %v17331_v37  ;;  %v13081_v37 = vld [vmem:[%s18666_s0 + $0x1e8] sm:$0xf0]  ;;  %v15682_v13 = vld [vmem:[%s18669_s1 + $0x430] sm:$0xff]  ;;  %v15735_v56 = vld [vmem:[%s18669_s1 + $0x5d8] sm:$0xff]  ;;  %s18678_s0 = sld [smem:[#allocation35_spill]] }
 0xe41   : > { %v13084_v31 = vor.u32 %v15665_v25, %v13081_v37  ;;  %v15703_v25 = vld [vmem:[%s18669_s1 + $0x4d8] sm:$0xff] }
 0xe42   : > { %v4635_v16 = vmul.f32 %v16274_v60, %v4630_v15  ;;  %v15691_v60 = vld [vmem:[%s18669_s1 + $0x478] sm:$0xff]  ;;  %v15705_v15 = vld [vmem:[%s18669_s1 + $0x4e8] sm:$0xff] }
 0xe43   : > { %v15679_v37 = vld [vmem:[%s18669_s1 + $0x418] sm:$0xff] }
 0xe44   : > { %v17386_v23 = vadd.f32 %v16275_v14, %v4635_v16  ;;  %v15690_v14 = vld [vmem:[%s18669_s1 + $0x470] sm:$0xff]  ;;  %v15681_v16 = vld [vmem:[%s18669_s1 + $0x428] sm:$0xff] }
 0xe46   : > { %v17393_v26 = vpack.c.bf16 %v17386_v23, %v17384_v22 }
 0xe48   : > { %13101 = vmatmul.msk.bf16.vlgmr.msra.gmra.mxu2 %vm1760_vm2, %v17393_v26  ;;  %13102 = vmatmul.msk.bf16.vlgmr.msra.gmra.mxu3 %vm1760_vm2, %v17393_v26 }
 0xe49   : > { %13103 = vmatmul.msk.bf16.vlgmr.msrb.gmra.mxu0 %vm1760_vm2, %v17393_v26  ;;  %13104 = vmatmul.msk.bf16.vlgmr.msrb.gmra.mxu1 %vm1760_vm2, %v17393_v26 }
 0xe4a   : > { %5252 = vmatpush.bf16.msra.mxu2 %v13072_v27  ;;  %5266 = vmatpush.bf16.msra.mxu3 %v13076_v45  ;;  %v15687_v27 = vld [vmem:[%s18669_s1 + $0x458] sm:$0xff]  ;;  %v15694_v45 = vld [vmem:[%s18669_s1 + $0x490] sm:$0xff] }
 0xe4b   : > { %5280 = vmatpush.bf16.msrb.mxu0 %v13080_v30  ;;  %5294 = vmatpush.bf16.msrb.mxu1 %v13084_v31  ;;  %v15686_v30 = vld [vmem:[%s18669_s1 + $0x450] sm:$0xff]  ;;  %v15693_v31 = vld [vmem:[%s18669_s1 + $0x488] sm:$0xff] }
 0xe4e   : > { %5253 = vmatpush.bf16.msra.mxu2 %v13008_v39  ;;  %5267 = vmatpush.bf16.msra.mxu3 %v13012_v40  ;;  %v15676_v39 = vld [vmem:[%s18669_s1 + $0x400] sm:$0xff] }
 0xe4f   : > { %5281 = vmatpush.bf16.msrb.mxu0 %v13016_v41  ;;  %5295 = vmatpush.bf16.msrb.mxu1 %v13020_v42  ;;  %v15684_v40 = vld [vmem:[%s18669_s1 + $0x440] sm:$0xff]  ;;  %v15715_v41 = vld [vmem:[%s18669_s1 + $0x538] sm:$0xff] }
 0xe50   : > { %v15723_v42 = vld [vmem:[%s18669_s1 + $0x578] sm:$0xff] }
 0xe58   : > { %13105 = vmatmul.msk.bf16.vlgmr.msrb.gmra.mxu2 %vm1760_vm2, %v17393_v26  ;;  %13106 = vmatmul.msk.bf16.vlgmr.msrb.gmra.mxu3 %vm1760_vm2, %v17393_v26 }
 0xe59   : > { %13107 = vmatmul.msk.bf16.vlgmr.msra.gmra.mxu0 %vm1760_vm2, %v17393_v26  ;;  %13108 = vmatmul.msk.bf16.vlgmr.msra.gmra.mxu1 %vm1760_vm2, %v17393_v26 }
 0xe5a   : > { %5308 = vmatpush.bf16.msrb.mxu2 %v13088_v54  ;;  %5322 = vmatpush.bf16.msrb.mxu3 %v13092_v3  ;;  %v15713_v54 = vld [vmem:[%s18669_s1 + $0x528] sm:$0xff] }
 0xe5b   : > { %5336 = vmatpush.bf16.msra.mxu0 %v13096_v58  ;;  %5350 = vmatpush.bf16.msra.mxu1 %v13100_v32  ;;  %v15721_v3 = vld [vmem:[%s18669_s1 + $0x568] sm:$0xff]  ;;  %v15712_v58 = vld [vmem:[%s18669_s1 + $0x520] sm:$0xff] }
 0xe5c   : > { %v15720_v32 = vld [vmem:[%s18669_s1 + $0x560] sm:$0xff] }
 0xe5e   : > { %5309 = vmatpush.bf16.msrb.mxu2 %v13024_v2  ;;  %5323 = vmatpush.bf16.msrb.mxu3 %v13028_v4  ;;  %v15710_v2 = vld [vmem:[%s18669_s1 + $0x510] sm:$0xff] }
 0xe5f   : > { %5337 = vmatpush.bf16.msra.mxu0 %v13032_v5  ;;  %5351 = vmatpush.bf16.msra.mxu1 %v13036_v6  ;;  %v15718_v4 = vld [vmem:[%s18669_s1 + $0x550] sm:$0xff]  ;;  %v15724_v5 = vld [vmem:[%s18669_s1 + $0x580] sm:$0xff] }
 0xe60   : > { %v15732_v6 = vld [vmem:[%s18669_s1 + $0x5c0] sm:$0xff] }
 0xe68   : > { %13109 = vmatmul.msk.bf16.vlgmr.msra.gmra.mxu2 %vm1760_vm2, %v17393_v26  ;;  %13110 = vmatmul.msk.bf16.vlgmr.msra.gmra.mxu3 %vm1760_vm2, %v17393_v26 }
 0xe69   : > { %13111 = vmatmul.msk.bf16.vlgmr.msrb.gmra.mxu0 %vm1760_vm2, %v17393_v26  ;;  %13112 = vmatmul.msk.bf16.vlgmr.msrb.gmra.mxu1 %vm1760_vm2, %v17393_v26 }
 0xe6a   : > { %6205 = vmatpush.bf16.msrb.mxu0 %v15699_v7  ;;  %6219 = vmatpush.bf16.msrb.mxu1 %v15707_v8  ;;  %v15709_v7 = vld [vmem:[%s18669_s1 + $0x508] sm:$0xff] }
 0xe6b   : > { %6177 = vmatpush.bf16.msra.mxu2 %v15683_v9  ;;  %6191 = vmatpush.bf16.msra.mxu3 %v15691_v60  ;;  %v15717_v8 = vld [vmem:[%s18669_s1 + $0x548] sm:$0xff]  ;;  %v15708_v9 = vld [vmem:[%s18669_s1 + $0x500] sm:$0xff] }
 0xe6c   : > { %v15716_v60 = vld [vmem:[%s18669_s1 + $0x540] sm:$0xff] }
 0xe6e   : > { %6206 = vmatpush.bf16.msrb.mxu0 %v15698_v10  ;;  %6220 = vmatpush.bf16.msrb.mxu1 %v15706_v11  ;;  %v17516_v10 = vld [vmem:[%s18670_s16 + $0x10] sm:$0xff] }
 0xe6f   : > { %6178 = vmatpush.bf16.msra.mxu2 %v15682_v13  ;;  %6192 = vmatpush.bf16.msra.mxu3 %v15690_v14  ;;  %v4941_v14 = vperm.slane %v17516_v10, 2 }
 0xe72   : > { %6207 = vmatpush.bf16.msrb.mxu0 %v15697_v61  ;;  %6221 = vmatpush.bf16.msrb.mxu1 %v15705_v15  ;;  %v4942_v61 = vperm.slane %v17516_v10, 3 }
 0xe73   : > { %6179 = vmatpush.bf16.msra.mxu2 %v15681_v16  ;;  %6193 = vmatpush.bf16.msra.mxu3 %v15689_v19 }
 0xe76   : > { %6208 = vmatpush.bf16.msrb.mxu0 %v15696_v20  ;;  %6222 = vmatpush.bf16.msrb.mxu1 %v15704_v21  ;;  %v4939_v21 = vperm.slane %v17516_v10, 0 }
 0xe77   : > { %6180 = vmatpush.bf16.msra.mxu2 %v15680_v59  ;;  %6194 = vmatpush.bf16.msra.mxu3 %v15688_v0  ;;  %v4940_v59 = vperm.slane %v17516_v10, 1 }
 0xe78   : > { %13113 = vmatmul.msk.bf16.vlgmr.msrb.gmra.mxu2 %vm1760_vm2, %v17393_v26  ;;  %13114 = vmatmul.msk.bf16.vlgmr.msrb.gmra.mxu3 %vm1760_vm2, %v17393_v26 }
 0xe79   : > { %13115 = vmatmul.msk.bf16.vlgmr.msra.gmra.mxu0 %vm1760_vm2, %v17393_v26  ;;  %13116 = vmatmul.msk.bf16.vlgmr.msra.gmra.mxu1 %vm1760_vm2, %v17393_v26  ;;  %v15701_v26 = vld [vmem:[%s18669_s1 + $0x4c8] sm:$0xff] }
 0xe7a   : > { %6209 = vmatpush.bf16.msrb.mxu0 %v15695_v24  ;;  %6223 = vmatpush.bf16.msrb.mxu1 %v15703_v25 }
 0xe7b   : > { %6181 = vmatpush.bf16.msra.mxu2 %v15679_v37  ;;  %6195 = vmatpush.bf16.msra.mxu3 %v15687_v27 }
 0xe7e   : > { %6210 = vmatpush.bf16.msrb.mxu0 %v15694_v45  ;;  %6224 = vmatpush.bf16.msrb.mxu1 %v15702_v28 }
 0xe7f   : > { %6182 = vmatpush.bf16.msra.mxu2 %v15678_v29  ;;  %6196 = vmatpush.bf16.msra.mxu3 %v15686_v30 }
 0xe82   : > { %6211 = vmatpush.bf16.msrb.mxu0 %v15693_v31  ;;  %6225 = vmatpush.bf16.msrb.mxu1 %v15701_v26  ;;  %v15763_v26 = vld [vmem:[%s18669_s1 + $0x6b8] sm:$0xff] }
 0xe83   : > { %6183 = vmatpush.bf16.msra.mxu2 %v15677_v18  ;;  %6197 = vmatpush.bf16.msra.mxu3 %v15685_v33  ;;  %v15771_v18 = vld [vmem:[%s18669_s1 + $0x6f8] sm:$0xff] }
 0xe86   : > { %6212 = vmatpush.bf16.msrb.mxu0 %v15692_v34  ;;  %6226 = vmatpush.bf16.msrb.mxu1 %v15700_v35 }
 0xe87   : > { %6184 = vmatpush.bf16.msra.mxu2 %v15676_v39  ;;  %6198 = vmatpush.bf16.msra.mxu3 %v15684_v40 }
 0xe8a   : > { %6261 = vmatpush.bf16.msra.mxu0 %v15731_v36  ;;  %6275 = vmatpush.bf16.msra.mxu1 %v15739_v38 }
 0xe8b   : > { %6233 = vmatpush.bf16.msrb.mxu2 %v15715_v41  ;;  %6247 = vmatpush.bf16.msrb.mxu3 %v15723_v42 }
 0xe8e   : > { %6262 = vmatpush.bf16.msra.mxu0 %v15730_v43  ;;  %6276 = vmatpush.bf16.msra.mxu1 %v15738_v44 }
 0xe8f   : > { %6234 = vmatpush.bf16.msrb.mxu2 %v15714_v46  ;;  %6248 = vmatpush.bf16.msrb.mxu3 %v15722_v47  ;;  %v15762_v47 = vld [vmem:[%s18669_s1 + $0x6b0] sm:$0xff] }
 0xe92   : > { %6263 = vmatpush.bf16.msra.mxu0 %v15729_v49  ;;  %6277 = vmatpush.bf16.msra.mxu1 %v15737_v50  ;;  %v15770_v49 = vld [vmem:[%s18669_s1 + $0x6f0] sm:$0xff] }
 0xe93   : > { %6235 = vmatpush.bf16.msrb.mxu2 %v15713_v54  ;;  %6249 = vmatpush.bf16.msrb.mxu3 %v15721_v3  ;;  %v15755_v54 = vld [vmem:[%s18669_s1 + $0x678] sm:$0xff]  ;;  %v4945_v3 = vperm.slane %v17516_v10, 6 }
 0xe96   : > { %6264 = vmatpush.bf16.msra.mxu0 %v15728_v51  ;;  %6278 = vmatpush.bf16.msra.mxu1 %v15736_v52  ;;  %v15747_v52 = vld [vmem:[%s18669_s1 + $0x638] sm:$0xff] }
 0xe97   : > { %6236 = vmatpush.bf16.msrb.mxu2 %v15712_v58  ;;  %6250 = vmatpush.bf16.msrb.mxu3 %v15720_v32  ;;  %v15769_v58 = vld [vmem:[%s18669_s1 + $0x6e8] sm:$0xff] }
 0xe9a   : > { %6265 = vmatpush.bf16.msra.mxu0 %v15727_v55  ;;  %6279 = vmatpush.bf16.msra.mxu1 %v15735_v56  ;;  %v4946_v55 = vperm.slane %v17516_v10, 7  ;;  %v15761_v56 = vld [vmem:[%s18669_s1 + $0x6a8] sm:$0xff] }
 0xe9b   : > { %6237 = vmatpush.bf16.msrb.mxu2 %v15711_v62  ;;  %6251 = vmatpush.bf16.msrb.mxu3 %v15719_v63  ;;  %v15754_v62 = vld [vmem:[%s18669_s1 + $0x670] sm:$0xff] }
 0xe9e   : > { %6266 = vmatpush.bf16.msra.mxu0 %v15726_v12  ;;  %6280 = vmatpush.bf16.msra.mxu1 %v15734_v53  ;;  %v15746_v53 = vld [vmem:[%s18669_s1 + $0x630] sm:$0xff] }
 0xe9f   : > { %6238 = vmatpush.bf16.msrb.mxu2 %v15710_v2  ;;  %6252 = vmatpush.bf16.msrb.mxu3 %v15718_v4  ;;  %v4944_v2 = vperm.slane %v17516_v10, 5 }
 0xea2   : > { %6267 = vmatpush.bf16.msra.mxu0 %v15725_v48  ;;  %6281 = vmatpush.bf16.msra.mxu1 %v15733_v1  ;;  %v4943_v1 = vperm.slane %v17516_v10, 4 }
 0xea3   : > { %6239 = vmatpush.bf16.msrb.mxu2 %v15709_v7  ;;  %6253 = vmatpush.bf16.msrb.mxu3 %v15717_v8  ;;  %v15768_v7 = vld [vmem:[%s18669_s1 + $0x6e0] sm:$0xff] }
 0xea6   : > { %6268 = vmatpush.bf16.msra.mxu0 %v15724_v5  ;;  %6282 = vmatpush.bf16.msra.mxu1 %v15732_v6  ;;  %v15760_v6 = vld [vmem:[%s18669_s1 + $0x6a0] sm:$0xff] }
 0xea7   : > { %6240 = vmatpush.bf16.msrb.mxu2 %v15708_v9  ;;  %6254 = vmatpush.bf16.msrb.mxu3 %v15716_v60  ;;  %v15745_v60 = vld [vmem:[%s18669_s1 + $0x628] sm:$0xff] }
 0xec6   : > { %v5171_v11 = vpop.f32.mrf.mxu0  ;;  %v5185_v13 = vpop.f32.mrf.mxu1 }
 0xec7   : > { %v5172_v19 = vadd.f32 %v5171_v11, %v4941_v14  ;;  %v5186_v20 = vadd.f32 %v5185_v13, %v4942_v61  ;;  %v15753_v11 = vld [vmem:[%s18669_s1 + $0x668] sm:$0xff] }
 0xec9   : > { %v5360_v27 = vmax.f32 %v5172_v19, 0.0  ;;  %v5361_v45 = vmax.f32 %v5186_v20, 0.0  ;;  %v15759_v19 = vld [vmem:[%s18669_s1 + $0x698] sm:$0xff] }
 0xeca   : > { %v15767_v20 = vld [vmem:[%s18669_s1 + $0x6d8] sm:$0xff] }
 0xecb   : > { %v5143_v15 = vpop.f32.mrf.mxu2  ;;  %v5157_v16 = vpop.f32.mrf.mxu3 }
 0xecc   : > { %v5144_v30 = vadd.f32 %v5143_v15, %v4939_v21  ;;  %v5158_v31 = vadd.f32 %v5157_v16, %v4940_v59 }
 0xece   : > { %v5173_v0 = vpop.f32.mrf.mxu0  ;;  %v5187_v24 = vpop.f32.mrf.mxu1  ;;  %v5358_v40 = vmax.f32 %v5144_v30, 0.0  ;;  %v5359_v41 = vmax.f32 %v5158_v31, 0.0 }
 0xecf   : > { %v5174_v25 = vadd.f32 %v5173_v0, %v4941_v14  ;;  %v5188_v37 = vadd.f32 %v5187_v24, %v4942_v61 }
 0xed1   : > { %v5376_v28 = vmax.f32 %v5174_v25, 0.0  ;;  %v5377_v29 = vmax.f32 %v5188_v37, 0.0 }
 0xed3   : > { %v5392_v33 = vpack.c.bf16 %v5376_v28, %v5360_v27  ;;  %v5393_v34 = vpack.c.bf16 %v5377_v29, %v5361_v45  ;;  %v5145_v35 = vpop.f32.mrf.mxu2  ;;  %v5159_v36 = vpop.f32.mrf.mxu3  ;;  %v15744_v27 = vld [vmem:[%s18669_s1 + $0x620] sm:$0xff]  ;;  %v17545_v28 = vld [vmem:[%s18670_s16 + $0x18] sm:$0xff]  ;;  %s18688_s16 = sld [smem:[#allocation38_spill]] }
 0xed4   : > { %v5146_v38 = vadd.f32 %v5145_v35, %v4939_v21  ;;  %v5160_v39 = vadd.f32 %v5159_v36, %v4940_v59  ;;  %v15752_v45 = vld [vmem:[%s18669_s1 + $0x660] sm:$0xff]  ;;  %v15766_v35 = vld [vmem:[%s18669_s1 + $0x6d0] sm:$0xff] }
 0xed5   : > { %6213 = vmatmul.bf16.vlgmr.msrb.gmra.mxu0 %v5392_v33  ;;  %6227 = vmatmul.bf16.vlgmr.msrb.gmra.mxu1 %v5393_v34  ;;  %v15758_v34 = vld [vmem:[%s18669_s1 + $0x690] sm:$0xff] }
 0xed6   : > { %v5374_v42 = vmax.f32 %v5146_v38, 0.0  ;;  %v5375_v43 = vmax.f32 %v5160_v39, 0.0  ;;  %6317 = vmatpush.bf16.msrb.mxu0 %v15763_v26  ;;  %6331 = vmatpush.bf16.msrb.mxu1 %v15771_v18  ;;  %v5227_v44 = vpop.f32.mrf.mxu0  ;;  %v5241_v46 = vpop.f32.mrf.mxu1  ;;  %v15743_v39 = vld [vmem:[%s18669_s1 + $0x618] sm:$0xff] }
 0xed7   : > { %v5228_v63 = vadd.f32 %v5227_v44, %v4945_v3  ;;  %v5242_v48 = vadd.f32 %v5241_v46, %v4946_v55  ;;  %v15765_v44 = vld [vmem:[%s18669_s1 + $0x6c8] sm:$0xff] }
 0xed8   : > { %v5390_v50 = vpack.c.bf16 %v5374_v42, %v5358_v40  ;;  %v5391_v51 = vpack.c.bf16 %v5375_v43, %v5359_v41  ;;  %v15751_v40 = vld [vmem:[%s18669_s1 + $0x658] sm:$0xff]  ;;  %v4949_v41 = vperm.slane %v17545_v28, 2  ;;  %v4950_v42 = vperm.slane %v17545_v28, 3  ;;  %v15757_v43 = vld [vmem:[%s18669_s1 + $0x688] sm:$0xff] }
 0xed9   : > { %v5364_v13 = vmax.f32 %v5228_v63, 0.0  ;;  %v5365_v14 = vmax.f32 %v5242_v48, 0.0  ;;  %v15803_v63 = vld [vmem:[%s18669_s1 + $0x7f8] sm:$0xff]  ;;  %v15741_v48 = vld [vmem:[%s18669_s1 + $0x608] sm:$0xff] }
 0xeda   : > { %6318 = vmatpush.bf16.msrb.mxu0 %v15762_v47  ;;  %6332 = vmatpush.bf16.msrb.mxu1 %v15770_v49  ;;  %v15742_v49 = vld [vmem:[%s18669_s1 + $0x610] sm:$0xff] }
 0xedb   : > { %6185 = vmatmul.bf16.vlgmr.msra.gmra.mxu2 %v5390_v50  ;;  %6199 = vmatmul.bf16.vlgmr.msra.gmra.mxu3 %v5391_v51  ;;  %v5199_v32 = vpop.f32.mrf.mxu2  ;;  %v5213_v12 = vpop.f32.mrf.mxu3  ;;  %v15750_v50 = vld [vmem:[%s18669_s1 + $0x650] sm:$0xff] }
 0xedc   : > { %6289 = vmatpush.bf16.msra.mxu2 %v15747_v52  ;;  %6303 = vmatpush.bf16.msra.mxu3 %v15755_v54  ;;  %v5200_v10 = vadd.f32 %v5199_v32, %v4943_v1  ;;  %v5214_v16 = vadd.f32 %v5213_v12, %v4944_v2  ;;  %v4947_v54 = vperm.slane %v17545_v28, 0  ;;  %v15764_v32 = vld [vmem:[%s18669_s1 + $0x6c0] sm:$0xff] }
 0xede   : > { %6319 = vmatpush.bf16.msrb.mxu0 %v15761_v56  ;;  %6333 = vmatpush.bf16.msrb.mxu1 %v15769_v58  ;;  %v5229_v4 = vpop.f32.mrf.mxu0  ;;  %v5243_v5 = vpop.f32.mrf.mxu1  ;;  %v5362_v29 = vmax.f32 %v5200_v10, 0.0  ;;  %v5363_v30 = vmax.f32 %v5214_v16, 0.0  ;;  %v15756_v58 = vld [vmem:[%s18669_s1 + $0x680] sm:$0xff] }
 0xedf   : > { %v5230_v8 = vadd.f32 %v5229_v4, %v4945_v3  ;;  %v5244_v9 = vadd.f32 %v5243_v5, %v4946_v55  ;;  %v4948_v3 = vperm.slane %v17545_v28, 1  ;;  %v15740_v16 = vld [vmem:[%s18669_s1 + $0x600] sm:$0xff] }
 0xee0   : > { %6290 = vmatpush.bf16.msra.mxu2 %v15746_v53  ;;  %6304 = vmatpush.bf16.msra.mxu3 %v15754_v62  ;;  %v15795_v62 = vld [vmem:[%s18669_s1 + $0x7b8] sm:$0xff] }
 0xee1   : > { %v5380_v61 = vmax.f32 %v5230_v8, 0.0  ;;  %v5381_v15 = vmax.f32 %v5244_v9, 0.0 }
 0xee2   : > { %6320 = vmatpush.bf16.msrb.mxu0 %v15760_v6  ;;  %6334 = vmatpush.bf16.msrb.mxu1 %v15768_v7 }
 0xee3   : > { %v5396_v21 = vpack.c.bf16 %v5380_v61, %v5364_v13  ;;  %v5397_v59 = vpack.c.bf16 %v5381_v15, %v5365_v14  ;;  %v5201_v0 = vpop.f32.mrf.mxu2  ;;  %v5215_v24 = vpop.f32.mrf.mxu3  ;;  %v15794_v14 = vld [vmem:[%s18669_s1 + $0x7b0] sm:$0xff] }
 0xee4   : > { %6291 = vmatpush.bf16.msra.mxu2 %v15745_v60  ;;  %6305 = vmatpush.bf16.msra.mxu3 %v15753_v11  ;;  %v5202_v25 = vadd.f32 %v5201_v0, %v4943_v1  ;;  %v5216_v37 = vadd.f32 %v5215_v24, %v4944_v2  ;;  %v15749_v1 = vld [vmem:[%s18669_s1 + $0x648] sm:$0xff]  ;;  %v15802_v61 = vld [vmem:[%s18669_s1 + $0x7f0] sm:$0xff] }
 0xee5   : > { %6269 = vmatmul.bf16.vlgmr.msra.gmra.mxu0 %v5396_v21  ;;  %6283 = vmatmul.bf16.vlgmr.msra.gmra.mxu1 %v5397_v59  ;;  %v15787_v21 = vld [vmem:[%s18669_s1 + $0x778] sm:$0xff] }
 0xee6   : > { %v5378_v31 = vmax.f32 %v5202_v25, 0.0  ;;  %v5379_v26 = vmax.f32 %v5216_v37, 0.0  ;;  %6321 = vmatpush.bf16.msrb.mxu0 %v15759_v19  ;;  %6335 = vmatpush.bf16.msrb.mxu1 %v15767_v20  ;;  %v5283_v18 = vpop.f32.mrf.mxu0  ;;  %v5297_v33 = vpop.f32.mrf.mxu1  ;;  %v15748_v19 = vld [vmem:[%s18669_s1 + $0x640] sm:$0xff]  ;;  %v15779_v20 = vld [vmem:[%s18669_s1 + $0x738] sm:$0xff]  ;;  %v15793_v37 = vld [vmem:[%s18669_s1 + $0x7a8] sm:$0xff] }
 0xee7   : > { %v5284_v51 = vadd.f32 %v5283_v18, %v4949_v41  ;;  %v5298_v52 = vadd.f32 %v5297_v33, %v4950_v42  ;;  %v15792_v33 = vld [vmem:[%s18669_s1 + $0x7a0] sm:$0xff] }
 0xee8   : > { %v5394_v36 = vpack.c.bf16 %v5378_v31, %v5362_v29  ;;  %v5395_v38 = vpack.c.bf16 %v5379_v26, %v5363_v30  ;;  %6292 = vmatpush.bf16.msra.mxu2 %v15744_v27  ;;  %6306 = vmatpush.bf16.msra.mxu3 %v15752_v45  ;;  %v15801_v27 = vld [vmem:[%s18669_s1 + $0x7e8] sm:$0xff]  ;;  %v15778_v30 = vld [vmem:[%s18669_s1 + $0x730] sm:$0xff] }
 0xee9   : > { %v5368_v2 = vmax.f32 %v5284_v51, 0.0  ;;  %v5369_v4 = vmax.f32 %v5298_v52, 0.0  ;;  %v15786_v31 = vld [vmem:[%s18669_s1 + $0x770] sm:$0xff]  ;;  %v15783_v51 = vld [vmem:[%s18669_s1 + $0x758] sm:$0xff]  ;;  %v4953_v52 = vperm.slane %v17545_v28, 6 }
 0xeea   : > { %6322 = vmatpush.bf16.msrb.mxu0 %v15758_v34  ;;  %6336 = vmatpush.bf16.msrb.mxu1 %v15766_v35  ;;  %v15800_v34 = vld [vmem:[%s18669_s1 + $0x7e0] sm:$0xff]  ;;  %v15777_v35 = vld [vmem:[%s18669_s1 + $0x728] sm:$0xff] }
 0xeeb   : > { %6241 = vmatmul.bf16.vlgmr.msrb.gmra.mxu2 %v5394_v36  ;;  %6255 = vmatmul.bf16.vlgmr.msrb.gmra.mxu3 %v5395_v38  ;;  %v5255_v46 = vpop.f32.mrf.mxu2  ;;  %v5269_v47 = vpop.f32.mrf.mxu3  ;;  %v15785_v36 = vld [vmem:[%s18669_s1 + $0x768] sm:$0xff]  ;;  %v15791_v38 = vld [vmem:[%s18669_s1 + $0x798] sm:$0xff] }
 0xeec   : > { %6293 = vmatpush.bf16.msra.mxu2 %v15743_v39  ;;  %6307 = vmatpush.bf16.msra.mxu3 %v15751_v40  ;;  %v5256_v7 = vadd.f32 %v5255_v46, %v4947_v54  ;;  %v5270_v8 = vadd.f32 %v5269_v47, %v4948_v3  ;;  %v15799_v39 = vld [vmem:[%s18669_s1 + $0x7d8] sm:$0xff]  ;;  %v15798_v46 = vld [vmem:[%s18669_s1 + $0x7d0] sm:$0xff] }
 0xeee   : > { %6323 = vmatpush.bf16.msrb.mxu0 %v15757_v43  ;;  %6337 = vmatpush.bf16.msrb.mxu1 %v15765_v44  ;;  %v5285_v55 = vpop.f32.mrf.mxu0  ;;  %v5299_v56 = vpop.f32.mrf.mxu1  ;;  %v5366_v59 = vmax.f32 %v5256_v7, 0.0  ;;  %v5367_v0 = vmax.f32 %v5270_v8, 0.0  ;;  %v15784_v43 = vld [vmem:[%s18669_s1 + $0x760] sm:$0xff]  ;;  %v15790_v44 = vld [vmem:[%s18669_s1 + $0x790] sm:$0xff]  ;;  %v15809_v8 = vld [vmem:[%s18678_s0 + $0x8] sm:$0xff] }
 0xeef   : > { %v5286_v12 = vadd.f32 %v5285_v55, %v4949_v41  ;;  %v5300_v53 = vadd.f32 %v5299_v56, %v4950_v42  ;;  %v15776_v42 = vld [vmem:[%s18669_s1 + $0x720] sm:$0xff]  ;;  %v15797_v55 = vld [vmem:[%s18669_s1 + $0x7c8] sm:$0xff] }
 0xef0   : > { %6294 = vmatpush.bf16.msra.mxu2 %v15742_v49  ;;  %6308 = vmatpush.bf16.msra.mxu3 %v15750_v50  ;;  %v15775_v50 = vld [vmem:[%s18669_s1 + $0x718] sm:$0xff] }
 0xef1   : > { %v5384_v5 = vmax.f32 %v5286_v12, 0.0  ;;  %v5385_v6 = vmax.f32 %v5300_v53, 0.0  ;;  %v15782_v12 = vld [vmem:[%s18669_s1 + $0x750] sm:$0xff] }
 0xef2   : > { %6324 = vmatpush.bf16.msrb.mxu0 %v15756_v58  ;;  %6338 = vmatpush.bf16.msrb.mxu1 %v15764_v32  ;;  %v15774_v32 = vld [vmem:[%s18669_s1 + $0x710] sm:$0xff] }
 0xef3   : > { %v5400_v9 = vpack.c.bf16 %v5384_v5, %v5368_v2  ;;  %v5401_v60 = vpack.c.bf16 %v5385_v6, %v5369_v4  ;;  %v5257_v11 = vpop.f32.mrf.mxu2  ;;  %v5271_v13 = vpop.f32.mrf.mxu3  ;;  %v15796_v2 = vld [vmem:[%s18669_s1 + $0x7c0] sm:$0xff]  ;;  %v4951_v4 = vperm.slane %v17545_v28, 4  ;;  %v4952_v5 = vperm.slane %v17545_v28, 5 }
 0xef4   : > { %6295 = vmatpush.bf16.msra.mxu2 %v15741_v48  ;;  %6309 = vmatpush.bf16.msra.mxu3 %v15749_v1  ;;  %v5258_v15 = vadd.f32 %v5257_v11, %v4947_v54  ;;  %v5272_v10 = vadd.f32 %v5271_v13, %v4948_v3  ;;  %v4954_v54 = vperm.slane %v17545_v28, 7  ;;  %v15789_v3 = vld [vmem:[%s18669_s1 + $0x788] sm:$0xff]  ;;  %v15788_v1 = vld [vmem:[%s18669_s1 + $0x780] sm:$0xff] }
 0xef5   : > { %6325 = vmatmul.bf16.vlgmr.msrb.gmra.mxu0 %v5400_v9  ;;  %6339 = vmatmul.bf16.vlgmr.msrb.gmra.mxu1 %v5401_v60  ;;  %v15773_v9 = vld [vmem:[%s18669_s1 + $0x708] sm:$0xff] }
 0xef6   : > { %6373 = vmatpush.bf16.msra.mxu0 %v15795_v62  ;;  %6387 = vmatpush.bf16.msra.mxu1 %v15803_v63  ;;  %v5382_v24 = vmax.f32 %v5258_v15, 0.0  ;;  %v5383_v25 = vmax.f32 %v5272_v10, 0.0  ;;  %v5339_v26 = vpop.f32.mrf.mxu0  ;;  %v5353_v18 = vpop.f32.mrf.mxu1  ;;  %v15781_v60 = vld [vmem:[%s18669_s1 + $0x748] sm:$0xff] }
 0xef7   : > { %v5340_v53 = vadd.f32 %v5339_v26, %v4953_v52  ;;  %v5354_v62 = vadd.f32 %v5353_v18, %v4954_v54  ;;  %v15806_v26 = vld [vmem:[%s18680_s6] sm:$0xff] }
 0xef8   : > { %v5398_v45 = vpack.c.bf16 %v5382_v24, %v5366_v59  ;;  %v5399_v29 = vpack.c.bf16 %v5383_v25, %v5367_v0  ;;  %6296 = vmatpush.bf16.msra.mxu2 %v15740_v16  ;;  %6310 = vmatpush.bf16.msra.mxu3 %v15748_v19  ;;  %v15808_v19 = vld [vmem:[%s18678_s0] sm:$0xff]  ;;  %v15805_v24 = vld [vmem:[%s18679_s2 + $0x8] sm:$0xff] }
 0xef9   : > { %v5372_v11 = vmax.f32 %v5340_v53, 0.0  ;;  %v5373_v13 = vmax.f32 %v5354_v62, 0.0  ;;  %v15807_v25 = vld [vmem:[%s18680_s6 + $0x8] sm:$0xff] }
 0xefa   : > { %6374 = vmatpush.bf16.msra.mxu0 %v15794_v14  ;;  %6388 = vmatpush.bf16.msra.mxu1 %v15802_v61 }
 0xefb   : > { %6297 = vmatmul.bf16.vlgmr.msra.gmra.mxu2 %v5398_v45  ;;  %6311 = vmatmul.bf16.vlgmr.msra.gmra.mxu3 %v5399_v29  ;;  %v5311_v40 = vpop.f32.mrf.mxu2  ;;  %v5325_v41 = vpop.f32.mrf.mxu3 }
 0xefc   : > { %6345 = vmatpush.bf16.msrb.mxu2 %v15779_v20  ;;  %6359 = vmatpush.bf16.msrb.mxu3 %v15787_v21  ;;  %v5312_v15 = vadd.f32 %v5311_v40, %v4951_v4  ;;  %v5326_v28 = vadd.f32 %v5325_v41, %v4952_v5  ;;  %v15772_v20 = vld [vmem:[%s18669_s1 + $0x700] sm:$0xff] }
 0xefd   : > { %v15780_v21 = vld [vmem:[%s18669_s1 + $0x740] sm:$0xff]  ;;  %s18684_s1 = sld [smem:[#allocation34_spill]] }
 0xefe   : > { %6375 = vmatpush.bf16.msra.mxu0 %v15793_v37  ;;  %6389 = vmatpush.bf16.msra.mxu1 %v15801_v27  ;;  %v5341_v47 = vpop.f32.mrf.mxu0  ;;  %v5355_v49 = vpop.f32.mrf.mxu1  ;;  %v16263_v37 = vld [vmem:[%s18681_s9] ss:$0 sm:$0xff]  ;;  %v5370_v27 = vmax.f32 %v5312_v15, 0.0  ;;  %v5371_v45 = vmax.f32 %v5326_v28, 0.0  ;;  %s18682_s9 = sld [smem:[#allocation36_spill]] }
 0xeff   : > { %v5342_v56 = vadd.f32 %v5341_v47, %v4953_v52  ;;  %v5356_v58 = vadd.f32 %v5355_v49, %v4954_v54  ;;  %v1720_v18 = vadd.f32 %v16263_v37, %v16891_v57 }
 0xf00   : > { %6346 = vmatpush.bf16.msrb.mxu2 %v15778_v30  ;;  %6360 = vmatpush.bf16.msrb.mxu3 %v15786_v31  ;;  %v15804_v31 = vld [vmem:[%s18679_s2] sm:$0xff] }
 0xf01   : > { %v5388_v6 = vmax.f32 %v5342_v56, 0.0  ;;  %v5389_v7 = vmax.f32 %v5356_v58, 0.0 }
 0xf02   : > { %6376 = vmatpush.bf16.msra.mxu0 %v15792_v33  ;;  %6390 = vmatpush.bf16.msra.mxu1 %v15800_v34  ;;  %v16478_v33 = vld [vmem:[%s16849_s26] ss:$0 sm:$0xff]  ;;  %s18683_s26 = sld [smem:[#allocation32_spill]] }
 0xf03   : > { %v5313_v63 = vpop.f32.mrf.mxu2  ;;  %v5327_v48 = vpop.f32.mrf.mxu3  ;;  %v5404_v10 = vpack.c.bf16 %v5388_v6, %v5372_v11  ;;  %v5405_v16 = vpack.c.bf16 %v5389_v7, %v5373_v13  ;;  %v17610_v34 = vadd.f32 %v16478_v33, %v1720_v18 }
 0xf04   : > { %6347 = vmatpush.bf16.msrb.mxu2 %v15777_v35  ;;  %6361 = vmatpush.bf16.msrb.mxu3 %v15785_v36  ;;  %v5314_v14 = vadd.f32 %v5313_v63, %v4951_v4  ;;  %v5328_v61 = vadd.f32 %v5327_v48, %v4952_v5 }
 0xf05   : > { %v6537_v35 = vpack.c.bf16 %v17610_v34, %v17610_v34 }
 0xf06   : > { %6377 = vmatpush.bf16.msra.mxu0 %v15791_v38  ;;  %6391 = vmatpush.bf16.msra.mxu1 %v15799_v39  ;;  %v5386_v59 = vmax.f32 %v5314_v14, 0.0  ;;  %v5387_v0 = vmax.f32 %v5328_v61, 0.0  ;;  %v17618_v38 = vld [vmem:[%s18671_s18 + $0x1] ss:$0 sm:$0xff]  ;;  %s18692_s18 = sld [smem:[#allocation41_spill]] }
 0xf08   : > { %6348 = vmatpush.bf16.msrb.mxu2 %v15776_v42  ;;  %6362 = vmatpush.bf16.msrb.mxu3 %v15784_v43  ;;  %v5402_v29 = vpack.c.bf16 %v5386_v59, %v5370_v27  ;;  %v5403_v30 = vpack.c.bf16 %v5387_v0, %v5371_v45 }
 0xf0a   : > { %6378 = vmatpush.bf16.msra.mxu0 %v15790_v44  ;;  %6392 = vmatpush.bf16.msra.mxu1 %v15798_v46 }
 0xf0c   : > { %6349 = vmatpush.bf16.msrb.mxu2 %v15775_v50  ;;  %6363 = vmatpush.bf16.msrb.mxu3 %v15783_v51 }
 0xf0e   : > { %6379 = vmatpush.bf16.msra.mxu0 %v15789_v3  ;;  %6393 = vmatpush.bf16.msra.mxu1 %v15797_v55 }
 0xf10   : > { %6350 = vmatpush.bf16.msrb.mxu2 %v15774_v32  ;;  %6364 = vmatpush.bf16.msrb.mxu3 %v15782_v12 }
 0xf12   : > { %6380 = vmatpush.bf16.msra.mxu0 %v15788_v1  ;;  %6394 = vmatpush.bf16.msra.mxu1 %v15796_v2 }
 0xf14   : > { %6351 = vmatpush.bf16.msrb.mxu2 %v15773_v9  ;;  %6365 = vmatpush.bf16.msrb.mxu3 %v15781_v60 }
 0xf15   : > { %6381 = vmatmul.bf16.vlgmr.msra.gmra.mxu0 %v5404_v10  ;;  %6395 = vmatmul.bf16.vlgmr.msra.gmra.mxu1 %v5405_v16  ;;  %v16277_v16 = vld [vmem:[%s18682_s9] ss:$0 sm:$0xff] }
 0xf16   : > { %6619 = vmatpush.bf16.msrb.mxu0 %v15809_v8 }
 0xf18   : > { %6352 = vmatpush.bf16.msrb.mxu2 %v15772_v20  ;;  %6366 = vmatpush.bf16.msrb.mxu3 %v15780_v21 }
 0xf1a   : > { %6620 = vmatpush.bf16.msrb.mxu0 %v15808_v19 }
 0xf1b   : > { %6353 = vmatmul.bf16.vlgmr.msrb.gmra.mxu2 %v5402_v29  ;;  %6367 = vmatmul.bf16.vlgmr.msrb.gmra.mxu3 %v5403_v30  ;;  %v16278_v30 = vld [vmem:[%s18683_s26] ss:$0 sm:$0xff] }
 0xf1c   : > { %6562 = vmatpush.bf16.msra.mxu2 %v15805_v24  ;;  %6591 = vmatpush.bf16.msra.mxu3 %v15807_v25 }
 0xf20   : > { %6563 = vmatpush.bf16.msra.mxu2 %v15804_v31  ;;  %6592 = vmatpush.bf16.msra.mxu3 %v15806_v26  ;;  %v16279_v31 = vld [vmem:[%s18684_s1] ss:$0 sm:$0xff] }
 0xf25   : > { %13657 = vmatmul.msk.bf16.vlgmr.msrb.gmra.mxu0 %vm1760_vm2, %v6537_v35 }
 0xf2b   : > { %13639 = vmatmul.msk.bf16.vlgmr.msra.gmra.mxu2 %vm1760_vm2, %v6537_v35  ;;  %13648 = vmatmul.msk.bf16.vlgmr.msra.gmra.mxu3 %vm1760_vm2, %v6537_v35 }
 0xf52   : > { %v6214_v36 = vpop.f32.mrf.mxu0  ;;  %v6228_v57 = vpop.f32.mrf.mxu1 }
 0xf5a   : > { %v17620_v41 = vpop.f32.mrf.mxu0  ;;  %v17627_v50 = vpop.f32.mrf.mxu1 }
 0xf5e   : > { %v6186_v39 = vpop.f32.mrf.mxu2  ;;  %v6200_v40 = vpop.f32.mrf.mxu3 }
 0xf5f   : > { %v6187_v42 = vadd.f32 %v17618_v38, %v6186_v39 }
 0xf61   : > { %v6201_v43 = vadd.f32 %v6200_v40, %v6187_v42 }
 0xf62   : > { %v6270_v51 = vpop.f32.mrf.mxu0  ;;  %v6284_v55 = vpop.f32.mrf.mxu1 }
 0xf63   : > { %v6215_v44 = vadd.f32 %v6214_v36, %v6201_v43 }
 0xf65   : > { %v6229_v46 = vadd.f32 %v6228_v57, %v6215_v44 }
 0xf66   : > { %v17623_v47 = vpop.f32.mrf.mxu2  ;;  %v17625_v49 = vpop.f32.mrf.mxu3 }
 0xf6a   : > { %v17629_v58 = vpop.f32.mrf.mxu0  ;;  %v17635_v63 = vpop.f32.mrf.mxu1 }
 0xf6e   : > { %v6242_v52 = vpop.f32.mrf.mxu2  ;;  %v6256_v54 = vpop.f32.mrf.mxu3 }
 0xf6f   : > { %v6243_v3 = vadd.f32 %v6242_v52, %v6229_v46 }
 0xf71   : > { %v6257_v56 = vadd.f32 %v6256_v54, %v6243_v3 }
 0xf72   : > { %v6326_v48 = vpop.f32.mrf.mxu0  ;;  %v6340_v7 = vpop.f32.mrf.mxu1 }
 0xf73   : > { %v6271_v32 = vadd.f32 %v6270_v51, %v6257_v56 }
 0xf75   : > { %v6285_v12 = vadd.f32 %v6284_v55, %v6271_v32 }
 0xf76   : > { %v17631_v53 = vpop.f32.mrf.mxu2  ;;  %v17633_v62 = vpop.f32.mrf.mxu3 }
 0xf7a   : > { %v17637_v9 = vpop.f32.mrf.mxu0  ;;  %v17645_v61 = vpop.f32.mrf.mxu1 }
 0xf7e   : > { %v6298_v1 = vpop.f32.mrf.mxu2  ;;  %v6312_v4 = vpop.f32.mrf.mxu3 }
 0xf7f   : > { %v6299_v2 = vadd.f32 %v6298_v1, %v6285_v12 }
 0xf81   : > { %v6313_v5 = vadd.f32 %v6312_v4, %v6299_v2 }
 0xf83   : > { %v6327_v6 = vadd.f32 %v6326_v48, %v6313_v5 }
 0xf85   : > { %v6341_v8 = vadd.f32 %v6340_v7, %v6327_v6 }
 0xf86   : > { %v17639_v11 = vpop.f32.mrf.mxu2  ;;  %v17641_v13 = vpop.f32.mrf.mxu3 }
 0xf92   : > { %v6382_v60 = vpop.f32.mrf.mxu0  ;;  %v6396_v0 = vpop.f32.mrf.mxu1 }
 0xf9a   : > { %v17643_v14 = vpop.f32.mrf.mxu0  ;;  %v17672_v1 = vpop.f32.mrf.mxu1 }
 0xf9e   : > { %v6354_v15 = vpop.f32.mrf.mxu2  ;;  %v6368_v28 = vpop.f32.mrf.mxu3 }
 0xf9f   : > { %v6355_v10 = vadd.f32 %v6354_v15, %v6341_v8 }
 0xfa1   : > { %v6369_v19 = vadd.f32 %v6368_v28, %v6355_v10 }
 0xfa2   : > { %v6622_v20 = vpop.f32.mrf.mxu0 }
 0xfa3   : > { %v6383_v21 = vadd.f32 %v6382_v60, %v6369_v19  ;;  %v6623_v59 = vadd.f32 %v16277_v16, %v6622_v20 }
 0xfa5   : > { %v17648_v24 = vpack.c.bf16 %v6623_v59, %v6623_v59  ;;  %v17650_v25 = vadd.f32 %v6396_v0, %v6383_v21 }
 0xfa6   : > { %v17652_v37 = vpop.f32.mrf.mxu2  ;;  %v17654_v27 = vpop.f32.mrf.mxu3 }
 0xfa7   : > { %v6665_v45 = vsel %vm6663_vm13, %v17648_v24, 0 }
 0xfa8   : > { %6674 = vmatpush.bf16.msrb.mxu2 %v6665_v45 }
 0xfaa   : > { %v6624_v29 = vpop.f32.mrf.mxu0 }
 0xfae   : > { %v6565_v26 = vpop.f32.mrf.mxu2  ;;  %v6594_v18 = vpop.f32.mrf.mxu3 }
 0xfaf   : > { %v6566_v33 = vadd.f32 %v16278_v30, %v6565_v26  ;;  %v6595_v35 = vadd.f32 %v16279_v31, %v6594_v18  ;;  %v6722_v30 = vunpack.c.l.b16 %v17648_v24 }
 0xfb1   : > { %v6569_v36 = vmul.f32 0.35355338, %v6566_v33  ;;  %v6627_v57 = vpack.c.bf16 %v6595_v35, %v6595_v35  ;;  %v6723_v26 = vpack.c.b16 %v6722_v30, %v6722_v30  ;;  %v6189_v30 = vadd.f32 %v17618_v38, %v17623_v47 }
 0xfb3   : > { %v6626_v39 = vpack.c.bf16 %v6569_v36, %v6569_v36  ;;  %v6633_v40 = vsel %vm1854_vm3, %v6627_v57, 0  ;;  %v6686_v42 = vunpack.c.l.b16 %v6627_v57 }
 0xfb4   : > { %6642 = vmatpush.bf16.xpose.msrb.mxu1 %v6633_v40 }
 0xfb5   : > { %v6681_v43 = vunpack.c.l.b16 %v6626_v39  ;;  %v6687_v44 = vpack.c.b16 %v6686_v42, %v6686_v42 }
 0xfb6   : > { %v6567_v46 = vpop.f32.mrf.mxu2  ;;  %v6596_v51 = vpop.f32.mrf.mxu3 }
 0xfb7   : > { %6747 = vrot.lane.b32.xlu0 %v6687_v44, %s18685_s12  ;;  %6688 = vrot.lane.b32.xlu2 %v6687_v44, %s18686_s13  ;;  %v6682_v52 = vpack.c.b16 %v6681_v43, %v6681_v43 }
 0xfb9   : > { %6683 = vrot.lane.b32.xlu1 %v6682_v52, %s18686_s13 }
 0xfbb   : > { %13658 = vmatmul.msk.bf16.vlgmr.msrb.gmra.mxu1 %vm1854_vm3, %v6626_v39 }
 0xfbf   : > { %6803 = vrot.lane.b32.xlu2 %v6687_v44, %s18674_s4  ;;  %6745 = vrot.lane.b32.xlu0 %v6682_v52, %s18685_s12 }
 0xfc1   : > { %6801 = vrot.lane.b32.xlu1 %v6682_v52, %s18674_s4 }
0x1011   : > { %v6689_v54 = vpop.permute.xlu2 %6688 }
0x1012   : > { %v6694_v3 = vsel %vm1854_vm3, %v6689_v54, 0 }
0x1013   : > { %6703 = vmatpush.bf16.xpose.msrb.mxu3 %v6694_v3 }
0x1019   : > { %v6804_v55 = vpop.permute.xlu2 %6803 }
0x101a   : > { %v6809_v56 = vsel %vm1854_vm3, %v6804_v55, 0 }
0x101b   : > { %6818 = vmatpush.bf16.xpose.msra.mxu3 %v6809_v56 }
0x1029   : > { %v6748_v32 = vpop.permute.xlu0 %6747 }
0x102a   : > { %v6753_v12 = vsel %vm1854_vm3, %v6748_v32, 0 }
0x102b   : > { %6762 = vmatpush.bf16.xpose.msra.mxu1 %v6753_v12  ;;  %v6684_v48 = vpop.permute.xlu1 %6683 }
0x102c   : > { %13660 = vmatmul.msk.bf16.vlgmr.msrb.gmra.mxu3 %vm1854_vm3, %v6684_v48 }
0x1031   : > { %v6746_v2 = vpop.permute.xlu0 %6745 }
0x1032   : > { %13662 = vmatmul.msk.bf16.vlgmr.msra.gmra.mxu1 %vm1854_vm3, %v6746_v2  ;;  %v6401_v2 = vadd.f32 %v17650_v25, %v17384_v22 }
0x1033   : > { %v6802_v6 = vpop.permute.xlu1 %6801 }
0x1038   : > { %v6644_v4 = vpop.f32.mrf.mxu1 }
0x1039   : > { %v6648_v5 = vsel %vm1854_vm3, %v6644_v4, -inf }
0x103a   : > { %6649 = vmax.xlane.f32.xlu2 %v6648_v5 }
0x103c   : > { %13664 = vmatmul.msk.bf16.vlgmr.msra.gmra.mxu3 %vm1854_vm3, %v6802_v6 }
0x1040   : > { %v6646_v7 = vpop.f32.mrf.mxu1 }
0x10ad   : > { %v6650_v8 = vpop.xlane.xlu2 %6649 }
0x10ae   : > { %v6651_v60 = vsub.f32 %v6644_v4, %v6650_v8  ;;  %v6407_v4 = vsel %vm1760_vm2, %v6401_v2, 0.0 }
0x10af   : > { %v6705_v15 = vpop.f32.mrf.mxu3  ;;  %v6764_v28 = vpop.f32.mrf.mxu1 }
0x10b0   : > { %v6652_v10 = vmul.f32 1.442695, %v6651_v60  ;;  %v6709_v16 = vsel %vm1854_vm3, %v6705_v15, -inf  ;;  %v6768_v19 = vsel %vm1854_vm3, %v6764_v28, -inf }
0x10b1   : > { %6710 = vmax.xlane.f32.xlu0 %v6709_v16  ;;  %6769 = vmax.xlane.f32.xlu1 %v6768_v19 }
0x10b2   : > { %16392 = vpow2.f32 %v6652_v10 }
0x10b7   : > { %v6707_v20 = vpop.f32.mrf.mxu3  ;;  %v6766_v21 = vpop.f32.mrf.mxu1 }
0x10b8   : > { %v16393_v59 = vpop.eup %16392 }
0x10b9   : > { %v6654_v0 = vsel %vm1854_vm3, %v16393_v59, 0.0 }
0x10ba   : > { %6655 = vadd.xlane.f32.xlu0 %v6654_v0 }
0x10bf   : > { %v6820_v45 = vpop.f32.mrf.mxu3 }
0x10c0   : > { %v6824_v29 = vsel %vm1854_vm3, %v6820_v45, -inf }
0x10c1   : > { %6825 = vmax.xlane.f32.xlu2 %v6824_v29 }
0x10c7   : > { %v6822_v31 = vpop.f32.mrf.mxu3 }
0x10ca   : > { %6724 = vrot.lane.b32.xlu1 %v6723_v26, %s18686_s13 }
0x1124   : > { %v6711_v18 = vpop.xlane.xlu0 %6710  ;;  %v6770_v33 = vpop.xlane.xlu1 %6769 }
0x1125   : > { %v6712_v35 = vsub.f32 %v6705_v15, %v6711_v18  ;;  %v6771_v36 = vsub.f32 %v6764_v28, %v6770_v33 }
0x1127   : > { %v6713_v57 = vmul.f32 1.442695, %v6712_v35  ;;  %v6772_v39 = vmul.f32 1.442695, %v6771_v36 }
0x1129   : > { %16394 = vpow2.f32 %v6713_v57 }
0x112a   : > { %16396 = vpow2.f32 %v6772_v39 }
0x112d   : > { %v6656_v40 = vpop.xlane.xlu0 %6655 }
0x112e   : > { %16398 = vrcp.f32 %v6656_v40 }
0x112f   : > { %v16395_v42 = vpop.eup %16394 }
0x1130   : > { %v16397_v43 = vpop.eup %16396  ;;  %v6715_v44 = vsel %vm1854_vm3, %v16395_v42, 0.0 }
0x1131   : > { %6716 = vadd.xlane.f32.xlu2 %v6715_v44  ;;  %v6774_v24 = vsel %vm1854_vm3, %v16397_v43, 0.0 }
0x1132   : > { %6775 = vadd.xlane.f32.xlu0 %v6774_v24 }
0x1134   : > { %v16399_v46 = vpop.eup %16398  ;;  %v6826_v51 = vpop.xlane.xlu2 %6825 }
0x1135   : > { %v6658_v52 = vmul.f32 %v16399_v46, %v16393_v59  ;;  %v6827_v54 = vsub.f32 %v6820_v45, %v6826_v51 }
0x1137   : > { %v6659_v3 = vpack.c.bf16 %v6658_v52, %v6658_v52  ;;  %v6828_v55 = vmul.f32 1.442695, %v6827_v54  ;;  %v15810_v52 = vld [vmem:[%s18687_s14] sm:$0xff] }
0x1139   : > { %16400 = vpow2.f32 %v6828_v55  ;;  %13659 = vmatmul.msk.bf16.vlgmr.msrb.gmra.mxu2 %vm1854_vm3, %v6659_v3 }
0x113c   : > { %v6725_v56 = vpop.permute.xlu1 %6724 }
0x113d   : > { %v6730_v32 = vsel %vm6663_vm13, %v6725_v56, 0 }
0x113e   : > { %6739 = vmatpush.bf16.msra.mxu0 %v6730_v32 }
0x113f   : > { %v16401_v12 = vpop.eup %16400 }
0x1140   : > { %v6830_v48 = vsel %vm1854_vm3, %v16401_v12, 0.0 }
0x1141   : > { %6831 = vadd.xlane.f32.xlu2 %v6830_v48 }
0x1146   : > { %6780 = vrot.lane.b32.xlu0 %v6723_v26, %s18685_s12 }
0x1159   : > { %6836 = vrot.lane.b32.xlu2 %v6723_v26, %s18674_s4  ;;  %v6203_v26 = vadd.f32 %v17625_v49, %v6189_v30 }
0x115b   : > { %v6217_v18 = vadd.f32 %v17620_v41, %v6203_v26 }
0x115d   : > { %v6231_v35 = vadd.f32 %v17627_v50, %v6217_v18 }
0x115f   : > { %v6245_v36 = vadd.f32 %v17631_v53, %v6231_v35 }
0x1161   : > { %v6259_v57 = vadd.f32 %v17633_v62, %v6245_v36 }
0x1163   : > { %v6273_v38 = vadd.f32 %v17629_v58, %v6259_v57 }
0x1165   : > { %v6287_v47 = vadd.f32 %v17635_v63, %v6273_v38 }
0x1167   : > { %v6301_v41 = vadd.f32 %v17639_v11, %v6287_v47 }
0x1169   : > { %v6315_v50 = vadd.f32 %v17641_v13, %v6301_v41 }
0x116b   : > { %v6329_v53 = vadd.f32 %v17637_v9, %v6315_v50 }
0x116d   : > { %v6343_v62 = vadd.f32 %v17645_v61, %v6329_v53 }
0x1182   : > { %6408 = vadd.xlane.f32.xlu2 %v6407_v4 }
0x11a4   : > { %v6717_v5 = vpop.xlane.xlu2 %6716 }
0x11a5   : > { %16402 = vrcp.f32 %v6717_v5  ;;  %v6776_v7 = vpop.xlane.xlu0 %6775 }
0x11a6   : > { %16404 = vrcp.f32 %v6776_v7 }
0x11ab   : > { %v16403_v6 = vpop.eup %16402 }
0x11ac   : > { %v6719_v8 = vmul.f32 %v16403_v6, %v16395_v42  ;;  %v16405_v15 = vpop.eup %16404 }
0x11ad   : > { %v6778_v10 = vmul.f32 %v16405_v15, %v16397_v43  ;;  %v6357_v43 = vadd.f32 %v17652_v37, %v6343_v62  ;;  %v15811_v37 = vld [vmem:[%s18687_s14 + $0x8] sm:$0xff] }
0x11ae   : > { %v6720_v60 = vpack.c.bf16 %v6719_v8, %v6719_v8  ;;  %6897 = vmatpush.bf16.msrb.mxu1 %v15811_v37 }
0x11af   : > { %v6779_v25 = vpack.c.bf16 %v6778_v10, %v6778_v10  ;;  %v6371_v24 = vadd.f32 %v17654_v27, %v6357_v43 }
0x11b0   : > { %13661 = vmatmul.msk.bf16.vlgmr.msra.gmra.mxu0 %vm1854_vm3, %v6720_v60 }
0x11b1   : > { %v6385_v63 = vadd.f32 %v17643_v14, %v6371_v24 }
0x11b2   : > { %6898 = vmatpush.bf16.msrb.mxu1 %v15810_v52 }
0x11b3   : > { %v6399_v11 = vadd.f32 %v17672_v1, %v6385_v63 }
0x11b4   : > { %v6832_v28 = vpop.xlane.xlu2 %6831 }
0x11b5   : > { %16406 = vrcp.f32 %v6832_v28  ;;  %v6402_v13 = vadd.f32 %v6399_v11, %v17386_v23 }
0x11b7   : > { %v6410_v61 = vsel %vm1760_vm2, %v6402_v13, 0.0 }
0x11b8   : > { %v6781_v16 = vpop.permute.xlu0 %6780 }
0x11b9   : > { %v6786_v19 = vsel %vm6663_vm13, %v6781_v16, 0  ;;  %v16280_v16 = vld [vmem:[%s18672_s15 + $0x1] ss:$0 sm:$0xff]  ;;  %s18690_s15 = sld [smem:[#allocation47_spill]] }
0x11ba   : > { %6795 = vmatpush.bf16.msra.mxu2 %v6786_v19 }
0x11bb   : > { %v16407_v22 = vpop.eup %16406 }
0x11bc   : > { %v6834_v20 = vmul.f32 %v16407_v22, %v16401_v12  ;;  %v6676_v21 = vpop.f32.mrf.mxu2  ;;  %v6837_v59 = vpop.permute.xlu2 %6836 }
0x11bd   : > { %v6842_v0 = vsel %vm6663_vm13, %v6837_v59, 0  ;;  %13663 = vmatmul.msk.bf16.vlgmr.msra.gmra.mxu2 %vm1854_vm3, %v6779_v25  ;;  %v16281_v25 = vld [vmem:[%s18673_s11 + $0x1] ss:$0 sm:$0xff]  ;;  %s18689_s11 = sld [smem:[#allocation39_spill]] }
0x11be   : > { %v6835_v45 = vpack.c.bf16 %v6834_v20, %v6834_v20  ;;  %6851 = vmatpush.bf16.msrb.mxu0 %v6842_v0  ;;  %v16282_v0 = vld [vmem:[%s18688_s16] ss:$0 sm:$0xff] }
0x11c1   : > { %13665 = vmatmul.msk.bf16.vlgmr.msrb.gmra.mxu0 %vm1854_vm3, %v6835_v45 }
0x11c4   : > { %v6678_v29 = vpop.f32.mrf.mxu2 }
0x11f5   : > { %v6409_v44 = vpop.xlane.xlu2 %6408 }
0x11f6   : > { %v6413_v58 = vmul.f32 %v6409_v44, %v16946_v17 }
0x11f8   : > { %v6415_v46 = vsub.f32 %v6401_v2, %v6413_v58 }
0x11fa   : > { %v6417_v51 = vmul.f32 %v6415_v46, %v6415_v46 }
0x11fc   : > { %v6419_v9 = vsel %vm1760_vm2, %v6417_v51, 0.0 }
0x122d   : > { %v6741_v31 = vpop.f32.mrf.mxu0 }
0x122e   : > { %6858 = vrot.lane.b32.xlu1 %v6741_v31, %s18675_s10 }
0x1235   : > { %v6743_v33 = vpop.f32.mrf.mxu0 }
0x123e   : > { %v6853_v39 = vpop.f32.mrf.mxu0 }
0x123f   : > { %6866 = vrot.lane.b32.xlu1 %v6853_v39, %s18676_s7 }
0x1240   : > { %v6797_v40 = vpop.f32.mrf.mxu2 }
0x1241   : > { %6862 = vrot.lane.b32.xlu0 %v6797_v40, %s18677_s5 }
0x1246   : > { %v6855_v49 = vpop.f32.mrf.mxu0 }
0x1248   : > { %v6799_v42 = vpop.f32.mrf.mxu2 }
0x1269   : > { %6420 = vadd.xlane.f32.xlu1 %v6419_v9 }
0x126b   : > { %6411 = vadd.xlane.f32.xlu0 %v6410_v61 }
0x12a0   : > { %v6859_v27 = vpop.permute.xlu1 %6858 }
0x12a1   : > { %v6869_v54 = vsel %vm1854_vm3, %v6676_v21, %v6859_v27  ;;  %v15813_v27 = vld [vmem:[%s18689_s11 + $0x8] sm:$0xff] }
0x12a2   : > { %6982 = vmatpush.bf16.msrb.mxu2 %v15813_v27 }
0x12b1   : > { %v6867_v3 = vpop.permute.xlu1 %6866 }
0x12b3   : > { %v6863_v14 = vpop.permute.xlu0 %6862 }
0x12b4   : > { %v6870_v1 = vsel %vm1875_vm4, %v6869_v54, %v6863_v14  ;;  %v15812_v54 = vld [vmem:[%s18689_s11] sm:$0xff] }
0x12b5   : > { %v6871_v55 = vsel %vm2175_vm5, %v6870_v1, %v6867_v3  ;;  %6983 = vmatpush.bf16.msrb.mxu2 %v15812_v54 }
0x12b6   : > { %v6872_v23 = vpack.c.bf16 %v6871_v55, %v6871_v55 }
0x12b8   : > { %13674 = vmatmul.msk.bf16.vlgmr.msrb.gmra.mxu1 %vm1760_vm2, %v6872_v23 }
0x12dc   : > { %v6421_v56 = vpop.xlane.xlu1 %6420 }
0x12dd   : > { %v6425_v32 = vmul.f32 %v6421_v56, %v16946_v17 }
0x12de   : > { %v6412_v12 = vpop.xlane.xlu0 %6411 }
0x12df   : > { %v6427_v48 = vadd.f32 1e-05, %v6425_v32  ;;  %v6414_v2 = vmul.f32 %v6412_v12, %v16946_v17 }
0x12e1   : > { %16408 = vrsqrt.f32 %v6427_v48  ;;  %v6416_v4 = vsub.f32 %v6402_v13, %v6414_v2  ;;  %vm6435_vm15 = vweird.f32 %v6427_v48  ;;  %v16285_v2 = vld [vmem:[%s18690_s15] ss:$0 sm:$0xff] }
0x12e3   : > { %v6418_v5 = vmul.f32 %v6416_v4, %v6416_v4 }
0x12e5   : > { %v6422_v6 = vsel %vm1760_vm2, %v6418_v5, 0.0  ;;  %v16286_v5 = vld [vmem:[%s18691_s17] ss:$0 sm:$0xff] }
0x12e6   : > { %6423 = vadd.xlane.f32.xlu2 %v6422_v6 }
0x12e7   : > { %v16409_v7 = vpop.eup %16408 }
0x12e8   : > { %v6430_v8 = vmul.f32 %v16409_v7, %v6427_v48  ;;  %vm6436_vm14 = vweird.f32 %v16409_v7 }
0x12e9   : > { %vm6437_vm0 = vmor %vm6435_vm15, %vm6436_vm14 }
0x12ea   : > { %v6431_v60 = vmul.f32 %v16409_v7, %v6430_v8 }
0x12ec   : > { %v6432_v15 = vmul.f32 0.5, %v6431_v60 }
0x12ee   : > { %v6433_v28 = vsub.f32 1.5, %v6432_v15 }
0x12f0   : > { %v6434_v10 = vmul.f32 %v16409_v7, %v6433_v28 }
0x12f2   : > { %v6438_v19 = vsel %vm6437_vm0, %v16409_v7, %v6434_v10 }
0x12f3   : > { %v6449_v22 = vmul.f32 %v6438_v19, %v6415_v46  ;;  %v15817_v19 = vld [vmem:[%s18693_s19 + $0x8] sm:$0xff] }
0x12f4   : > { %7044 = vmatpush.bf16.msra.mxu0 %v15817_v19 }
0x12f5   : > { %v6454_v20 = vmul.f32 %v16280_v16, %v6449_v22 }
0x12f7   : > { %v6459_v21 = vadd.f32 %v16281_v25, %v6454_v20  ;;  %v15816_v20 = vld [vmem:[%s18693_s19] sm:$0xff] }
0x12f8   : > { %7045 = vmatpush.bf16.msra.mxu0 %v15816_v20 }
0x12f9   : > { %v6463_v59 = vsel %vm1760_vm2, %v6459_v21, 0.0 }
0x12fa   : > { %6464 = vadd.xlane.f32.xlu0 %v6463_v59 }
0x1335   : > { %v6900_v45 = vpop.f32.mrf.mxu1 }
0x1336   : > { %v6901_v29 = vadd.f32 %v16282_v0, %v6900_v45 }
0x1338   : > { %v6904_v30 = vadd.f32 %v6901_v29, %v17610_v34 }
0x133a   : > { %v6907_v31 = vsel %vm1760_vm2, %v6904_v30, 0.0 }
0x133b   : > { %6908 = vadd.xlane.f32.xlu2 %v6907_v31 }
0x133d   : > { %v6902_v26 = vpop.f32.mrf.mxu1 }
0x1359   : > { %v6424_v18 = vpop.xlane.xlu2 %6423 }
0x135a   : > { %v6426_v33 = vmul.f32 %v6424_v18, %v16946_v17 }
0x135c   : > { %v6428_v35 = vadd.f32 1e-05, %v6426_v33 }
0x135e   : > { %16410 = vrsqrt.f32 %v6428_v35  ;;  %vm6445_vm6 = vweird.f32 %v6428_v35 }
0x1364   : > { %v16411_v36 = vpop.eup %16410 }
0x1365   : > { %v6440_v57 = vmul.f32 %v16411_v36, %v6428_v35  ;;  %vm6446_vm1 = vweird.f32 %v16411_v36 }
0x1366   : > { %vm6447_vm7 = vmor %vm6445_vm6, %vm6446_vm1 }
0x1367   : > { %v6441_v39 = vmul.f32 %v16411_v36, %v6440_v57 }
0x1369   : > { %v6442_v40 = vmul.f32 0.5, %v6441_v39 }
0x136b   : > { %v6443_v38 = vsub.f32 1.5, %v6442_v40  ;;  %v16283_v40 = vld [vmem:[%s18694_s20] ss:$0 sm:$0xff]  ;;  %s18698_s20 = sld [smem:[#allocation42_spill]] }
0x136d   : > { %v6444_v47 = vmul.f32 %v16411_v36, %v6443_v38  ;;  %v6465_v49 = vpop.xlane.xlu0 %6464 }
0x136e   : > { %v6469_v34 = vmul.f32 %v6465_v49, %v16946_v17 }
0x136f   : > { %v6448_v41 = vsel %vm6447_vm7, %v16411_v36, %v6444_v47 }
0x1370   : > { %v17739_v42 = vsub.f32 %v6459_v21, %v6469_v34  ;;  %v6450_v50 = vmul.f32 %v6448_v41, %v6416_v4  ;;  %v16284_v34 = vld [vmem:[%s18695_s21] ss:$0 sm:$0xff]  ;;  %s18699_s21 = sld [smem:[#allocation45_spill]] }
0x1371   : > { %v16289_v27 = vld [vmem:[%s18698_s20] ss:$0 sm:$0xff] }
0x1372   : > { %v6473_v53 = vmul.f32 %v17739_v42, %v17739_v42  ;;  %v6455_v62 = vmul.f32 %v16280_v16, %v6450_v50  ;;  %v15815_v16 = vld [vmem:[%s18692_s18 + $0x8] sm:$0xff] }
0x1373   : > { %7015 = vmatpush.bf16.msrb.mxu3 %v15815_v16 }
0x1374   : > { %v6475_v43 = vsel %vm1760_vm2, %v6473_v53, 0.0  ;;  %v6460_v44 = vadd.f32 %v16281_v25, %v6455_v62  ;;  %v15814_v25 = vld [vmem:[%s18692_s18] sm:$0xff] }
0x1375   : > { %6476 = vadd.xlane.f32.xlu0 %v6475_v43 }
0x1376   : > { %v6466_v24 = vsel %vm1760_vm2, %v6460_v44, 0.0 }
0x1377   : > { %6467 = vadd.xlane.f32.xlu1 %v6466_v24  ;;  %7016 = vmatpush.bf16.msrb.mxu3 %v15814_v25 }
0x13ae   : > { %v6909_v58 = vpop.xlane.xlu2 %6908 }
0x13af   : > { %v6910_v63 = vmul.f32 %v6909_v58, %v16946_v17 }
0x13b1   : > { %v6911_v46 = vsub.f32 %v6904_v30, %v6910_v63 }
0x13b3   : > { %v6912_v11 = vmul.f32 %v6911_v46, %v6911_v46 }
0x13b5   : > { %v6913_v51 = vsel %vm1760_vm2, %v6912_v11, 0.0 }
0x13b6   : > { %6914 = vadd.xlane.f32.xlu2 %v6913_v51 }
0x13e8   : > { %v6477_v15 = vpop.xlane.xlu0 %6476 }
0x13e9   : > { %v6481_v28 = vmul.f32 %v6477_v15, %v16946_v17 }
0x13ea   : > { %v6468_v13 = vpop.xlane.xlu1 %6467 }
0x13eb   : > { %v6470_v9 = vmul.f32 %v6468_v13, %v16946_v17  ;;  %v6483_v10 = vadd.f32 1e-05, %v6481_v28 }
0x13ed   : > { %v17748_v61 = vsub.f32 %v6460_v44, %v6470_v9  ;;  %vm6491_vm12 = vweird.f32 %v6483_v10 }
0x13ef   : > { %v6474_v37 = vmul.f32 %v17748_v61, %v17748_v61 }
0x13f1   : > { %v6478_v52 = vsel %vm1760_vm2, %v6474_v37, 0.0 }
0x13f2   : > { %6479 = vadd.xlane.f32.xlu1 %v6478_v52 }
0x1429   : > { %v6915_v14 = vpop.xlane.xlu2 %6914 }
0x142a   : > { %v6916_v3 = vmul.f32 %v6915_v14, %v16946_v17 }
0x142c   : > { %v6917_v1 = vadd.f32 1e-05, %v6916_v3 }
0x142e   : > { %16412 = vrsqrt.f32 %v6917_v1  ;;  %vm6924_vm9 = vweird.f32 %v6917_v1 }
0x142f   : > { %16414 = vrsqrt.f32 %v6483_v10 }
0x1434   : > { %v16413_v55 = vpop.eup %16412 }
0x1435   : > { %v6919_v23 = vmul.f32 %v16413_v55, %v6917_v1  ;;  %vm6925_vm8 = vweird.f32 %v16413_v55  ;;  %v16415_v22 = vpop.eup %16414 }
0x1436   : > { %vm6926_vm10 = vmor %vm6924_vm9, %vm6925_vm8  ;;  %v6486_v21 = vmul.f32 %v16415_v22, %v6483_v10  ;;  %vm6492_vm11 = vweird.f32 %v16415_v22 }
0x1437   : > { %v6920_v56 = vmul.f32 %v16413_v55, %v6919_v23  ;;  %vm6493_vm14 = vmor %vm6491_vm12, %vm6492_vm11 }
0x1438   : > { %v6487_v59 = vmul.f32 %v16415_v22, %v6486_v21 }
0x1439   : > { %v6921_v32 = vmul.f32 0.5, %v6920_v56 }
0x143a   : > { %v6488_v30 = vmul.f32 0.5, %v6487_v59 }
0x143b   : > { %v6922_v12 = vsub.f32 1.5, %v6921_v32 }
0x143c   : > { %v6489_v31 = vsub.f32 1.5, %v6488_v30 }
0x143d   : > { %v6923_v48 = vmul.f32 %v16413_v55, %v6922_v12 }
0x143e   : > { %v6490_v18 = vmul.f32 %v16415_v22, %v6489_v31 }
0x143f   : > { %v6927_v4 = vsel %vm6926_vm10, %v16413_v55, %v6923_v48 }
0x1440   : > { %v6928_v6 = vmul.f32 %v6927_v4, %v6911_v46  ;;  %v6494_v36 = vsel %vm6493_vm14, %v16415_v22, %v6490_v18 }
0x1441   : > { %v6505_v38 = vmul.f32 %v6494_v36, %v17739_v42  ;;  %v16287_v42 = vld [vmem:[%s18696_s25] ss:$0 sm:$0xff] }
0x1442   : > { %v6932_v7 = vmul.f32 %v16285_v2, %v6928_v6 }
0x1443   : > { %v6510_v41 = vmul.f32 %v16283_v40, %v6505_v38 }
0x1444   : > { %v17758_v8 = vadd.f32 %v16286_v5, %v6932_v7 }
0x1445   : > { %v6515_v62 = vadd.f32 %v16284_v34, %v6510_v41 }
0x1446   : > { %v6957_v60 = vpack.c.bf16 %v17758_v8, %v17758_v8 }
0x1448   : > { %13683 = vmatmul.msk.bf16.vlgmr.msrb.gmra.mxu2 %vm1760_vm2, %v6957_v60 }
0x1465   : > { %v6480_v0 = vpop.xlane.xlu1 %6479 }
0x1466   : > { %v6482_v45 = vmul.f32 %v6480_v0, %v16946_v17 }
0x1468   : > { %v6484_v29 = vadd.f32 1e-05, %v6482_v45 }
0x146a   : > { %16416 = vrsqrt.f32 %v6484_v29  ;;  %vm6501_vm0 = vweird.f32 %v6484_v29 }
0x1470   : > { %v16417_v26 = vpop.eup %16416 }
0x1471   : > { %v6496_v33 = vmul.f32 %v16417_v26, %v6484_v29  ;;  %vm6502_vm15 = vweird.f32 %v16417_v26 }
0x1472   : > { %vm6503_vm1 = vmor %vm6501_vm0, %vm6502_vm15 }
0x1473   : > { %v6497_v35 = vmul.f32 %v16417_v26, %v6496_v33 }
0x1475   : > { %v6498_v57 = vmul.f32 0.5, %v6497_v35 }
0x1477   : > { %v6499_v39 = vsub.f32 1.5, %v6498_v57 }
0x1479   : > { %v6500_v47 = vmul.f32 %v16417_v26, %v6499_v39 }
0x147b   : > { %v6504_v49 = vsel %vm6503_vm1, %v16417_v26, %v6500_v47 }
0x147c   : > { %v6506_v50 = vmul.f32 %v6504_v49, %v17748_v61  ;;  %v16288_v61 = vld [vmem:[%s18697_s27] ss:$0 sm:$0xff] }
0x147e   : > { %v6511_v53 = vmul.f32 %v16283_v40, %v6506_v50 }
0x1480   : > { %v6516_v43 = vadd.f32 %v16284_v34, %v6511_v53 }
0x1482   : > { %v17773_v44 = vpack.c.bf16 %v6516_v43, %v6515_v62 }
0x1484   : > { %13692 = vmatmul.msk.bf16.vlgmr.msrb.gmra.mxu3 %vm1760_vm2, %v17773_v44  ;;  %13701 = vmatmul.msk.bf16.vlgmr.msra.gmra.mxu0 %vm1760_vm2, %v17773_v44 }
0x14cb   : > { %v6985_v24 = vpop.f32.mrf.mxu2 }
0x14cc   : > { %v6986_v58 = vadd.f32 %v16287_v42, %v6985_v24 }
0x14ce   : > { %v6989_v63 = vmul.f32 0.35355338, %v6986_v58 }
0x14d0   : > { %v7052_v46 = vpack.c.bf16 %v6989_v63, %v6989_v63 }
0x14d2   : > { %v7116_v11 = vunpack.c.l.b16 %v7052_v46 }
0x14d3   : > { %v6987_v51 = vpop.f32.mrf.mxu2 }
0x14d4   : > { %v7117_v13 = vpack.c.b16 %v7116_v11, %v7116_v11 }
0x14d6   : > { %7118 = vrot.lane.b32.xlu1 %v7117_v13, %s18686_s13 }
0x14de   : > { %7172 = vrot.lane.b32.xlu1 %v7117_v13, %s18685_s12 }
0x1501   : > { %v7047_v9 = vpop.f32.mrf.mxu0 }
0x1502   : > { %v7048_v37 = vadd.f32 %v16288_v61, %v7047_v9 }
0x1504   : > { %v7055_v14 = vpack.c.bf16 %v7048_v37, %v7048_v37 }
0x1506   : > { %v7095_v23 = vunpack.c.l.b16 %v7055_v14 }
0x1507   : > { %v7018_v52 = vpop.f32.mrf.mxu3 }
0x1508   : > { %v7019_v1 = vadd.f32 %v16289_v27, %v7018_v52 }
0x1509   : > { %v7049_v54 = vpop.f32.mrf.mxu0 }
0x150a   : > { %v7050_v3 = vadd.f32 %v16288_v61, %v7049_v54  ;;  %v7053_v12 = vpack.c.bf16 %v7019_v1, %v7019_v1 }
0x150c   : > { %v7056_v55 = vpack.c.bf16 %v7050_v3, %v7050_v3  ;;  %v7059_v5 = vunpack.c.l.b16 %v7053_v12 }
0x150e   : > { %v7096_v56 = vunpack.c.l.b16 %v7056_v55 }
0x150f   : > { %v7020_v32 = vpop.f32.mrf.mxu3 }
0x1510   : > { %v17784_v48 = vpack.c.b16 %v7096_v56, %v7095_v23  ;;  %v7021_v2 = vadd.f32 %v16289_v27, %v7020_v32 }
0x1512   : > { %v7054_v4 = vpack.c.bf16 %v7021_v2, %v7021_v2  ;;  %7109 = vmatpush.bf16.msra.mxu2 %v17784_v48 }
0x1514   : > { %v7060_v6 = vunpack.c.l.b16 %v7054_v4 }
0x1516   : > { %v7061_v7 = vpack.c.b16 %v7060_v6, %v7059_v5 }
0x1518   : > { %7120 = vrot.lane.b32.xlu0 %v7061_v7, %s18686_s13  ;;  %7174 = vrot.lane.b32.xlu2 %v7061_v7, %s18685_s12  ;;  %v7066_v60 = vsel %vm1854_vm3, %v7061_v7, 0 }
0x1519   : > { %7075 = vmatpush.bf16.xpose.msra.mxu1 %v7066_v60 }
0x1520   : > { %7228 = vrot.lane.b32.xlu0 %v7061_v7, %s18674_s4  ;;  %13702 = vmatmul.msk.bf16.vlgmr.msra.gmra.mxu1 %vm1854_vm3, %v7052_v46 }
0x1528   : > { %7226 = vrot.lane.b32.xlu0 %v7117_v13, %s18674_s4 }
0x1548   : > { %v7119_v15 = vpop.permute.xlu1 %7118 }
0x1550   : > { %v7173_v16 = vpop.permute.xlu1 %7172 }
0x1572   : > { %v7175_v28 = vpop.permute.xlu2 %7174 }
0x1573   : > { %v7180_v10 = vsel %vm1854_vm3, %v7175_v28, 0 }
0x1574   : > { %7189 = vmatpush.bf16.xpose.msrb.mxu1 %v7180_v10 }
0x157b   : > { %13706 = vmatmul.msk.bf16.vlgmr.msrb.gmra.mxu1 %vm1854_vm3, %v7173_v16 }
0x158a   : > { %v7121_v19 = vpop.permute.xlu0 %7120 }
0x158b   : > { %v7126_v22 = vsel %vm1854_vm3, %v7121_v19, 0 }
0x158c   : > { %7135 = vmatpush.bf16.xpose.msra.mxu3 %v7126_v22 }
0x1592   : > { %v7229_v25 = vpop.permute.xlu0 %7228 }
0x1593   : > { %v7234_v20 = vsel %vm1854_vm3, %v7229_v25, 0  ;;  %13704 = vmatmul.msk.bf16.vlgmr.msra.gmra.mxu3 %vm1854_vm3, %v7119_v15 }
0x1594   : > { %7243 = vmatpush.bf16.xpose.msrb.mxu3 %v7234_v20  ;;  %v15819_v20 = vld [vmem:[%s18699_s21 + $0x8] sm:$0xff] }
0x1595   : > { %7320 = vmatpush.bf16.msra.mxu1 %v15819_v20 }
0x159a   : > { %v7227_v0 = vpop.permute.xlu0 %7226 }
0x159d   : > { %v7077_v21 = vpop.f32.mrf.mxu1 }
0x159e   : > { %v7081_v59 = vsel %vm1875_vm4, %v7077_v21, -inf }
0x159f   : > { %7082 = vmax.xlane.f32.xlu2 %v7081_v59 }
0x15a3   : > { %13708 = vmatmul.msk.bf16.vlgmr.msrb.gmra.mxu3 %vm1854_vm3, %v7227_v0 }
0x15a5   : > { %v7079_v45 = vpop.f32.mrf.mxu1 }
0x15f8   : > { %v7191_v29 = vpop.f32.mrf.mxu1 }
0x15f9   : > { %v7195_v30 = vsel %vm1875_vm4, %v7191_v29, -inf }
0x15fa   : > { %7196 = vmax.xlane.f32.xlu0 %v7195_v30 }
0x1600   : > { %v7193_v31 = vpop.f32.mrf.mxu1 }
0x1612   : > { %v7083_v26 = vpop.xlane.xlu2 %7082 }
0x1613   : > { %v7084_v18 = vsub.f32 %v7077_v21, %v7083_v26  ;;  %v15818_v21 = vld [vmem:[%s18699_s21] sm:$0xff] }
0x1614   : > { %7321 = vmatpush.bf16.msra.mxu1 %v15818_v21  ;;  %v13739_v21 = vld [vmem:[%s18701_s30 + $0x50] sm:$0xf0] }
0x1615   : > { %v7085_v33 = vmul.f32 1.442695, %v7084_v18  ;;  %v16290_v18 = vld [vmem:[%s18700_s28] ss:$0 sm:$0xff] }
0x1616   : > { %v7137_v35 = vpop.f32.mrf.mxu3 }
0x1617   : > { %16418 = vpow2.f32 %v7085_v33  ;;  %v7141_v36 = vsel %vm1875_vm4, %v7137_v35, -inf }
0x1618   : > { %7142 = vmax.xlane.f32.xlu1 %v7141_v36 }
0x161d   : > { %v16419_v57 = vpop.eup %16418 }
0x161e   : > { %v7139_v39 = vpop.f32.mrf.mxu3  ;;  %v7087_v40 = vsel %vm1875_vm4, %v16419_v57, 0.0 }
0x1620   : > { %7088 = vadd.xlane.f32.xlu1 %v7087_v40 }
0x1626   : > { %v7245_v38 = vpop.f32.mrf.mxu3 }
0x1627   : > { %v7249_v47 = vsel %vm1875_vm4, %v7245_v38, -inf }
0x1628   : > { %7250 = vmax.xlane.f32.xlu2 %v7249_v47 }
0x162e   : > { %v7247_v49 = vpop.f32.mrf.mxu3 }
0x1640   : > { %7153 = vrot.lane.b32.xlu2 %v17784_v48, %s18686_s13 }
0x166d   : > { %v7197_v34 = vpop.xlane.xlu0 %7196 }
0x166e   : > { %v7198_v41 = vsub.f32 %v7191_v29, %v7197_v34 }
0x1670   : > { %v7199_v50 = vmul.f32 1.442695, %v7198_v41  ;;  %v15844_v41 = vld [vmem:[%s18701_s30 + $0xbc] sm:$0xf0] }
0x1672   : > { %16420 = vpow2.f32 %v7199_v50  ;;  %v15836_v50 = vld [vmem:[%s18701_s30 + $0x84] sm:$0xf] }
0x1678   : > { %v16421_v53 = vpop.eup %16420 }
0x1679   : > { %v7201_v62 = vsel %vm1875_vm4, %v16421_v53, 0.0 }
0x167a   : > { %7202 = vadd.xlane.f32.xlu1 %v7201_v62  ;;  %v13787_v62 = vld [vmem:[%s18701_s30 + $0xc0] sm:$0xf0] }
0x168b   : > { %v7143_v43 = vpop.xlane.xlu1 %7142 }
0x168c   : > { %v7144_v42 = vsub.f32 %v7137_v35, %v7143_v43  ;;  %v13793_v43 = vld [vmem:[%s18701_s30 + $0x88] sm:$0xf] }
0x168e   : > { %v7145_v24 = vmul.f32 1.442695, %v7144_v42  ;;  %v15845_v42 = vld [vmem:[%s18701_s30 + $0xc4] sm:$0xf0] }
0x1690   : > { %16422 = vpow2.f32 %v7145_v24  ;;  %v13790_v24 = vor.u32 %v15836_v50, %v13787_v62  ;;  %v15848_v50 = vld [vmem:[%s18701_s30 + $0xdc] sm:$0xf0]  ;;  %v13819_v62 = vld [vmem:[%s18701_s30 + $0xe0] sm:$0xf0] }
0x1692   : > { %7868 = vmatpush.bf16.msra.mxu3 %v13790_v24  ;;  %v15849_v24 = vld [vmem:[%s18701_s30 + $0xe4] sm:$0xf0] }
0x1693   : > { %7207 = vrot.lane.b32.xlu1 %v17784_v48, %s18685_s12  ;;  %v7089_v58 = vpop.xlane.xlu1 %7088 }
0x1694   : > { %16424 = vrcp.f32 %v7089_v58  ;;  %v13794_v58 = vor.u32 %v15845_v42, %v13793_v43  ;;  %v13825_v43 = vld [vmem:[%s18701_s30 + $0xa8] sm:$0xf] }
0x1696   : > { %v16423_v63 = vpop.eup %16422 }
0x1697   : > { %v7147_v46 = vsel %vm1875_vm4, %v16423_v63, 0.0 }
0x1698   : > { %7148 = vadd.xlane.f32.xlu0 %v7147_v46  ;;  %v13795_v46 = vld [vmem:[%s18701_s30 + $0xc8] sm:$0xf0] }
0x169a   : > { %v16425_v11 = vpop.eup %16424 }
0x169b   : > { %v7091_v51 = vmul.f32 %v16425_v11, %v16419_v57  ;;  %v7251_v13 = vpop.xlane.xlu2 %7250 }
0x169c   : > { %v7252_v9 = vsub.f32 %v7245_v38, %v7251_v13  ;;  %v15828_v13 = vld [vmem:[%s18701_s30 + $0x3c] sm:$0xf0] }
0x169d   : > { %v7092_v61 = vpack.c.bf16 %v7091_v51, %v7091_v51  ;;  %v13721_v51 = vld [vmem:[%s18701_s30] sm:$0xf] }
0x169e   : > { %v7253_v37 = vmul.f32 1.442695, %v7252_v9  ;;  %v15820_v9 = vld [vmem:[%s18701_s30 + $0x4] sm:$0xf] }
0x169f   : > { %13703 = vmatmul.msk.bf16.vlgmr.msra.gmra.mxu2 %vm1875_vm4, %v7092_v61  ;;  %v13722_v61 = vor.u32 %v15828_v13, %v13721_v51  ;;  %v13753_v51 = vld [vmem:[%s18701_s30 + $0x20] sm:$0xf] }
0x16a0   : > { %16426 = vpow2.f32 %v7253_v37  ;;  %v13723_v37 = vld [vmem:[%s18701_s30 + $0x40] sm:$0xf0]  ;;  %v15832_v13 = vld [vmem:[%s18701_s30 + $0x5c] sm:$0xf0] }
0x16a3   : > { %v7154_v52 = vpop.permute.xlu2 %7153 }
0x16a4   : > { %7166 = vmatpush.bf16.msrb.mxu0 %v7154_v52  ;;  %v13729_v52 = vld [vmem:[%s18701_s30 + $0x8] sm:$0xf] }
0x16a6   : > { %v16427_v27 = vpop.eup %16426 }
0x16a7   : > { %v7255_v54 = vsel %vm1875_vm4, %v16427_v27, 0.0 }
0x16a8   : > { %7256 = vadd.xlane.f32.xlu0 %v7255_v54  ;;  %v13726_v54 = vor.u32 %v15820_v9, %v13723_v37  ;;  %v13826_v9 = vor.u32 %v15849_v24, %v13825_v43  ;;  %v15824_v37 = vld [vmem:[%s18701_s30 + $0x24] sm:$0xf]  ;;  %v15871_v43 = vld [vmem:[%s16822_s24 + $0x98] sm:$0xff] }
0x16a9   : > { %v15879_v24 = vld [vmem:[%s16822_s24 + $0xd8] sm:$0xff] }
0x16aa   : > { %7869 = vmatpush.bf16.msra.mxu3 %v13726_v54  ;;  %v15833_v54 = vld [vmem:[%s18701_s30 + $0x64] sm:$0xf0] }
0x16bc   : > { %7261 = vrot.lane.b32.xlu0 %v17784_v48, %s18674_s4 }
0x16ed   : > { %v7203_v14 = vpop.xlane.xlu1 %7202 }
0x16ee   : > { %16428 = vrcp.f32 %v7203_v14 }
0x16f4   : > { %v16429_v3 = vpop.eup %16428 }
0x16f5   : > { %v7205_v1 = vmul.f32 %v16429_v3, %v16421_v53  ;;  %v15821_v3 = vld [vmem:[%s18701_s30 + $0xc] sm:$0xf] }
0x16f7   : > { %v7206_v23 = vpack.c.bf16 %v7205_v1, %v7205_v1  ;;  %v13731_v1 = vld [vmem:[%s18701_s30 + $0x48] sm:$0xf0] }
0x1705   : > { %v7208_v55 = vpop.permute.xlu1 %7207 }
0x1706   : > { %7220 = vmatpush.bf16.msrb.mxu2 %v7208_v55  ;;  %v13734_v55 = vor.u32 %v15821_v3, %v13731_v1  ;;  %v13763_v3 = vld [vmem:[%s18701_s30 + $0x68] sm:$0xf0]  ;;  %v13754_v1 = vor.u32 %v15832_v13, %v13753_v51  ;;  %v15854_v51 = vld [vmem:[%s16822_s24 + $0x10] sm:$0xff] }
0x1707   : > { %v15862_v13 = vld [vmem:[%s16822_s24 + $0x50] sm:$0xff] }
0x1709   : > { %13707 = vmatmul.msk.bf16.vlgmr.msrb.gmra.mxu2 %vm1875_vm4, %v7206_v23 }
0x170b   : > { %v7149_v56 = vpop.xlane.xlu0 %7148 }
0x170c   : > { %16430 = vrcp.f32 %v7149_v56  ;;  %v13801_v56 = vld [vmem:[%s18701_s30 + $0x90] sm:$0xf] }
0x1712   : > { %v16431_v32 = vpop.eup %16430 }
0x1713   : > { %v7151_v12 = vmul.f32 %v16431_v32, %v16423_v63  ;;  %v15837_v63 = vld [vmem:[%s18701_s30 + $0x8c] sm:$0xf]  ;;  %v15846_v32 = vld [vmem:[%s18701_s30 + $0xcc] sm:$0xf0] }
0x1714   : > { %v13798_v11 = vor.u32 %v15837_v63, %v13795_v46  ;;  %v13827_v63 = vld [vmem:[%s18701_s30 + $0xe8] sm:$0xf0] }
0x1715   : > { %v7152_v2 = vpack.c.bf16 %v7151_v12, %v7151_v12  ;;  %v15838_v12 = vld [vmem:[%s18701_s30 + $0x94] sm:$0xf] }
0x1716   : > { %7894 = vmatpush.bf16.msrb.mxu1 %v13798_v11 }
0x1717   : > { %13705 = vmatmul.msk.bf16.vlgmr.msrb.gmra.mxu0 %vm1875_vm4, %v7152_v2 }
0x171a   : > { %7895 = vmatpush.bf16.msrb.mxu1 %v13734_v55 }
0x171b   : > { %v7257_v4 = vpop.xlane.xlu0 %7256 }
0x171c   : > { %16432 = vrcp.f32 %v7257_v4  ;;  %v13802_v4 = vor.u32 %v15846_v32, %v13801_v56  ;;  %v13833_v32 = vld [vmem:[%s18701_s30 + $0xb0] sm:$0xf] }
0x1722   : > { %v7111_v5 = vpop.f32.mrf.mxu2  ;;  %v16433_v48 = vpop.eup %16432 }
0x1723   : > { %v7259_v7 = vmul.f32 %v16433_v48, %v16427_v27  ;;  %v15829_v27 = vld [vmem:[%s18701_s30 + $0x44] sm:$0xf0]  ;;  %v13809_v48 = vld [vmem:[%s18701_s30 + $0x98] sm:$0xf] }
0x1724   : > { %v13730_v14 = vor.u32 %v15829_v27, %v13729_v52  ;;  %v13755_v52 = vld [vmem:[%s18701_s30 + $0x60] sm:$0xf0]  ;;  %v13761_v27 = vld [vmem:[%s18701_s30 + $0x28] sm:$0xf] }
0x1725   : > { %v7260_v15 = vpack.c.bf16 %v7259_v7, %v7259_v7  ;;  %v13758_v55 = vor.u32 %v15824_v37, %v13755_v52  ;;  %v15861_v37 = vld [vmem:[%s16822_s24 + $0x48] sm:$0xff]  ;;  %v15868_v52 = vld [vmem:[%s16822_s24 + $0x80] sm:$0xff] }
0x172a   : > { %v7113_v6 = vpop.f32.mrf.mxu2 }
0x172b   : > { %v15847_v6 = vld [vmem:[%s18701_s30 + $0xd4] sm:$0xf0] }
0x172e   : > { %v7262_v60 = vpop.permute.xlu0 %7261 }
0x172f   : > { %7274 = vmatpush.bf16.msra.mxu0 %v7262_v60  ;;  %v13810_v60 = vor.u32 %v15847_v6, %v13809_v48  ;;  %v15851_v48 = vld [vmem:[%s18701_s30 + $0xf4] sm:$0xf0]  ;;  %v15843_v6 = vld [vmem:[%s18701_s30 + $0xbc] sm:$0xf] }
0x1732   : > { %13709 = vmatmul.msk.bf16.vlgmr.msra.gmra.mxu0 %vm1875_vm4, %v7260_v15  ;;  %v15839_v15 = vld [vmem:[%s18701_s30 + $0x9c] sm:$0xf] }
0x1733   : > { %7881 = vmatpush.bf16.msrb.mxu0 %v13794_v58  ;;  %v15841_v58 = vld [vmem:[%s18701_s30 + $0xac] sm:$0xf] }
0x1737   : > { %7882 = vmatpush.bf16.msrb.mxu0 %v13730_v14  ;;  %v15825_v14 = vld [vmem:[%s18701_s30 + $0x2c] sm:$0xf] }
0x1738   : > { %v13766_v56 = vor.u32 %v15825_v14, %v13763_v3  ;;  %v15915_v14 = vld [vmem:[%s16822_s24 + $0x1f8] sm:$0xff]  ;;  %v15852_v3 = vld [vmem:[%s16822_s24] sm:$0xff] }
0x173b   : > { %7933 = vmatpush.bf16.msra.mxu0 %v13810_v60 }
0x178c   : > { %v7222_v28 = vpop.f32.mrf.mxu2 }
0x1794   : > { %v7168_v10 = vpop.f32.mrf.mxu0  ;;  %v7224_v16 = vpop.f32.mrf.mxu2 }
0x1795   : > { %7281 = vrot.lane.b32.xlu2 %v7168_v10, %s18675_s10  ;;  %v13737_v10 = vld [vmem:[%s18701_s30 + $0x10] sm:$0xf] }
0x179c   : > { %v7170_v19 = vpop.f32.mrf.mxu0 }
0x179d   : > { %7285 = vrot.lane.b32.xlu2 %v7222_v28, %s18677_s5  ;;  %v13811_v28 = vld [vmem:[%s18701_s30 + $0xd8] sm:$0xf0] }
0x179e   : > { %v13814_v19 = vor.u32 %v15839_v15, %v13811_v28  ;;  %v13769_v28 = vld [vmem:[%s18701_s30 + $0x30] sm:$0xf] }
0x17af   : > { %v7276_v22 = vpop.f32.mrf.mxu0 }
0x17b0   : > { %7289 = vrot.lane.b32.xlu0 %v7276_v22, %s18676_s7  ;;  %v15830_v22 = vld [vmem:[%s18701_s30 + $0x4c] sm:$0xf0] }
0x17b1   : > { %v13738_v20 = vor.u32 %v15830_v22, %v13737_v10  ;;  %v15834_v10 = vld [vmem:[%s18701_s30 + $0x6c] sm:$0xf0]  ;;  %v15826_v22 = vld [vmem:[%s18701_s30 + $0x34] sm:$0xf] }
0x17b7   : > { %v7278_v25 = vpop.f32.mrf.mxu0 }
0x17b8   : > { %v15822_v25 = vld [vmem:[%s18701_s30 + $0x14] sm:$0xf] }
0x17ef   : > { %v7282_v59 = vpop.permute.xlu2 %7281 }
0x17f0   : > { %v7292_v45 = vsel %vm1854_vm3, %v7111_v5, %v7282_v59  ;;  %v13803_v5 = vld [vmem:[%s18701_s30 + $0xd0] sm:$0xf0]  ;;  %v13745_v59 = vld [vmem:[%s18701_s30 + $0x18] sm:$0xf] }
0x17f1   : > { %v13806_v7 = vor.u32 %v15838_v12, %v13803_v5  ;;  %v15850_v12 = vld [vmem:[%s18701_s30 + $0xec] sm:$0xf0]  ;;  %v13841_v5 = vld [vmem:[%s18701_s30 + $0xb8] sm:$0xf] }
0x17f2   : > { %v13834_v60 = vor.u32 %v15850_v12, %v13833_v32  ;;  %v15914_v32 = vld [vmem:[%s16822_s24 + $0x1f0] sm:$0xff] }
0x17f3   : > { %7920 = vmatpush.bf16.msrb.mxu3 %v13806_v7  ;;  %v13843_v7 = vld [vmem:[%s18701_s30 + $0xf8] sm:$0xf0]  ;;  %v15890_v12 = vld [vmem:[%s16822_s24 + $0x130] sm:$0xff] }
0x17f7   : > { %v7286_v0 = vpop.permute.xlu2 %7285 }
0x17f8   : > { %v7293_v29 = vsel %vm1875_vm4, %v7292_v45, %v7286_v0  ;;  %v15831_v0 = vld [vmem:[%s18701_s30 + $0x54] sm:$0xf0]  ;;  %v13742_v45 = vor.u32 %v15822_v25, %v13739_v21  ;;  %v13771_v25 = vld [vmem:[%s18701_s30 + $0x70] sm:$0xf0] }
0x17f9   : > { %v15835_v21 = vld [vmem:[%s18701_s30 + $0x74] sm:$0xf0] }
0x17fa   : > { %7921 = vmatpush.bf16.msrb.mxu3 %v13742_v45  ;;  %v13770_v45 = vor.u32 %v15834_v10, %v13769_v28  ;;  %v15896_v28 = vld [vmem:[%s16822_s24 + $0x160] sm:$0xff]  ;;  %v15903_v10 = vld [vmem:[%s16822_s24 + $0x198] sm:$0xff] }
0x1822   : > { %v7290_v30 = vpop.permute.xlu0 %7289 }
0x1823   : > { %v7294_v31 = vsel %vm2175_vm5, %v7293_v29, %v7290_v30  ;;  %v13746_v29 = vor.u32 %v15831_v0, %v13745_v59  ;;  %v15823_v30 = vld [vmem:[%s18701_s30 + $0x1c] sm:$0xf] }
0x1824   : > { %v7295_v26 = vpack.c.bf16 %v7294_v31, %v7294_v31  ;;  %v13747_v31 = vld [vmem:[%s18701_s30 + $0x58] sm:$0xf0] }
0x1825   : > { %7934 = vmatpush.bf16.msra.mxu0 %v13746_v29  ;;  %v15827_v59 = vld [vmem:[%s18701_s30 + $0x3c] sm:$0xf]  ;;  %v13774_v29 = vor.u32 %v15826_v22, %v13771_v25  ;;  %v15910_v22 = vld [vmem:[%s16822_s24 + $0x1d0] sm:$0xff] }
0x1826   : > { %13718 = vmatmul.msk.bf16.vlgmr.msra.gmra.mxu1 %vm1760_vm2, %v7295_v26  ;;  %v13750_v26 = vor.u32 %v15823_v30, %v13747_v31  ;;  %v13779_v0 = vld [vmem:[%s18701_s30 + $0x78] sm:$0xf0] }
0x1827   : > { %7946 = vmatpush.bf16.msra.mxu1 %v13814_v19  ;;  %v13846_v19 = vor.u32 %v15843_v6, %v13843_v7  ;;  %v13782_v31 = vor.u32 %v15827_v59, %v13779_v0  ;;  %v15897_v6 = vld [vmem:[%s16822_s24 + $0x168] sm:$0xff]  ;;  %v15904_v7 = vld [vmem:[%s16822_s24 + $0x1a0] sm:$0xff]  ;;  %v15887_v25 = vld [vmem:[%s16822_s24 + $0x118] sm:$0xff] }
0x1828   : > { %v15909_v59 = vld [vmem:[%s16822_s24 + $0x1c8] sm:$0xff]  ;;  %v15886_v0 = vld [vmem:[%s16822_s24 + $0x110] sm:$0xff] }
0x182b   : > { %7947 = vmatpush.bf16.msra.mxu1 %v13750_v26  ;;  %v15875_v26 = vld [vmem:[%s16822_s24 + $0xb8] sm:$0xff] }
0x18a3   : > { %v7323_v33 = vpop.f32.mrf.mxu1 }
0x18a4   : > { %v7324_v35 = vadd.f32 %v16290_v18, %v7323_v33 }
0x18a6   : > { %v7327_v36 = vadd.f32 %v7324_v35, %v17758_v8  ;;  %v13785_v8 = vld [vmem:[%s18701_s30 + $0x80] sm:$0xf] }
0x18a7   : > { %v13786_v53 = vor.u32 %v15844_v41, %v13785_v8  ;;  %v13817_v41 = vld [vmem:[%s18701_s30 + $0xa0] sm:$0xf] }
0x18a8   : > { %v7330_v57 = vsel %vm1760_vm2, %v7327_v36, 0.0  ;;  %v13818_v46 = vor.u32 %v15848_v50, %v13817_v41  ;;  %v15872_v41 = vld [vmem:[%s16822_s24 + $0xa0] sm:$0xff] }
0x18a9   : > { %7331 = vadd.xlane.f32.xlu1 %v7330_v57  ;;  %7855 = vmatpush.bf16.msra.mxu2 %v13786_v53  ;;  %v15840_v53 = vld [vmem:[%s18701_s30 + $0xa4] sm:$0xf] }
0x18aa   : > { %v13822_v11 = vor.u32 %v15840_v53, %v13819_v62  ;;  %v15880_v50 = vld [vmem:[%s16822_s24 + $0xe0] sm:$0xff] }
0x18ab   : > { %v7325_v39 = vpop.f32.mrf.mxu1  ;;  %v15856_v53 = vld [vmem:[%s16822_s24 + $0x20] sm:$0xff] }
0x18ac   : > { %v15864_v62 = vld [vmem:[%s16822_s24 + $0x60] sm:$0xff] }
0x18ad   : > { %7856 = vmatpush.bf16.msra.mxu2 %v13722_v61  ;;  %v13830_v61 = vor.u32 %v15841_v58, %v13827_v63  ;;  %v15855_v58 = vld [vmem:[%s16822_s24 + $0x18] sm:$0xff] }
0x18ae   : > { %v15863_v63 = vld [vmem:[%s16822_s24 + $0x58] sm:$0xff] }
0x18b1   : > { %7907 = vmatpush.bf16.msrb.mxu2 %v13802_v4  ;;  %v13835_v4 = vld [vmem:[%s18701_s30 + $0xf0] sm:$0xf0] }
0x18b5   : > { %7908 = vmatpush.bf16.msrb.mxu2 %v13738_v20  ;;  %v13777_v20 = vld [vmem:[%s18701_s30 + $0x38] sm:$0xf] }
0x18b6   : > { %v13778_v30 = vor.u32 %v15835_v21, %v13777_v20  ;;  %v15895_v20 = vld [vmem:[%s16822_s24 + $0x158] sm:$0xff]  ;;  %v15901_v21 = vld [vmem:[%s16822_s24 + $0x188] sm:$0xff] }
0x191c   : > { %v7332_v40 = vpop.xlane.xlu1 %7331 }
0x191d   : > { %v7333_v38 = vmul.f32 %v7332_v40, %v16946_v17  ;;  %v16291_v40 = vld [vmem:[%s18702_s22] ss:$0 sm:$0xff]  ;;  %s18706_s22 = sld [smem:[#allocation51_spill]] }
0x191f   : > { %v17830_v47 = vsub.f32 %v7327_v36, %v7333_v38 }
0x1921   : > { %v7335_v49 = vmul.f32 %v17830_v47, %v17830_v47 }
0x1923   : > { %v7336_v34 = vsel %vm1760_vm2, %v7335_v49, 0.0  ;;  %v16292_v49 = vld [vmem:[%s18704_s23] ss:$0 sm:$0xff] }
0x1924   : > { %7337 = vadd.xlane.f32.xlu2 %v7336_v34 }
0x1997   : > { %v7338_v23 = vpop.xlane.xlu2 %7337 }
0x1998   : > { %v7339_v2 = vmul.f32 %v7338_v23, %v16946_v17  ;;  %v13762_v23 = vor.u32 %v15833_v54, %v13761_v27  ;;  %v15876_v27 = vld [vmem:[%s16822_s24 + $0xc0] sm:$0xff]  ;;  %v15907_v54 = vld [vmem:[%s16822_s24 + $0x1b8] sm:$0xff] }
0x199a   : > { %v7340_v16 = vadd.f32 1e-05, %v7339_v2  ;;  %v15842_v2 = vld [vmem:[%s18701_s30 + $0xb4] sm:$0xf] }
0x199b   : > { %v13838_v15 = vor.u32 %v15842_v2, %v13835_v4  ;;  %v15898_v2 = vld [vmem:[%s16822_s24 + $0x170] sm:$0xff]  ;;  %v15905_v4 = vld [vmem:[%s16822_s24 + $0x1a8] sm:$0xff] }
0x199c   : > { %16434 = vrsqrt.f32 %v7340_v16  ;;  %vm7347_vm7 = vweird.f32 %v7340_v16 }
0x19a2   : > { %v16435_v18 = vpop.eup %16434 }
0x19a3   : > { %v7342_v33 = vmul.f32 %v16435_v18, %v7340_v16  ;;  %vm7348_vm6 = vweird.f32 %v16435_v18  ;;  %v13842_v16 = vor.u32 %v15851_v48, %v13841_v5  ;;  %v15913_v5 = vld [vmem:[%s16822_s24 + $0x1e8] sm:$0xff] }
0x19a4   : > { %vm7349_vm8 = vmor %vm7347_vm7, %vm7348_vm6  ;;  %v15889_v48 = vld [vmem:[%s16822_s24 + $0x128] sm:$0xff] }
0x19a5   : > { %v7343_v35 = vmul.f32 %v16435_v18, %v7342_v33  ;;  %v15859_v33 = vld [vmem:[%s16822_s24 + $0x38] sm:$0xff] }
0x19a7   : > { %v7344_v36 = vmul.f32 0.5, %v7343_v35  ;;  %v15867_v35 = vld [vmem:[%s16822_s24 + $0x78] sm:$0xff] }
0x19a9   : > { %v7345_v57 = vsub.f32 1.5, %v7344_v36  ;;  %v15874_v36 = vld [vmem:[%s16822_s24 + $0xb0] sm:$0xff] }
0x19ab   : > { %v7346_v39 = vmul.f32 %v16435_v18, %v7345_v57  ;;  %v15882_v57 = vld [vmem:[%s16822_s24 + $0xf0] sm:$0xff] }
0x19ad   : > { %v7350_v38 = vsel %vm7349_vm8, %v16435_v18, %v7346_v39  ;;  %v15883_v18 = vld [vmem:[%s16822_s24 + $0xf8] sm:$0xff]  ;;  %v15858_v39 = vld [vmem:[%s16822_s24 + $0x30] sm:$0xff] }
0x19ae   : > { %v7351_v34 = vmul.f32 %v7350_v38, %v17830_v47  ;;  %v15873_v38 = vld [vmem:[%s16822_s24 + $0xa8] sm:$0xff] }
0x19b0   : > { %v7355_v8 = vmul.f32 %v16291_v40, %v7351_v34  ;;  %v15866_v40 = vld [vmem:[%s16822_s24 + $0x70] sm:$0xff]  ;;  %v15857_v34 = vld [vmem:[%s16822_s24 + $0x28] sm:$0xff] }
0x19b2   : > { %v17876_v42 = vadd.f32 %v16292_v49, %v7355_v8  ;;  %v15881_v49 = vld [vmem:[%s16822_s24 + $0xe8] sm:$0xff] }
0x19b3   : > { %v15865_v8 = vld [vmem:[%s16822_s24 + $0x68] sm:$0xff] }
0x19b4   : > { %v17883_v47 = vpack.c.bf16 %v17876_v42, %v17876_v42 }
0x19b6   : > { %13847 = vmatmul.msk.bf16.vlgmr.msra.gmra.mxu2 %vm1760_vm2, %v17883_v47  ;;  %13848 = vmatmul.msk.bf16.vlgmr.msra.gmra.mxu3 %vm1760_vm2, %v17883_v47 }
0x19b7   : > { %13849 = vmatmul.msk.bf16.vlgmr.msrb.gmra.mxu0 %vm1760_vm2, %v17883_v47  ;;  %13850 = vmatmul.msk.bf16.vlgmr.msrb.gmra.mxu1 %vm1760_vm2, %v17883_v47 }
0x19b8   : > { %7959 = vmatpush.bf16.msra.mxu2 %v13818_v46  ;;  %7972 = vmatpush.bf16.msra.mxu3 %v13822_v11  ;;  %v15870_v46 = vld [vmem:[%s16822_s24 + $0x90] sm:$0xff] }
0x19b9   : > { %7985 = vmatpush.bf16.msrb.mxu0 %v13826_v9  ;;  %7998 = vmatpush.bf16.msrb.mxu1 %v13830_v61  ;;  %v15878_v11 = vld [vmem:[%s16822_s24 + $0xd0] sm:$0xff]  ;;  %v15869_v9 = vld [vmem:[%s16822_s24 + $0x88] sm:$0xff] }
0x19ba   : > { %v15853_v61 = vld [vmem:[%s16822_s24 + $0x8] sm:$0xff] }
0x19bc   : > { %7960 = vmatpush.bf16.msra.mxu2 %v13754_v1  ;;  %7973 = vmatpush.bf16.msra.mxu3 %v13758_v55  ;;  %v15860_v1 = vld [vmem:[%s16822_s24 + $0x40] sm:$0xff]  ;;  %v15891_v55 = vld [vmem:[%s16822_s24 + $0x138] sm:$0xff] }
0x19bd   : > { %7986 = vmatpush.bf16.msrb.mxu0 %v13762_v23  ;;  %7999 = vmatpush.bf16.msrb.mxu1 %v13766_v56  ;;  %v15899_v23 = vld [vmem:[%s16822_s24 + $0x178] sm:$0xff]  ;;  %v15906_v56 = vld [vmem:[%s16822_s24 + $0x1b0] sm:$0xff] }
0x19c6   : > { %13851 = vmatmul.msk.bf16.vlgmr.msrb.gmra.mxu2 %vm1760_vm2, %v17883_v47  ;;  %13852 = vmatmul.msk.bf16.vlgmr.msrb.gmra.mxu3 %vm1760_vm2, %v17883_v47 }
0x19c7   : > { %13853 = vmatmul.msk.bf16.vlgmr.msra.gmra.mxu0 %vm1760_vm2, %v17883_v47  ;;  %13854 = vmatmul.msk.bf16.vlgmr.msra.gmra.mxu1 %vm1760_vm2, %v17883_v47 }
0x19c8   : > { %8011 = vmatpush.bf16.msrb.mxu2 %v13834_v60  ;;  %8024 = vmatpush.bf16.msrb.mxu3 %v13838_v15  ;;  %v15912_v60 = vld [vmem:[%s16822_s24 + $0x1e0] sm:$0xff] }
0x19c9   : > { %8037 = vmatpush.bf16.msra.mxu0 %v13842_v16  ;;  %8050 = vmatpush.bf16.msra.mxu1 %v13846_v19  ;;  %v15888_v15 = vld [vmem:[%s16822_s24 + $0x120] sm:$0xff]  ;;  %v15911_v16 = vld [vmem:[%s16822_s24 + $0x1d8] sm:$0xff]  ;;  %v15902_v19 = vld [vmem:[%s16822_s24 + $0x190] sm:$0xff] }
0x19cc   : > { %8012 = vmatpush.bf16.msrb.mxu2 %v13770_v45  ;;  %8025 = vmatpush.bf16.msrb.mxu3 %v13774_v29  ;;  %v15894_v45 = vld [vmem:[%s16822_s24 + $0x150] sm:$0xff]  ;;  %v15900_v29 = vld [vmem:[%s16822_s24 + $0x180] sm:$0xff] }
0x19cd   : > { %8038 = vmatpush.bf16.msra.mxu0 %v13778_v30  ;;  %8051 = vmatpush.bf16.msra.mxu1 %v13782_v31  ;;  %v15908_v30 = vld [vmem:[%s16822_s24 + $0x1c0] sm:$0xff]  ;;  %v15885_v31 = vld [vmem:[%s16822_s24 + $0x108] sm:$0xff] }
0x19d6   : > { %13855 = vmatmul.msk.bf16.vlgmr.msra.gmra.mxu2 %vm1760_vm2, %v17883_v47  ;;  %13856 = vmatmul.msk.bf16.vlgmr.msra.gmra.mxu3 %vm1760_vm2, %v17883_v47 }
0x19d7   : > { %13857 = vmatmul.msk.bf16.vlgmr.msrb.gmra.mxu0 %vm1760_vm2, %v17883_v47  ;;  %13858 = vmatmul.msk.bf16.vlgmr.msrb.gmra.mxu1 %vm1760_vm2, %v17883_v47 }
0x19d8   : > { %8886 = vmatpush.bf16.msrb.mxu0 %v15875_v26  ;;  %8899 = vmatpush.bf16.msrb.mxu1 %v15883_v18  ;;  %v15893_v26 = vld [vmem:[%s16822_s24 + $0x148] sm:$0xff]  ;;  %v15884_v18 = vld [vmem:[%s16822_s24 + $0x100] sm:$0xff] }
0x19d9   : > { %8860 = vmatpush.bf16.msra.mxu2 %v15859_v33  ;;  %8873 = vmatpush.bf16.msra.mxu3 %v15867_v35  ;;  %v15892_v33 = vld [vmem:[%s16822_s24 + $0x140] sm:$0xff] }
0x19da   : > { %v18006_v35 = vld [vmem:[%s18649_s29] sm:$0xff] }
0x19dc   : > { %8887 = vmatpush.bf16.msrb.mxu0 %v15874_v36  ;;  %8900 = vmatpush.bf16.msrb.mxu1 %v15882_v57  ;;  %v7656_v36 = vperm.slane %v18006_v35, 2  ;;  %v7657_v57 = vperm.slane %v18006_v35, 3 }
0x19dd   : > { %8861 = vmatpush.bf16.msra.mxu2 %v15858_v39  ;;  %8874 = vmatpush.bf16.msra.mxu3 %v15866_v40 }
0x19e0   : > { %8888 = vmatpush.bf16.msrb.mxu0 %v15873_v38  ;;  %8901 = vmatpush.bf16.msrb.mxu1 %v15881_v49 }
0x19e1   : > { %8862 = vmatpush.bf16.msra.mxu2 %v15857_v34  ;;  %8875 = vmatpush.bf16.msra.mxu3 %v15865_v8  ;;  %v7654_v34 = vperm.slane %v18006_v35, 0  ;;  %v7655_v8 = vperm.slane %v18006_v35, 1 }
0x19e4   : > { %8889 = vmatpush.bf16.msrb.mxu0 %v15872_v41  ;;  %8902 = vmatpush.bf16.msrb.mxu1 %v15880_v50 }
0x19e5   : > { %8863 = vmatpush.bf16.msra.mxu2 %v15856_v53  ;;  %8876 = vmatpush.bf16.msra.mxu3 %v15864_v62  ;;  %v15939_v53 = vld [vmem:[%s16822_s24 + $0x2b8] sm:$0xff] }
0x19e6   : > { %13859 = vmatmul.msk.bf16.vlgmr.msrb.gmra.mxu2 %vm1760_vm2, %v17883_v47  ;;  %13860 = vmatmul.msk.bf16.vlgmr.msrb.gmra.mxu3 %vm1760_vm2, %v17883_v47  ;;  %v15947_v62 = vld [vmem:[%s16822_s24 + $0x2f8] sm:$0xff] }
0x19e7   : > { %13861 = vmatmul.msk.bf16.vlgmr.msra.gmra.mxu0 %vm1760_vm2, %v17883_v47  ;;  %13862 = vmatmul.msk.bf16.vlgmr.msra.gmra.mxu1 %vm1760_vm2, %v17883_v47  ;;  %v15877_v47 = vld [vmem:[%s16822_s24 + $0xc8] sm:$0xff] }
0x19e8   : > { %8890 = vmatpush.bf16.msrb.mxu0 %v15871_v43  ;;  %8903 = vmatpush.bf16.msrb.mxu1 %v15879_v24 }
0x19e9   : > { %8864 = vmatpush.bf16.msra.mxu2 %v15855_v58  ;;  %8877 = vmatpush.bf16.msra.mxu3 %v15863_v63 }
0x19ec   : > { %8891 = vmatpush.bf16.msrb.mxu0 %v15870_v46  ;;  %8904 = vmatpush.bf16.msrb.mxu1 %v15878_v11 }
0x19ed   : > { %8865 = vmatpush.bf16.msra.mxu2 %v15854_v51  ;;  %8878 = vmatpush.bf16.msra.mxu3 %v15862_v13 }
0x19f0   : > { %8892 = vmatpush.bf16.msrb.mxu0 %v15869_v9  ;;  %8905 = vmatpush.bf16.msrb.mxu1 %v15877_v47 }
0x19f1   : > { %8866 = vmatpush.bf16.msra.mxu2 %v15853_v61  ;;  %8879 = vmatpush.bf16.msra.mxu3 %v15861_v37  ;;  %v15938_v61 = vld [vmem:[%s16822_s24 + $0x2b0] sm:$0xff] }
0x19f2   : > { %v15946_v37 = vld [vmem:[%s16822_s24 + $0x2f0] sm:$0xff] }
0x19f4   : > { %8893 = vmatpush.bf16.msrb.mxu0 %v15868_v52  ;;  %8906 = vmatpush.bf16.msrb.mxu1 %v15876_v27 }
0x19f5   : > { %8867 = vmatpush.bf16.msra.mxu2 %v15852_v3  ;;  %8880 = vmatpush.bf16.msra.mxu3 %v15860_v1  ;;  %v15937_v3 = vld [vmem:[%s16822_s24 + $0x2a8] sm:$0xff] }
0x19f6   : > { %v15945_v1 = vld [vmem:[%s16822_s24 + $0x2e8] sm:$0xff] }
0x19f8   : > { %8938 = vmatpush.bf16.msra.mxu0 %v15907_v54  ;;  %8951 = vmatpush.bf16.msra.mxu1 %v15915_v14  ;;  %v15923_v54 = vld [vmem:[%s16822_s24 + $0x238] sm:$0xff] }
0x19f9   : > { %8912 = vmatpush.bf16.msrb.mxu2 %v15891_v55  ;;  %8925 = vmatpush.bf16.msrb.mxu3 %v15899_v23  ;;  %v15931_v14 = vld [vmem:[%s16822_s24 + $0x278] sm:$0xff] }
0x19fc   : > { %8939 = vmatpush.bf16.msra.mxu0 %v15906_v56  ;;  %8952 = vmatpush.bf16.msra.mxu1 %v15914_v32  ;;  %v7660_v56 = vperm.slane %v18006_v35, 6  ;;  %v7661_v32 = vperm.slane %v18006_v35, 7 }
0x19fd   : > { %8913 = vmatpush.bf16.msrb.mxu2 %v15890_v12  ;;  %8926 = vmatpush.bf16.msrb.mxu3 %v15898_v2  ;;  %v15922_v12 = vld [vmem:[%s16822_s24 + $0x230] sm:$0xff] }
0x19fe   : > { %v15930_v2 = vld [vmem:[%s16822_s24 + $0x270] sm:$0xff] }
0x1a00   : > { %8940 = vmatpush.bf16.msra.mxu0 %v15905_v4  ;;  %8953 = vmatpush.bf16.msra.mxu1 %v15913_v5 }
0x1a01   : > { %8914 = vmatpush.bf16.msrb.mxu2 %v15889_v48  ;;  %8927 = vmatpush.bf16.msrb.mxu3 %v15897_v6  ;;  %v15936_v48 = vld [vmem:[%s16822_s24 + $0x2a0] sm:$0xff] }
0x1a02   : > { %v15944_v6 = vld [vmem:[%s16822_s24 + $0x2e0] sm:$0xff] }
0x1a04   : > { %8941 = vmatpush.bf16.msra.mxu0 %v15904_v7  ;;  %8954 = vmatpush.bf16.msra.mxu1 %v15912_v60 }
0x1a05   : > { %8915 = vmatpush.bf16.msrb.mxu2 %v15888_v15  ;;  %8928 = vmatpush.bf16.msrb.mxu3 %v15896_v28  ;;  %v15921_v15 = vld [vmem:[%s16822_s24 + $0x228] sm:$0xff] }
0x1a06   : > { %v15929_v28 = vld [vmem:[%s16822_s24 + $0x268] sm:$0xff] }
0x1a08   : > { %8942 = vmatpush.bf16.msra.mxu0 %v15903_v10  ;;  %8955 = vmatpush.bf16.msra.mxu1 %v15911_v16  ;;  %v7658_v10 = vperm.slane %v18006_v35, 4  ;;  %v7659_v16 = vperm.slane %v18006_v35, 5 }
0x1a09   : > { %8916 = vmatpush.bf16.msrb.mxu2 %v15887_v25  ;;  %8929 = vmatpush.bf16.msrb.mxu3 %v15895_v20  ;;  %v15935_v25 = vld [vmem:[%s16822_s24 + $0x298] sm:$0xff] }
0x1a0a   : > { %v15943_v20 = vld [vmem:[%s16822_s24 + $0x2d8] sm:$0xff] }
0x1a0c   : > { %8943 = vmatpush.bf16.msra.mxu0 %v15902_v19  ;;  %8956 = vmatpush.bf16.msra.mxu1 %v15910_v22 }
0x1a0d   : > { %8917 = vmatpush.bf16.msrb.mxu2 %v15886_v0  ;;  %8930 = vmatpush.bf16.msrb.mxu3 %v15894_v45 }
0x1a10   : > { %8944 = vmatpush.bf16.msra.mxu0 %v15901_v21  ;;  %8957 = vmatpush.bf16.msra.mxu1 %v15909_v59 }
0x1a11   : > { %8918 = vmatpush.bf16.msrb.mxu2 %v15885_v31  ;;  %8931 = vmatpush.bf16.msrb.mxu3 %v15893_v26  ;;  %v15920_v31 = vld [vmem:[%s16822_s24 + $0x220] sm:$0xff] }
0x1a12   : > { %v15928_v26 = vld [vmem:[%s16822_s24 + $0x260] sm:$0xff] }
0x1a14   : > { %8945 = vmatpush.bf16.msra.mxu0 %v15900_v29  ;;  %8958 = vmatpush.bf16.msra.mxu1 %v15908_v30 }
0x1a15   : > { %8919 = vmatpush.bf16.msrb.mxu2 %v15884_v18  ;;  %8932 = vmatpush.bf16.msrb.mxu3 %v15892_v33 }
0x1a34   : > { %v7884_v39 = vpop.f32.mrf.mxu0  ;;  %v7897_v40 = vpop.f32.mrf.mxu1 }
0x1a35   : > { %v7885_v38 = vadd.f32 %v7884_v39, %v7656_v36  ;;  %v7898_v49 = vadd.f32 %v7897_v40, %v7657_v57  ;;  %v15934_v57 = vld [vmem:[%s16822_s24 + $0x290] sm:$0xff] }
0x1a36   : > { %v15942_v39 = vld [vmem:[%s16822_s24 + $0x2d0] sm:$0xff] }
0x1a37   : > { %v8059_v41 = vmax.f32 %v7885_v38, 0.0  ;;  %v8060_v50 = vmax.f32 %v7898_v49, 0.0  ;;  %v15919_v49 = vld [vmem:[%s16822_s24 + $0x218] sm:$0xff] }
0x1a39   : > { %v8075_v43 = vpack.c.bf16 %v8059_v41, %v8059_v41  ;;  %v8076_v24 = vpack.c.bf16 %v8060_v50, %v8060_v50  ;;  %v7858_v58 = vpop.f32.mrf.mxu2  ;;  %v7871_v63 = vpop.f32.mrf.mxu3  ;;  %v15933_v41 = vld [vmem:[%s16822_s24 + $0x288] sm:$0xff] }
0x1a3a   : > { %v7859_v46 = vadd.f32 %v7858_v58, %v7654_v34  ;;  %v7872_v11 = vadd.f32 %v7871_v63, %v7655_v8  ;;  %v15927_v34 = vld [vmem:[%s16822_s24 + $0x258] sm:$0xff]  ;;  %v18039_v8 = vld [vmem:[%s18649_s29 + $0x8] sm:$0xff]  ;;  %v15918_v58 = vld [vmem:[%s16822_s24 + $0x210] sm:$0xff]  ;;  %s18708_s29 = sld [smem:[#allocation52_spill]] }
0x1a3b   : > { %8894 = vmatmul.bf16.vlgmr.msrb.gmra.mxu0 %v8075_v43  ;;  %8907 = vmatmul.bf16.vlgmr.msrb.gmra.mxu1 %v8076_v24  ;;  %v15941_v50 = vld [vmem:[%s16822_s24 + $0x2c8] sm:$0xff]  ;;  %v7664_v43 = vperm.slane %v18039_v8, 2  ;;  %v7665_v24 = vperm.slane %v18039_v8, 3  ;;  %v15926_v63 = vld [vmem:[%s16822_s24 + $0x250] sm:$0xff] }
0x1a3c   : > { %v8057_v51 = vmax.f32 %v7859_v46, 0.0  ;;  %v8058_v13 = vmax.f32 %v7872_v11, 0.0  ;;  %8990 = vmatpush.bf16.msrb.mxu0 %v15939_v53  ;;  %9003 = vmatpush.bf16.msrb.mxu1 %v15947_v62  ;;  %v7886_v9 = vpop.f32.mrf.mxu0  ;;  %v7899_v47 = vpop.f32.mrf.mxu1 }
0x1a3e   : > { %v8073_v52 = vpack.c.bf16 %v8057_v51, %v8057_v51  ;;  %v8074_v27 = vpack.c.bf16 %v8058_v13, %v8058_v13  ;;  %v15932_v51 = vld [vmem:[%s16822_s24 + $0x280] sm:$0xff] }
0x1a3f   : > { %v15940_v13 = vld [vmem:[%s16822_s24 + $0x2c0] sm:$0xff] }
0x1a40   : > { %8991 = vmatpush.bf16.msrb.mxu0 %v15938_v61  ;;  %9004 = vmatpush.bf16.msrb.mxu1 %v15946_v37  ;;  %v15971_v61 = vld [vmem:[%s16822_s24 + $0x3b8] sm:$0xff] }
0x1a41   : > { %8868 = vmatmul.bf16.vlgmr.msra.gmra.mxu2 %v8073_v52  ;;  %8881 = vmatmul.bf16.vlgmr.msra.gmra.mxu3 %v8074_v27  ;;  %v7860_v55 = vpop.f32.mrf.mxu2  ;;  %v7873_v23 = vpop.f32.mrf.mxu3  ;;  %v15979_v37 = vld [vmem:[%s16822_s24 + $0x3f8] sm:$0xff]  ;;  %v15917_v52 = vld [vmem:[%s16822_s24 + $0x208] sm:$0xff] }
0x1a42   : > { %8964 = vmatpush.bf16.msra.mxu2 %v15923_v54  ;;  %8977 = vmatpush.bf16.msra.mxu3 %v15931_v14  ;;  %v15925_v27 = vld [vmem:[%s16822_s24 + $0x248] sm:$0xff]  ;;  %v7662_v54 = vperm.slane %v18039_v8, 0  ;;  %v7663_v14 = vperm.slane %v18039_v8, 1 }
0x1a44   : > { %8992 = vmatpush.bf16.msrb.mxu0 %v15937_v3  ;;  %9005 = vmatpush.bf16.msrb.mxu1 %v15945_v1  ;;  %v7936_v4 = vpop.f32.mrf.mxu0  ;;  %v7949_v5 = vpop.f32.mrf.mxu1 }
0x1a45   : > { %v7937_v7 = vadd.f32 %v7936_v4, %v7660_v56  ;;  %v7950_v60 = vadd.f32 %v7949_v5, %v7661_v32 }
0x1a46   : > { %8965 = vmatpush.bf16.msra.mxu2 %v15922_v12  ;;  %8978 = vmatpush.bf16.msra.mxu3 %v15930_v2  ;;  %v15970_v12 = vld [vmem:[%s16822_s24 + $0x3b0] sm:$0xff] }
0x1a47   : > { %v8063_v19 = vmax.f32 %v7937_v7, 0.0  ;;  %v8064_v22 = vmax.f32 %v7950_v60, 0.0  ;;  %v15978_v2 = vld [vmem:[%s16822_s24 + $0x3f0] sm:$0xff]  ;;  %v15955_v7 = vld [vmem:[%s16822_s24 + $0x338] sm:$0xff] }
0x1a48   : > { %8993 = vmatpush.bf16.msrb.mxu0 %v15936_v48  ;;  %9006 = vmatpush.bf16.msrb.mxu1 %v15944_v6  ;;  %v15916_v48 = vld [vmem:[%s16822_s24 + $0x200] sm:$0xff]  ;;  %v15963_v60 = vld [vmem:[%s16822_s24 + $0x378] sm:$0xff] }
0x1a49   : > { %v8079_v21 = vpack.c.bf16 %v8063_v19, %v8063_v19  ;;  %v8080_v59 = vpack.c.bf16 %v8064_v22, %v8064_v22  ;;  %v7910_v0 = vpop.f32.mrf.mxu2  ;;  %v7923_v45 = vpop.f32.mrf.mxu3  ;;  %v15924_v6 = vld [vmem:[%s16822_s24 + $0x240] sm:$0xff]  ;;  %v15969_v19 = vld [vmem:[%s16822_s24 + $0x3a8] sm:$0xff] }
0x1a4a   : > { %8966 = vmatpush.bf16.msra.mxu2 %v15921_v15  ;;  %8979 = vmatpush.bf16.msra.mxu3 %v15929_v28  ;;  %v7911_v29 = vadd.f32 %v7910_v0, %v7658_v10  ;;  %v7924_v30 = vadd.f32 %v7923_v45, %v7659_v16  ;;  %v15977_v22 = vld [vmem:[%s16822_s24 + $0x3e8] sm:$0xff] }
0x1a4b   : > { %8946 = vmatmul.bf16.vlgmr.msra.gmra.mxu0 %v8079_v21  ;;  %8959 = vmatmul.bf16.vlgmr.msra.gmra.mxu1 %v8080_v59  ;;  %v15954_v21 = vld [vmem:[%s16822_s24 + $0x330] sm:$0xff] }
0x1a4c   : > { %v8061_v18 = vmax.f32 %v7911_v29, 0.0  ;;  %v8062_v33 = vmax.f32 %v7924_v30, 0.0  ;;  %8994 = vmatpush.bf16.msrb.mxu0 %v15935_v25  ;;  %9007 = vmatpush.bf16.msrb.mxu1 %v15943_v20  ;;  %v7938_v35 = vpop.f32.mrf.mxu0  ;;  %v7951_v36 = vpop.f32.mrf.mxu1  ;;  %v15962_v59 = vld [vmem:[%s16822_s24 + $0x370] sm:$0xff]  ;;  %v15968_v29 = vld [vmem:[%s16822_s24 + $0x3a0] sm:$0xff] }
0x1a4d   : > { %v15976_v30 = vld [vmem:[%s16822_s24 + $0x3e0] sm:$0xff]  ;;  %v15967_v35 = vld [vmem:[%s16822_s24 + $0x398] sm:$0xff] }
0x1a4e   : > { %v8077_v40 = vpack.c.bf16 %v8061_v18, %v8061_v18  ;;  %v8078_v38 = vpack.c.bf16 %v8062_v33, %v8062_v33  ;;  %8967 = vmatpush.bf16.msra.mxu2 %v15920_v31  ;;  %8980 = vmatpush.bf16.msra.mxu3 %v15928_v26  ;;  %v15953_v31 = vld [vmem:[%s16822_s24 + $0x328] sm:$0xff]  ;;  %v15975_v36 = vld [vmem:[%s16822_s24 + $0x3d8] sm:$0xff] }
0x1a4f   : > { %v15961_v26 = vld [vmem:[%s16822_s24 + $0x368] sm:$0xff] }
0x1a50   : > { %8995 = vmatpush.bf16.msrb.mxu0 %v15934_v57  ;;  %9008 = vmatpush.bf16.msrb.mxu1 %v15942_v39  ;;  %v15952_v57 = vld [vmem:[%s16822_s24 + $0x320] sm:$0xff] }
0x1a51   : > { %8920 = vmatmul.bf16.vlgmr.msrb.gmra.mxu2 %v8077_v40  ;;  %8933 = vmatmul.bf16.vlgmr.msrb.gmra.mxu3 %v8078_v38  ;;  %v7912_v53 = vpop.f32.mrf.mxu2  ;;  %v7925_v62 = vpop.f32.mrf.mxu3  ;;  %v15960_v39 = vld [vmem:[%s16822_s24 + $0x360] sm:$0xff] }
0x1a52   : > { %8968 = vmatpush.bf16.msra.mxu2 %v15919_v49  ;;  %8981 = vmatpush.bf16.msra.mxu3 %v15927_v34  ;;  %v15966_v49 = vld [vmem:[%s16822_s24 + $0x390] sm:$0xff]  ;;  %v15951_v53 = vld [vmem:[%s16822_s24 + $0x318] sm:$0xff] }
0x1a53   : > { %v15974_v34 = vld [vmem:[%s16822_s24 + $0x3d0] sm:$0xff]  ;;  %v15959_v62 = vld [vmem:[%s16822_s24 + $0x358] sm:$0xff] }
0x1a54   : > { %8996 = vmatpush.bf16.msrb.mxu0 %v15933_v41  ;;  %9009 = vmatpush.bf16.msrb.mxu1 %v15941_v50  ;;  %v7988_v46 = vpop.f32.mrf.mxu0  ;;  %v8001_v11 = vpop.f32.mrf.mxu1  ;;  %v7668_v41 = vperm.slane %v18039_v8, 6  ;;  %v7669_v50 = vperm.slane %v18039_v8, 7 }
0x1a55   : > { %v7989_v9 = vadd.f32 %v7988_v46, %v7664_v43  ;;  %v8002_v47 = vadd.f32 %v8001_v11, %v7665_v24 }
0x1a56   : > { %8969 = vmatpush.bf16.msra.mxu2 %v15918_v58  ;;  %8982 = vmatpush.bf16.msra.mxu3 %v15926_v63  ;;  %v15965_v58 = vld [vmem:[%s16822_s24 + $0x388] sm:$0xff] }
0x1a57   : > { %v8067_v3 = vmax.f32 %v7989_v9, 0.0  ;;  %v8068_v1 = vmax.f32 %v8002_v47, 0.0  ;;  %v15973_v63 = vld [vmem:[%s16822_s24 + $0x3c8] sm:$0xff]  ;;  %v7666_v9 = vperm.slane %v18039_v8, 4  ;;  %v7667_v47 = vperm.slane %v18039_v8, 5 }
0x1a58   : > { %8997 = vmatpush.bf16.msrb.mxu0 %v15932_v51  ;;  %9010 = vmatpush.bf16.msrb.mxu1 %v15940_v13  ;;  %v15950_v51 = vld [vmem:[%s16822_s24 + $0x310] sm:$0xff] }
0x1a59   : > { %v8083_v55 = vpack.c.bf16 %v8067_v3, %v8067_v3  ;;  %v8084_v23 = vpack.c.bf16 %v8068_v1, %v8068_v1  ;;  %v7962_v56 = vpop.f32.mrf.mxu2  ;;  %v7975_v32 = vpop.f32.mrf.mxu3  ;;  %v15958_v13 = vld [vmem:[%s16822_s24 + $0x350] sm:$0xff]  ;;  %v15949_v3 = vld [vmem:[%s16822_s24 + $0x308] sm:$0xff] }
0x1a5a   : > { %8970 = vmatpush.bf16.msra.mxu2 %v15917_v52  ;;  %8983 = vmatpush.bf16.msra.mxu3 %v15925_v27  ;;  %v7963_v4 = vadd.f32 %v7962_v56, %v7662_v54  ;;  %v7976_v5 = vadd.f32 %v7975_v32, %v7663_v14  ;;  %v15964_v52 = vld [vmem:[%s16822_s24 + $0x380] sm:$0xff]  ;;  %v15957_v1 = vld [vmem:[%s16822_s24 + $0x348] sm:$0xff] }
0x1a5b   : > { %8998 = vmatmul.bf16.vlgmr.msrb.gmra.mxu0 %v8083_v55  ;;  %9011 = vmatmul.bf16.vlgmr.msrb.gmra.mxu1 %v8084_v23  ;;  %v15972_v27 = vld [vmem:[%s16822_s24 + $0x3c0] sm:$0xff] }
0x1a5c   : > { %9042 = vmatpush.bf16.msra.mxu0 %v15971_v61  ;;  %9055 = vmatpush.bf16.msra.mxu1 %v15979_v37  ;;  %v8065_v15 = vmax.f32 %v7963_v4, 0.0  ;;  %v8066_v28 = vmax.f32 %v7976_v5, 0.0  ;;  %v7990_v10 = vpop.f32.mrf.mxu0  ;;  %v8003_v16 = vpop.f32.mrf.mxu1  ;;  %v15948_v32 = vld [vmem:[%s16822_s24 + $0x300] sm:$0xff] }
0x1a5e   : > { %v8081_v25 = vpack.c.bf16 %v8065_v15, %v8065_v15  ;;  %v8082_v20 = vpack.c.bf16 %v8066_v28, %v8066_v28  ;;  %8971 = vmatpush.bf16.msra.mxu2 %v15916_v48  ;;  %8984 = vmatpush.bf16.msra.mxu3 %v15924_v6 }
0x1a60   : > { %9043 = vmatpush.bf16.msra.mxu0 %v15970_v12  ;;  %9056 = vmatpush.bf16.msra.mxu1 %v15978_v2  ;;  %v15956_v12 = vld [vmem:[%s16822_s24 + $0x340] sm:$0xff] }
0x1a61   : > { %v7964_v0 = vpop.f32.mrf.mxu2  ;;  %v7977_v45 = vpop.f32.mrf.mxu3  ;;  %8972 = vmatmul.bf16.vlgmr.msra.gmra.mxu2 %v8081_v25  ;;  %8985 = vmatmul.bf16.vlgmr.msra.gmra.mxu3 %v8082_v20 }
0x1a62   : > { %9016 = vmatpush.bf16.msrb.mxu2 %v15955_v7  ;;  %9029 = vmatpush.bf16.msrb.mxu3 %v15963_v60 }
0x1a64   : > { %9044 = vmatpush.bf16.msra.mxu0 %v15969_v19  ;;  %9057 = vmatpush.bf16.msra.mxu1 %v15977_v22  ;;  %v8040_v18 = vpop.f32.mrf.mxu0  ;;  %v8053_v33 = vpop.f32.mrf.mxu1 }
0x1a65   : > { %v8041_v46 = vadd.f32 %v8040_v18, %v7668_v41  ;;  %v8054_v11 = vadd.f32 %v8053_v33, %v7669_v50 }
0x1a66   : > { %9017 = vmatpush.bf16.msrb.mxu2 %v15954_v21  ;;  %9030 = vmatpush.bf16.msrb.mxu3 %v15962_v59  ;;  %v16293_v59 = vld [vmem:[%s18705_s8] ss:$0 sm:$0xff]  ;;  %s18707_s8 = smov %s18706_s22 }
0x1a67   : > { %v8071_v54 = vmax.f32 %v8041_v46, 0.0  ;;  %v8072_v14 = vmax.f32 %v8054_v11, 0.0 }
0x1a68   : > { %9045 = vmatpush.bf16.msra.mxu0 %v15968_v29  ;;  %9058 = vmatpush.bf16.msra.mxu1 %v15976_v30 }
0x1a69   : > { %v8014_v40 = vpop.f32.mrf.mxu2  ;;  %v8027_v38 = vpop.f32.mrf.mxu3  ;;  %v8087_v56 = vpack.c.bf16 %v8071_v54, %v8071_v54  ;;  %v8088_v8 = vpack.c.bf16 %v8072_v14, %v8072_v14 }
0x1a6a   : > { %9018 = vmatpush.bf16.msrb.mxu2 %v15953_v31  ;;  %9031 = vmatpush.bf16.msrb.mxu3 %v15961_v26  ;;  %v8015_v55 = vadd.f32 %v8014_v40, %v7666_v9  ;;  %v8028_v23 = vadd.f32 %v8027_v38, %v7667_v47 }
0x1a6c   : > { %9046 = vmatpush.bf16.msra.mxu0 %v15967_v35  ;;  %9059 = vmatpush.bf16.msra.mxu1 %v15975_v36  ;;  %v8042_v43 = vpop.f32.mrf.mxu0  ;;  %v8055_v24 = vpop.f32.mrf.mxu1  ;;  %v8069_v2 = vmax.f32 %v8015_v55, 0.0  ;;  %v8070_v4 = vmax.f32 %v8028_v23, 0.0 }
0x1a6e   : > { %9019 = vmatpush.bf16.msrb.mxu2 %v15952_v57  ;;  %9032 = vmatpush.bf16.msrb.mxu3 %v15960_v39  ;;  %v8085_v5 = vpack.c.bf16 %v8069_v2, %v8069_v2  ;;  %v8086_v48 = vpack.c.bf16 %v8070_v4, %v8070_v4  ;;  %v15983_v2 = vld [vmem:[%s18680_s6 + $0x18] sm:$0xff] }
0x1a6f   : > { %v15985_v4 = vld [vmem:[%s18678_s0 + $0x18] sm:$0xff] }
0x1a70   : > { %9047 = vmatpush.bf16.msra.mxu0 %v15966_v49  ;;  %9060 = vmatpush.bf16.msra.mxu1 %v15974_v34 }
0x1a71   : > { %v8016_v61 = vpop.f32.mrf.mxu2  ;;  %v8029_v37 = vpop.f32.mrf.mxu3 }
0x1a72   : > { %9020 = vmatpush.bf16.msrb.mxu2 %v15951_v53  ;;  %9033 = vmatpush.bf16.msrb.mxu3 %v15959_v62 }
0x1a74   : > { %9048 = vmatpush.bf16.msra.mxu0 %v15965_v58  ;;  %9061 = vmatpush.bf16.msra.mxu1 %v15973_v63 }
0x1a76   : > { %9021 = vmatpush.bf16.msrb.mxu2 %v15950_v51  ;;  %9034 = vmatpush.bf16.msrb.mxu3 %v15958_v13 }
0x1a78   : > { %9049 = vmatpush.bf16.msra.mxu0 %v15964_v52  ;;  %9062 = vmatpush.bf16.msra.mxu1 %v15972_v27 }
0x1a7a   : > { %9022 = vmatpush.bf16.msrb.mxu2 %v15949_v3  ;;  %9035 = vmatpush.bf16.msrb.mxu3 %v15957_v1 }
0x1a7b   : > { %9050 = vmatmul.bf16.vlgmr.msra.gmra.mxu0 %v8087_v56  ;;  %9063 = vmatmul.bf16.vlgmr.msra.gmra.mxu1 %v8088_v8 }
0x1a7c   : > { %9211 = vmatpush.bf16.msrb.mxu0 %v15985_v4 }
0x1a7e   : > { %9023 = vmatpush.bf16.msrb.mxu2 %v15948_v32  ;;  %9036 = vmatpush.bf16.msrb.mxu3 %v15956_v12  ;;  %v15981_v12 = vld [vmem:[%s18679_s2 + $0x18] sm:$0xff] }
0x1a81   : > { %9024 = vmatmul.bf16.vlgmr.msrb.gmra.mxu2 %v8085_v5  ;;  %9037 = vmatmul.bf16.vlgmr.msrb.gmra.mxu3 %v8086_v48  ;;  %v15982_v5 = vld [vmem:[%s18680_s6 + $0x10] sm:$0xff] }
0x1a82   : > { %9154 = vmatpush.bf16.msra.mxu2 %v15981_v12  ;;  %9183 = vmatpush.bf16.msra.mxu3 %v15983_v2  ;;  %v15984_v48 = vld [vmem:[%s18678_s0 + $0x10] sm:$0xff] }
0x1a83   : > { %9212 = vmatpush.bf16.msrb.mxu0 %v15984_v48 }
0x1a86   : > { %9184 = vmatpush.bf16.msra.mxu3 %v15982_v5 }
0x1ab8   : > { %v8895_v6 = vpop.f32.mrf.mxu0  ;;  %v8908_v7 = vpop.f32.mrf.mxu1 }
0x1ac0   : > { %v8897_v60 = vpop.f32.mrf.mxu0  ;;  %v8910_v15 = vpop.f32.mrf.mxu1 }
0x1ac4   : > { %v8869_v28 = vpop.f32.mrf.mxu2  ;;  %v8882_v10 = vpop.f32.mrf.mxu3 }
0x1ac5   : > { %v8870_v29 = vadd.f32 %v16293_v59, %v8869_v28 }
0x1ac7   : > { %v8883_v26 = vadd.f32 %v8882_v10, %v8870_v29 }
0x1ac8   : > { %v8947_v16 = vpop.f32.mrf.mxu0  ;;  %v8960_v19 = vpop.f32.mrf.mxu1 }
0x1ac9   : > { %v8896_v35 = vadd.f32 %v8895_v6, %v8883_v26 }
0x1acb   : > { %v8909_v39 = vadd.f32 %v8908_v7, %v8896_v35 }
0x1acc   : > { %v8871_v22 = vpop.f32.mrf.mxu2  ;;  %v8884_v25 = vpop.f32.mrf.mxu3 }
0x1acd   : > { %v16294_v25 = vld [vmem:[%s18706_s22] ss:$0 sm:$0xff]  ;;  %s18715_s22 = sld [smem:[#allocation58_spill]] }
0x1ad0   : > { %v8949_v20 = vpop.f32.mrf.mxu0  ;;  %v8962_v21 = vpop.f32.mrf.mxu1 }
0x1ad1   : > { %v16295_v21 = vld [vmem:[%s18708_s29] ss:$0 sm:$0xff] }
0x1ad4   : > { %v8921_v0 = vpop.f32.mrf.mxu2  ;;  %v8934_v45 = vpop.f32.mrf.mxu3 }
0x1ad5   : > { %v8922_v49 = vadd.f32 %v8921_v0, %v8909_v39 }
0x1ad7   : > { %v8935_v34 = vadd.f32 %v8934_v45, %v8922_v49 }
0x1ad8   : > { %v8999_v30 = vpop.f32.mrf.mxu0  ;;  %v9012_v31 = vpop.f32.mrf.mxu1 }
0x1ad9   : > { %v8948_v53 = vadd.f32 %v8947_v16, %v8935_v34 }
0x1adb   : > { %v8961_v62 = vadd.f32 %v8960_v19, %v8948_v53 }
0x1adc   : > { %v8923_v18 = vpop.f32.mrf.mxu2  ;;  %v8936_v33 = vpop.f32.mrf.mxu3 }
0x1add   : > { %v16297_v18 = vld [vmem:[%s18683_s26 + $0x1] ss:$0 sm:$0xff] }
0x1ade   : > { %v16298_v33 = vld [vmem:[%s18684_s1 + $0x1] ss:$0 sm:$0xff] }
0x1ae0   : > { %v9001_v36 = vpop.f32.mrf.mxu0  ;;  %v9014_v57 = vpop.f32.mrf.mxu1 }
0x1ae4   : > { %v8973_v40 = vpop.f32.mrf.mxu2  ;;  %v8986_v38 = vpop.f32.mrf.mxu3 }
0x1ae5   : > { %v8974_v43 = vadd.f32 %v8973_v40, %v8961_v62 }
0x1ae7   : > { %v8987_v63 = vadd.f32 %v8986_v38, %v8974_v43 }
0x1ae9   : > { %v9000_v46 = vadd.f32 %v8999_v30, %v8987_v63  ;;  %v16296_v30 = vld [vmem:[%s18682_s9 + $0x1] ss:$0 sm:$0xff] }
0x1aeb   : > { %v9013_v13 = vadd.f32 %v9012_v31, %v9000_v46 }
0x1aec   : > { %v8975_v41 = vpop.f32.mrf.mxu2  ;;  %v8988_v50 = vpop.f32.mrf.mxu3 }
0x1af8   : > { %v9051_v24 = vpop.f32.mrf.mxu0  ;;  %v9064_v58 = vpop.f32.mrf.mxu1 }
0x1b00   : > { %v9053_v11 = vpop.f32.mrf.mxu0  ;;  %v9066_v51 = vpop.f32.mrf.mxu1 }
0x1b04   : > { %v9025_v9 = vpop.f32.mrf.mxu2  ;;  %v9038_v47 = vpop.f32.mrf.mxu3 }
0x1b05   : > { %v9026_v61 = vadd.f32 %v9025_v9, %v9013_v13 }
0x1b07   : > { %v9039_v37 = vadd.f32 %v9038_v47, %v9026_v61 }
0x1b09   : > { %v9052_v52 = vadd.f32 %v9051_v24, %v9039_v37  ;;  %v15991_v37 = vld [vmem:[%s18692_s18 + $0x18] sm:$0xff] }
0x1b0b   : > { %v9065_v27 = vadd.f32 %v9064_v58, %v9052_v52 }
0x1b0c   : > { %v9027_v54 = vpop.f32.mrf.mxu2  ;;  %v9040_v14 = vpop.f32.mrf.mxu3 }
0x1b0d   : > { %v9068_v3 = vadd.f32 %v9065_v27, %v17876_v42  ;;  %v15980_v42 = vld [vmem:[%s18679_s2 + $0x10] sm:$0xff] }
0x1b0e   : > { %9155 = vmatpush.bf16.msra.mxu2 %v15980_v42  ;;  %v15990_v54 = vld [vmem:[%s18692_s18 + $0x10] sm:$0xff] }
0x1b0f   : > { %v9071_v1 = vsel %vm1760_vm2, %v9068_v3, 0.0 }
0x1b10   : > { %9072 = vadd.xlane.f32.xlu0 %v9071_v1 }
0x1b83   : > { %v9073_v55 = vpop.xlane.xlu0 %9072 }
0x1b84   : > { %v9074_v23 = vmul.f32 %v9073_v55, %v16946_v17 }
0x1b86   : > { %v9075_v56 = vsub.f32 %v9068_v3, %v9074_v23 }
0x1b88   : > { %v9076_v8 = vmul.f32 %v9075_v56, %v9075_v56 }
0x1b8a   : > { %v9077_v32 = vsel %vm1760_vm2, %v9076_v8, 0.0 }
0x1b8b   : > { %9078 = vadd.xlane.f32.xlu1 %v9077_v32 }
0x1bfe   : > { %v9079_v6 = vpop.xlane.xlu1 %9078 }
0x1bff   : > { %v9080_v7 = vmul.f32 %v9079_v6, %v16946_v17 }
0x1c01   : > { %v9081_v60 = vadd.f32 1e-05, %v9080_v7  ;;  %v15987_v7 = vld [vmem:[%s18687_s14 + $0x18] sm:$0xff] }
0x1c03   : > { %16436 = vrsqrt.f32 %v9081_v60  ;;  %vm9088_vm10 = vweird.f32 %v9081_v60 }
0x1c09   : > { %v16437_v15 = vpop.eup %16436 }
0x1c0a   : > { %v9083_v28 = vmul.f32 %v16437_v15, %v9081_v60  ;;  %vm9089_vm9 = vweird.f32 %v16437_v15  ;;  %v15986_v60 = vld [vmem:[%s18687_s14 + $0x10] sm:$0xff] }
0x1c0b   : > { %vm9090_vm11 = vmor %vm9088_vm10, %vm9089_vm9 }
0x1c0c   : > { %v9084_v10 = vmul.f32 %v16437_v15, %v9083_v28 }
0x1c0e   : > { %v9085_v16 = vmul.f32 0.5, %v9084_v10 }
0x1c10   : > { %v9086_v19 = vsub.f32 1.5, %v9085_v16 }
0x1c12   : > { %v9087_v22 = vmul.f32 %v16437_v15, %v9086_v19 }
0x1c14   : > { %v9091_v20 = vsel %vm9090_vm11, %v16437_v15, %v9087_v22 }
0x1c15   : > { %v9092_v59 = vmul.f32 %v9091_v20, %v9075_v56 }
0x1c17   : > { %v9096_v0 = vmul.f32 %v16294_v25, %v9092_v59  ;;  %v16299_v25 = vld [vmem:[%s18698_s20 + $0x1] ss:$0 sm:$0xff] }
0x1c19   : > { %v18105_v45 = vadd.f32 %v16295_v21, %v9096_v0 }
0x1c1b   : > { %v9129_v29 = vpack.c.bf16 %v18105_v45, %v18105_v45 }
0x1c1d   : > { %14403 = vmatmul.msk.bf16.vlgmr.msra.gmra.mxu2 %vm1760_vm2, %v9129_v29  ;;  %14412 = vmatmul.msk.bf16.vlgmr.msra.gmra.mxu3 %vm1760_vm2, %v9129_v29 }
0x1c1e   : > { %14421 = vmatmul.msk.bf16.vlgmr.msrb.gmra.mxu0 %vm1760_vm2, %v9129_v29 }
0x1c9b   : > { %v9214_v31 = vpop.f32.mrf.mxu0 }
0x1c9c   : > { %v9215_v26 = vadd.f32 %v16296_v30, %v9214_v31 }
0x1c9e   : > { %v18115_v35 = vpack.c.bf16 %v9215_v26, %v9215_v26 }
0x1ca0   : > { %v9256_v36 = vsel %vm6663_vm13, %v18115_v35, 0  ;;  %v9157_v57 = vpop.f32.mrf.mxu2  ;;  %v9186_v39 = vpop.f32.mrf.mxu3  ;;  %v9313_v15 = vunpack.c.l.b16 %v18115_v35 }
0x1ca1   : > { %v9158_v40 = vadd.f32 %v16297_v18, %v9157_v57  ;;  %v9187_v38 = vadd.f32 %v16298_v33, %v9186_v39  ;;  %9265 = vmatpush.bf16.msrb.mxu2 %v9256_v36 }
0x1ca2   : > { %v9314_v16 = vpack.c.b16 %v9313_v15, %v9313_v15 }
0x1ca3   : > { %v9161_v49 = vmul.f32 0.35355338, %v9158_v40  ;;  %v9219_v34 = vpack.c.bf16 %v9187_v38, %v9187_v38  ;;  %v9216_v41 = vpop.f32.mrf.mxu0 }
0x1ca5   : > { %v9218_v50 = vpack.c.bf16 %v9161_v49, %v9161_v49  ;;  %v9225_v53 = vsel %vm1854_vm3, %v9219_v34, 0  ;;  %v9277_v62 = vunpack.c.l.b16 %v9219_v34 }
0x1ca6   : > { %9234 = vmatpush.bf16.xpose.msrb.mxu1 %v9225_v53 }
0x1ca7   : > { %v9272_v43 = vunpack.c.l.b16 %v9218_v50  ;;  %v9278_v24 = vpack.c.b16 %v9277_v62, %v9277_v62 }
0x1ca8   : > { %v9159_v58 = vpop.f32.mrf.mxu2  ;;  %v9188_v63 = vpop.f32.mrf.mxu3 }
0x1ca9   : > { %9338 = vrot.lane.b32.xlu1 %v9278_v24, %s18685_s12  ;;  %9279 = vrot.lane.b32.xlu2 %v9278_v24, %s18686_s13  ;;  %v9273_v46 = vpack.c.b16 %v9272_v43, %v9272_v43 }
0x1cab   : > { %9274 = vrot.lane.b32.xlu0 %v9273_v46, %s18686_s13 }
0x1cad   : > { %14422 = vmatmul.msk.bf16.vlgmr.msrb.gmra.mxu1 %vm1854_vm3, %v9218_v50 }
0x1cb1   : > { %9336 = vrot.lane.b32.xlu2 %v9273_v46, %s18685_s12 }
0x1cb3   : > { %9394 = vrot.lane.b32.xlu0 %v9278_v24, %s18674_s4 }
0x1cbb   : > { %9392 = vrot.lane.b32.xlu0 %v9273_v46, %s18674_s4 }
0x1d03   : > { %v9280_v11 = vpop.permute.xlu2 %9279 }
0x1d04   : > { %v9285_v51 = vsel %vm1854_vm3, %v9280_v11, 0 }
0x1d05   : > { %9294 = vmatpush.bf16.xpose.msrb.mxu3 %v9285_v51 }
0x1d0b   : > { %v9337_v61 = vpop.permute.xlu2 %9336 }
0x1d1b   : > { %v9339_v13 = vpop.permute.xlu1 %9338 }
0x1d1c   : > { %v9344_v9 = vsel %vm1854_vm3, %v9339_v13, 0 }
0x1d1d   : > { %9353 = vmatpush.bf16.xpose.msra.mxu1 %v9344_v9  ;;  %v9275_v47 = vpop.permute.xlu0 %9274 }
0x1d1e   : > { %14424 = vmatmul.msk.bf16.vlgmr.msrb.gmra.mxu3 %vm1854_vm3, %v9275_v47 }
0x1d24   : > { %14426 = vmatmul.msk.bf16.vlgmr.msra.gmra.mxu1 %vm1854_vm3, %v9337_v61 }
0x1d25   : > { %v9395_v52 = vpop.permute.xlu0 %9394  ;;  %9488 = vmatpush.bf16.msrb.mxu1 %v15987_v7  ;;  %v15989_v7 = vld [vmem:[%s18689_s11 + $0x18] sm:$0xff] }
0x1d26   : > { %v9400_v27 = vsel %vm1854_vm3, %v9395_v52, 0 }
0x1d27   : > { %9409 = vmatpush.bf16.xpose.msra.mxu3 %v9400_v27 }
0x1d29   : > { %9489 = vmatpush.bf16.msrb.mxu1 %v15986_v60  ;;  %v15988_v60 = vld [vmem:[%s18689_s11 + $0x10] sm:$0xff] }
0x1d2a   : > { %v9236_v14 = vpop.f32.mrf.mxu1 }
0x1d2b   : > { %v9240_v3 = vsel %vm1854_vm3, %v9236_v14, -inf }
0x1d2c   : > { %9241 = vmax.xlane.f32.xlu1 %v9240_v3  ;;  %v15993_v3 = vld [vmem:[%s18693_s19 + $0x18] sm:$0xff] }
0x1d2d   : > { %v9393_v1 = vpop.permute.xlu0 %9392 }
0x1d2e   : > { %14428 = vmatmul.msk.bf16.vlgmr.msra.gmra.mxu3 %vm1854_vm3, %v9393_v1 }
0x1d2f   : > { %9612 = vmatpush.bf16.msrb.mxu3 %v15991_v37 }
0x1d32   : > { %v9238_v55 = vpop.f32.mrf.mxu1 }
0x1d33   : > { %9613 = vmatpush.bf16.msrb.mxu3 %v15990_v54 }
0x1d3e   : > { %14478 = vmatmul.msk.bf16.vlgmr.msrb.gmra.mxu3 %vm1760_vm2, %v17773_v44 }
0x1d9f   : > { %v9242_v23 = vpop.xlane.xlu1 %9241 }
0x1da0   : > { %v9243_v56 = vsub.f32 %v9236_v14, %v9242_v23 }
0x1da1   : > { %v9296_v8 = vpop.f32.mrf.mxu3  ;;  %v9355_v32 = vpop.f32.mrf.mxu1 }
0x1da2   : > { %v9244_v12 = vmul.f32 1.442695, %v9243_v56  ;;  %v9300_v2 = vsel %vm1854_vm3, %v9296_v8, -inf  ;;  %v9359_v4 = vsel %vm1854_vm3, %v9355_v32, -inf }
0x1da3   : > { %9301 = vmax.xlane.f32.xlu2 %v9300_v2  ;;  %9360 = vmax.xlane.f32.xlu0 %v9359_v4  ;;  %v15992_v4 = vld [vmem:[%s18693_s19 + $0x10] sm:$0xff] }
0x1da4   : > { %16438 = vpow2.f32 %v9244_v12 }
0x1da9   : > { %v9298_v42 = vpop.f32.mrf.mxu3  ;;  %v9357_v5 = vpop.f32.mrf.mxu1 }
0x1daa   : > { %v16439_v48 = vpop.eup %16438 }
0x1dab   : > { %v9246_v6 = vsel %vm1854_vm3, %v16439_v48, 0.0 }
0x1dac   : > { %9247 = vadd.xlane.f32.xlu1 %v9246_v6 }
0x1db1   : > { %v9411_v28 = vpop.f32.mrf.mxu3 }
0x1db2   : > { %v9415_v10 = vsel %vm1854_vm3, %v9411_v28, -inf }
0x1db3   : > { %9416 = vmax.xlane.f32.xlu2 %v9415_v10 }
0x1db7   : > { %9315 = vrot.lane.b32.xlu0 %v9314_v16, %s18686_s13 }
0x1db9   : > { %v9413_v19 = vpop.f32.mrf.mxu3 }
0x1dba   : > { %v16300_v19 = vld [vmem:[%s18697_s27 + $0x1] ss:$0 sm:$0xff] }
0x1dc1   : > { %v9615_v22 = vpop.f32.mrf.mxu3 }
0x1dc2   : > { %v9616_v20 = vadd.f32 %v16299_v25, %v9615_v22 }
0x1dc4   : > { %v9650_v59 = vpack.c.bf16 %v9616_v20, %v9616_v20 }
0x1dc6   : > { %v9656_v30 = vunpack.c.l.b16 %v9650_v59 }
0x1dc9   : > { %v9617_v21 = vpop.f32.mrf.mxu3 }
0x1dca   : > { %v9618_v0 = vadd.f32 %v16299_v25, %v9617_v21 }
0x1dcc   : > { %v9651_v29 = vpack.c.bf16 %v9618_v0, %v9618_v0 }
0x1dce   : > { %v9657_v31 = vunpack.c.l.b16 %v9651_v29 }
0x1dd0   : > { %v18147_v26 = vpack.c.b16 %v9657_v31, %v9656_v30 }
0x1dd2   : > { %v9663_v18 = vsel %vm1854_vm3, %v18147_v26, 0 }
0x1dd3   : > { %9672 = vmatpush.bf16.xpose.msra.mxu1 %v9663_v18 }
0x1e16   : > { %v9302_v33 = vpop.xlane.xlu2 %9301  ;;  %v9361_v35 = vpop.xlane.xlu0 %9360 }
0x1e17   : > { %v9303_v36 = vsub.f32 %v9296_v8, %v9302_v33  ;;  %v9362_v57 = vsub.f32 %v9355_v32, %v9361_v35 }
0x1e19   : > { %v9304_v39 = vmul.f32 1.442695, %v9303_v36  ;;  %v9363_v40 = vmul.f32 1.442695, %v9362_v57 }
0x1e1b   : > { %16440 = vpow2.f32 %v9304_v39 }
0x1e1c   : > { %16442 = vpow2.f32 %v9363_v40 }
0x1e1f   : > { %v9248_v38 = vpop.xlane.xlu1 %9247 }
0x1e20   : > { %16444 = vrcp.f32 %v9248_v38 }
0x1e21   : > { %v16441_v49 = vpop.eup %16440 }
0x1e22   : > { %v16443_v34 = vpop.eup %16442  ;;  %v9306_v41 = vsel %vm1854_vm3, %v16441_v49, 0.0 }
0x1e23   : > { %9307 = vadd.xlane.f32.xlu2 %v9306_v41  ;;  %v9365_v50 = vsel %vm1854_vm3, %v16443_v34, 0.0  ;;  %v16301_v41 = vld [vmem:[%s18688_s16 + $0x1] ss:$0 sm:$0xff] }
0x1e24   : > { %9366 = vadd.xlane.f32.xlu1 %v9365_v50 }
0x1e26   : > { %v16445_v53 = vpop.eup %16444  ;;  %v9417_v62 = vpop.xlane.xlu2 %9416 }
0x1e27   : > { %v9250_v43 = vmul.f32 %v16445_v53, %v16439_v48  ;;  %v9418_v24 = vsub.f32 %v9411_v28, %v9417_v62 }
0x1e29   : > { %v9251_v58 = vpack.c.bf16 %v9250_v43, %v9250_v43  ;;  %v9419_v63 = vmul.f32 1.442695, %v9418_v24  ;;  %v9316_v46 = vpop.permute.xlu0 %9315 }
0x1e2a   : > { %v9321_v11 = vsel %vm6663_vm13, %v9316_v46, 0 }
0x1e2b   : > { %16446 = vpow2.f32 %v9419_v63  ;;  %14423 = vmatmul.msk.bf16.vlgmr.msrb.gmra.mxu2 %vm1854_vm3, %v9251_v58  ;;  %9330 = vmatpush.bf16.msra.mxu0 %v9321_v11 }
0x1e31   : > { %v16447_v51 = vpop.eup %16446 }
0x1e32   : > { %v9421_v13 = vsel %vm1854_vm3, %v16447_v51, 0.0 }
0x1e33   : > { %9422 = vadd.xlane.f32.xlu2 %v9421_v13 }
0x1e3d   : > { %9371 = vrot.lane.b32.xlu1 %v9314_v16, %s18685_s12 }
0x1e4b   : > { %9427 = vrot.lane.b32.xlu2 %v9314_v16, %s18674_s4 }
0x1e96   : > { %v9308_v9 = vpop.xlane.xlu2 %9307 }
0x1e97   : > { %16448 = vrcp.f32 %v9308_v9  ;;  %v9367_v52 = vpop.xlane.xlu1 %9366 }
0x1e98   : > { %16450 = vrcp.f32 %v9367_v52 }
0x1e9d   : > { %v16449_v47 = vpop.eup %16448 }
0x1e9e   : > { %v9310_v61 = vmul.f32 %v16449_v47, %v16441_v49  ;;  %v16451_v54 = vpop.eup %16450 }
0x1e9f   : > { %v9369_v1 = vmul.f32 %v16451_v54, %v16443_v34 }
0x1ea0   : > { %v9311_v37 = vpack.c.bf16 %v9310_v61, %v9310_v61 }
0x1ea1   : > { %v9370_v42 = vpack.c.bf16 %v9369_v1, %v9369_v1  ;;  %v16303_v1 = vld [vmem:[%s18691_s17 + $0x1] ss:$0 sm:$0xff] }
0x1ea2   : > { %14425 = vmatmul.msk.bf16.vlgmr.msra.gmra.mxu0 %vm1854_vm3, %v9311_v37 }
0x1ea6   : > { %v9423_v27 = vpop.xlane.xlu2 %9422 }
0x1ea7   : > { %16452 = vrcp.f32 %v9423_v27 }
0x1ead   : > { %v16453_v14 = vpop.eup %16452 }
0x1eae   : > { %v9425_v55 = vmul.f32 %v16453_v14, %v16447_v51  ;;  %v9428_v23 = vpop.permute.xlu2 %9427  ;;  %v9267_v56 = vpop.f32.mrf.mxu2  ;;  %v16302_v14 = vld [vmem:[%s18690_s15 + $0x1] ss:$0 sm:$0xff] }
0x1eaf   : > { %v9433_v8 = vsel %vm6663_vm13, %v9428_v23, 0  ;;  %v9372_v32 = vpop.permute.xlu1 %9371 }
0x1eb0   : > { %v9426_v12 = vpack.c.bf16 %v9425_v55, %v9425_v55  ;;  %v9377_v2 = vsel %vm6663_vm13, %v9372_v32, 0  ;;  %9442 = vmatpush.bf16.msrb.mxu0 %v9433_v8  ;;  %v16304_v32 = vld [vmem:[%s18696_s25 + $0x1] ss:$0 sm:$0xff] }
0x1eb1   : > { %9386 = vmatpush.bf16.msra.mxu2 %v9377_v2 }
0x1eb3   : > { %14429 = vmatmul.msk.bf16.vlgmr.msrb.gmra.mxu0 %vm1854_vm3, %v9426_v12 }
0x1eb4   : > { %9641 = vmatpush.bf16.msra.mxu0 %v15993_v3  ;;  %14427 = vmatmul.msk.bf16.vlgmr.msra.gmra.mxu2 %vm1854_vm3, %v9370_v42 }
0x1eb5   : > { %9583 = vmatpush.bf16.msrb.mxu2 %v15989_v7 }
0x1eb6   : > { %v9269_v5 = vpop.f32.mrf.mxu2 }
0x1eb8   : > { %9642 = vmatpush.bf16.msra.mxu0 %v15992_v4 }
0x1eb9   : > { %9584 = vmatpush.bf16.msrb.mxu2 %v15988_v60 }
0x1ec3   : > { %14487 = vmatmul.msk.bf16.vlgmr.msra.gmra.mxu0 %vm1760_vm2, %v17773_v44 }
0x1f1f   : > { %v9332_v48 = vpop.f32.mrf.mxu0 }
0x1f20   : > { %9449 = vrot.lane.b32.xlu0 %v9332_v48, %s18675_s10 }
0x1f27   : > { %v9334_v6 = vpop.f32.mrf.mxu0 }
0x1f30   : > { %v9444_v15 = vpop.f32.mrf.mxu0 }
0x1f31   : > { %9457 = vrot.lane.b32.xlu1 %v9444_v15, %s18676_s7 }
0x1f37   : > { %v9388_v28 = vpop.f32.mrf.mxu2 }
0x1f38   : > { %9453 = vrot.lane.b32.xlu0 %v9388_v28, %s18677_s5  ;;  %v9446_v10 = vpop.f32.mrf.mxu0 }
0x1f39   : > { %9717 = vrot.lane.b32.xlu1 %v18147_v26, %s18686_s13 }
0x1f3f   : > { %v9390_v44 = vpop.f32.mrf.mxu2 }
0x1f40   : > { %v9644_v16 = vpop.f32.mrf.mxu0 }
0x1f41   : > { %9771 = vrot.lane.b32.xlu1 %v18147_v26, %s18685_s12  ;;  %v9645_v22 = vadd.f32 %v16300_v19, %v9644_v16 }
0x1f43   : > { %v9652_v20 = vpack.c.bf16 %v9645_v22, %v9645_v22 }
0x1f45   : > { %v9692_v0 = vunpack.c.l.b16 %v9652_v20 }
0x1f48   : > { %v9646_v25 = vpop.f32.mrf.mxu0 }
0x1f49   : > { %v9647_v21 = vadd.f32 %v16300_v19, %v9646_v25 }
0x1f4b   : > { %v9653_v59 = vpack.c.bf16 %v9647_v21, %v9647_v21 }
0x1f4d   : > { %v9693_v29 = vunpack.c.l.b16 %v9653_v59 }
0x1f4f   : > { %v18177_v30 = vpack.c.b16 %v9693_v29, %v9692_v0 }
0x1f51   : > { %9706 = vmatpush.bf16.msra.mxu2 %v18177_v30 }
0x1f92   : > { %v9450_v31 = vpop.permute.xlu0 %9449 }
0x1f93   : > { %v9460_v33 = vsel %vm1854_vm3, %v9267_v56, %v9450_v31 }
0x1fa3   : > { %v9458_v18 = vpop.permute.xlu1 %9457 }
0x1faa   : > { %v9454_v35 = vpop.permute.xlu0 %9453 }
0x1fab   : > { %v9461_v36 = vsel %vm1875_vm4, %v9460_v33, %v9454_v35  ;;  %v9718_v57 = vpop.permute.xlu1 %9717 }
0x1fac   : > { %v9462_v39 = vsel %vm2175_vm5, %v9461_v36, %v9458_v18  ;;  %v9723_v40 = vsel %vm1854_vm3, %v9718_v57, 0 }
0x1fad   : > { %v9463_v38 = vpack.c.bf16 %v9462_v39, %v9462_v39  ;;  %9732 = vmatpush.bf16.xpose.msra.mxu3 %v9723_v40 }
0x1faf   : > { %14438 = vmatmul.msk.bf16.vlgmr.msrb.gmra.mxu1 %vm1760_vm2, %v9463_v38 }
0x1fb3   : > { %v9772_v49 = vpop.permute.xlu1 %9771 }
0x1fb4   : > { %v9777_v34 = vsel %vm1854_vm3, %v9772_v49, 0 }
0x1fb5   : > { %9786 = vmatpush.bf16.xpose.msrb.mxu1 %v9777_v34 }
0x202c   : > { %v9491_v50 = vpop.f32.mrf.mxu1 }
0x202d   : > { %v9492_v53 = vadd.f32 %v16301_v41, %v9491_v50 }
0x202f   : > { %v9495_v62 = vadd.f32 %v9492_v53, %v18105_v45 }
0x2031   : > { %v9500_v43 = vsel %vm1760_vm2, %v9495_v62, 0.0 }
0x2032   : > { %9501 = vadd.xlane.f32.xlu0 %v9500_v43 }
0x2034   : > { %v9493_v24 = vpop.f32.mrf.mxu1 }
0x20a5   : > { %v9502_v58 = vpop.xlane.xlu0 %9501 }
0x20a6   : > { %v9503_v63 = vmul.f32 %v9502_v58, %v16946_v17 }
0x20a8   : > { %v9504_v46 = vsub.f32 %v9495_v62, %v9503_v63 }
0x20aa   : > { %v9505_v11 = vmul.f32 %v9504_v46, %v9504_v46 }
0x20ac   : > { %v9506_v51 = vsel %vm1760_vm2, %v9505_v11, 0.0 }
0x20ad   : > { %9507 = vadd.xlane.f32.xlu2 %v9506_v51 }
0x2120   : > { %v9508_v13 = vpop.xlane.xlu2 %9507 }
0x2121   : > { %v9509_v9 = vmul.f32 %v9508_v13, %v16946_v17 }
0x2123   : > { %v9510_v47 = vadd.f32 1e-05, %v9509_v9 }
0x2125   : > { %16454 = vrsqrt.f32 %v9510_v47  ;;  %vm9517_vm12 = vweird.f32 %v9510_v47 }
0x212b   : > { %v16455_v45 = vpop.eup %16454 }
0x212c   : > { %v9512_v61 = vmul.f32 %v16455_v45, %v9510_v47  ;;  %vm9518_vm13 = vweird.f32 %v16455_v45 }
0x212d   : > { %vm9519_vm14 = vmor %vm9517_vm12, %vm9518_vm13 }
0x212e   : > { %v9513_v37 = vmul.f32 %v16455_v45, %v9512_v61 }
0x2130   : > { %v9514_v52 = vmul.f32 0.5, %v9513_v37 }
0x2132   : > { %v9515_v27 = vsub.f32 1.5, %v9514_v52 }
0x2134   : > { %v9516_v54 = vmul.f32 %v16455_v45, %v9515_v27 }
0x2136   : > { %v9520_v3 = vsel %vm9519_vm14, %v16455_v45, %v9516_v54 }
0x2137   : > { %v9521_v55 = vmul.f32 %v9520_v3, %v9504_v46 }
0x2139   : > { %v9525_v23 = vmul.f32 %v16302_v14, %v9521_v55 }
0x213b   : > { %v18194_v56 = vadd.f32 %v16303_v1, %v9525_v23 }
0x213d   : > { %v9558_v8 = vpack.c.bf16 %v18194_v56, %v18194_v56 }
0x213f   : > { %14469 = vmatmul.msk.bf16.vlgmr.msrb.gmra.mxu2 %vm1760_vm2, %v9558_v8 }
0x21c2   : > { %v9586_v12 = vpop.f32.mrf.mxu2 }
0x21c3   : > { %v9587_v2 = vadd.f32 %v16304_v32, %v9586_v12 }
0x21c5   : > { %v9590_v4 = vmul.f32 0.35355338, %v9587_v2 }
0x21c7   : > { %v9649_v42 = vpack.c.bf16 %v9590_v4, %v9590_v4 }
0x21c9   : > { %v9713_v5 = vunpack.c.l.b16 %v9649_v42  ;;  %14488 = vmatmul.msk.bf16.vlgmr.msra.gmra.mxu1 %vm1854_vm3, %v9649_v42 }
0x21ca   : > { %v9588_v48 = vpop.f32.mrf.mxu2 }
0x21cb   : > { %v9714_v6 = vpack.c.b16 %v9713_v5, %v9713_v5 }
0x21cd   : > { %9823 = vrot.lane.b32.xlu0 %v9714_v6, %s18674_s4  ;;  %9715 = vrot.lane.b32.xlu1 %v9714_v6, %s18686_s13 }
0x21d5   : > { %9825 = vrot.lane.b32.xlu1 %v18147_v26, %s18674_s4 }
0x21dd   : > { %9769 = vrot.lane.b32.xlu1 %v9714_v6, %s18685_s12 }
0x223f   : > { %v9716_v7 = vpop.permute.xlu1 %9715  ;;  %v9824_v16 = vpop.permute.xlu0 %9823 }
0x2240   : > { %14490 = vmatmul.msk.bf16.vlgmr.msra.gmra.mxu3 %vm1854_vm3, %v9716_v7 }
0x2246   : > { %v9674_v60 = vpop.f32.mrf.mxu1 }
0x2247   : > { %v9826_v15 = vpop.permute.xlu1 %9825  ;;  %v9678_v28 = vsel %vm1875_vm4, %v9674_v60, -inf }
0x2248   : > { %v9831_v10 = vsel %vm1854_vm3, %v9826_v15, 0  ;;  %9679 = vmax.xlane.f32.xlu2 %v9678_v28  ;;  %v15995_v15 = vld [vmem:[%s18699_s21 + $0x18] sm:$0xff]  ;;  %v15994_v28 = vld [vmem:[%s18699_s21 + $0x10] sm:$0xff] }
0x2249   : > { %9840 = vmatpush.bf16.xpose.msrb.mxu3 %v9831_v10  ;;  %9917 = vmatpush.bf16.msra.mxu1 %v15995_v15  ;;  %v14818_v15 = vld [vmem:[%s18701_s30 + $0x150] sm:$0xf0] }
0x224d   : > { %9918 = vmatpush.bf16.msra.mxu1 %v15994_v28  ;;  %v14824_v28 = vld [vmem:[%s18701_s30 + $0x118] sm:$0xf] }
0x224e   : > { %v9676_v44 = vpop.f32.mrf.mxu1 }
0x224f   : > { %v9770_v19 = vpop.permute.xlu1 %9769 }
0x2250   : > { %14492 = vmatmul.msk.bf16.vlgmr.msrb.gmra.mxu1 %vm1854_vm3, %v9770_v19  ;;  %14494 = vmatmul.msk.bf16.vlgmr.msrb.gmra.mxu3 %vm1854_vm3, %v9824_v16 }
0x22bb   : > { %v9680_v26 = vpop.xlane.xlu2 %9679 }
0x22bc   : > { %v9681_v22 = vsub.f32 %v9674_v60, %v9680_v26 }
0x22be   : > { %v9682_v25 = vmul.f32 1.442695, %v9681_v22 }
0x22c0   : > { %16456 = vpow2.f32 %v9682_v25 }
0x22c3   : > { %v9734_v20 = vpop.f32.mrf.mxu3 }
0x22c4   : > { %v9738_v21 = vsel %vm1875_vm4, %v9734_v20, -inf }
0x22c5   : > { %9739 = vmax.xlane.f32.xlu1 %v9738_v21 }
0x22c6   : > { %v16457_v59 = vpop.eup %16456 }
0x22c7   : > { %v9684_v0 = vsel %vm1875_vm4, %v16457_v59, 0.0 }
0x22c8   : > { %9685 = vadd.xlane.f32.xlu0 %v9684_v0 }
0x22cb   : > { %v9736_v29 = vpop.f32.mrf.mxu3 }
0x22cd   : > { %v9788_v31 = vpop.f32.mrf.mxu1 }
0x22ce   : > { %v9792_v18 = vsel %vm1875_vm4, %v9788_v31, -inf }
0x22cf   : > { %9793 = vmax.xlane.f32.xlu2 %v9792_v18 }
0x22d3   : > { %v9842_v33 = vpop.f32.mrf.mxu3 }
0x22d4   : > { %v9846_v36 = vsel %vm1875_vm4, %v9842_v33, -inf }
0x22d5   : > { %v9790_v35 = vpop.f32.mrf.mxu1 }
0x22d7   : > { %9847 = vmax.xlane.f32.xlu2 %v9846_v36 }
0x22db   : > { %v9844_v57 = vpop.f32.mrf.mxu3 }
0x22ef   : > { %9750 = vrot.lane.b32.xlu2 %v18177_v30, %s18686_s13  ;;  %s18710_s13 = sld [smem:[#allocation55_spill]] }
0x2338   : > { %v9740_v39 = vpop.xlane.xlu1 %9739 }
0x2339   : > { %v9741_v40 = vsub.f32 %v9734_v20, %v9740_v39  ;;  %v16305_v20 = vld [vmem:[%s18700_s28 + $0x1] ss:$0 sm:$0xff] }
0x233a   : > { %v16020_v39 = vld [vmem:[%s18701_s30 + $0x1bc] sm:$0xf0] }
0x233b   : > { %v9742_v38 = vmul.f32 1.442695, %v9741_v40  ;;  %v9686_v49 = vpop.xlane.xlu0 %9685  ;;  %v16012_v40 = vld [vmem:[%s18701_s30 + $0x184] sm:$0xf] }
0x233c   : > { %16458 = vrcp.f32 %v9686_v49  ;;  %v14866_v49 = vld [vmem:[%s18701_s30 + $0x1c0] sm:$0xf0] }
0x233d   : > { %16460 = vpow2.f32 %v9742_v38 }
0x2342   : > { %v16459_v34 = vpop.eup %16458  ;;  %v9794_v41 = vpop.xlane.xlu2 %9793 }
0x2343   : > { %v16461_v50 = vpop.eup %16460  ;;  %v9688_v53 = vmul.f32 %v16459_v34, %v16457_v59  ;;  %v9795_v62 = vsub.f32 %v9788_v31, %v9794_v41  ;;  %v14872_v34 = vld [vmem:[%s18701_s30 + $0x188] sm:$0xf] }
0x2344   : > { %v9744_v43 = vsel %vm1875_vm4, %v16461_v50, 0.0  ;;  %v16021_v41 = vld [vmem:[%s18701_s30 + $0x1c4] sm:$0xf0] }
0x2345   : > { %v9689_v24 = vpack.c.bf16 %v9688_v53, %v9688_v53  ;;  %v9796_v58 = vmul.f32 1.442695, %v9795_v62  ;;  %9745 = vadd.xlane.f32.xlu2 %v9744_v43  ;;  %v14873_v53 = vor.u32 %v16021_v41, %v14872_v34  ;;  %v16013_v62 = vld [vmem:[%s18701_s30 + $0x18c] sm:$0xf]  ;;  %v16025_v41 = vld [vmem:[%s18701_s30 + $0x1e4] sm:$0xf0] }
0x2346   : > { %v14874_v43 = vld [vmem:[%s18701_s30 + $0x1c8] sm:$0xf0] }
0x2347   : > { %16462 = vpow2.f32 %v9796_v58  ;;  %14489 = vmatmul.msk.bf16.vlgmr.msra.gmra.mxu2 %vm1875_vm4, %v9689_v24  ;;  %v14877_v24 = vor.u32 %v16013_v62, %v14874_v43  ;;  %v14800_v58 = vld [vmem:[%s18701_s30 + $0x100] sm:$0xf] }
0x2349   : > { %10497 = vmatpush.bf16.msrb.mxu1 %v14877_v24  ;;  %v14832_v24 = vld [vmem:[%s18701_s30 + $0x120] sm:$0xf] }
0x234a   : > { %v9848_v63 = vpop.xlane.xlu2 %9847 }
0x234b   : > { %v9849_v46 = vsub.f32 %v9842_v33, %v9848_v63  ;;  %v16004_v63 = vld [vmem:[%s18701_s30 + $0x13c] sm:$0xf0] }
0x234d   : > { %v16463_v11 = vpop.eup %16462  ;;  %v9850_v51 = vmul.f32 1.442695, %v9849_v46  ;;  %v15996_v46 = vld [vmem:[%s18701_s30 + $0x104] sm:$0xf] }
0x234e   : > { %v9798_v13 = vsel %vm1875_vm4, %v16463_v11, 0.0 }
0x234f   : > { %16464 = vpow2.f32 %v9850_v51  ;;  %9799 = vadd.xlane.f32.xlu1 %v9798_v13  ;;  %v14802_v51 = vld [vmem:[%s18701_s30 + $0x140] sm:$0xf0]  ;;  %v14808_v13 = vld [vmem:[%s18701_s30 + $0x108] sm:$0xf] }
0x2352   : > { %v9751_v9 = vpop.permute.xlu2 %9750 }
0x2353   : > { %9763 = vmatpush.bf16.msrb.mxu0 %v9751_v9  ;;  %v16005_v9 = vld [vmem:[%s18701_s30 + $0x144] sm:$0xf0] }
0x2355   : > { %v16465_v47 = vpop.eup %16464 }
0x2356   : > { %v9852_v45 = vsel %vm1875_vm4, %v16465_v47, 0.0 }
0x2357   : > { %9853 = vadd.xlane.f32.xlu1 %v9852_v45  ;;  %v14809_v45 = vor.u32 %v16005_v9, %v14808_v13  ;;  %v14840_v13 = vld [vmem:[%s18701_s30 + $0x128] sm:$0xf] }
0x2358   : > { %v16009_v9 = vld [vmem:[%s18701_s30 + $0x164] sm:$0xf0] }
0x235d   : > { %9804 = vrot.lane.b32.xlu2 %v18177_v30, %s18685_s12  ;;  %s18711_s12 = sld [smem:[#allocation13_spill]] }
0x2370   : > { %9858 = vrot.lane.b32.xlu1 %v18177_v30, %s18674_s4  ;;  %s18712_s4 = sld [smem:[#allocation11_spill]] }
0x23b8   : > { %v9746_v61 = vpop.xlane.xlu2 %9745 }
0x23b9   : > { %16466 = vrcp.f32 %v9746_v61  ;;  %v15997_v61 = vld [vmem:[%s18701_s30 + $0x10c] sm:$0xf] }
0x23bf   : > { %v16467_v37 = vpop.eup %16466 }
0x23c0   : > { %v9748_v52 = vmul.f32 %v16467_v37, %v16461_v50  ;;  %v9805_v27 = vpop.permute.xlu2 %9804  ;;  %v14869_v50 = vor.u32 %v16012_v40, %v14866_v49  ;;  %v14810_v37 = vld [vmem:[%s18701_s30 + $0x148] sm:$0xf0]  ;;  %v16016_v40 = vld [vmem:[%s18701_s30 + $0x1a4] sm:$0xf]  ;;  %v14904_v49 = vld [vmem:[%s18701_s30 + $0x1a8] sm:$0xf] }
0x23c1   : > { %9817 = vmatpush.bf16.msrb.mxu2 %v9805_v27 }
0x23c2   : > { %v9749_v54 = vpack.c.bf16 %v9748_v52, %v9748_v52  ;;  %v9800_v14 = vpop.xlane.xlu1 %9799  ;;  %10471 = vmatpush.bf16.msra.mxu3 %v14869_v50  ;;  %v14813_v52 = vor.u32 %v15997_v61, %v14810_v37  ;;  %v16017_v50 = vld [vmem:[%s18701_s30 + $0x1ac] sm:$0xf] }
0x23c3   : > { %16468 = vrcp.f32 %v9800_v14  ;;  %v16022_v14 = vld [vmem:[%s18701_s30 + $0x1cc] sm:$0xf0] }
0x23c4   : > { %14491 = vmatmul.msk.bf16.vlgmr.msrb.gmra.mxu0 %vm1875_vm4, %v9749_v54  ;;  %10498 = vmatpush.bf16.msrb.mxu1 %v14813_v52  ;;  %v14880_v54 = vld [vmem:[%s18701_s30 + $0x190] sm:$0xf]  ;;  %v14841_v52 = vor.u32 %v16009_v9, %v14840_v13  ;;  %v16083_v13 = vld [vmem:[%s16822_s24 + $0x5b8] sm:$0xff] }
0x23c5   : > { %v16091_v9 = vld [vmem:[%s16822_s24 + $0x5f8] sm:$0xff] }
0x23c9   : > { %v16469_v3 = vpop.eup %16468 }
0x23ca   : > { %v9802_v1 = vmul.f32 %v16469_v3, %v16463_v11  ;;  %v9708_v55 = vpop.f32.mrf.mxu2  ;;  %v9854_v32 = vpop.xlane.xlu1 %9853  ;;  %v14801_v11 = vor.u32 %v16004_v63, %v14800_v58  ;;  %v16014_v3 = vld [vmem:[%s18701_s30 + $0x194] sm:$0xf]  ;;  %v16008_v58 = vld [vmem:[%s18701_s30 + $0x15c] sm:$0xf0]  ;;  %v14905_v63 = vor.u32 %v16025_v41, %v14904_v49  ;;  %v16055_v49 = vld [vmem:[%s16822_s24 + $0x4d8] sm:$0xff] }
0x23cb   : > { %16470 = vrcp.f32 %v9854_v32  ;;  %v16023_v32 = vld [vmem:[%s18701_s30 + $0x1d4] sm:$0xf0]  ;;  %v14833_v61 = vor.u32 %v16008_v58, %v14832_v24  ;;  %v16038_v24 = vld [vmem:[%s16822_s24 + $0x450] sm:$0xff]  ;;  %v16045_v58 = vld [vmem:[%s16822_s24 + $0x488] sm:$0xff] }
0x23cc   : > { %v9803_v23 = vpack.c.bf16 %v9802_v1, %v9802_v1  ;;  %v16031_v41 = vld [vmem:[%s16822_s24 + $0x418] sm:$0xff] }
0x23ce   : > { %14493 = vmatmul.msk.bf16.vlgmr.msrb.gmra.mxu2 %vm1875_vm4, %v9803_v23  ;;  %v14882_v23 = vld [vmem:[%s18701_s30 + $0x1d0] sm:$0xf0] }
0x23d1   : > { %v16471_v30 = vpop.eup %16470 }
0x23d2   : > { %v9710_v8 = vpop.f32.mrf.mxu2  ;;  %v9856_v12 = vmul.f32 %v16471_v30, %v16465_v47  ;;  %v14805_v47 = vor.u32 %v15996_v46, %v14802_v51  ;;  %v14885_v30 = vor.u32 %v16014_v3, %v14882_v23  ;;  %v14834_v51 = vld [vmem:[%s18701_s30 + $0x160] sm:$0xf0]  ;;  %v16018_v3 = vld [vmem:[%s18701_s30 + $0x1b4] sm:$0xf]  ;;  %v16027_v23 = vld [vmem:[%s18701_s30 + $0x1f4] sm:$0xf0] }
0x23d3   : > { %v14888_v8 = vld [vmem:[%s18701_s30 + $0x198] sm:$0xf] }
0x23d4   : > { %v9857_v4 = vpack.c.bf16 %v9856_v12, %v9856_v12  ;;  %10472 = vmatpush.bf16.msra.mxu3 %v14805_v47  ;;  %v14889_v12 = vor.u32 %v16023_v32, %v14888_v8  ;;  %v16001_v47 = vld [vmem:[%s18701_s30 + $0x12c] sm:$0xf]  ;;  %v16019_v8 = vld [vmem:[%s18701_s30 + $0x1bc] sm:$0xf] }
0x23d5   : > { %v14922_v32 = vld [vmem:[%s18701_s30 + $0x1f8] sm:$0xf0] }
0x23d8   : > { %10523 = vmatpush.bf16.msrb.mxu3 %v14885_v30 }
0x23e2   : > { %v9859_v2 = vpop.permute.xlu1 %9858 }
0x23e3   : > { %9871 = vmatpush.bf16.msra.mxu0 %v9859_v2  ;;  %v16015_v2 = vld [vmem:[%s18701_s30 + $0x19c] sm:$0xf] }
0x23e6   : > { %14495 = vmatmul.msk.bf16.vlgmr.msra.gmra.mxu0 %vm1875_vm4, %v9857_v4  ;;  %v14890_v4 = vld [vmem:[%s18701_s30 + $0x1d8] sm:$0xf0] }
0x23e7   : > { %10484 = vmatpush.bf16.msrb.mxu0 %v14873_v53  ;;  %v14906_v53 = vld [vmem:[%s18701_s30 + $0x1e8] sm:$0xf0] }
0x23e8   : > { %v14909_v46 = vor.u32 %v16017_v50, %v14906_v53  ;;  %v16039_v50 = vld [vmem:[%s16822_s24 + $0x458] sm:$0xff]  ;;  %v16046_v53 = vld [vmem:[%s16822_s24 + $0x490] sm:$0xff] }
0x23eb   : > { %10485 = vmatpush.bf16.msrb.mxu0 %v14809_v45  ;;  %v14842_v45 = vld [vmem:[%s18701_s30 + $0x168] sm:$0xf0] }
0x23ef   : > { %10536 = vmatpush.bf16.msra.mxu0 %v14889_v12 }
0x2441   : > { %v9765_v42 = vpop.f32.mrf.mxu0 }
0x2442   : > { %9878 = vrot.lane.b32.xlu0 %v9765_v42, %s18675_s10  ;;  %v14816_v42 = vld [vmem:[%s18701_s30 + $0x110] sm:$0xf]  ;;  %s18714_s10 = sld [smem:[#allocation14_spill]] }
0x2449   : > { %v9767_v5 = vpop.f32.mrf.mxu0 }
0x2451   : > { %v9819_v48 = vpop.f32.mrf.mxu2 }
0x2452   : > { %9882 = vrot.lane.b32.xlu2 %v9819_v48, %s18677_s5  ;;  %v14893_v48 = vor.u32 %v16015_v2, %v14890_v4  ;;  %v14848_v2 = vld [vmem:[%s18701_s30 + $0x130] sm:$0xf]  ;;  %s18709_s5 = sld [smem:[#allocation54_spill]] }
0x2453   : > { %v16010_v4 = vld [vmem:[%s18701_s30 + $0x16c] sm:$0xf0] }
0x2459   : > { %v9821_v6 = vpop.f32.mrf.mxu2 }
0x245a   : > { %v16006_v6 = vld [vmem:[%s18701_s30 + $0x14c] sm:$0xf0] }
0x2463   : > { %v9873_v7 = vpop.f32.mrf.mxu0 }
0x2464   : > { %9886 = vrot.lane.b32.xlu2 %v9873_v7, %s18676_s7  ;;  %v15998_v7 = vld [vmem:[%s18701_s30 + $0x114] sm:$0xf]  ;;  %s18713_s7 = sld [smem:[#allocation12_spill]] }
0x246b   : > { %v9875_v60 = vpop.f32.mrf.mxu0 }
0x246c   : > { %v14817_v60 = vor.u32 %v16006_v6, %v14816_v42  ;;  %v14850_v6 = vld [vmem:[%s18701_s30 + $0x170] sm:$0xf0] }
0x24ac   : > { %v9883_v10 = vpop.permute.xlu2 %9882 }
0x24b4   : > { %v9879_v44 = vpop.permute.xlu0 %9878 }
0x24b5   : > { %v9889_v16 = vsel %vm1854_vm3, %v9708_v55, %v9879_v44  ;;  %v14881_v55 = vor.u32 %v16022_v14, %v14880_v54  ;;  %v14821_v44 = vor.u32 %v15998_v7, %v14818_v15  ;;  %v14912_v54 = vld [vmem:[%s18701_s30 + $0x1b0] sm:$0xf]  ;;  %v14856_v7 = vld [vmem:[%s18701_s30 + $0x138] sm:$0xf]  ;;  %v16003_v15 = vld [vmem:[%s18701_s30 + $0x13c] sm:$0xf] }
0x24b6   : > { %v9890_v19 = vsel %vm1875_vm4, %v9889_v16, %v9883_v10  ;;  %v16007_v10 = vld [vmem:[%s18701_s30 + $0x154] sm:$0xf0]  ;;  %v16026_v14 = vld [vmem:[%s18701_s30 + $0x1ec] sm:$0xf0] }
0x24b7   : > { %v14825_v16 = vor.u32 %v16007_v10, %v14824_v28  ;;  %10524 = vmatpush.bf16.msrb.mxu3 %v14821_v44  ;;  %v14913_v30 = vor.u32 %v16026_v14, %v14912_v54  ;;  %v14858_v28 = vld [vmem:[%s18701_s30 + $0x178] sm:$0xf0]  ;;  %v14849_v10 = vor.u32 %v16010_v4, %v14848_v2  ;;  %v16066_v54 = vld [vmem:[%s16822_s24 + $0x530] sm:$0xff] }
0x24b8   : > { %v16074_v14 = vld [vmem:[%s16822_s24 + $0x570] sm:$0xff]  ;;  %v16079_v2 = vld [vmem:[%s16822_s24 + $0x598] sm:$0xff] }
0x24b9   : > { %10537 = vmatpush.bf16.msra.mxu0 %v14825_v16  ;;  %v16087_v4 = vld [vmem:[%s16822_s24 + $0x5d8] sm:$0xff] }
0x24be   : > { %v9887_v26 = vpop.permute.xlu2 %9886 }
0x24bf   : > { %v9891_v22 = vsel %vm2175_vm5, %v9890_v19, %v9887_v26  ;;  %v15999_v19 = vld [vmem:[%s18701_s30 + $0x11c] sm:$0xf] }
0x24c0   : > { %v9892_v25 = vpack.c.bf16 %v9891_v22, %v9891_v22  ;;  %v14826_v26 = vld [vmem:[%s18701_s30 + $0x158] sm:$0xf0] }
0x24c1   : > { %v14829_v22 = vor.u32 %v15999_v19, %v14826_v26  ;;  %v14861_v19 = vor.u32 %v16003_v15, %v14858_v28  ;;  %v16051_v26 = vld [vmem:[%s16822_s24 + $0x4b8] sm:$0xff]  ;;  %v16062_v15 = vld [vmem:[%s16822_s24 + $0x510] sm:$0xff] }
0x24c2   : > { %14504 = vmatmul.msk.bf16.vlgmr.msra.gmra.mxu1 %vm1760_vm2, %v9892_v25  ;;  %v16070_v28 = vld [vmem:[%s16822_s24 + $0x550] sm:$0xff] }
0x24c3   : > { %10549 = vmatpush.bf16.msra.mxu1 %v14893_v48  ;;  %v16002_v48 = vld [vmem:[%s18701_s30 + $0x134] sm:$0xf] }
0x24c4   : > { %v14853_v44 = vor.u32 %v16002_v48, %v14850_v6  ;;  %v16063_v48 = vld [vmem:[%s16822_s24 + $0x518] sm:$0xff] }
0x24c5   : > { %v16071_v6 = vld [vmem:[%s16822_s24 + $0x558] sm:$0xff] }
0x24c7   : > { %10550 = vmatpush.bf16.msra.mxu1 %v14829_v22  ;;  %v16059_v22 = vld [vmem:[%s16822_s24 + $0x4f8] sm:$0xff] }
0x253f   : > { %v9920_v21 = vpop.f32.mrf.mxu1 }
0x2540   : > { %v9921_v59 = vadd.f32 %v16305_v20, %v9920_v21 }
0x2542   : > { %v9924_v0 = vadd.f32 %v9921_v59, %v18194_v56  ;;  %v14864_v56 = vld [vmem:[%s18701_s30 + $0x180] sm:$0xf] }
0x2543   : > { %v14865_v38 = vor.u32 %v16020_v39, %v14864_v56  ;;  %v14896_v56 = vld [vmem:[%s18701_s30 + $0x1a0] sm:$0xf] }
0x2544   : > { %v9929_v29 = vsel %vm1760_vm2, %v9924_v0, 0.0  ;;  %v16024_v39 = vld [vmem:[%s18701_s30 + $0x1dc] sm:$0xf0] }
0x2545   : > { %9930 = vadd.xlane.f32.xlu0 %v9929_v29  ;;  %10458 = vmatpush.bf16.msra.mxu2 %v14865_v38  ;;  %v14898_v38 = vld [vmem:[%s18701_s30 + $0x1e0] sm:$0xf0]  ;;  %v14897_v62 = vor.u32 %v16024_v39, %v14896_v56 }
0x2546   : > { %v14901_v43 = vor.u32 %v16016_v40, %v14898_v38  ;;  %v16056_v56 = vld [vmem:[%s16822_s24 + $0x4e0] sm:$0xff]  ;;  %v16047_v38 = vld [vmem:[%s16822_s24 + $0x498] sm:$0xff] }
0x2547   : > { %v9922_v31 = vpop.f32.mrf.mxu1  ;;  %v16032_v39 = vld [vmem:[%s16822_s24 + $0x420] sm:$0xff] }
0x2548   : > { %v16306_v31 = vld [vmem:[%s18703_s3 + $0x1] ss:$0 sm:$0xff] }
0x2549   : > { %10459 = vmatpush.bf16.msra.mxu2 %v14801_v11  ;;  %v16000_v11 = vld [vmem:[%s18701_s30 + $0x124] sm:$0xf] }
0x254a   : > { %v14837_v37 = vor.u32 %v16000_v11, %v14834_v51  ;;  %v16040_v40 = vld [vmem:[%s16822_s24 + $0x460] sm:$0xff] }
0x254b   : > { %v16044_v11 = vld [vmem:[%s16822_s24 + $0x480] sm:$0xff] }
0x254c   : > { %v16052_v51 = vld [vmem:[%s16822_s24 + $0x4c0] sm:$0xff] }
0x254d   : > { %10510 = vmatpush.bf16.msrb.mxu2 %v14881_v55  ;;  %v14920_v55 = vld [vmem:[%s18701_s30 + $0x1b8] sm:$0xf] }
0x254e   : > { %v14921_v42 = vor.u32 %v16027_v23, %v14920_v55  ;;  %v16065_v55 = vld [vmem:[%s16822_s24 + $0x528] sm:$0xff] }
0x254f   : > { %v16073_v23 = vld [vmem:[%s16822_s24 + $0x568] sm:$0xff] }
0x2551   : > { %10511 = vmatpush.bf16.msrb.mxu2 %v14817_v60  ;;  %v16011_v60 = vld [vmem:[%s18701_s30 + $0x174] sm:$0xf0] }
0x2552   : > { %v14857_v16 = vor.u32 %v16011_v60, %v14856_v7  ;;  %v16077_v7 = vld [vmem:[%s16822_s24 + $0x588] sm:$0xff] }
0x2553   : > { %v16085_v60 = vld [vmem:[%s16822_s24 + $0x5c8] sm:$0xff] }
0x25b8   : > { %v9931_v18 = vpop.xlane.xlu0 %9930 }
0x25b9   : > { %v9932_v33 = vmul.f32 %v9931_v18, %v16946_v17 }
0x25bb   : > { %v18241_v35 = vsub.f32 %v9924_v0, %v9932_v33  ;;  %v16307_v33 = vld [vmem:[%s18704_s23 + $0x1] ss:$0 sm:$0xff] }
0x25bd   : > { %v9934_v36 = vmul.f32 %v18241_v35, %v18241_v35 }
0x25bf   : > { %v9935_v57 = vsel %vm1760_vm2, %v9934_v36, 0.0 }
0x25c0   : > { %9936 = vadd.xlane.f32.xlu2 %v9935_v57 }
0x2633   : > { %v9937_v27 = vpop.xlane.xlu2 %9936 }
0x2634   : > { %v9938_v1 = vmul.f32 %v9937_v27, %v16946_v17  ;;  %v14845_v27 = vor.u32 %v16001_v47, %v14842_v45  ;;  %v16028_v47 = vld [vmem:[%s16822_s24 + $0x400] sm:$0xff] }
0x2635   : > { %v16036_v45 = vld [vmem:[%s16822_s24 + $0x440] sm:$0xff] }
0x2636   : > { %v9939_v5 = vadd.f32 1e-05, %v9938_v1  ;;  %v14914_v1 = vld [vmem:[%s18701_s30 + $0x1f0] sm:$0xf0] }
0x2637   : > { %v14917_v12 = vor.u32 %v16018_v3, %v14914_v1  ;;  %v16081_v3 = vld [vmem:[%s16822_s24 + $0x5a8] sm:$0xff] }
0x2638   : > { %16472 = vrsqrt.f32 %v9939_v5  ;;  %vm9946_vm4 = vweird.f32 %v9939_v5  ;;  %v16089_v1 = vld [vmem:[%s16822_s24 + $0x5e8] sm:$0xff] }
0x263e   : > { %v16473_v25 = vpop.eup %16472 }
0x263f   : > { %v9941_v20 = vmul.f32 %v16473_v25, %v9939_v5  ;;  %vm9947_vm3 = vweird.f32 %v16473_v25  ;;  %v14925_v5 = vor.u32 %v16019_v8, %v14922_v32  ;;  %v16080_v8 = vld [vmem:[%s16822_s24 + $0x5a0] sm:$0xff] }
0x2640   : > { %vm9948_vm5 = vmor %vm9946_vm4, %vm9947_vm3  ;;  %v16088_v32 = vld [vmem:[%s16822_s24 + $0x5e0] sm:$0xff] }
0x2641   : > { %v9942_v21 = vmul.f32 %v16473_v25, %v9941_v20  ;;  %v16043_v20 = vld [vmem:[%s16822_s24 + $0x478] sm:$0xff] }
0x2643   : > { %v9943_v59 = vmul.f32 0.5, %v9942_v21  ;;  %v16050_v21 = vld [vmem:[%s16822_s24 + $0x4b0] sm:$0xff] }
0x2645   : > { %v9944_v0 = vsub.f32 1.5, %v9943_v59  ;;  %v16058_v59 = vld [vmem:[%s16822_s24 + $0x4f0] sm:$0xff] }
0x2647   : > { %v9945_v29 = vmul.f32 %v16473_v25, %v9944_v0  ;;  %v16034_v0 = vld [vmem:[%s16822_s24 + $0x430] sm:$0xff] }
0x2649   : > { %v9949_v18 = vsel %vm9948_vm5, %v16473_v25, %v9945_v29  ;;  %v16035_v25 = vld [vmem:[%s16822_s24 + $0x438] sm:$0xff]  ;;  %v16042_v29 = vld [vmem:[%s16822_s24 + $0x470] sm:$0xff] }
0x264a   : > { %v9950_v36 = vmul.f32 %v9949_v18, %v18241_v35  ;;  %v16057_v18 = vld [vmem:[%s16822_s24 + $0x4e8] sm:$0xff] }
0x264c   : > { %v9954_v57 = vmul.f32 %v16306_v31, %v9950_v36  ;;  %v16049_v31 = vld [vmem:[%s16822_s24 + $0x4a8] sm:$0xff] }
0x264d   : > { %v16041_v36 = vld [vmem:[%s16822_s24 + $0x468] sm:$0xff] }
0x264e   : > { %v18287_v34 = vadd.f32 %v16307_v33, %v9954_v57  ;;  %v16033_v33 = vld [vmem:[%s16822_s24 + $0x428] sm:$0xff]  ;;  %v16048_v57 = vld [vmem:[%s16822_s24 + $0x4a0] sm:$0xff] }
0x2650   : > { %v18294_v35 = vpack.c.bf16 %v18287_v34, %v18287_v34 }
0x2652   : > { %14926 = vmatmul.msk.bf16.vlgmr.msra.gmra.mxu2 %vm1760_vm2, %v18294_v35  ;;  %14927 = vmatmul.msk.bf16.vlgmr.msra.gmra.mxu3 %vm1760_vm2, %v18294_v35 }
0x2653   : > { %14928 = vmatmul.msk.bf16.vlgmr.msrb.gmra.mxu0 %vm1760_vm2, %v18294_v35  ;;  %14929 = vmatmul.msk.bf16.vlgmr.msrb.gmra.mxu1 %vm1760_vm2, %v18294_v35 }
0x2654   : > { %10562 = vmatpush.bf16.msra.mxu2 %v14897_v62  ;;  %10575 = vmatpush.bf16.msra.mxu3 %v14901_v43  ;;  %v16054_v62 = vld [vmem:[%s16822_s24 + $0x4d0] sm:$0xff] }
0x2655   : > { %10588 = vmatpush.bf16.msrb.mxu0 %v14905_v63  ;;  %10601 = vmatpush.bf16.msrb.mxu1 %v14909_v46  ;;  %v16030_v43 = vld [vmem:[%s16822_s24 + $0x410] sm:$0xff]  ;;  %v16029_v63 = vld [vmem:[%s16822_s24 + $0x408] sm:$0xff] }
0x2656   : > { %v16037_v46 = vld [vmem:[%s16822_s24 + $0x448] sm:$0xff] }
0x2658   : > { %10563 = vmatpush.bf16.msra.mxu2 %v14833_v61  ;;  %10576 = vmatpush.bf16.msra.mxu3 %v14837_v37  ;;  %v16067_v61 = vld [vmem:[%s16822_s24 + $0x538] sm:$0xff] }
0x2659   : > { %10589 = vmatpush.bf16.msrb.mxu0 %v14841_v52  ;;  %10602 = vmatpush.bf16.msrb.mxu1 %v14845_v27  ;;  %v16075_v37 = vld [vmem:[%s16822_s24 + $0x578] sm:$0xff]  ;;  %v16082_v52 = vld [vmem:[%s16822_s24 + $0x5b0] sm:$0xff] }
0x265a   : > { %v16090_v27 = vld [vmem:[%s16822_s24 + $0x5f0] sm:$0xff] }
0x2662   : > { %14930 = vmatmul.msk.bf16.vlgmr.msrb.gmra.mxu2 %vm1760_vm2, %v18294_v35  ;;  %14931 = vmatmul.msk.bf16.vlgmr.msrb.gmra.mxu3 %vm1760_vm2, %v18294_v35 }
0x2663   : > { %14932 = vmatmul.msk.bf16.vlgmr.msra.gmra.mxu0 %vm1760_vm2, %v18294_v35  ;;  %14933 = vmatmul.msk.bf16.vlgmr.msra.gmra.mxu1 %vm1760_vm2, %v18294_v35 }
0x2664   : > { %10614 = vmatpush.bf16.msrb.mxu2 %v14913_v30  ;;  %10627 = vmatpush.bf16.msrb.mxu3 %v14917_v12  ;;  %v16064_v30 = vld [vmem:[%s16822_s24 + $0x520] sm:$0xff] }
0x2665   : > { %10640 = vmatpush.bf16.msra.mxu0 %v14921_v42  ;;  %10653 = vmatpush.bf16.msra.mxu1 %v14925_v5  ;;  %v16072_v12 = vld [vmem:[%s16822_s24 + $0x560] sm:$0xff]  ;;  %v16078_v42 = vld [vmem:[%s16822_s24 + $0x590] sm:$0xff] }
0x2666   : > { %v16086_v5 = vld [vmem:[%s16822_s24 + $0x5d0] sm:$0xff] }
0x2668   : > { %10615 = vmatpush.bf16.msrb.mxu2 %v14849_v10  ;;  %10628 = vmatpush.bf16.msrb.mxu3 %v14853_v44  ;;  %v16076_v10 = vld [vmem:[%s16822_s24 + $0x580] sm:$0xff] }
0x2669   : > { %10641 = vmatpush.bf16.msra.mxu0 %v14857_v16  ;;  %10654 = vmatpush.bf16.msra.mxu1 %v14861_v19  ;;  %v16084_v44 = vld [vmem:[%s16822_s24 + $0x5c0] sm:$0xff]  ;;  %v16061_v16 = vld [vmem:[%s16822_s24 + $0x508] sm:$0xff] }
0x266a   : > { %v16069_v19 = vld [vmem:[%s16822_s24 + $0x548] sm:$0xff] }
0x2672   : > { %14934 = vmatmul.msk.bf16.vlgmr.msra.gmra.mxu2 %vm1760_vm2, %v18294_v35  ;;  %14935 = vmatmul.msk.bf16.vlgmr.msra.gmra.mxu3 %vm1760_vm2, %v18294_v35 }
0x2673   : > { %14936 = vmatmul.msk.bf16.vlgmr.msrb.gmra.mxu0 %vm1760_vm2, %v18294_v35  ;;  %14937 = vmatmul.msk.bf16.vlgmr.msrb.gmra.mxu1 %vm1760_vm2, %v18294_v35 }
0x2674   : > { %11489 = vmatpush.bf16.msrb.mxu0 %v16051_v26  ;;  %11502 = vmatpush.bf16.msrb.mxu1 %v16059_v22  ;;  %v16060_v26 = vld [vmem:[%s16822_s24 + $0x500] sm:$0xff] }
0x2675   : > { %11463 = vmatpush.bf16.msra.mxu2 %v16035_v25  ;;  %11476 = vmatpush.bf16.msra.mxu3 %v16043_v20  ;;  %v16068_v22 = vld [vmem:[%s16822_s24 + $0x540] sm:$0xff]  ;;  %v18417_v25 = vld [vmem:[%s18709_s5 + $0x10] sm:$0xff] }
0x2676   : > { %v10259_v20 = vperm.slane %v18417_v25, 2 }
0x2678   : > { %11490 = vmatpush.bf16.msrb.mxu0 %v16050_v21  ;;  %11503 = vmatpush.bf16.msrb.mxu1 %v16058_v59  ;;  %v10260_v21 = vperm.slane %v18417_v25, 3 }
0x2679   : > { %11464 = vmatpush.bf16.msra.mxu2 %v16034_v0  ;;  %11477 = vmatpush.bf16.msra.mxu3 %v16042_v29 }
0x267c   : > { %11491 = vmatpush.bf16.msrb.mxu0 %v16049_v31  ;;  %11504 = vmatpush.bf16.msrb.mxu1 %v16057_v18  ;;  %v10257_v18 = vperm.slane %v18417_v25, 0 }
0x267d   : > { %11465 = vmatpush.bf16.msra.mxu2 %v16033_v33  ;;  %11478 = vmatpush.bf16.msra.mxu3 %v16041_v36  ;;  %v10258_v33 = vperm.slane %v18417_v25, 1 }
0x2680   : > { %11492 = vmatpush.bf16.msrb.mxu0 %v16048_v57  ;;  %11505 = vmatpush.bf16.msrb.mxu1 %v16056_v56  ;;  %v16115_v56 = vld [vmem:[%s16822_s24 + $0x6b8] sm:$0xff] }
0x2681   : > { %11466 = vmatpush.bf16.msra.mxu2 %v16032_v39  ;;  %11479 = vmatpush.bf16.msra.mxu3 %v16040_v40  ;;  %v16123_v39 = vld [vmem:[%s16822_s24 + $0x6f8] sm:$0xff] }
0x2682   : > { %14938 = vmatmul.msk.bf16.vlgmr.msrb.gmra.mxu2 %vm1760_vm2, %v18294_v35  ;;  %14939 = vmatmul.msk.bf16.vlgmr.msrb.gmra.mxu3 %vm1760_vm2, %v18294_v35 }
0x2683   : > { %14940 = vmatmul.msk.bf16.vlgmr.msra.gmra.mxu0 %vm1760_vm2, %v18294_v35  ;;  %14941 = vmatmul.msk.bf16.vlgmr.msra.gmra.mxu1 %vm1760_vm2, %v18294_v35  ;;  %v16053_v35 = vld [vmem:[%s16822_s24 + $0x4c8] sm:$0xff] }
0x2684   : > { %11493 = vmatpush.bf16.msrb.mxu0 %v16047_v38  ;;  %11506 = vmatpush.bf16.msrb.mxu1 %v16055_v49 }
0x2685   : > { %11467 = vmatpush.bf16.msra.mxu2 %v16031_v41  ;;  %11480 = vmatpush.bf16.msra.mxu3 %v16039_v50 }
0x2688   : > { %11494 = vmatpush.bf16.msrb.mxu0 %v16046_v53  ;;  %11507 = vmatpush.bf16.msrb.mxu1 %v16054_v62 }
0x2689   : > { %11468 = vmatpush.bf16.msra.mxu2 %v16030_v43  ;;  %11481 = vmatpush.bf16.msra.mxu3 %v16038_v24 }
0x268c   : > { %11495 = vmatpush.bf16.msrb.mxu0 %v16045_v58  ;;  %11508 = vmatpush.bf16.msrb.mxu1 %v16053_v35  ;;  %v16114_v35 = vld [vmem:[%s16822_s24 + $0x6b0] sm:$0xff] }
0x268d   : > { %11469 = vmatpush.bf16.msra.mxu2 %v16029_v63  ;;  %11482 = vmatpush.bf16.msra.mxu3 %v16037_v46  ;;  %v16122_v63 = vld [vmem:[%s16822_s24 + $0x6f0] sm:$0xff] }
0x2690   : > { %11496 = vmatpush.bf16.msrb.mxu0 %v16044_v11  ;;  %11509 = vmatpush.bf16.msrb.mxu1 %v16052_v51  ;;  %v16099_v51 = vld [vmem:[%s16822_s24 + $0x638] sm:$0xff] }
0x2691   : > { %11470 = vmatpush.bf16.msra.mxu2 %v16028_v47  ;;  %11483 = vmatpush.bf16.msra.mxu3 %v16036_v45  ;;  %v16121_v47 = vld [vmem:[%s16822_s24 + $0x6e8] sm:$0xff] }
0x2694   : > { %11541 = vmatpush.bf16.msra.mxu0 %v16083_v13  ;;  %11554 = vmatpush.bf16.msra.mxu1 %v16091_v9  ;;  %v16107_v13 = vld [vmem:[%s16822_s24 + $0x678] sm:$0xff]  ;;  %v16113_v9 = vld [vmem:[%s16822_s24 + $0x6a8] sm:$0xff] }
0x2695   : > { %11515 = vmatpush.bf16.msrb.mxu2 %v16067_v61  ;;  %11528 = vmatpush.bf16.msrb.mxu3 %v16075_v37  ;;  %v10263_v37 = vperm.slane %v18417_v25, 6 }
0x2698   : > { %11542 = vmatpush.bf16.msra.mxu0 %v16082_v52  ;;  %11555 = vmatpush.bf16.msra.mxu1 %v16090_v27  ;;  %v10264_v52 = vperm.slane %v18417_v25, 7  ;;  %v16098_v27 = vld [vmem:[%s16822_s24 + $0x630] sm:$0xff] }
0x2699   : > { %11516 = vmatpush.bf16.msrb.mxu2 %v16066_v54  ;;  %11529 = vmatpush.bf16.msrb.mxu3 %v16074_v14  ;;  %v16106_v54 = vld [vmem:[%s16822_s24 + $0x670] sm:$0xff] }
0x269c   : > { %11543 = vmatpush.bf16.msra.mxu0 %v16081_v3  ;;  %11556 = vmatpush.bf16.msra.mxu1 %v16089_v1  ;;  %v16112_v1 = vld [vmem:[%s16822_s24 + $0x6a0] sm:$0xff] }
0x269d   : > { %11517 = vmatpush.bf16.msrb.mxu2 %v16065_v55  ;;  %11530 = vmatpush.bf16.msrb.mxu3 %v16073_v23  ;;  %v16120_v55 = vld [vmem:[%s16822_s24 + $0x6e0] sm:$0xff] }
0x26a0   : > { %11544 = vmatpush.bf16.msra.mxu0 %v16080_v8  ;;  %11557 = vmatpush.bf16.msra.mxu1 %v16088_v32  ;;  %v16097_v32 = vld [vmem:[%s16822_s24 + $0x628] sm:$0xff] }
0x26a1   : > { %11518 = vmatpush.bf16.msrb.mxu2 %v16064_v30  ;;  %11531 = vmatpush.bf16.msrb.mxu3 %v16072_v12  ;;  %v16105_v30 = vld [vmem:[%s16822_s24 + $0x668] sm:$0xff]  ;;  %v10261_v12 = vperm.slane %v18417_v25, 4 }
0x26a4   : > { %11545 = vmatpush.bf16.msra.mxu0 %v16079_v2  ;;  %11558 = vmatpush.bf16.msra.mxu1 %v16087_v4  ;;  %v10262_v2 = vperm.slane %v18417_v25, 5 }
0x26a5   : > { %11519 = vmatpush.bf16.msrb.mxu2 %v16063_v48  ;;  %11532 = vmatpush.bf16.msrb.mxu3 %v16071_v6  ;;  %v16119_v48 = vld [vmem:[%s16822_s24 + $0x6d8] sm:$0xff] }
0x26a8   : > { %11546 = vmatpush.bf16.msra.mxu0 %v16078_v42  ;;  %11559 = vmatpush.bf16.msra.mxu1 %v16086_v5  ;;  %v16111_v5 = vld [vmem:[%s16822_s24 + $0x698] sm:$0xff] }
0x26a9   : > { %11520 = vmatpush.bf16.msrb.mxu2 %v16062_v15  ;;  %11533 = vmatpush.bf16.msrb.mxu3 %v16070_v28 }
0x26ac   : > { %11547 = vmatpush.bf16.msra.mxu0 %v16077_v7  ;;  %11560 = vmatpush.bf16.msra.mxu1 %v16085_v60 }
0x26ad   : > { %11521 = vmatpush.bf16.msrb.mxu2 %v16061_v16  ;;  %11534 = vmatpush.bf16.msrb.mxu3 %v16069_v19  ;;  %v16104_v16 = vld [vmem:[%s16822_s24 + $0x660] sm:$0xff] }
0x26b0   : > { %11548 = vmatpush.bf16.msra.mxu0 %v16076_v10  ;;  %11561 = vmatpush.bf16.msra.mxu1 %v16084_v44  ;;  %v16096_v44 = vld [vmem:[%s16822_s24 + $0x620] sm:$0xff] }
0x26b1   : > { %11522 = vmatpush.bf16.msrb.mxu2 %v16060_v26  ;;  %11535 = vmatpush.bf16.msrb.mxu3 %v16068_v22 }
0x26d0   : > { %v10487_v59 = vpop.f32.mrf.mxu0  ;;  %v10500_v0 = vpop.f32.mrf.mxu1 }
0x26d1   : > { %v10488_v29 = vadd.f32 %v10487_v59, %v10259_v20  ;;  %v10501_v31 = vadd.f32 %v10500_v0, %v10260_v21  ;;  %v16110_v20 = vld [vmem:[%s16822_s24 + $0x690] sm:$0xff] }
0x26d2   : > { %v16118_v21 = vld [vmem:[%s16822_s24 + $0x6d0] sm:$0xff] }
0x26d3   : > { %v10662_v36 = vmax.f32 %v10488_v29, 0.0  ;;  %v10663_v57 = vmax.f32 %v10501_v31, 0.0  ;;  %v16095_v29 = vld [vmem:[%s16822_s24 + $0x618] sm:$0xff] }
0x26d4   : > { %v16103_v31 = vld [vmem:[%s16822_s24 + $0x658] sm:$0xff] }
0x26d5   : > { %v10678_v40 = vpack.c.bf16 %v10662_v36, %v10662_v36  ;;  %v10679_v38 = vpack.c.bf16 %v10663_v57, %v10663_v57  ;;  %v10461_v49 = vpop.f32.mrf.mxu2  ;;  %v10474_v41 = vpop.f32.mrf.mxu3  ;;  %v16117_v36 = vld [vmem:[%s16822_s24 + $0x6c8] sm:$0xff] }
0x26d6   : > { %v10462_v50 = vadd.f32 %v10461_v49, %v10257_v18  ;;  %v10475_v53 = vadd.f32 %v10474_v41, %v10258_v33  ;;  %v18450_v18 = vld [vmem:[%s18709_s5 + $0x18] sm:$0xff]  ;;  %v16109_v33 = vld [vmem:[%s16822_s24 + $0x688] sm:$0xff]  ;;  %v16102_v49 = vld [vmem:[%s16822_s24 + $0x650] sm:$0xff]  ;;  %s18716_s5 = sld [smem:[#allocation56_spill]] }
0x26d7   : > { %11497 = vmatmul.bf16.vlgmr.msrb.gmra.mxu0 %v10678_v40  ;;  %11510 = vmatmul.bf16.vlgmr.msrb.gmra.mxu1 %v10679_v38  ;;  %v10268_v40 = vperm.slane %v18450_v18, 3  ;;  %v16094_v38 = vld [vmem:[%s16822_s24 + $0x610] sm:$0xff] }
0x26d8   : > { %v10660_v62 = vmax.f32 %v10462_v50, 0.0  ;;  %v10661_v43 = vmax.f32 %v10475_v53, 0.0  ;;  %11593 = vmatpush.bf16.msrb.mxu0 %v16115_v56  ;;  %11606 = vmatpush.bf16.msrb.mxu1 %v16123_v39  ;;  %v10489_v24 = vpop.f32.mrf.mxu0  ;;  %v10502_v58 = vpop.f32.mrf.mxu1  ;;  %v10267_v39 = vperm.slane %v18450_v18, 2  ;;  %v16108_v53 = vld [vmem:[%s16822_s24 + $0x680] sm:$0xff] }
0x26d9   : > { %v16147_v58 = vld [vmem:[%s16822_s24 + $0x7b8] sm:$0xff] }
0x26da   : > { %v10676_v46 = vpack.c.bf16 %v10660_v62, %v10660_v62  ;;  %v10677_v11 = vpack.c.bf16 %v10661_v43, %v10661_v43  ;;  %v16116_v62 = vld [vmem:[%s16822_s24 + $0x6c0] sm:$0xff] }
0x26dc   : > { %11594 = vmatpush.bf16.msrb.mxu0 %v16114_v35  ;;  %11607 = vmatpush.bf16.msrb.mxu1 %v16122_v63  ;;  %v16155_v35 = vld [vmem:[%s16822_s24 + $0x7f8] sm:$0xff]  ;;  %v16093_v63 = vld [vmem:[%s16822_s24 + $0x608] sm:$0xff] }
0x26dd   : > { %11471 = vmatmul.bf16.vlgmr.msra.gmra.mxu2 %v10676_v46  ;;  %11484 = vmatmul.bf16.vlgmr.msra.gmra.mxu3 %v10677_v11  ;;  %v10463_v45 = vpop.f32.mrf.mxu2  ;;  %v10476_v61 = vpop.f32.mrf.mxu3  ;;  %v16101_v46 = vld [vmem:[%s16822_s24 + $0x648] sm:$0xff]  ;;  %v10265_v11 = vperm.slane %v18450_v18, 0 }
0x26de   : > { %11567 = vmatpush.bf16.msra.mxu2 %v16099_v51  ;;  %11580 = vmatpush.bf16.msra.mxu3 %v16107_v13  ;;  %v10266_v51 = vperm.slane %v18450_v18, 1 }
0x26e0   : > { %11595 = vmatpush.bf16.msrb.mxu0 %v16113_v9  ;;  %11608 = vmatpush.bf16.msrb.mxu1 %v16121_v47  ;;  %v10539_v14 = vpop.f32.mrf.mxu0  ;;  %v10552_v3 = vpop.f32.mrf.mxu1 }
0x26e1   : > { %v10540_v23 = vadd.f32 %v10539_v14, %v10263_v37  ;;  %v10553_v8 = vadd.f32 %v10552_v3, %v10264_v52  ;;  %v16146_v52 = vld [vmem:[%s16822_s24 + $0x7b0] sm:$0xff]  ;;  %v16092_v3 = vld [vmem:[%s16822_s24 + $0x600] sm:$0xff] }
0x26e2   : > { %11568 = vmatpush.bf16.msra.mxu2 %v16098_v27  ;;  %11581 = vmatpush.bf16.msra.mxu3 %v16106_v54  ;;  %v16154_v27 = vld [vmem:[%s16822_s24 + $0x7f0] sm:$0xff] }
0x26e3   : > { %v10666_v4 = vmax.f32 %v10540_v23, 0.0  ;;  %v10667_v42 = vmax.f32 %v10553_v8, 0.0  ;;  %v16139_v23 = vld [vmem:[%s16822_s24 + $0x778] sm:$0xff] }
0x26e4   : > { %11596 = vmatpush.bf16.msrb.mxu0 %v16112_v1  ;;  %11609 = vmatpush.bf16.msrb.mxu1 %v16120_v55  ;;  %v16100_v1 = vld [vmem:[%s16822_s24 + $0x640] sm:$0xff]  ;;  %v16131_v55 = vld [vmem:[%s16822_s24 + $0x738] sm:$0xff] }
0x26e5   : > { %v10682_v6 = vpack.c.bf16 %v10666_v4, %v10666_v4  ;;  %v10683_v7 = vpack.c.bf16 %v10667_v42, %v10667_v42  ;;  %v10513_v60 = vpop.f32.mrf.mxu2  ;;  %v10526_v15 = vpop.f32.mrf.mxu3  ;;  %v16153_v4 = vld [vmem:[%s16822_s24 + $0x7e8] sm:$0xff] }
0x26e6   : > { %11569 = vmatpush.bf16.msra.mxu2 %v16097_v32  ;;  %11582 = vmatpush.bf16.msra.mxu3 %v16105_v30  ;;  %v10514_v28 = vadd.f32 %v10513_v60, %v10261_v12  ;;  %v10527_v10 = vadd.f32 %v10526_v15, %v10262_v2  ;;  %v16145_v2 = vld [vmem:[%s16822_s24 + $0x7a8] sm:$0xff]  ;;  %v16144_v15 = vld [vmem:[%s16822_s24 + $0x7a0] sm:$0xff] }
0x26e7   : > { %11549 = vmatmul.bf16.vlgmr.msra.gmra.mxu0 %v10682_v6  ;;  %11562 = vmatmul.bf16.vlgmr.msra.gmra.mxu1 %v10683_v7  ;;  %v16138_v6 = vld [vmem:[%s16822_s24 + $0x770] sm:$0xff] }
0x26e8   : > { %v10664_v19 = vmax.f32 %v10514_v28, 0.0  ;;  %v10665_v26 = vmax.f32 %v10527_v10, 0.0  ;;  %11597 = vmatpush.bf16.msrb.mxu0 %v16111_v5  ;;  %11610 = vmatpush.bf16.msrb.mxu1 %v16119_v48  ;;  %v10541_v22 = vpop.f32.mrf.mxu0  ;;  %v10554_v25 = vpop.f32.mrf.mxu1  ;;  %v16130_v48 = vld [vmem:[%s16822_s24 + $0x730] sm:$0xff]  ;;  %v16152_v28 = vld [vmem:[%s16822_s24 + $0x7e0] sm:$0xff]  ;;  %v16129_v10 = vld [vmem:[%s16822_s24 + $0x728] sm:$0xff] }
0x26e9   : > { %v16151_v22 = vld [vmem:[%s16822_s24 + $0x7d8] sm:$0xff]  ;;  %v16128_v25 = vld [vmem:[%s16822_s24 + $0x720] sm:$0xff] }
0x26ea   : > { %v10680_v59 = vpack.c.bf16 %v10664_v19, %v10664_v19  ;;  %v10681_v0 = vpack.c.bf16 %v10665_v26, %v10665_v26  ;;  %11570 = vmatpush.bf16.msra.mxu2 %v16096_v44  ;;  %11583 = vmatpush.bf16.msra.mxu3 %v16104_v16  ;;  %v16137_v44 = vld [vmem:[%s16822_s24 + $0x768] sm:$0xff]  ;;  %v16143_v26 = vld [vmem:[%s16822_s24 + $0x798] sm:$0xff] }
0x26ec   : > { %11598 = vmatpush.bf16.msrb.mxu0 %v16110_v20  ;;  %11611 = vmatpush.bf16.msrb.mxu1 %v16118_v21  ;;  %v16136_v20 = vld [vmem:[%s16822_s24 + $0x760] sm:$0xff] }
0x26ed   : > { %11523 = vmatmul.bf16.vlgmr.msrb.gmra.mxu2 %v10680_v59  ;;  %11536 = vmatmul.bf16.vlgmr.msrb.gmra.mxu3 %v10681_v0  ;;  %v10515_v57 = vpop.f32.mrf.mxu2  ;;  %v10528_v56 = vpop.f32.mrf.mxu3  ;;  %v16142_v0 = vld [vmem:[%s16822_s24 + $0x790] sm:$0xff] }
0x26ee   : > { %11571 = vmatpush.bf16.msra.mxu2 %v16095_v29  ;;  %11584 = vmatpush.bf16.msra.mxu3 %v16103_v31  ;;  %v16150_v29 = vld [vmem:[%s16822_s24 + $0x7d0] sm:$0xff]  ;;  %v10271_v31 = vperm.slane %v18450_v18, 6  ;;  %v16135_v57 = vld [vmem:[%s16822_s24 + $0x758] sm:$0xff] }
0x26f0   : > { %11599 = vmatpush.bf16.msrb.mxu0 %v16109_v33  ;;  %11612 = vmatpush.bf16.msrb.mxu1 %v16117_v36  ;;  %v10591_v41 = vpop.f32.mrf.mxu0  ;;  %v10604_v50 = vpop.f32.mrf.mxu1  ;;  %v10272_v33 = vperm.slane %v18450_v18, 7  ;;  %v16127_v36 = vld [vmem:[%s16822_s24 + $0x718] sm:$0xff] }
0x26f1   : > { %v10592_v43 = vadd.f32 %v10591_v41, %v10267_v39  ;;  %v10605_v24 = vadd.f32 %v10604_v50, %v10268_v40  ;;  %v16141_v40 = vld [vmem:[%s16822_s24 + $0x788] sm:$0xff]  ;;  %v16126_v50 = vld [vmem:[%s16822_s24 + $0x710] sm:$0xff] }
0x26f2   : > { %11572 = vmatpush.bf16.msra.mxu2 %v16094_v38  ;;  %11585 = vmatpush.bf16.msra.mxu3 %v16102_v49  ;;  %v16149_v38 = vld [vmem:[%s16822_s24 + $0x7c8] sm:$0xff] }
0x26f3   : > { %v10670_v13 = vmax.f32 %v10592_v43, 0.0  ;;  %v10671_v9 = vmax.f32 %v10605_v24, 0.0  ;;  %v10270_v43 = vperm.slane %v18450_v18, 5 }
0x26f4   : > { %11600 = vmatpush.bf16.msrb.mxu0 %v16108_v53  ;;  %11613 = vmatpush.bf16.msrb.mxu1 %v16116_v62  ;;  %v16134_v53 = vld [vmem:[%s16822_s24 + $0x750] sm:$0xff]  ;;  %v10269_v62 = vperm.slane %v18450_v18, 4 }
0x26f5   : > { %v10686_v47 = vpack.c.bf16 %v10670_v13, %v10670_v13  ;;  %v10687_v45 = vpack.c.bf16 %v10671_v9, %v10671_v9  ;;  %v10565_v61 = vpop.f32.mrf.mxu2  ;;  %v10578_v37 = vpop.f32.mrf.mxu3  ;;  %v16133_v13 = vld [vmem:[%s16822_s24 + $0x748] sm:$0xff] }
0x26f6   : > { %11573 = vmatpush.bf16.msra.mxu2 %v16093_v63  ;;  %11586 = vmatpush.bf16.msra.mxu3 %v16101_v46  ;;  %v10566_v54 = vadd.f32 %v10565_v61, %v10265_v11  ;;  %v10579_v14 = vadd.f32 %v10578_v37, %v10266_v51  ;;  %v16148_v63 = vld [vmem:[%s16822_s24 + $0x7c0] sm:$0xff]  ;;  %v16125_v51 = vld [vmem:[%s16822_s24 + $0x708] sm:$0xff] }
0x26f7   : > { %11601 = vmatmul.bf16.vlgmr.msrb.gmra.mxu0 %v10686_v47  ;;  %11614 = vmatmul.bf16.vlgmr.msrb.gmra.mxu1 %v10687_v45  ;;  %v16124_v61 = vld [vmem:[%s16822_s24 + $0x700] sm:$0xff] }
0x26f8   : > { %11645 = vmatpush.bf16.msra.mxu0 %v16147_v58  ;;  %11658 = vmatpush.bf16.msra.mxu1 %v16155_v35  ;;  %v10668_v8 = vmax.f32 %v10566_v54, 0.0  ;;  %v10669_v32 = vmax.f32 %v10579_v14, 0.0  ;;  %v10593_v30 = vpop.f32.mrf.mxu0  ;;  %v10606_v12 = vpop.f32.mrf.mxu1  ;;  %v16140_v35 = vld [vmem:[%s16822_s24 + $0x780] sm:$0xff] }
0x26f9   : > { %v16132_v37 = vld [vmem:[%s16822_s24 + $0x740] sm:$0xff] }
0x26fa   : > { %v10684_v42 = vpack.c.bf16 %v10668_v8, %v10668_v8  ;;  %v10685_v5 = vpack.c.bf16 %v10669_v32, %v10669_v32  ;;  %11574 = vmatpush.bf16.msra.mxu2 %v16092_v3  ;;  %11587 = vmatpush.bf16.msra.mxu3 %v16100_v1 }
0x26fc   : > { %11646 = vmatpush.bf16.msra.mxu0 %v16146_v52  ;;  %11659 = vmatpush.bf16.msra.mxu1 %v16154_v27 }
0x26fd   : > { %v10567_v7 = vpop.f32.mrf.mxu2  ;;  %v10580_v60 = vpop.f32.mrf.mxu3  ;;  %11575 = vmatmul.bf16.vlgmr.msra.gmra.mxu2 %v10684_v42  ;;  %11588 = vmatmul.bf16.vlgmr.msra.gmra.mxu3 %v10685_v5 }
0x26fe   : > { %11619 = vmatpush.bf16.msrb.mxu2 %v16131_v55  ;;  %11632 = vmatpush.bf16.msrb.mxu3 %v16139_v23 }
0x2700   : > { %11647 = vmatpush.bf16.msra.mxu0 %v16145_v2  ;;  %11660 = vmatpush.bf16.msra.mxu1 %v16153_v4  ;;  %v10643_v16 = vpop.f32.mrf.mxu0  ;;  %v10656_v19 = vpop.f32.mrf.mxu1 }
0x2701   : > { %v10644_v49 = vadd.f32 %v10643_v16, %v10271_v31  ;;  %v10657_v41 = vadd.f32 %v10656_v19, %v10272_v33 }
0x2702   : > { %11620 = vmatpush.bf16.msrb.mxu2 %v16130_v48  ;;  %11633 = vmatpush.bf16.msrb.mxu3 %v16138_v6  ;;  %v16308_v48 = vld [vmem:[%s18710_s13 + $0x1] ss:$0 sm:$0xff]  ;;  %s18717_s13 = sshll.u32 %s18715_s22, 3 }
0x2703   : > { %v10674_v46 = vmax.f32 %v10644_v49, 0.0  ;;  %v10675_v11 = vmax.f32 %v10657_v41, 0.0  ;;  %s1659_s0 = scalar_lea.vmem %s18716_s5, %s18717_s13 }
0x2704   : > { %11648 = vmatpush.bf16.msra.mxu0 %v16144_v15  ;;  %11661 = vmatpush.bf16.msra.mxu1 %v16152_v28 }
0x2705   : > { %v10617_v21 = vpop.f32.mrf.mxu2  ;;  %v10630_v59 = vpop.f32.mrf.mxu3  ;;  %v10690_v45 = vpack.c.bf16 %v10674_v46, %v10674_v46  ;;  %v10691_v18 = vpack.c.bf16 %v10675_v11, %v10675_v11 }
0x2706   : > { %11621 = vmatpush.bf16.msrb.mxu2 %v16129_v10  ;;  %11634 = vmatpush.bf16.msrb.mxu3 %v16137_v44  ;;  %v10618_v9 = vadd.f32 %v10617_v21, %v10269_v62  ;;  %v10631_v47 = vadd.f32 %v10630_v59, %v10270_v43 }
0x2708   : > { %11649 = vmatpush.bf16.msra.mxu0 %v16143_v26  ;;  %11662 = vmatpush.bf16.msra.mxu1 %v16151_v22  ;;  %v10645_v56 = vpop.f32.mrf.mxu0  ;;  %v10658_v39 = vpop.f32.mrf.mxu1  ;;  %v10672_v52 = vmax.f32 %v10618_v9, 0.0  ;;  %v10673_v27 = vmax.f32 %v10631_v47, 0.0 }
0x270a   : > { %11622 = vmatpush.bf16.msrb.mxu2 %v16128_v25  ;;  %11635 = vmatpush.bf16.msrb.mxu3 %v16136_v20  ;;  %v10688_v54 = vpack.c.bf16 %v10672_v52, %v10672_v52  ;;  %v10689_v14 = vpack.c.bf16 %v10673_v27, %v10673_v27 }
0x270c   : > { %11650 = vmatpush.bf16.msra.mxu0 %v16142_v0  ;;  %11663 = vmatpush.bf16.msra.mxu1 %v16150_v29 }
0x270d   : > { %v10619_v24 = vpop.f32.mrf.mxu2  ;;  %v10632_v58 = vpop.f32.mrf.mxu3 }
0x270e   : > { %11623 = vmatpush.bf16.msrb.mxu2 %v16127_v36  ;;  %11636 = vmatpush.bf16.msrb.mxu3 %v16135_v57 }
0x2710   : > { %11651 = vmatpush.bf16.msra.mxu0 %v16141_v40  ;;  %11664 = vmatpush.bf16.msra.mxu1 %v16149_v38 }
0x2712   : > { %11624 = vmatpush.bf16.msrb.mxu2 %v16126_v50  ;;  %11637 = vmatpush.bf16.msrb.mxu3 %v16134_v53 }
0x2714   : > { %11652 = vmatpush.bf16.msra.mxu0 %v16140_v35  ;;  %11665 = vmatpush.bf16.msra.mxu1 %v16148_v63 }
0x2716   : > { %11625 = vmatpush.bf16.msrb.mxu2 %v16125_v51  ;;  %11638 = vmatpush.bf16.msrb.mxu3 %v16133_v13 }
0x2717   : > { %11653 = vmatmul.bf16.vlgmr.msra.gmra.mxu0 %v10690_v45  ;;  %11666 = vmatmul.bf16.vlgmr.msra.gmra.mxu1 %v10691_v18 }
0x271a   : > { %11626 = vmatpush.bf16.msrb.mxu2 %v16124_v61  ;;  %11639 = vmatpush.bf16.msrb.mxu3 %v16132_v37 }
0x271d   : > { %11627 = vmatmul.bf16.vlgmr.msrb.gmra.mxu2 %v10688_v54  ;;  %11640 = vmatmul.bf16.vlgmr.msrb.gmra.mxu3 %v10689_v14 }
0x2754   : > { %v11498_v3 = vpop.f32.mrf.mxu0  ;;  %v11511_v1 = vpop.f32.mrf.mxu1 }
0x275c   : > { %v11500_v55 = vpop.f32.mrf.mxu0  ;;  %v11513_v23 = vpop.f32.mrf.mxu1 }
0x275d   : > { %v16309_v55 = vld [vmem:[%s18707_s8 + $0x1] ss:$0 sm:$0xff] }
0x2760   : > { %v11472_v8 = vpop.f32.mrf.mxu2  ;;  %v11485_v32 = vpop.f32.mrf.mxu3 }
0x2761   : > { %v11473_v60 = vadd.f32 %v16308_v48, %v11472_v8 }
0x2763   : > { %v11486_v10 = vadd.f32 %v11485_v32, %v11473_v60  ;;  %v16310_v32 = vld [vmem:[%s18708_s29 + $0x1] ss:$0 sm:$0xff] }
0x2764   : > { %v11550_v30 = vpop.f32.mrf.mxu0  ;;  %v11563_v12 = vpop.f32.mrf.mxu1  ;;  %v16156_v60 = vld [vmem:[%s18711_s12] sm:$0xff] }
0x2765   : > { %v11499_v19 = vadd.f32 %v11498_v3, %v11486_v10 }
0x2767   : > { %v11512_v25 = vadd.f32 %v11511_v1, %v11499_v19 }
0x2768   : > { %v11474_v2 = vpop.f32.mrf.mxu2  ;;  %v11487_v4 = vpop.f32.mrf.mxu3 }
0x276c   : > { %v11552_v42 = vpop.f32.mrf.mxu0  ;;  %v11565_v5 = vpop.f32.mrf.mxu1 }
0x2770   : > { %v11524_v6 = vpop.f32.mrf.mxu2  ;;  %v11537_v7 = vpop.f32.mrf.mxu3 }
0x2771   : > { %v11525_v59 = vadd.f32 %v11524_v6, %v11512_v25 }
0x2773   : > { %v11538_v0 = vadd.f32 %v11537_v7, %v11525_v59  ;;  %v16157_v7 = vld [vmem:[%s18711_s12 + $0x8] sm:$0xff]  ;;  %v16312_v59 = vld [vmem:[%s18713_s7] ss:$0 sm:$0xff] }
0x2774   : > { %v11602_v15 = vpop.f32.mrf.mxu0  ;;  %v11615_v28 = vpop.f32.mrf.mxu1  ;;  %11768 = vmatpush.bf16.msra.mxu2 %v16157_v7 }
0x2775   : > { %v11551_v33 = vadd.f32 %v11550_v30, %v11538_v0 }
0x2777   : > { %v11564_v36 = vadd.f32 %v11563_v12, %v11551_v33  ;;  %v16313_v33 = vld [vmem:[%s18714_s10] ss:$0 sm:$0xff] }
0x2778   : > { %v11526_v44 = vpop.f32.mrf.mxu2  ;;  %v11539_v16 = vpop.f32.mrf.mxu3  ;;  %11769 = vmatpush.bf16.msra.mxu2 %v16156_v60 }
0x277c   : > { %v11604_v26 = vpop.f32.mrf.mxu0  ;;  %v11617_v22 = vpop.f32.mrf.mxu1 }
0x2780   : > { %v11576_v20 = vpop.f32.mrf.mxu2  ;;  %v11589_v21 = vpop.f32.mrf.mxu3 }
0x2781   : > { %v11577_v57 = vadd.f32 %v11576_v20, %v11564_v36  ;;  %v16311_v20 = vld [vmem:[%s18712_s4] ss:$0 sm:$0xff] }
0x2783   : > { %v11590_v40 = vadd.f32 %v11589_v21, %v11577_v57 }
0x2785   : > { %v11603_v38 = vadd.f32 %v11602_v15, %v11590_v40 }
0x2787   : > { %v11616_v50 = vadd.f32 %v11615_v28, %v11603_v38 }
0x2788   : > { %v11578_v29 = vpop.f32.mrf.mxu2  ;;  %v11591_v31 = vpop.f32.mrf.mxu3 }
0x2794   : > { %v11654_v56 = vpop.f32.mrf.mxu0  ;;  %v11667_v39 = vpop.f32.mrf.mxu1 }
0x279c   : > { %v11656_v49 = vpop.f32.mrf.mxu0  ;;  %v11669_v41 = vpop.f32.mrf.mxu1 }
0x27a0   : > { %v11628_v53 = vpop.f32.mrf.mxu2  ;;  %v11641_v62 = vpop.f32.mrf.mxu3 }
0x27a1   : > { %v11629_v43 = vadd.f32 %v11628_v53, %v11616_v50 }
0x27a3   : > { %v11642_v24 = vadd.f32 %v11641_v62, %v11629_v43 }
0x27a5   : > { %v11655_v58 = vadd.f32 %v11654_v56, %v11642_v24 }
0x27a7   : > { %v11668_v35 = vadd.f32 %v11667_v39, %v11655_v58 }
0x27a8   : > { %v11630_v63 = vpop.f32.mrf.mxu2  ;;  %v11643_v46 = vpop.f32.mrf.mxu3 }
0x27a9   : > { %v11671_v11 = vadd.f32 %v11668_v35, %v18287_v34 }
0x27ab   : > { %v11676_v51 = vsel %vm1760_vm2, %v11671_v11, 0.0 }
0x27ac   : > { %11677 = vadd.xlane.f32.xlu1 %v11676_v51 }
0x281f   : > { %v11678_v13 = vpop.xlane.xlu1 %11677 }
0x2820   : > { %v11679_v9 = vmul.f32 %v11678_v13, %v16946_v17 }
0x2822   : > { %v11680_v47 = vsub.f32 %v11671_v11, %v11679_v9 }
0x2824   : > { %v11681_v45 = vmul.f32 %v11680_v47, %v11680_v47 }
0x2826   : > { %v11682_v18 = vsel %vm1760_vm2, %v11681_v45, 0.0 }
0x2827   : > { %11683 = vadd.xlane.f32.xlu2 %v11682_v18 }
0x289a   : > { %v11684_v61 = vpop.xlane.xlu2 %11683 }
0x289b   : > { %v11685_v37 = vmul.f32 %v11684_v61, %v16946_v17 }
0x289d   : > { %v11686_v52 = vadd.f32 1e-05, %v11685_v37 }
0x289f   : > { %16474 = vrsqrt.f32 %v11686_v52  ;;  %vm11693_vm0 = vweird.f32 %v11686_v52 }
0x28a5   : > { %v16475_v27 = vpop.eup %16474 }
0x28a6   : > { %v11688_v34 = vmul.f32 %v16475_v27, %v11686_v52  ;;  %vm11694_vm15 = vweird.f32 %v16475_v27 }
0x28a7   : > { %vm11695_vm1 = vmor %vm11693_vm0, %vm11694_vm15 }
0x28a8   : > { %v11689_v54 = vmul.f32 %v16475_v27, %v11688_v34 }
0x28aa   : > { %v11690_v14 = vmul.f32 0.5, %v11689_v54 }
0x28ac   : > { %v11691_v3 = vsub.f32 1.5, %v11690_v14 }
0x28ae   : > { %v11692_v1 = vmul.f32 %v16475_v27, %v11691_v3 }
0x28b0   : > { %v11696_v23 = vsel %vm11695_vm1, %v16475_v27, %v11692_v1 }
0x28b1   : > { %v11697_v8 = vmul.f32 %v11696_v23, %v11680_v47 }
0x28b3   : > { %v11701_v30 = vmul.f32 %v16309_v55, %v11697_v8 }
0x28b5   : > { %v11705_v12 = vadd.f32 %v16310_v32, %v11701_v30 }
0x28b7   : > { %v11708_v2 = vsel %vm1760_vm2, %v11705_v12, 0.0 }
0x28b8   : > { %11709 = vadd.xlane.f32.xlu0 %v11708_v2 }
0x292b   : > { %v11710_v4 = vpop.xlane.xlu0 %11709 }
0x292c   : > { %v11711_v42 = vmul.f32 %v11710_v4, %v16946_v17 }
0x292e   : > { %v11712_v5 = vsub.f32 %v11705_v12, %v11711_v42 }
0x2930   : > { %v11713_v48 = vmul.f32 %v11712_v5, %v11712_v5 }
0x2932   : > { %v11714_v6 = vsel %vm1760_vm2, %v11713_v48, 0.0 }
0x2933   : > { %11715 = vadd.xlane.f32.xlu1 %v11714_v6 }
0x29a6   : > { %v11716_v15 = vpop.xlane.xlu1 %11715 }
0x29a7   : > { %v11717_v28 = vmul.f32 %v11716_v15, %v16946_v17 }
0x29a9   : > { %v11718_v10 = vadd.f32 1e-05, %v11717_v28 }
0x29ab   : > { %16476 = vrsqrt.f32 %v11718_v10  ;;  %vm11725_vm7 = vweird.f32 %v11718_v10 }
0x29b1   : > { %v16477_v44 = vpop.eup %16476 }
0x29b2   : > { %v11720_v16 = vmul.f32 %v16477_v44, %v11718_v10  ;;  %vm11726_vm6 = vweird.f32 %v16477_v44 }
0x29b3   : > { %vm11727_vm8 = vmor %vm11725_vm7, %vm11726_vm6 }
0x29b4   : > { %v11721_v19 = vmul.f32 %v16477_v44, %v11720_v16 }
0x29b6   : > { %v11722_v26 = vmul.f32 0.5, %v11721_v19 }
0x29b8   : > { %v11723_v22 = vsub.f32 1.5, %v11722_v26 }
0x29ba   : > { %v11724_v25 = vmul.f32 %v16477_v44, %v11723_v22 }
0x29bc   : > { %v11728_v21 = vsel %vm11727_vm8, %v16477_v44, %v11724_v25 }
0x29bd   : > { %v11729_v0 = vmul.f32 %v11728_v21, %v11712_v5 }
0x29bf   : > { %v11733_v29 = vmul.f32 %v16311_v20, %v11729_v0 }
0x29c1   : > { %v11737_v17 = vadd.f32 %v16312_v59, %v11733_v29 }
0x29c3   : > { %v11743_v31 = vpack.c.bf16 %v11737_v17, %v11737_v17 }
0x29c5   : > { %15464 = vmatmul.msk.bf16.vlgmr.msra.gmra.mxu2 %vm1760_vm2, %v11743_v31 }
0x2a48   : > { %v11771_v36 = vpop.f32.mrf.mxu2 }
0x2a49   : > { %v11772_v57 = vadd.f32 %v16313_v33, %v11771_v36 }
0x2a4b   : > { %11775 = vst [vmem:[%s1659_s0] sm:$0xff] %v11772_v57 }
0x2a50   : > { %v11773_v56 = vpop.f32.mrf.mxu2 }
0x2a51 PF: > { %s18718_s1 = sld [smem:[#allocation57_spill]] }
0x2a57   : > { %s121_s22 = sadd.s32 1, %s18718_s1  }
0x2a58   : > { %p118_p4 = scmp.ge.s32.totalorder %s121_s22, 4  }
0x2a5a   :  { %120 = sbr.rel (!%p118_p4) target bundleno = 129 (0x81), region = 373 }

</bundles_post_ra>
